<compile_context>
chip_gen: v7x
topology: tpu7x:2x2x1
jax: 0.10.0
libtpu: 0.0.40
codegen_flags: <defaults>
</compile_context>

<pallas_src>
import functools

import jax
import jax.numpy as jnp
from jax.experimental import pallas as pl
from jax.experimental.pallas import tpu as pltpu


# ----------------------------------------------------------------------------
# small helpers
# ----------------------------------------------------------------------------
def _round_up(x, m):
    return (x + m - 1) // m * m


def _cp(c):
    """Channel padding: every channel-like dim lives on the 128-lane grid."""
    return _round_up(c, 128)


# VMEM sizing: budget chosen so double-buffered tiles comfortably fit v7x's
# 64 MiB VMEM per TensorCore (v5e/v6e have 128 MiB and are trivially fine).
_VMEM_BUDGET = 28 * 1024 * 1024
_VMEM_LIMIT_CAP = 40 * 1024 * 1024


def _tile_footprint(tm, tn, k_pads):
    """Double-buffered VMEM bytes for one grid step of the fused kernel."""
    a_bytes = sum(tm * kp for kp in k_pads) * 2      # bf16 activation blocks
    w_bytes = sum(kp * tn for kp in k_pads) * 2      # bf16 weight slabs
    b_bytes = tn * 4                                 # f32 bias row
    o_bytes = tm * tn * 2                            # bf16 output block
    return 2 * (a_bytes + w_bytes + b_bytes + o_bytes)


def _select_tiles(Pp, Ctot, k_pads):
    """Largest (tm, tn) whose double-buffered footprint fits the VMEM budget."""
    if Pp <= 2048:
        # Single full-rows block preferred (fewest grid steps, no row padding).
        m_cands = [Pp] + [c for c in (1024, 512, 256, 128, 64, 32)
                          if c < Pp and Pp % c == 0]
    else:
        m_cands = [c for c in (2048, 1024, 512, 256) if Pp % c == 0]
    n_cands = [c for c in (512, 256, 128) if Ctot % c == 0]
    for tm in m_cands:
        for tn in n_cands:
            if _tile_footprint(tm, tn, k_pads) <= _VMEM_BUDGET:
                return tm, tn
    return m_cands[-1], n_cands[-1]


# ----------------------------------------------------------------------------
# Fused multi-source  silu(sum_i A_i @ W_i + bias)  kernel
# ----------------------------------------------------------------------------
def _make_fused_kernel(n_src):
    def kernel(*refs):
        a_refs = refs[:n_src]
        w_refs = refs[n_src:2 * n_src]
        b_ref = refs[2 * n_src]
        o_ref = refs[2 * n_src + 1]
        acc = jnp.dot(a_refs[0][...], w_refs[0][...],
                      preferred_element_type=jnp.float32)
        for t in range(1, n_src):
            acc = acc + jnp.dot(a_refs[t][...], w_refs[t][...],
                                preferred_element_type=jnp.float32)
        z = acc + b_ref[...]                        # BN scale folded into W
        # SiLU: exp + approximate reciprocal both run on the (idle) EUP.
        o_ref[...] = (z * pl.reciprocal(1.0 + jnp.exp(-z), approx=True)
                      ).astype(o_ref.dtype)
    return kernel


def _fused_multisrc_conv_bn_silu(a_list, w_slabs, bias_row):
    """silu(sum_i a_i @ w_i + bias), bf16 in / bf16 out, f32 accumulation.

    a_i      : (P, Kp_i)   bf16, channels already zero-padded to Kp_i
    w_i      : (Kp_i, Ctot) bf16, BN scale folded in, padded rows/cols zero
    bias_row : (1, Ctot)    f32, padded cols zero (=> padded outputs stay 0)
    """
    n_src = len(a_list)
    P = a_list[0].shape[0]
    Ctot = w_slabs[0].shape[1]
    k_pads = [w.shape[0] for w in w_slabs]

    Pp = P if P <= 2048 else _round_up(P, 256)
    tm, tn = _select_tiles(Pp, Ctot, k_pads)

    a_in = []
    for a, kp in zip(a_list, k_pads):
        if a.dtype != jnp.bfloat16:
            a = a.astype(jnp.bfloat16)
        if a.shape[1] != kp:
            a = jnp.pad(a, ((0, 0), (0, kp - a.shape[1])))
        if Pp != P:
            a = jnp.pad(a, ((0, Pp - P), (0, 0)))
        a_in.append(a)

    # TODO(synk): add a K-reduction grid axis (per-source K tiling) for
    # production channel widths where full-K per source exceeds the budget.
    in_specs = ([pl.BlockSpec((tm, kp), lambda i, j: (i, 0)) for kp in k_pads]
                + [pl.BlockSpec((kp, tn), lambda i, j: (0, j)) for kp in k_pads]
                + [pl.BlockSpec((1, tn), lambda i, j: (0, j))])

    sum_k = sum(k_pads)
    footprint = _tile_footprint(tm, tn, k_pads)
    vmem_limit = int(min(max(2 * footprint, 32 * 1024 * 1024), _VMEM_LIMIT_CAP))
    cost = pl.CostEstimate(
        flops=2 * Pp * sum_k * Ctot,
        transcendentals=2 * Pp * Ctot,              # exp + reciprocal
        bytes_accessed=2 * (Pp * sum_k + sum_k * Ctot + Pp * Ctot) + 4 * Ctot)

    out = pl.pallas_call(
        _make_fused_kernel(n_src),
        out_shape=jax.ShapeDtypeStruct((Pp, Ctot), jnp.bfloat16),
        grid_spec=pltpu.PrefetchScalarGridSpec(
            num_scalar_prefetch=0,
            grid=(Pp // tm, Ctot // tn),
            in_specs=in_specs,
            out_specs=pl.BlockSpec((tm, tn), lambda i, j: (i, j))),
        compiler_params=pltpu.CompilerParams(
            dimension_semantics=("parallel", "parallel"),
            vmem_limit_bytes=vmem_limit),
        cost_estimate=cost,
    )(*a_in, *w_slabs, bias_row)

    if Pp != P:
        out = out[:P]
    return out


# ----------------------------------------------------------------------------
# Conv blocks (NHWC, padded-channel bf16 activations)
# ----------------------------------------------------------------------------
def fused_conv(xs, params):
    """Conv2d(bias=False) + folded BatchNorm(eval) + SiLU over the (virtual)
    channel-concat of `xs`.  1x1 convs: one source per input tensor.
    3x3 convs: 9 shifted views per input tensor (no im2col concat tensor)."""
    k, stride = params["k"], params["stride"]
    N, H, W, _ = xs[0].shape
    if k == 1:
        Ho, Wo = H, W
        a_list = [x.reshape(N * H * W, x.shape[-1]) for x in xs]
    else:
        pad = k // 2
        Ho = (H + 2 * pad - k) // stride + 1
        Wo = (W + 2 * pad - k) // stride + 1
        # TODO(synk): replace the k*k shifted HBM views with an in-kernel halo
        # window (4D BlockSpec over (N, Ho-tile, W, C)) to cut activation reads.
        a_list = []
        for x in xs:
            xp = jnp.pad(x, ((0, 0), (pad, pad), (pad, pad), (0, 0)))
            for kh in range(k):
                for kw in range(k):
                    v = xp[:, kh:kh + stride * (Ho - 1) + 1:stride,
                           kw:kw + stride * (Wo - 1) + 1:stride, :]
                    a_list.append(v.reshape(N * Ho * Wo, v.shape[-1]))
    out = _fused_multisrc_conv_bn_silu(a_list, params["w"], params["b"])
    return out.reshape(N, Ho, Wo, -1)


def upsample2x(x):
    # nn.Upsample(scale_factor=2, mode="nearest") on bf16 activations.
    # TODO(synk): fuse into the consuming conv kernel via an index_map that
    # reads each input row block twice instead of materializing the 4x tensor.
    return jnp.repeat(jnp.repeat(x, 2, axis=1), 2, axis=2)


def bottleneck_forward(x, params, shortcut=False):
    y = fused_conv([x], params["conv1"])
    y = fused_conv([y], params["conv2"])
    if shortcut:
        y = y + x
    return y


def c2f_forward(xs, params):
    """C2f whose cv1 consumes the (virtual) channel-concat of `xs`."""
    y = fused_conv(xs, params["cv1"])          # dual-slab output layout
    hp = params["cv1"]["half_pad"]
    ys = [y[..., :hp], y[..., hp:]]            # lane-aligned (128-mult) split
    for bp in params["m"]:
        ys.append(bottleneck_forward(ys[-1], bp, shortcut=False))
    return fused_conv(ys, params["cv2"])       # concat never materialized


def _prep_input(x):
    """Cast external f32 NHWC input to bf16 and zero-pad channels to 128."""
    c = x.shape[-1]
    x = x.astype(jnp.bfloat16)
    pad = _cp(c) - c
    if pad:
        x = jnp.pad(x, ((0, 0), (0, 0), (0, 0), (0, pad)))
    return x


def neck_forward(params, x_res_1, x_res_2, x):
    x_res_1 = _prep_input(x_res_1)
    x_res_2 = _prep_input(x_res_2)
    x = _prep_input(x)

    res_1 = x
    res_2 = c2f_forward([upsample2x(x), x_res_2], params["c2f_1"])
    out_1 = c2f_forward([upsample2x(res_2), x_res_1], params["c2f_2"])
    y = fused_conv([out_1], params["conv_1"])
    out_2 = c2f_forward([y, res_2], params["c2f_3"])
    y = fused_conv([out_2], params["conv_2"])
    out_3 = c2f_forward([y, res_1], params["c2f_4"])

    # Only the three network outputs are de-padded and cast back to f32.
    return (out_1[..., :params["c2f_2"]["cout"]].astype(jnp.float32),
            out_2[..., :params["c2f_3"]["cout"]].astype(jnp.float32),
            out_3[..., :params["c2f_4"]["cout"]].astype(jnp.float32))


# ----------------------------------------------------------------------------
# Deterministic parameter construction (BN folded, padded bf16 weight slabs)
# ----------------------------------------------------------------------------
def make_conv_params(key, cin_splits, cout, k, stride=1, dual_out=False):
    """cin_splits: logical channel count of each (virtually concatenated)
    input source.  dual_out=True lays the output columns out as two separate
    128-aligned half slabs (for the C2f cv1 split)."""
    cin = sum(cin_splits)
    k1, k2, k3, k4, k5 = jax.random.split(key, 5)
    w = jax.random.normal(k1, (cout, cin, k, k), jnp.float32) / jnp.sqrt(
        float(cin * k * k))
    gamma = 1.0 + 0.1 * jax.random.normal(k2, (cout,), jnp.float32)
    beta = 0.1 * jax.random.normal(k3, (cout,), jnp.float32)
    mean = 0.1 * jax.random.normal(k4, (cout,), jnp.float32)
    var = jnp.abs(jax.random.normal(k5, (cout,), jnp.float32)) + 1.0
    eps = 1e-3
    scale = gamma / jnp.sqrt(var + eps)
    bias = beta - mean * scale

    # OIHW -> (kh, kw, cin, cout); fold BN scale into output columns.
    wt = jnp.transpose(w, (2, 3, 1, 0)) * scale[None, None, None, :]

    if dual_out:
        half = cout // 2
        hp = _cp(half)
        wt = jnp.concatenate(
            [jnp.pad(wt[..., :half], ((0, 0), (0, 0), (0, 0), (0, hp - half))),
             jnp.pad(wt[..., half:],
                     ((0, 0), (0, 0), (0, 0), (0, hp - (cout - half))))],
            axis=-1)
        bias = jnp.concatenate(
            [jnp.pad(bias[:half], (0, hp - half)),
             jnp.pad(bias[half:], (0, hp - (cout - half)))])
        ctot = 2 * hp
        half_pad = hp
    else:
        ctot = _cp(cout)
        wt = jnp.pad(wt, ((0, 0), (0, 0), (0, 0), (0, ctot - cout)))
        bias = jnp.pad(bias, (0, ctot - cout))
        half_pad = None

    # One bf16 slab per (source, kh, kw); K rows padded to 128-multiples.
    slabs = []
    off = 0
    for ci in cin_splits:
        kp = _cp(ci)
        for kh in range(k):
            for kw in range(k):
                slab = jnp.pad(wt[kh, kw, off:off + ci, :],
                               ((0, kp - ci), (0, 0)))
                slabs.append(slab.astype(jnp.bfloat16))
        off += ci

    return {"w": slabs,
            "b": bias.reshape(1, ctot).astype(jnp.float32),
            "k": k, "stride": stride, "cout": cout, "half_pad": half_pad}


def make_bottleneck_params(key, c):
    k1, k2 = jax.random.split(key, 2)
    return {"conv1": make_conv_params(k1, (c,), c, 3),
            "conv2": make_conv_params(k2, (c,), c, 3)}


def make_c2f_params(key, cin_splits, cout, n):
    keys = jax.random.split(key, n + 2)
    mid = cout // 2
    return {
        "cv1": make_conv_params(keys[0], cin_splits, cout, 1, dual_out=True),
        "m": [make_bottleneck_params(keys[2 + i], mid) for i in range(n)],
        "cv2": make_conv_params(keys[1], (mid,) * (n + 2), cout, 1),
        "cout": cout,
    }


def make_neck_params(key, d, w, r):
    nb = max(1, int(round(3 * d)))
    c_x = int(512 * w * r)     # channels of the top (lowest-res) feature map
    c_r2 = int(512 * w)        # x_res_2 channels
    c_r1 = int(256 * w)        # x_res_1 channels
    c1_out = int(512 * w)      # c2f_1 out
    c2_out = int(256 * w)      # c2f_2 out
    c3_out = int(512 * w)      # c2f_3 out
    c4_out = int(512 * w * r)  # c2f_4 out
    keys = jax.random.split(key, 6)
    return {
        "c2f_1": make_c2f_params(keys[0], (c_x, c_r2), c1_out, nb),
        "c2f_2": make_c2f_params(keys[1], (c1_out, c_r1), c2_out, nb),
        "c2f_3": make_c2f_params(keys[2], (c2_out, c1_out), c3_out, nb),
        "c2f_4": make_c2f_params(keys[3], (c3_out, c_x), c4_out, nb),
        "conv_1": make_conv_params(keys[4], (c2_out,), c2_out, 3, stride=2),
        "conv_2": make_conv_params(keys[5], (c3_out,), c3_out, 3, stride=2),
    }


# ----------------------------------------------------------------------------
if __name__ == "__main__":
    key = jax.random.PRNGKey(0)
    # Small synthetic "version": depth d=1/3 -> 1 bottleneck per C2f,
    # width w=1/32 -> base channels (8, 16), ratio r=2 -> top channels 32.
    d, w, r = 1.0 / 3.0, 1.0 / 32.0, 2.0
    B, H = 2, 16  # highest-resolution feature map is H x H

    kparams, k1, k2, k3 = jax.random.split(key, 4)
    params = make_neck_params(kparams, d, w, r)

    # NHWC inputs (PyTorch reference would be NCHW with the same channels).
    x_res_1 = jax.random.normal(k1, (B, H, H, int(256 * w)), jnp.float32)
    x_res_2 = jax.random.normal(k2, (B, H // 2, H // 2, int(512 * w)), jnp.float32)
    x = jax.random.normal(k3, (B, H // 4, H // 4, int(512 * w * r)), jnp.float32)

    fwd = jax.jit(functools.partial(neck_forward, params))
    out_1, out_2, out_3 = fwd(x_res_1, x_res_2, x)
    jax.block_until_ready((out_1, out_2, out_3))

    assert out_1.shape == (B, H, H, int(256 * w)), out_1.shape
    assert out_2.shape == (B, H // 2, H // 2, int(512 * w)), out_2.shape
    assert out_3.shape == (B, H // 4, H // 4, int(512 * w * r)), out_3.shape
    print("KERNEL_OK")
</pallas_src>

<mosaic_0001>
module attributes {stable_mosaic.version = 11 : i64} {
  func.func @kernel(%arg0: i32, %arg1: i32, %arg2: memref<128x128xbf16, #tpu.memory_space<vmem>>, %arg3: memref<128x128xbf16, #tpu.memory_space<vmem>>, %arg4: memref<128x256xbf16, #tpu.memory_space<vmem>>, %arg5: memref<128x256xbf16, #tpu.memory_space<vmem>>, %arg6: memref<1x256xf32, #tpu.memory_space<vmem>>, %arg7: memref<128x256xbf16, #tpu.memory_space<vmem>>) attributes {dimension_semantics = [#tpu.dimension_semantics<parallel>, #tpu.dimension_semantics<parallel>], iteration_bounds = array<i64: 1, 1>, scalar_prefetch = 0 : i64, scratch_operands = 0 : i64, tpu.core_type = #tpu.core_type<tc>, window_params = [{transform_indices = @transform_0, window_bounds = array<i64: 128, 128>}, {transform_indices = @transform_1, window_bounds = array<i64: 128, 128>}, {transform_indices = @transform_2, window_bounds = array<i64: 128, 256>}, {transform_indices = @transform_3, window_bounds = array<i64: 128, 256>}, {transform_indices = @transform_4, window_bounds = array<i64: 1, 256>}, {transform_indices = @transform_5, window_bounds = array<i64: 128, 256>}]} {
    %c0 = arith.constant 0 : index
    %c0_0 = arith.constant 0 : index
    %0 = vector.load %arg2[%c0, %c0_0] : memref<128x128xbf16, #tpu.memory_space<vmem>>, vector<128x128xbf16>
    %c0_1 = arith.constant 0 : index
    %c0_2 = arith.constant 0 : index
    %1 = vector.load %arg4[%c0_1, %c0_2] : memref<128x256xbf16, #tpu.memory_space<vmem>>, vector<128x256xbf16>
    %cst = arith.constant dense<0.000000e+00> : vector<128x256xf32>
    %2 = tpu.matmul %0, %1, %cst {dimension_numbers = #tpu.dot_dimension_numbers<[1], [0], [0], [1], [0, 0, 1, 1], [], []>} : vector<128x128xbf16>, vector<128x256xbf16>, vector<128x256xf32> -> vector<128x256xf32>
    %c0_3 = arith.constant 0 : index
    %c0_4 = arith.constant 0 : index
    %3 = vector.load %arg3[%c0_3, %c0_4] : memref<128x128xbf16, #tpu.memory_space<vmem>>, vector<128x128xbf16>
    %c0_5 = arith.constant 0 : index
    %c0_6 = arith.constant 0 : index
    %4 = vector.load %arg5[%c0_5, %c0_6] : memref<128x256xbf16, #tpu.memory_space<vmem>>, vector<128x256xbf16>
    %cst_7 = arith.constant dense<0.000000e+00> : vector<128x256xf32>
    %5 = tpu.matmul %3, %4, %cst_7 {dimension_numbers = #tpu.dot_dimension_numbers<[1], [0], [0], [1], [0, 0, 1, 1], [], []>} : vector<128x128xbf16>, vector<128x256xbf16>, vector<128x256xf32> -> vector<128x256xf32>
    %6 = arith.addf %2, %5 : vector<128x256xf32>
    %c0_8 = arith.constant 0 : index
    %c0_9 = arith.constant 0 : index
    %7 = vector.load %arg6[%c0_8, %c0_9] : memref<1x256xf32, #tpu.memory_space<vmem>>, vector<1x256xf32>
    %8 = vector.broadcast %7 : vector<1x256xf32> to vector<128x256xf32>
    %9 = arith.addf %6, %8 : vector<128x256xf32>
    %cst_10 = arith.constant 0.000000e+00 : f32
    %10 = vector.broadcast %cst_10 : f32 to vector<128x256xf32>
    %11 = arith.subf %10, %9 : vector<128x256xf32>
    %12 = math.exp %11 : vector<128x256xf32>
    %cst_11 = arith.constant 1.000000e+00 : f32
    %13 = vector.broadcast %cst_11 : f32 to vector<128x256xf32>
    %14 = arith.addf %13, %12 : vector<128x256xf32>
    %15 = tpu.reciprocal %14 {approx = true} : vector<128x256xf32> -> vector<128x256xf32>
    %16 = arith.mulf %9, %15 : vector<128x256xf32>
    %17 = arith.truncf %16 : vector<128x256xf32> to vector<128x256xbf16>
    %c0_12 = arith.constant 0 : index
    %c0_13 = arith.constant 0 : index
    %18 = vector.load %arg7[%c0_12, %c0_13] : memref<128x256xbf16, #tpu.memory_space<vmem>>, vector<128x256xbf16>
    tpu.vector_store %arg7[%c0_12, %c0_13], %17 {strides = array<i32>} : memref<128x256xbf16, #tpu.memory_space<vmem>>, vector<128x256xbf16>,
    return
  }
  func.func @transform_0(%arg0: i32, %arg1: i32) -> (i32, i32) {
    %c0_i32 = arith.constant 0 : i32
    %c0_i32_0 = arith.constant 0 : i32
    return %arg0, %c0_i32 : i32, i32
  }
  func.func @transform_1(%arg0: i32, %arg1: i32) -> (i32, i32) {
    %c0_i32 = arith.constant 0 : i32
    %c0_i32_0 = arith.constant 0 : i32
    return %arg0, %c0_i32 : i32, i32
  }
  func.func @transform_2(%arg0: i32, %arg1: i32) -> (i32, i32) {
    %c0_i32 = arith.constant 0 : i32
    %c0_i32_0 = arith.constant 0 : i32
    return %c0_i32, %arg1 : i32, i32
  }
  func.func @transform_3(%arg0: i32, %arg1: i32) -> (i32, i32) {
    %c0_i32 = arith.constant 0 : i32
    %c0_i32_0 = arith.constant 0 : i32
    return %c0_i32, %arg1 : i32, i32
  }
  func.func @transform_4(%arg0: i32, %arg1: i32) -> (i32, i32) {
    %c0_i32 = arith.constant 0 : i32
    %c0_i32_0 = arith.constant 0 : i32
    return %c0_i32, %arg1 : i32, i32
  }
  func.func @transform_5(%arg0: i32, %arg1: i32) -> (i32, i32) {
    %c0_i32 = arith.constant 0 : i32
    return %arg0, %arg1 : i32, i32
  }
}

module attributes {stable_mosaic.version = 11 : i64} {
  func.func @kernel(%arg0: i32, %arg1: i32, %arg2: memref<128x128xbf16, #tpu.memory_space<vmem>>, %arg3: memref<128x128xbf16, #tpu.memory_space<vmem>>, %arg4: memref<128x128xbf16, #tpu.memory_space<vmem>>, %arg5: memref<128x128xbf16, #tpu.memory_space<vmem>>, %arg6: memref<128x128xbf16, #tpu.memory_space<vmem>>, %arg7: memref<128x128xbf16, #tpu.memory_space<vmem>>, %arg8: memref<128x128xbf16, #tpu.memory_space<vmem>>, %arg9: memref<128x128xbf16, #tpu.memory_space<vmem>>, %arg10: memref<128x128xbf16, #tpu.memory_space<vmem>>, %arg11: memref<128x128xbf16, #tpu.memory_space<vmem>>, %arg12: memref<128x128xbf16, #tpu.memory_space<vmem>>, %arg13: memref<128x128xbf16, #tpu.memory_space<vmem>>, %arg14: memref<128x128xbf16, #tpu.memory_space<vmem>>, %arg15: memref<128x128xbf16, #tpu.memory_space<vmem>>, %arg16: memref<128x128xbf16, #tpu.memory_space<vmem>>, %arg17: memref<128x128xbf16, #tpu.memory_space<vmem>>, %arg18: memref<128x128xbf16, #tpu.memory_space<vmem>>, %arg19: memref<128x128xbf16, #tpu.memory_space<vmem>>, %arg20: memref<1x128xf32, #tpu.memory_space<vmem>>, %arg21: memref<128x128xbf16, #tpu.memory_space<vmem>>) attributes {dimension_semantics = [#tpu.dimension_semantics<parallel>, #tpu.dimension_semantics<parallel>], iteration_bounds = array<i64: 1, 1>, scalar_prefetch = 0 : i64, scratch_operands = 0 : i64, tpu.core_type = #tpu.core_type<tc>, window_params = [{transform_indices = @transform_0, window_bounds = array<i64: 128, 128>}, {transform_indices = @transform_1, window_bounds = array<i64: 128, 128>}, {transform_indices = @transform_2, window_bounds = array<i64: 128, 128>}, {transform_indices = @transform_3, window_bounds = array<i64: 128, 128>}, {transform_indices = @transform_4, window_bounds = array<i64: 128, 128>}, {transform_indices = @transform_5, window_bounds = array<i64: 128, 128>}, {transform_indices = @transform_6, window_bounds = array<i64: 128, 128>}, {transform_indices = @transform_7, window_bounds = array<i64: 128, 128>}, {transform_indices = @transform_8, window_bounds = array<i64: 128, 128>}, {transform_indices = @transform_9, window_bounds = array<i64: 128, 128>}, {transform_indices = @transform_10, window_bounds = array<i64: 128, 128>}, {transform_indices = @transform_11, window_bounds = array<i64: 128, 128>}, {transform_indices = @transform_12, window_bounds = array<i64: 128, 128>}, {transform_indices = @transform_13, window_bounds = array<i64: 128, 128>}, {transform_indices = @transform_14, window_bounds = array<i64: 128, 128>}, {transform_indices = @transform_15, window_bounds = array<i64: 128, 128>}, {transform_indices = @transform_16, window_bounds = array<i64: 128, 128>}, {transform_indices = @transform_17, window_bounds = array<i64: 128, 128>}, {transform_indices = @transform_18, window_bounds = array<i64: 1, 128>}, {transform_indices = @transform_19, window_bounds = array<i64: 128, 128>}]} {
    %c0 = arith.constant 0 : index
    %c0_0 = arith.constant 0 : index
    %0 = vector.load %arg2[%c0, %c0_0] : memref<128x128xbf16, #tpu.memory_space<vmem>>, vector<128x128xbf16>
    %c0_1 = arith.constant 0 : index
    %c0_2 = arith.constant 0 : index
    %1 = vector.load %arg11[%c0_1, %c0_2] : memref<128x128xbf16, #tpu.memory_space<vmem>>, vector<128x128xbf16>
    %cst = arith.constant dense<0.000000e+00> : vector<128x128xf32>
    %2 = tpu.matmul %0, %1, %cst {dimension_numbers = #tpu.dot_dimension_numbers<[1], [0], [0], [1], [0, 0, 1, 1], [], []>} : vector<128x128xbf16>, vector<128x128xbf16>, vector<128x128xf32> -> vector<128x128xf32>
    %c0_3 = arith.constant 0 : index
    %c0_4 = arith.constant 0 : index
    %3 = vector.load %arg3[%c0_3, %c0_4] : memref<128x128xbf16, #tpu.memory_space<vmem>>, vector<128x128xbf16>
    %c0_5 = arith.constant 0 : index
    %c0_6 = arith.constant 0 : index
    %4 = vector.load %arg12[%c0_5, %c0_6] : memref<128x128xbf16, #tpu.memory_space<vmem>>, vector<128x128xbf16>
    %cst_7 = arith.constant dense<0.000000e+00> : vector<128x128xf32>
    %5 = tpu.matmul %3, %4, %cst_7 {dimension_numbers = #tpu.dot_dimension_numbers<[1], [0], [0], [1], [0, 0, 1, 1], [], []>} : vector<128x128xbf16>, vector<128x128xbf16>, vector<128x128xf32> -> vector<128x128xf32>
    %6 = arith.addf %2, %5 : vector<128x128xf32>
    %c0_8 = arith.constant 0 : index
    %c0_9 = arith.constant 0 : index
    %7 = vector.load %arg4[%c0_8, %c0_9] : memref<128x128xbf16, #tpu.memory_space<vmem>>, vector<128x128xbf16>
    %c0_10 = arith.constant 0 : index
    %c0_11 = arith.constant 0 : index
    %8 = vector.load %arg13[%c0_10, %c0_11] : memref<128x128xbf16, #tpu.memory_space<vmem>>, vector<128x128xbf16>
    %cst_12 = arith.constant dense<0.000000e+00> : vector<128x128xf32>
    %9 = tpu.matmul %7, %8, %cst_12 {dimension_numbers = #tpu.dot_dimension_numbers<[1], [0], [0], [1], [0, 0, 1, 1], [], []>} : vector<128x128xbf16>, vector<128x128xbf16>, vector<128x128xf32> -> vector<128x128xf32>
    %10 = arith.addf %6, %9 : vector<128x128xf32>
    %c0_13 = arith.constant 0 : index
    %c0_14 = arith.constant 0 : index
    %11 = vector.load %arg5[%c0_13, %c0_14] : memref<128x128xbf16, #tpu.memory_space<vmem>>, vector<128x128xbf16>
    %c0_15 = arith.constant 0 : index
    %c0_16 = arith.constant 0 : index
    %12 = vector.load %arg14[%c0_15, %c0_16] : memref<128x128xbf16, #tpu.memory_space<vmem>>, vector<128x128xbf16>
    %cst_17 = arith.constant dense<0.000000e+00> : vector<128x128xf32>
    %13 = tpu.matmul %11, %12, %cst_17 {dimension_numbers = #tpu.dot_dimension_numbers<[1], [0], [0], [1], [0, 0, 1, 1], [], []>} : vector<128x128xbf16>, vector<128x128xbf16>, vector<128x128xf32> -> vector<128x128xf32>
    %14 = arith.addf %10, %13 : vector<128x128xf32>
    %c0_18 = arith.constant 0 : index
    %c0_19 = arith.constant 0 : index
    %15 = vector.load %arg6[%c0_18, %c0_19] : memref<128x128xbf16, #tpu.memory_space<vmem>>, vector<128x128xbf16>
    %c0_20 = arith.constant 0 : index
    %c0_21 = arith.constant 0 : index
    %16 = vector.load %arg15[%c0_20, %c0_21] : memref<128x128xbf16, #tpu.memory_space<vmem>>, vector<128x128xbf16>
    %cst_22 = arith.constant dense<0.000000e+00> : vector<128x128xf32>
    %17 = tpu.matmul %15, %16, %cst_22 {dimension_numbers = #tpu.dot_dimension_numbers<[1], [0], [0], [1], [0, 0, 1, 1], [], []>} : vector<128x128xbf16>, vector<128x128xbf16>, vector<128x128xf32> -> vector<128x128xf32>
    %18 = arith.addf %14, %17 : vector<128x128xf32>
    %c0_23 = arith.constant 0 : index
    %c0_24 = arith.constant 0 : index
    %19 = vector.load %arg7[%c0_23, %c0_24] : memref<128x128xbf16, #tpu.memory_space<vmem>>, vector<128x128xbf16>
    %c0_25 = arith.constant 0 : index
    %c0_26 = arith.constant 0 : index
    %20 = vector.load %arg16[%c0_25, %c0_26] : memref<128x128xbf16, #tpu.memory_space<vmem>>, vector<128x128xbf16>
    %cst_27 = arith.constant dense<0.000000e+00> : vector<128x128xf32>
    %21 = tpu.matmul %19, %20, %cst_27 {dimension_numbers = #tpu.dot_dimension_numbers<[1], [0], [0], [1], [0, 0, 1, 1], [], []>} : vector<128x128xbf16>, vector<128x128xbf16>, vector<128x128xf32> -> vector<128x128xf32>
    %22 = arith.addf %18, %21 : vector<128x128xf32>
    %c0_28 = arith.constant 0 : index
    %c0_29 = arith.constant 0 : index
    %23 = vector.load %arg8[%c0_28, %c0_29] : memref<128x128xbf16, #tpu.memory_space<vmem>>, vector<128x128xbf16>
    %c0_30 = arith.constant 0 : index
    %c0_31 = arith.constant 0 : index
    %24 = vector.load %arg17[%c0_30, %c0_31] : memref<128x128xbf16, #tpu.memory_space<vmem>>, vector<128x128xbf16>
    %cst_32 = arith.constant dense<0.000000e+00> : vector<128x128xf32>
    %25 = tpu.matmul %23, %24, %cst_32 {dimension_numbers = #tpu.dot_dimension_numbers<[1], [0], [0], [1], [0, 0, 1, 1], [], []>} : vector<128x128xbf16>, vector<128x128xbf16>, vector<128x128xf32> -> vector<128x128xf32>
    %26 = arith.addf %22, %25 : vector<128x128xf32>
    %c0_33 = arith.constant 0 : index
    %c0_34 = arith.constant 0 : index
    %27 = vector.load %arg9[%c0_33, %c0_34] : memref<128x128xbf16, #tpu.memory_space<vmem>>, vector<128x128xbf16>
    %c0_35 = arith.constant 0 : index
    %c0_36 = arith.constant 0 : index
    %28 = vector.load %arg18[%c0_35, %c0_36] : memref<128x128xbf16, #tpu.memory_space<vmem>>, vector<128x128xbf16>
    %cst_37 = arith.constant dense<0.000000e+00> : vector<128x128xf32>
    %29 = tpu.matmul %27, %28, %cst_37 {dimension_numbers = #tpu.dot_dimension_numbers<[1], [0], [0], [1], [0, 0, 1, 1], [], []>} : vector<128x128xbf16>, vector<128x128xbf16>, vector<128x128xf32> -> vector<128x128xf32>
    %30 = arith.addf %26, %29 : vector<128x128xf32>
    %c0_38 = arith.constant 0 : index
    %c0_39 = arith.constant 0 : index
    %31 = vector.load %arg10[%c0_38, %c0_39] : memref<128x128xbf16, #tpu.memory_space<vmem>>, vector<128x128xbf16>
    %c0_40 = arith.constant 0 : index
    %c0_41 = arith.constant 0 : index
    %32 = vector.load %arg19[%c0_40, %c0_41] : memref<128x128xbf16, #tpu.memory_space<vmem>>, vector<128x128xbf16>
    %cst_42 = arith.constant dense<0.000000e+00> : vector<128x128xf32>
    %33 = tpu.matmul %31, %32, %cst_42 {dimension_numbers = #tpu.dot_dimension_numbers<[1], [0], [0], [1], [0, 0, 1, 1], [], []>} : vector<128x128xbf16>, vector<128x128xbf16>, vector<128x128xf32> -> vector<128x128xf32>
    %34 = arith.addf %30, %33 : vector<128x128xf32>
    %c0_43 = arith.constant 0 : index
    %c0_44 = arith.constant 0 : index
    %35 = vector.load %arg20[%c0_43, %c0_44] : memref<1x128xf32, #tpu.memory_space<vmem>>, vector<1x128xf32>
    %36 = vector.broadcast %35 : vector<1x128xf32> to vector<128x128xf32>
    %37 = arith.addf %34, %36 : vector<128x128xf32>
    %cst_45 = arith.constant 0.000000e+00 : f32
    %38 = vector.broadcast %cst_45 : f32 to vector<128x128xf32>
    %39 = arith.subf %38, %37 : vector<128x128xf32>
    %40 = math.exp %39 : vector<128x128xf32>
    %cst_46 = arith.constant 1.000000e+00 : f32
    %41 = vector.broadcast %cst_46 : f32 to vector<128x128xf32>
    %42 = arith.addf %41, %40 : vector<128x128xf32>
    %43 = tpu.reciprocal %42 {approx = true} : vector<128x128xf32> -> vector<128x128xf32>
    %44 = arith.mulf %37, %43 : vector<128x128xf32>
    %45 = arith.truncf %44 : vector<128x128xf32> to vector<128x128xbf16>
    %c0_47 = arith.constant 0 : index
    %c0_48 = arith.constant 0 : index
    %46 = vector.load %arg21[%c0_47, %c0_48] : memref<128x128xbf16, #tpu.memory_space<vmem>>, vector<128x128xbf16>
    tpu.vector_store %arg21[%c0_47, %c0_48], %45 {strides = array<i32>} : memref<128x128xbf16, #tpu.memory_space<vmem>>, vector<128x128xbf16>,
    return
  }
  func.func @transform_0(%arg0: i32, %arg1: i32) -> (i32, i32) {
    %c0_i32 = arith.constant 0 : i32
    %c0_i32_0 = arith.constant 0 : i32
    return %arg0, %c0_i32 : i32, i32
  }
  func.func @transform_1(%arg0: i32, %arg1: i32) -> (i32, i32) {
    %c0_i32 = arith.constant 0 : i32
    %c0_i32_0 = arith.constant 0 : i32
    return %arg0, %c0_i32 : i32, i32
  }
  func.func @transform_2(%arg0: i32, %arg1: i32) -> (i32, i32) {
    %c0_i32 = arith.constant 0 : i32
    %c0_i32_0 = arith.constant 0 : i32
    return %arg0, %c0_i32 : i32, i32
  }
  func.func @transform_3(%arg0: i32, %arg1: i32) -> (i32, i32) {
    %c0_i32 = arith.constant 0 : i32
    %c0_i32_0 = arith.constant 0 : i32
    return %arg0, %c0_i32 : i32, i32
  }
  func.func @transform_4(%arg0: i32, %arg1: i32) -> (i32, i32) {
    %c0_i32 = arith.constant 0 : i32
    %c0_i32_0 = arith.constant 0 : i32
    return %arg0, %c0_i32 : i32, i32
  }
  func.func @transform_5(%arg0: i32, %arg1: i32) -> (i32, i32) {
    %c0_i32 = arith.constant 0 : i32
    %c0_i32_0 = arith.constant 0 : i32
    return %arg0, %c0_i32 : i32, i32
  }
  func.func @transform_6(%arg0: i32, %arg1: i32) -> (i32, i32) {
    %c0_i32 = arith.constant 0 : i32
    %c0_i32_0 = arith.constant 0 : i32
    return %arg0, %c0_i32 : i32, i32
  }
  func.func @transform_7(%arg0: i32, %arg1: i32) -> (i32, i32) {
    %c0_i32 = arith.constant 0 : i32
    %c0_i32_0 = arith.constant 0 : i32
    return %arg0, %c0_i32 : i32, i32
  }
  func.func @transform_8(%arg0: i32, %arg1: i32) -> (i32, i32) {
    %c0_i32 = arith.constant 0 : i32
    %c0_i32_0 = arith.constant 0 : i32
    return %arg0, %c0_i32 : i32, i32
  }
  func.func @transform_9(%arg0: i32, %arg1: i32) -> (i32, i32) {
    %c0_i32 = arith.constant 0 : i32
    %c0_i32_0 = arith.constant 0 : i32
    return %c0_i32, %arg1 : i32, i32
  }
  func.func @transform_10(%arg0: i32, %arg1: i32) -> (i32, i32) {
    %c0_i32 = arith.constant 0 : i32
    %c0_i32_0 = arith.constant 0 : i32
    return %c0_i32, %arg1 : i32, i32
  }
  func.func @transform_11(%arg0: i32, %arg1: i32) -> (i32, i32) {
    %c0_i32 = arith.constant 0 : i32
    %c0_i32_0 = arith.constant 0 : i32
    return %c0_i32, %arg1 : i32, i32
  }
  func.func @transform_12(%arg0: i32, %arg1: i32) -> (i32, i32) {
    %c0_i32 = arith.constant 0 : i32
    %c0_i32_0 = arith.constant 0 : i32
    return %c0_i32, %arg1 : i32, i32
  }
  func.func @transform_13(%arg0: i32, %arg1: i32) -> (i32, i32) {
    %c0_i32 = arith.constant 0 : i32
    %c0_i32_0 = arith.constant 0 : i32
    return %c0_i32, %arg1 : i32, i32
  }
  func.func @transform_14(%arg0: i32, %arg1: i32) -> (i32, i32) {
    %c0_i32 = arith.constant 0 : i32
    %c0_i32_0 = arith.constant 0 : i32
    return %c0_i32, %arg1 : i32, i32
  }
  func.func @transform_15(%arg0: i32, %arg1: i32) -> (i32, i32) {
    %c0_i32 = arith.constant 0 : i32
    %c0_i32_0 = arith.constant 0 : i32
    return %c0_i32, %arg1 : i32, i32
  }
  func.func @transform_16(%arg0: i32, %arg1: i32) -> (i32, i32) {
    %c0_i32 = arith.constant 0 : i32
    %c0_i32_0 = arith.constant 0 : i32
    return %c0_i32, %arg1 : i32, i32
  }
  func.func @transform_17(%arg0: i32, %arg1: i32) -> (i32, i32) {
    %c0_i32 = arith.constant 0 : i32
    %c0_i32_0 = arith.constant 0 : i32
    return %c0_i32, %arg1 : i32, i32
  }
  func.func @transform_18(%arg0: i32, %arg1: i32) -> (i32, i32) {
    %c0_i32 = arith.constant 0 : i32
    %c0_i32_0 = arith.constant 0 : i32
    return %c0_i32, %arg1 : i32, i32
  }
  func.func @transform_19(%arg0: i32, %arg1: i32) -> (i32, i32) {
    %c0_i32 = arith.constant 0 : i32
    return %arg0, %arg1 : i32, i32
  }
}

module attributes {stable_mosaic.version = 11 : i64} {
  func.func @kernel(%arg0: i32, %arg1: i32, %arg2: memref<128x128xbf16, #tpu.memory_space<vmem>>, %arg3: memref<128x128xbf16, #tpu.memory_space<vmem>>, %arg4: memref<128x128xbf16, #tpu.memory_space<vmem>>, %arg5: memref<128x128xbf16, #tpu.memory_space<vmem>>, %arg6: memref<128x128xbf16, #tpu.memory_space<vmem>>, %arg7: memref<128x128xbf16, #tpu.memory_space<vmem>>, %arg8: memref<1x128xf32, #tpu.memory_space<vmem>>, %arg9: memref<128x128xbf16, #tpu.memory_space<vmem>>) attributes {dimension_semantics = [#tpu.dimension_semantics<parallel>, #tpu.dimension_semantics<parallel>], iteration_bounds = array<i64: 1, 1>, scalar_prefetch = 0 : i64, scratch_operands = 0 : i64, tpu.core_type = #tpu.core_type<tc>, window_params = [{transform_indices = @transform_0, window_bounds = array<i64: 128, 128>}, {transform_indices = @transform_1, window_bounds = array<i64: 128, 128>}, {transform_indices = @transform_2, window_bounds = array<i64: 128, 128>}, {transform_indices = @transform_3, window_bounds = array<i64: 128, 128>}, {transform_indices = @transform_4, window_bounds = array<i64: 128, 128>}, {transform_indices = @transform_5, window_bounds = array<i64: 128, 128>}, {transform_indices = @transform_6, window_bounds = array<i64: 1, 128>}, {transform_indices = @transform_7, window_bounds = array<i64: 128, 128>}]} {
    %c0 = arith.constant 0 : index
    %c0_0 = arith.constant 0 : index
    %0 = vector.load %arg2[%c0, %c0_0] : memref<128x128xbf16, #tpu.memory_space<vmem>>, vector<128x128xbf16>
    %c0_1 = arith.constant 0 : index
    %c0_2 = arith.constant 0 : index
    %1 = vector.load %arg5[%c0_1, %c0_2] : memref<128x128xbf16, #tpu.memory_space<vmem>>, vector<128x128xbf16>
    %cst = arith.constant dense<0.000000e+00> : vector<128x128xf32>
    %2 = tpu.matmul %0, %1, %cst {dimension_numbers = #tpu.dot_dimension_numbers<[1], [0], [0], [1], [0, 0, 1, 1], [], []>} : vector<128x128xbf16>, vector<128x128xbf16>, vector<128x128xf32> -> vector<128x128xf32>
    %c0_3 = arith.constant 0 : index
    %c0_4 = arith.constant 0 : index
    %3 = vector.load %arg3[%c0_3, %c0_4] : memref<128x128xbf16, #tpu.memory_space<vmem>>, vector<128x128xbf16>
    %c0_5 = arith.constant 0 : index
    %c0_6 = arith.constant 0 : index
    %4 = vector.load %arg6[%c0_5, %c0_6] : memref<128x128xbf16, #tpu.memory_space<vmem>>, vector<128x128xbf16>
    %cst_7 = arith.constant dense<0.000000e+00> : vector<128x128xf32>
    %5 = tpu.matmul %3, %4, %cst_7 {dimension_numbers = #tpu.dot_dimension_numbers<[1], [0], [0], [1], [0, 0, 1, 1], [], []>} : vector<128x128xbf16>, vector<128x128xbf16>, vector<128x128xf32> -> vector<128x128xf32>
    %6 = arith.addf %2, %5 : vector<128x128xf32>
    %c0_8 = arith.constant 0 : index
    %c0_9 = arith.constant 0 : index
    %7 = vector.load %arg4[%c0_8, %c0_9] : memref<128x128xbf16, #tpu.memory_space<vmem>>, vector<128x128xbf16>
    %c0_10 = arith.constant 0 : index
    %c0_11 = arith.constant 0 : index
    %8 = vector.load %arg7[%c0_10, %c0_11] : memref<128x128xbf16, #tpu.memory_space<vmem>>, vector<128x128xbf16>
    %cst_12 = arith.constant dense<0.000000e+00> : vector<128x128xf32>
    %9 = tpu.matmul %7, %8, %cst_12 {dimension_numbers = #tpu.dot_dimension_numbers<[1], [0], [0], [1], [0, 0, 1, 1], [], []>} : vector<128x128xbf16>, vector<128x128xbf16>, vector<128x128xf32> -> vector<128x128xf32>
    %10 = arith.addf %6, %9 : vector<128x128xf32>
    %c0_13 = arith.constant 0 : index
    %c0_14 = arith.constant 0 : index
    %11 = vector.load %arg8[%c0_13, %c0_14] : memref<1x128xf32, #tpu.memory_space<vmem>>, vector<1x128xf32>
    %12 = vector.broadcast %11 : vector<1x128xf32> to vector<128x128xf32>
    %13 = arith.addf %10, %12 : vector<128x128xf32>
    %cst_15 = arith.constant 0.000000e+00 : f32
    %14 = vector.broadcast %cst_15 : f32 to vector<128x128xf32>
    %15 = arith.subf %14, %13 : vector<128x128xf32>
    %16 = math.exp %15 : vector<128x128xf32>
    %cst_16 = arith.constant 1.000000e+00 : f32
    %17 = vector.broadcast %cst_16 : f32 to vector<128x128xf32>
    %18 = arith.addf %17, %16 : vector<128x128xf32>
    %19 = tpu.reciprocal %18 {approx = true} : vector<128x128xf32> -> vector<128x128xf32>
    %20 = arith.mulf %13, %19 : vector<128x128xf32>
    %21 = arith.truncf %20 : vector<128x128xf32> to vector<128x128xbf16>
    %c0_17 = arith.constant 0 : index
    %c0_18 = arith.constant 0 : index
    %22 = vector.load %arg9[%c0_17, %c0_18] : memref<128x128xbf16, #tpu.memory_space<vmem>>, vector<128x128xbf16>
    tpu.vector_store %arg9[%c0_17, %c0_18], %21 {strides = array<i32>} : memref<128x128xbf16, #tpu.memory_space<vmem>>, vector<128x128xbf16>,
    return
  }
  func.func @transform_0(%arg0: i32, %arg1: i32) -> (i32, i32) {
    %c0_i32 = arith.constant 0 : i32
    %c0_i32_0 = arith.constant 0 : i32
    return %arg0, %c0_i32 : i32, i32
  }
  func.func @transform_1(%arg0: i32, %arg1: i32) -> (i32, i32) {
    %c0_i32 = arith.constant 0 : i32
    %c0_i32_0 = arith.constant 0 : i32
    return %arg0, %c0_i32 : i32, i32
  }
  func.func @transform_2(%arg0: i32, %arg1: i32) -> (i32, i32) {
    %c0_i32 = arith.constant 0 : i32
    %c0_i32_0 = arith.constant 0 : i32
    return %arg0, %c0_i32 : i32, i32
  }
  func.func @transform_3(%arg0: i32, %arg1: i32) -> (i32, i32) {
    %c0_i32 = arith.constant 0 : i32
    %c0_i32_0 = arith.constant 0 : i32
    return %c0_i32, %arg1 : i32, i32
  }
  func.func @transform_4(%arg0: i32, %arg1: i32) -> (i32, i32) {
    %c0_i32 = arith.constant 0 : i32
    %c0_i32_0 = arith.constant 0 : i32
    return %c0_i32, %arg1 : i32, i32
  }
  func.func @transform_5(%arg0: i32, %arg1: i32) -> (i32, i32) {
    %c0_i32 = arith.constant 0 : i32
    %c0_i32_0 = arith.constant 0 : i32
    return %c0_i32, %arg1 : i32, i32
  }
  func.func @transform_6(%arg0: i32, %arg1: i32) -> (i32, i32) {
    %c0_i32 = arith.constant 0 : i32
    %c0_i32_0 = arith.constant 0 : i32
    return %c0_i32, %arg1 : i32, i32
  }
  func.func @transform_7(%arg0: i32, %arg1: i32) -> (i32, i32) {
    %c0_i32 = arith.constant 0 : i32
    return %arg0, %arg1 : i32, i32
  }
}

module attributes {stable_mosaic.version = 11 : i64} {
  func.func @kernel(%arg0: i32, %arg1: i32, %arg2: memref<512x128xbf16, #tpu.memory_space<vmem>>, %arg3: memref<512x128xbf16, #tpu.memory_space<vmem>>, %arg4: memref<128x256xbf16, #tpu.memory_space<vmem>>, %arg5: memref<128x256xbf16, #tpu.memory_space<vmem>>, %arg6: memref<1x256xf32, #tpu.memory_space<vmem>>, %arg7: memref<512x256xbf16, #tpu.memory_space<vmem>>) attributes {dimension_semantics = [#tpu.dimension_semantics<parallel>, #tpu.dimension_semantics<parallel>], iteration_bounds = array<i64: 1, 1>, scalar_prefetch = 0 : i64, scratch_operands = 0 : i64, tpu.core_type = #tpu.core_type<tc>, window_params = [{transform_indices = @transform_0, window_bounds = array<i64: 512, 128>}, {transform_indices = @transform_1, window_bounds = array<i64: 512, 128>}, {transform_indices = @transform_2, window_bounds = array<i64: 128, 256>}, {transform_indices = @transform_3, window_bounds = array<i64: 128, 256>}, {transform_indices = @transform_4, window_bounds = array<i64: 1, 256>}, {transform_indices = @transform_5, window_bounds = array<i64: 512, 256>}]} {
    %c0 = arith.constant 0 : index
    %c0_0 = arith.constant 0 : index
    %0 = vector.load %arg2[%c0, %c0_0] : memref<512x128xbf16, #tpu.memory_space<vmem>>, vector<512x128xbf16>
    %c0_1 = arith.constant 0 : index
    %c0_2 = arith.constant 0 : index
    %1 = vector.load %arg4[%c0_1, %c0_2] : memref<128x256xbf16, #tpu.memory_space<vmem>>, vector<128x256xbf16>
    %cst = arith.constant dense<0.000000e+00> : vector<512x256xf32>
    %2 = tpu.matmul %0, %1, %cst {dimension_numbers = #tpu.dot_dimension_numbers<[1], [0], [0], [1], [0, 0, 1, 1], [], []>} : vector<512x128xbf16>, vector<128x256xbf16>, vector<512x256xf32> -> vector<512x256xf32>
    %c0_3 = arith.constant 0 : index
    %c0_4 = arith.constant 0 : index
    %3 = vector.load %arg3[%c0_3, %c0_4] : memref<512x128xbf16, #tpu.memory_space<vmem>>, vector<512x128xbf16>
    %c0_5 = arith.constant 0 : index
    %c0_6 = arith.constant 0 : index
    %4 = vector.load %arg5[%c0_5, %c0_6] : memref<128x256xbf16, #tpu.memory_space<vmem>>, vector<128x256xbf16>
    %cst_7 = arith.constant dense<0.000000e+00> : vector<512x256xf32>
    %5 = tpu.matmul %3, %4, %cst_7 {dimension_numbers = #tpu.dot_dimension_numbers<[1], [0], [0], [1], [0, 0, 1, 1], [], []>} : vector<512x128xbf16>, vector<128x256xbf16>, vector<512x256xf32> -> vector<512x256xf32>
    %6 = arith.addf %2, %5 : vector<512x256xf32>
    %c0_8 = arith.constant 0 : index
    %c0_9 = arith.constant 0 : index
    %7 = vector.load %arg6[%c0_8, %c0_9] : memref<1x256xf32, #tpu.memory_space<vmem>>, vector<1x256xf32>
    %8 = vector.broadcast %7 : vector<1x256xf32> to vector<512x256xf32>
    %9 = arith.addf %6, %8 : vector<512x256xf32>
    %cst_10 = arith.constant 0.000000e+00 : f32
    %10 = vector.broadcast %cst_10 : f32 to vector<512x256xf32>
    %11 = arith.subf %10, %9 : vector<512x256xf32>
    %12 = math.exp %11 : vector<512x256xf32>
    %cst_11 = arith.constant 1.000000e+00 : f32
    %13 = vector.broadcast %cst_11 : f32 to vector<512x256xf32>
    %14 = arith.addf %13, %12 : vector<512x256xf32>
    %15 = tpu.reciprocal %14 {approx = true} : vector<512x256xf32> -> vector<512x256xf32>
    %16 = arith.mulf %9, %15 : vector<512x256xf32>
    %17 = arith.truncf %16 : vector<512x256xf32> to vector<512x256xbf16>
    %c0_12 = arith.constant 0 : index
    %c0_13 = arith.constant 0 : index
    %18 = vector.load %arg7[%c0_12, %c0_13] : memref<512x256xbf16, #tpu.memory_space<vmem>>, vector<512x256xbf16>
    tpu.vector_store %arg7[%c0_12, %c0_13], %17 {strides = array<i32>} : memref<512x256xbf16, #tpu.memory_space<vmem>>, vector<512x256xbf16>,
    return
  }
  func.func @transform_0(%arg0: i32, %arg1: i32) -> (i32, i32) {
    %c0_i32 = arith.constant 0 : i32
    %c0_i32_0 = arith.constant 0 : i32
    return %arg0, %c0_i32 : i32, i32
  }
  func.func @transform_1(%arg0: i32, %arg1: i32) -> (i32, i32) {
    %c0_i32 = arith.constant 0 : i32
    %c0_i32_0 = arith.constant 0 : i32
    return %arg0, %c0_i32 : i32, i32
  }
  func.func @transform_2(%arg0: i32, %arg1: i32) -> (i32, i32) {
    %c0_i32 = arith.constant 0 : i32
    %c0_i32_0 = arith.constant 0 : i32
    return %c0_i32, %arg1 : i32, i32
  }
  func.func @transform_3(%arg0: i32, %arg1: i32) -> (i32, i32) {
    %c0_i32 = arith.constant 0 : i32
    %c0_i32_0 = arith.constant 0 : i32
    return %c0_i32, %arg1 : i32, i32
  }
  func.func @transform_4(%arg0: i32, %arg1: i32) -> (i32, i32) {
    %c0_i32 = arith.constant 0 : i32
    %c0_i32_0 = arith.constant 0 : i32
    return %c0_i32, %arg1 : i32, i32
  }
  func.func @transform_5(%arg0: i32, %arg1: i32) -> (i32, i32) {
    %c0_i32 = arith.constant 0 : i32
    return %arg0, %arg1 : i32, i32
  }
}

module attributes {stable_mosaic.version = 11 : i64} {
  func.func @kernel(%arg0: i32, %arg1: i32, %arg2: memref<512x128xbf16, #tpu.memory_space<vmem>>, %arg3: memref<512x128xbf16, #tpu.memory_space<vmem>>, %arg4: memref<512x128xbf16, #tpu.memory_space<vmem>>, %arg5: memref<512x128xbf16, #tpu.memory_space<vmem>>, %arg6: memref<512x128xbf16, #tpu.memory_space<vmem>>, %arg7: memref<512x128xbf16, #tpu.memory_space<vmem>>, %arg8: memref<512x128xbf16, #tpu.memory_space<vmem>>, %arg9: memref<512x128xbf16, #tpu.memory_space<vmem>>, %arg10: memref<512x128xbf16, #tpu.memory_space<vmem>>, %arg11: memref<128x128xbf16, #tpu.memory_space<vmem>>, %arg12: memref<128x128xbf16, #tpu.memory_space<vmem>>, %arg13: memref<128x128xbf16, #tpu.memory_space<vmem>>, %arg14: memref<128x128xbf16, #tpu.memory_space<vmem>>, %arg15: memref<128x128xbf16, #tpu.memory_space<vmem>>, %arg16: memref<128x128xbf16, #tpu.memory_space<vmem>>, %arg17: memref<128x128xbf16, #tpu.memory_space<vmem>>, %arg18: memref<128x128xbf16, #tpu.memory_space<vmem>>, %arg19: memref<128x128xbf16, #tpu.memory_space<vmem>>, %arg20: memref<1x128xf32, #tpu.memory_space<vmem>>, %arg21: memref<512x128xbf16, #tpu.memory_space<vmem>>) attributes {dimension_semantics = [#tpu.dimension_semantics<parallel>, #tpu.dimension_semantics<parallel>], iteration_bounds = array<i64: 1, 1>, scalar_prefetch = 0 : i64, scratch_operands = 0 : i64, tpu.core_type = #tpu.core_type<tc>, window_params = [{transform_indices = @transform_0, window_bounds = array<i64: 512, 128>}, {transform_indices = @transform_1, window_bounds = array<i64: 512, 128>}, {transform_indices = @transform_2, window_bounds = array<i64: 512, 128>}, {transform_indices = @transform_3, window_bounds = array<i64: 512, 128>}, {transform_indices = @transform_4, window_bounds = array<i64: 512, 128>}, {transform_indices = @transform_5, window_bounds = array<i64: 512, 128>}, {transform_indices = @transform_6, window_bounds = array<i64: 512, 128>}, {transform_indices = @transform_7, window_bounds = array<i64: 512, 128>}, {transform_indices = @transform_8, window_bounds = array<i64: 512, 128>}, {transform_indices = @transform_9, window_bounds = array<i64: 128, 128>}, {transform_indices = @transform_10, window_bounds = array<i64: 128, 128>}, {transform_indices = @transform_11, window_bounds = array<i64: 128, 128>}, {transform_indices = @transform_12, window_bounds = array<i64: 128, 128>}, {transform_indices = @transform_13, window_bounds = array<i64: 128, 128>}, {transform_indices = @transform_14, window_bounds = array<i64: 128, 128>}, {transform_indices = @transform_15, window_bounds = array<i64: 128, 128>}, {transform_indices = @transform_16, window_bounds = array<i64: 128, 128>}, {transform_indices = @transform_17, window_bounds = array<i64: 128, 128>}, {transform_indices = @transform_18, window_bounds = array<i64: 1, 128>}, {transform_indices = @transform_19, window_bounds = array<i64: 512, 128>}]} {
    %c0 = arith.constant 0 : index
    %c0_0 = arith.constant 0 : index
    %0 = vector.load %arg2[%c0, %c0_0] : memref<512x128xbf16, #tpu.memory_space<vmem>>, vector<512x128xbf16>
    %c0_1 = arith.constant 0 : index
    %c0_2 = arith.constant 0 : index
    %1 = vector.load %arg11[%c0_1, %c0_2] : memref<128x128xbf16, #tpu.memory_space<vmem>>, vector<128x128xbf16>
    %cst = arith.constant dense<0.000000e+00> : vector<512x128xf32>
    %2 = tpu.matmul %0, %1, %cst {dimension_numbers = #tpu.dot_dimension_numbers<[1], [0], [0], [1], [0, 0, 1, 1], [], []>} : vector<512x128xbf16>, vector<128x128xbf16>, vector<512x128xf32> -> vector<512x128xf32>
    %c0_3 = arith.constant 0 : index
    %c0_4 = arith.constant 0 : index
    %3 = vector.load %arg3[%c0_3, %c0_4] : memref<512x128xbf16, #tpu.memory_space<vmem>>, vector<512x128xbf16>
    %c0_5 = arith.constant 0 : index
    %c0_6 = arith.constant 0 : index
    %4 = vector.load %arg12[%c0_5, %c0_6] : memref<128x128xbf16, #tpu.memory_space<vmem>>, vector<128x128xbf16>
    %cst_7 = arith.constant dense<0.000000e+00> : vector<512x128xf32>
    %5 = tpu.matmul %3, %4, %cst_7 {dimension_numbers = #tpu.dot_dimension_numbers<[1], [0], [0], [1], [0, 0, 1, 1], [], []>} : vector<512x128xbf16>, vector<128x128xbf16>, vector<512x128xf32> -> vector<512x128xf32>
    %6 = arith.addf %2, %5 : vector<512x128xf32>
    %c0_8 = arith.constant 0 : index
    %c0_9 = arith.constant 0 : index
    %7 = vector.load %arg4[%c0_8, %c0_9] : memref<512x128xbf16, #tpu.memory_space<vmem>>, vector<512x128xbf16>
    %c0_10 = arith.constant 0 : index
    %c0_11 = arith.constant 0 : index
    %8 = vector.load %arg13[%c0_10, %c0_11] : memref<128x128xbf16, #tpu.memory_space<vmem>>, vector<128x128xbf16>
    %cst_12 = arith.constant dense<0.000000e+00> : vector<512x128xf32>
    %9 = tpu.matmul %7, %8, %cst_12 {dimension_numbers = #tpu.dot_dimension_numbers<[1], [0], [0], [1], [0, 0, 1, 1], [], []>} : vector<512x128xbf16>, vector<128x128xbf16>, vector<512x128xf32> -> vector<512x128xf32>
    %10 = arith.addf %6, %9 : vector<512x128xf32>
    %c0_13 = arith.constant 0 : index
    %c0_14 = arith.constant 0 : index
    %11 = vector.load %arg5[%c0_13, %c0_14] : memref<512x128xbf16, #tpu.memory_space<vmem>>, vector<512x128xbf16>
    %c0_15 = arith.constant 0 : index
    %c0_16 = arith.constant 0 : index
    %12 = vector.load %arg14[%c0_15, %c0_16] : memref<128x128xbf16, #tpu.memory_space<vmem>>, vector<128x128xbf16>
    %cst_17 = arith.constant dense<0.000000e+00> : vector<512x128xf32>
    %13 = tpu.matmul %11, %12, %cst_17 {dimension_numbers = #tpu.dot_dimension_numbers<[1], [0], [0], [1], [0, 0, 1, 1], [], []>} : vector<512x128xbf16>, vector<128x128xbf16>, vector<512x128xf32> -> vector<512x128xf32>
    %14 = arith.addf %10, %13 : vector<512x128xf32>
    %c0_18 = arith.constant 0 : index
    %c0_19 = arith.constant 0 : index
    %15 = vector.load %arg6[%c0_18, %c0_19] : memref<512x128xbf16, #tpu.memory_space<vmem>>, vector<512x128xbf16>
    %c0_20 = arith.constant 0 : index
    %c0_21 = arith.constant 0 : index
    %16 = vector.load %arg15[%c0_20, %c0_21] : memref<128x128xbf16, #tpu.memory_space<vmem>>, vector<128x128xbf16>
    %cst_22 = arith.constant dense<0.000000e+00> : vector<512x128xf32>
    %17 = tpu.matmul %15, %16, %cst_22 {dimension_numbers = #tpu.dot_dimension_numbers<[1], [0], [0], [1], [0, 0, 1, 1], [], []>} : vector<512x128xbf16>, vector<128x128xbf16>, vector<512x128xf32> -> vector<512x128xf32>
    %18 = arith.addf %14, %17 : vector<512x128xf32>
    %c0_23 = arith.constant 0 : index
    %c0_24 = arith.constant 0 : index
    %19 = vector.load %arg7[%c0_23, %c0_24] : memref<512x128xbf16, #tpu.memory_space<vmem>>, vector<512x128xbf16>
    %c0_25 = arith.constant 0 : index
    %c0_26 = arith.constant 0 : index
    %20 = vector.load %arg16[%c0_25, %c0_26] : memref<128x128xbf16, #tpu.memory_space<vmem>>, vector<128x128xbf16>
    %cst_27 = arith.constant dense<0.000000e+00> : vector<512x128xf32>
    %21 = tpu.matmul %19, %20, %cst_27 {dimension_numbers = #tpu.dot_dimension_numbers<[1], [0], [0], [1], [0, 0, 1, 1], [], []>} : vector<512x128xbf16>, vector<128x128xbf16>, vector<512x128xf32> -> vector<512x128xf32>
    %22 = arith.addf %18, %21 : vector<512x128xf32>
    %c0_28 = arith.constant 0 : index
    %c0_29 = arith.constant 0 : index
    %23 = vector.load %arg8[%c0_28, %c0_29] : memref<512x128xbf16, #tpu.memory_space<vmem>>, vector<512x128xbf16>
    %c0_30 = arith.constant 0 : index
    %c0_31 = arith.constant 0 : index
    %24 = vector.load %arg17[%c0_30, %c0_31] : memref<128x128xbf16, #tpu.memory_space<vmem>>, vector<128x128xbf16>
    %cst_32 = arith.constant dense<0.000000e+00> : vector<512x128xf32>
    %25 = tpu.matmul %23, %24, %cst_32 {dimension_numbers = #tpu.dot_dimension_numbers<[1], [0], [0], [1], [0, 0, 1, 1], [], []>} : vector<512x128xbf16>, vector<128x128xbf16>, vector<512x128xf32> -> vector<512x128xf32>
    %26 = arith.addf %22, %25 : vector<512x128xf32>
    %c0_33 = arith.constant 0 : index
    %c0_34 = arith.constant 0 : index
    %27 = vector.load %arg9[%c0_33, %c0_34] : memref<512x128xbf16, #tpu.memory_space<vmem>>, vector<512x128xbf16>
    %c0_35 = arith.constant 0 : index
    %c0_36 = arith.constant 0 : index
    %28 = vector.load %arg18[%c0_35, %c0_36] : memref<128x128xbf16, #tpu.memory_space<vmem>>, vector<128x128xbf16>
    %cst_37 = arith.constant dense<0.000000e+00> : vector<512x128xf32>
    %29 = tpu.matmul %27, %28, %cst_37 {dimension_numbers = #tpu.dot_dimension_numbers<[1], [0], [0], [1], [0, 0, 1, 1], [], []>} : vector<512x128xbf16>, vector<128x128xbf16>, vector<512x128xf32> -> vector<512x128xf32>
    %30 = arith.addf %26, %29 : vector<512x128xf32>
    %c0_38 = arith.constant 0 : index
    %c0_39 = arith.constant 0 : index
    %31 = vector.load %arg10[%c0_38, %c0_39] : memref<512x128xbf16, #tpu.memory_space<vmem>>, vector<512x128xbf16>
    %c0_40 = arith.constant 0 : index
    %c0_41 = arith.constant 0 : index
    %32 = vector.load %arg19[%c0_40, %c0_41] : memref<128x128xbf16, #tpu.memory_space<vmem>>, vector<128x128xbf16>
    %cst_42 = arith.constant dense<0.000000e+00> : vector<512x128xf32>
    %33 = tpu.matmul %31, %32, %cst_42 {dimension_numbers = #tpu.dot_dimension_numbers<[1], [0], [0], [1], [0, 0, 1, 1], [], []>} : vector<512x128xbf16>, vector<128x128xbf16>, vector<512x128xf32> -> vector<512x128xf32>
    %34 = arith.addf %30, %33 : vector<512x128xf32>
    %c0_43 = arith.constant 0 : index
    %c0_44 = arith.constant 0 : index
    %35 = vector.load %arg20[%c0_43, %c0_44] : memref<1x128xf32, #tpu.memory_space<vmem>>, vector<1x128xf32>
    %36 = vector.broadcast %35 : vector<1x128xf32> to vector<512x128xf32>
    %37 = arith.addf %34, %36 : vector<512x128xf32>
    %cst_45 = arith.constant 0.000000e+00 : f32
    %38 = vector.broadcast %cst_45 : f32 to vector<512x128xf32>
    %39 = arith.subf %38, %37 : vector<512x128xf32>
    %40 = math.exp %39 : vector<512x128xf32>
    %cst_46 = arith.constant 1.000000e+00 : f32
    %41 = vector.broadcast %cst_46 : f32 to vector<512x128xf32>
    %42 = arith.addf %41, %40 : vector<512x128xf32>
    %43 = tpu.reciprocal %42 {approx = true} : vector<512x128xf32> -> vector<512x128xf32>
    %44 = arith.mulf %37, %43 : vector<512x128xf32>
    %45 = arith.truncf %44 : vector<512x128xf32> to vector<512x128xbf16>
    %c0_47 = arith.constant 0 : index
    %c0_48 = arith.constant 0 : index
    %46 = vector.load %arg21[%c0_47, %c0_48] : memref<512x128xbf16, #tpu.memory_space<vmem>>, vector<512x128xbf16>
    tpu.vector_store %arg21[%c0_47, %c0_48], %45 {strides = array<i32>} : memref<512x128xbf16, #tpu.memory_space<vmem>>, vector<512x128xbf16>,
    return
  }
  func.func @transform_0(%arg0: i32, %arg1: i32) -> (i32, i32) {
    %c0_i32 = arith.constant 0 : i32
    %c0_i32_0 = arith.constant 0 : i32
    return %arg0, %c0_i32 : i32, i32
  }
  func.func @transform_1(%arg0: i32, %arg1: i32) -> (i32, i32) {
    %c0_i32 = arith.constant 0 : i32
    %c0_i32_0 = arith.constant 0 : i32
    return %arg0, %c0_i32 : i32, i32
  }
  func.func @transform_2(%arg0: i32, %arg1: i32) -> (i32, i32) {
    %c0_i32 = arith.constant 0 : i32
    %c0_i32_0 = arith.constant 0 : i32
    return %arg0, %c0_i32 : i32, i32
  }
  func.func @transform_3(%arg0: i32, %arg1: i32) -> (i32, i32) {
    %c0_i32 = arith.constant 0 : i32
    %c0_i32_0 = arith.constant 0 : i32
    return %arg0, %c0_i32 : i32, i32
  }
  func.func @transform_4(%arg0: i32, %arg1: i32) -> (i32, i32) {
    %c0_i32 = arith.constant 0 : i32
    %c0_i32_0 = arith.constant 0 : i32
    return %arg0, %c0_i32 : i32, i32
  }
  func.func @transform_5(%arg0: i32, %arg1: i32) -> (i32, i32) {
    %c0_i32 = arith.constant 0 : i32
    %c0_i32_0 = arith.constant 0 : i32
    return %arg0, %c0_i32 : i32, i32
  }
  func.func @transform_6(%arg0: i32, %arg1: i32) -> (i32, i32) {
    %c0_i32 = arith.constant 0 : i32
    %c0_i32_0 = arith.constant 0 : i32
    return %arg0, %c0_i32 : i32, i32
  }
  func.func @transform_7(%arg0: i32, %arg1: i32) -> (i32, i32) {
    %c0_i32 = arith.constant 0 : i32
    %c0_i32_0 = arith.constant 0 : i32
    return %arg0, %c0_i32 : i32, i32
  }
  func.func @transform_8(%arg0: i32, %arg1: i32) -> (i32, i32) {
    %c0_i32 = arith.constant 0 : i32
    %c0_i32_0 = arith.constant 0 : i32
    return %arg0, %c0_i32 : i32, i32
  }
  func.func @transform_9(%arg0: i32, %arg1: i32) -> (i32, i32) {
    %c0_i32 = arith.constant 0 : i32
    %c0_i32_0 = arith.constant 0 : i32
    return %c0_i32, %arg1 : i32, i32
  }
  func.func @transform_10(%arg0: i32, %arg1: i32) -> (i32, i32) {
    %c0_i32 = arith.constant 0 : i32
    %c0_i32_0 = arith.constant 0 : i32
    return %c0_i32, %arg1 : i32, i32
  }
  func.func @transform_11(%arg0: i32, %arg1: i32) -> (i32, i32) {
    %c0_i32 = arith.constant 0 : i32
    %c0_i32_0 = arith.constant 0 : i32
    return %c0_i32, %arg1 : i32, i32
  }
  func.func @transform_12(%arg0: i32, %arg1: i32) -> (i32, i32) {
    %c0_i32 = arith.constant 0 : i32
    %c0_i32_0 = arith.constant 0 : i32
    return %c0_i32, %arg1 : i32, i32
  }
  func.func @transform_13(%arg0: i32, %arg1: i32) -> (i32, i32) {
    %c0_i32 = arith.constant 0 : i32
    %c0_i32_0 = arith.constant 0 : i32
    return %c0_i32, %arg1 : i32, i32
  }
  func.func @transform_14(%arg0: i32, %arg1: i32) -> (i32, i32) {
    %c0_i32 = arith.constant 0 : i32
    %c0_i32_0 = arith.constant 0 : i32
    return %c0_i32, %arg1 : i32, i32
  }
  func.func @transform_15(%arg0: i32, %arg1: i32) -> (i32, i32) {
    %c0_i32 = arith.constant 0 : i32
    %c0_i32_0 = arith.constant 0 : i32
    return %c0_i32, %arg1 : i32, i32
  }
  func.func @transform_16(%arg0: i32, %arg1: i32) -> (i32, i32) {
    %c0_i32 = arith.constant 0 : i32
    %c0_i32_0 = arith.constant 0 : i32
    return %c0_i32, %arg1 : i32, i32
  }
  func.func @transform_17(%arg0: i32, %arg1: i32) -> (i32, i32) {
    %c0_i32 = arith.constant 0 : i32
    %c0_i32_0 = arith.constant 0 : i32
    return %c0_i32, %arg1 : i32, i32
  }
  func.func @transform_18(%arg0: i32, %arg1: i32) -> (i32, i32) {
    %c0_i32 = arith.constant 0 : i32
    %c0_i32_0 = arith.constant 0 : i32
    return %c0_i32, %arg1 : i32, i32
  }
  func.func @transform_19(%arg0: i32, %arg1: i32) -> (i32, i32) {
    %c0_i32 = arith.constant 0 : i32
    return %arg0, %arg1 : i32, i32
  }
}

module attributes {stable_mosaic.version = 11 : i64} {
  func.func @kernel(%arg0: i32, %arg1: i32, %arg2: memref<512x128xbf16, #tpu.memory_space<vmem>>, %arg3: memref<512x128xbf16, #tpu.memory_space<vmem>>, %arg4: memref<512x128xbf16, #tpu.memory_space<vmem>>, %arg5: memref<128x128xbf16, #tpu.memory_space<vmem>>, %arg6: memref<128x128xbf16, #tpu.memory_space<vmem>>, %arg7: memref<128x128xbf16, #tpu.memory_space<vmem>>, %arg8: memref<1x128xf32, #tpu.memory_space<vmem>>, %arg9: memref<512x128xbf16, #tpu.memory_space<vmem>>) attributes {dimension_semantics = [#tpu.dimension_semantics<parallel>, #tpu.dimension_semantics<parallel>], iteration_bounds = array<i64: 1, 1>, scalar_prefetch = 0 : i64, scratch_operands = 0 : i64, tpu.core_type = #tpu.core_type<tc>, window_params = [{transform_indices = @transform_0, window_bounds = array<i64: 512, 128>}, {transform_indices = @transform_1, window_bounds = array<i64: 512, 128>}, {transform_indices = @transform_2, window_bounds = array<i64: 512, 128>}, {transform_indices = @transform_3, window_bounds = array<i64: 128, 128>}, {transform_indices = @transform_4, window_bounds = array<i64: 128, 128>}, {transform_indices = @transform_5, window_bounds = array<i64: 128, 128>}, {transform_indices = @transform_6, window_bounds = array<i64: 1, 128>}, {transform_indices = @transform_7, window_bounds = array<i64: 512, 128>}]} {
    %c0 = arith.constant 0 : index
    %c0_0 = arith.constant 0 : index
    %0 = vector.load %arg2[%c0, %c0_0] : memref<512x128xbf16, #tpu.memory_space<vmem>>, vector<512x128xbf16>
    %c0_1 = arith.constant 0 : index
    %c0_2 = arith.constant 0 : index
    %1 = vector.load %arg5[%c0_1, %c0_2] : memref<128x128xbf16, #tpu.memory_space<vmem>>, vector<128x128xbf16>
    %cst = arith.constant dense<0.000000e+00> : vector<512x128xf32>
    %2 = tpu.matmul %0, %1, %cst {dimension_numbers = #tpu.dot_dimension_numbers<[1], [0], [0], [1], [0, 0, 1, 1], [], []>} : vector<512x128xbf16>, vector<128x128xbf16>, vector<512x128xf32> -> vector<512x128xf32>
    %c0_3 = arith.constant 0 : index
    %c0_4 = arith.constant 0 : index
    %3 = vector.load %arg3[%c0_3, %c0_4] : memref<512x128xbf16, #tpu.memory_space<vmem>>, vector<512x128xbf16>
    %c0_5 = arith.constant 0 : index
    %c0_6 = arith.constant 0 : index
    %4 = vector.load %arg6[%c0_5, %c0_6] : memref<128x128xbf16, #tpu.memory_space<vmem>>, vector<128x128xbf16>
    %cst_7 = arith.constant dense<0.000000e+00> : vector<512x128xf32>
    %5 = tpu.matmul %3, %4, %cst_7 {dimension_numbers = #tpu.dot_dimension_numbers<[1], [0], [0], [1], [0, 0, 1, 1], [], []>} : vector<512x128xbf16>, vector<128x128xbf16>, vector<512x128xf32> -> vector<512x128xf32>
    %6 = arith.addf %2, %5 : vector<512x128xf32>
    %c0_8 = arith.constant 0 : index
    %c0_9 = arith.constant 0 : index
    %7 = vector.load %arg4[%c0_8, %c0_9] : memref<512x128xbf16, #tpu.memory_space<vmem>>, vector<512x128xbf16>
    %c0_10 = arith.constant 0 : index
    %c0_11 = arith.constant 0 : index
    %8 = vector.load %arg7[%c0_10, %c0_11] : memref<128x128xbf16, #tpu.memory_space<vmem>>, vector<128x128xbf16>
    %cst_12 = arith.constant dense<0.000000e+00> : vector<512x128xf32>
    %9 = tpu.matmul %7, %8, %cst_12 {dimension_numbers = #tpu.dot_dimension_numbers<[1], [0], [0], [1], [0, 0, 1, 1], [], []>} : vector<512x128xbf16>, vector<128x128xbf16>, vector<512x128xf32> -> vector<512x128xf32>
    %10 = arith.addf %6, %9 : vector<512x128xf32>
    %c0_13 = arith.constant 0 : index
    %c0_14 = arith.constant 0 : index
    %11 = vector.load %arg8[%c0_13, %c0_14] : memref<1x128xf32, #tpu.memory_space<vmem>>, vector<1x128xf32>
    %12 = vector.broadcast %11 : vector<1x128xf32> to vector<512x128xf32>
    %13 = arith.addf %10, %12 : vector<512x128xf32>
    %cst_15 = arith.constant 0.000000e+00 : f32
    %14 = vector.broadcast %cst_15 : f32 to vector<512x128xf32>
    %15 = arith.subf %14, %13 : vector<512x128xf32>
    %16 = math.exp %15 : vector<512x128xf32>
    %cst_16 = arith.constant 1.000000e+00 : f32
    %17 = vector.broadcast %cst_16 : f32 to vector<512x128xf32>
    %18 = arith.addf %17, %16 : vector<512x128xf32>
    %19 = tpu.reciprocal %18 {approx = true} : vector<512x128xf32> -> vector<512x128xf32>
    %20 = arith.mulf %13, %19 : vector<512x128xf32>
    %21 = arith.truncf %20 : vector<512x128xf32> to vector<512x128xbf16>
    %c0_17 = arith.constant 0 : index
    %c0_18 = arith.constant 0 : index
    %22 = vector.load %arg9[%c0_17, %c0_18] : memref<512x128xbf16, #tpu.memory_space<vmem>>, vector<512x128xbf16>
    tpu.vector_store %arg9[%c0_17, %c0_18], %21 {strides = array<i32>} : memref<512x128xbf16, #tpu.memory_space<vmem>>, vector<512x128xbf16>,
    return
  }
  func.func @transform_0(%arg0: i32, %arg1: i32) -> (i32, i32) {
    %c0_i32 = arith.constant 0 : i32
    %c0_i32_0 = arith.constant 0 : i32
    return %arg0, %c0_i32 : i32, i32
  }
  func.func @transform_1(%arg0: i32, %arg1: i32) -> (i32, i32) {
    %c0_i32 = arith.constant 0 : i32
    %c0_i32_0 = arith.constant 0 : i32
    return %arg0, %c0_i32 : i32, i32
  }
  func.func @transform_2(%arg0: i32, %arg1: i32) -> (i32, i32) {
    %c0_i32 = arith.constant 0 : i32
    %c0_i32_0 = arith.constant 0 : i32
    return %arg0, %c0_i32 : i32, i32
  }
  func.func @transform_3(%arg0: i32, %arg1: i32) -> (i32, i32) {
    %c0_i32 = arith.constant 0 : i32
    %c0_i32_0 = arith.constant 0 : i32
    return %c0_i32, %arg1 : i32, i32
  }
  func.func @transform_4(%arg0: i32, %arg1: i32) -> (i32, i32) {
    %c0_i32 = arith.constant 0 : i32
    %c0_i32_0 = arith.constant 0 : i32
    return %c0_i32, %arg1 : i32, i32
  }
  func.func @transform_5(%arg0: i32, %arg1: i32) -> (i32, i32) {
    %c0_i32 = arith.constant 0 : i32
    %c0_i32_0 = arith.constant 0 : i32
    return %c0_i32, %arg1 : i32, i32
  }
  func.func @transform_6(%arg0: i32, %arg1: i32) -> (i32, i32) {
    %c0_i32 = arith.constant 0 : i32
    %c0_i32_0 = arith.constant 0 : i32
    return %c0_i32, %arg1 : i32, i32
  }
  func.func @transform_7(%arg0: i32, %arg1: i32) -> (i32, i32) {
    %c0_i32 = arith.constant 0 : i32
    return %arg0, %arg1 : i32, i32
  }
}

module attributes {stable_mosaic.version = 11 : i64} {
  func.func @kernel(%arg0: i32, %arg1: i32, %arg2: memref<32x128xbf16, #tpu.memory_space<vmem>>, %arg3: memref<32x128xbf16, #tpu.memory_space<vmem>>, %arg4: memref<128x256xbf16, #tpu.memory_space<vmem>>, %arg5: memref<128x256xbf16, #tpu.memory_space<vmem>>, %arg6: memref<1x256xf32, #tpu.memory_space<vmem>>, %arg7: memref<32x256xbf16, #tpu.memory_space<vmem>>) attributes {dimension_semantics = [#tpu.dimension_semantics<parallel>, #tpu.dimension_semantics<parallel>], iteration_bounds = array<i64: 1, 1>, scalar_prefetch = 0 : i64, scratch_operands = 0 : i64, tpu.core_type = #tpu.core_type<tc>, window_params = [{transform_indices = @transform_0, window_bounds = array<i64: 32, 128>}, {transform_indices = @transform_1, window_bounds = array<i64: 32, 128>}, {transform_indices = @transform_2, window_bounds = array<i64: 128, 256>}, {transform_indices = @transform_3, window_bounds = array<i64: 128, 256>}, {transform_indices = @transform_4, window_bounds = array<i64: 1, 256>}, {transform_indices = @transform_5, window_bounds = array<i64: 32, 256>}]} {
    %c0 = arith.constant 0 : index
    %c0_0 = arith.constant 0 : index
    %0 = vector.load %arg2[%c0, %c0_0] : memref<32x128xbf16, #tpu.memory_space<vmem>>, vector<32x128xbf16>
    %c0_1 = arith.constant 0 : index
    %c0_2 = arith.constant 0 : index
    %1 = vector.load %arg4[%c0_1, %c0_2] : memref<128x256xbf16, #tpu.memory_space<vmem>>, vector<128x256xbf16>
    %cst = arith.constant dense<0.000000e+00> : vector<32x256xf32>
    %2 = tpu.matmul %0, %1, %cst {dimension_numbers = #tpu.dot_dimension_numbers<[1], [0], [0], [1], [0, 0, 1, 1], [], []>} : vector<32x128xbf16>, vector<128x256xbf16>, vector<32x256xf32> -> vector<32x256xf32>
    %c0_3 = arith.constant 0 : index
    %c0_4 = arith.constant 0 : index
    %3 = vector.load %arg3[%c0_3, %c0_4] : memref<32x128xbf16, #tpu.memory_space<vmem>>, vector<32x128xbf16>
    %c0_5 = arith.constant 0 : index
    %c0_6 = arith.constant 0 : index
    %4 = vector.load %arg5[%c0_5, %c0_6] : memref<128x256xbf16, #tpu.memory_space<vmem>>, vector<128x256xbf16>
    %cst_7 = arith.constant dense<0.000000e+00> : vector<32x256xf32>
    %5 = tpu.matmul %3, %4, %cst_7 {dimension_numbers = #tpu.dot_dimension_numbers<[1], [0], [0], [1], [0, 0, 1, 1], [], []>} : vector<32x128xbf16>, vector<128x256xbf16>, vector<32x256xf32> -> vector<32x256xf32>
    %6 = arith.addf %2, %5 : vector<32x256xf32>
    %c0_8 = arith.constant 0 : index
    %c0_9 = arith.constant 0 : index
    %7 = vector.load %arg6[%c0_8, %c0_9] : memref<1x256xf32, #tpu.memory_space<vmem>>, vector<1x256xf32>
    %8 = vector.broadcast %7 : vector<1x256xf32> to vector<32x256xf32>
    %9 = arith.addf %6, %8 : vector<32x256xf32>
    %cst_10 = arith.constant 0.000000e+00 : f32
    %10 = vector.broadcast %cst_10 : f32 to vector<32x256xf32>
    %11 = arith.subf %10, %9 : vector<32x256xf32>
    %12 = math.exp %11 : vector<32x256xf32>
    %cst_11 = arith.constant 1.000000e+00 : f32
    %13 = vector.broadcast %cst_11 : f32 to vector<32x256xf32>
    %14 = arith.addf %13, %12 : vector<32x256xf32>
    %15 = tpu.reciprocal %14 {approx = true} : vector<32x256xf32> -> vector<32x256xf32>
    %16 = arith.mulf %9, %15 : vector<32x256xf32>
    %17 = arith.truncf %16 : vector<32x256xf32> to vector<32x256xbf16>
    %c0_12 = arith.constant 0 : index
    %c0_13 = arith.constant 0 : index
    %18 = vector.load %arg7[%c0_12, %c0_13] : memref<32x256xbf16, #tpu.memory_space<vmem>>, vector<32x256xbf16>
    tpu.vector_store %arg7[%c0_12, %c0_13], %17 {strides = array<i32>} : memref<32x256xbf16, #tpu.memory_space<vmem>>, vector<32x256xbf16>,
    return
  }
  func.func @transform_0(%arg0: i32, %arg1: i32) -> (i32, i32) {
    %c0_i32 = arith.constant 0 : i32
    %c0_i32_0 = arith.constant 0 : i32
    return %arg0, %c0_i32 : i32, i32
  }
  func.func @transform_1(%arg0: i32, %arg1: i32) -> (i32, i32) {
    %c0_i32 = arith.constant 0 : i32
    %c0_i32_0 = arith.constant 0 : i32
    return %arg0, %c0_i32 : i32, i32
  }
  func.func @transform_2(%arg0: i32, %arg1: i32) -> (i32, i32) {
    %c0_i32 = arith.constant 0 : i32
    %c0_i32_0 = arith.constant 0 : i32
    return %c0_i32, %arg1 : i32, i32
  }
  func.func @transform_3(%arg0: i32, %arg1: i32) -> (i32, i32) {
    %c0_i32 = arith.constant 0 : i32
    %c0_i32_0 = arith.constant 0 : i32
    return %c0_i32, %arg1 : i32, i32
  }
  func.func @transform_4(%arg0: i32, %arg1: i32) -> (i32, i32) {
    %c0_i32 = arith.constant 0 : i32
    %c0_i32_0 = arith.constant 0 : i32
    return %c0_i32, %arg1 : i32, i32
  }
  func.func @transform_5(%arg0: i32, %arg1: i32) -> (i32, i32) {
    %c0_i32 = arith.constant 0 : i32
    return %arg0, %arg1 : i32, i32
  }
}

module attributes {stable_mosaic.version = 11 : i64} {
  func.func @kernel(%arg0: i32, %arg1: i32, %arg2: memref<32x128xbf16, #tpu.memory_space<vmem>>, %arg3: memref<32x128xbf16, #tpu.memory_space<vmem>>, %arg4: memref<32x128xbf16, #tpu.memory_space<vmem>>, %arg5: memref<32x128xbf16, #tpu.memory_space<vmem>>, %arg6: memref<32x128xbf16, #tpu.memory_space<vmem>>, %arg7: memref<32x128xbf16, #tpu.memory_space<vmem>>, %arg8: memref<32x128xbf16, #tpu.memory_space<vmem>>, %arg9: memref<32x128xbf16, #tpu.memory_space<vmem>>, %arg10: memref<32x128xbf16, #tpu.memory_space<vmem>>, %arg11: memref<128x128xbf16, #tpu.memory_space<vmem>>, %arg12: memref<128x128xbf16, #tpu.memory_space<vmem>>, %arg13: memref<128x128xbf16, #tpu.memory_space<vmem>>, %arg14: memref<128x128xbf16, #tpu.memory_space<vmem>>, %arg15: memref<128x128xbf16, #tpu.memory_space<vmem>>, %arg16: memref<128x128xbf16, #tpu.memory_space<vmem>>, %arg17: memref<128x128xbf16, #tpu.memory_space<vmem>>, %arg18: memref<128x128xbf16, #tpu.memory_space<vmem>>, %arg19: memref<128x128xbf16, #tpu.memory_space<vmem>>, %arg20: memref<1x128xf32, #tpu.memory_space<vmem>>, %arg21: memref<32x128xbf16, #tpu.memory_space<vmem>>) attributes {dimension_semantics = [#tpu.dimension_semantics<parallel>, #tpu.dimension_semantics<parallel>], iteration_bounds = array<i64: 1, 1>, scalar_prefetch = 0 : i64, scratch_operands = 0 : i64, tpu.core_type = #tpu.core_type<tc>, window_params = [{transform_indices = @transform_0, window_bounds = array<i64: 32, 128>}, {transform_indices = @transform_1, window_bounds = array<i64: 32, 128>}, {transform_indices = @transform_2, window_bounds = array<i64: 32, 128>}, {transform_indices = @transform_3, window_bounds = array<i64: 32, 128>}, {transform_indices = @transform_4, window_bounds = array<i64: 32, 128>}, {transform_indices = @transform_5, window_bounds = array<i64: 32, 128>}, {transform_indices = @transform_6, window_bounds = array<i64: 32, 128>}, {transform_indices = @transform_7, window_bounds = array<i64: 32, 128>}, {transform_indices = @transform_8, window_bounds = array<i64: 32, 128>}, {transform_indices = @transform_9, window_bounds = array<i64: 128, 128>}, {transform_indices = @transform_10, window_bounds = array<i64: 128, 128>}, {transform_indices = @transform_11, window_bounds = array<i64: 128, 128>}, {transform_indices = @transform_12, window_bounds = array<i64: 128, 128>}, {transform_indices = @transform_13, window_bounds = array<i64: 128, 128>}, {transform_indices = @transform_14, window_bounds = array<i64: 128, 128>}, {transform_indices = @transform_15, window_bounds = array<i64: 128, 128>}, {transform_indices = @transform_16, window_bounds = array<i64: 128, 128>}, {transform_indices = @transform_17, window_bounds = array<i64: 128, 128>}, {transform_indices = @transform_18, window_bounds = array<i64: 1, 128>}, {transform_indices = @transform_19, window_bounds = array<i64: 32, 128>}]} {
    %c0 = arith.constant 0 : index
    %c0_0 = arith.constant 0 : index
    %0 = vector.load %arg2[%c0, %c0_0] : memref<32x128xbf16, #tpu.memory_space<vmem>>, vector<32x128xbf16>
    %c0_1 = arith.constant 0 : index
    %c0_2 = arith.constant 0 : index
    %1 = vector.load %arg11[%c0_1, %c0_2] : memref<128x128xbf16, #tpu.memory_space<vmem>>, vector<128x128xbf16>
    %cst = arith.constant dense<0.000000e+00> : vector<32x128xf32>
    %2 = tpu.matmul %0, %1, %cst {dimension_numbers = #tpu.dot_dimension_numbers<[1], [0], [0], [1], [0, 0, 1, 1], [], []>} : vector<32x128xbf16>, vector<128x128xbf16>, vector<32x128xf32> -> vector<32x128xf32>
    %c0_3 = arith.constant 0 : index
    %c0_4 = arith.constant 0 : index
    %3 = vector.load %arg3[%c0_3, %c0_4] : memref<32x128xbf16, #tpu.memory_space<vmem>>, vector<32x128xbf16>
    %c0_5 = arith.constant 0 : index
    %c0_6 = arith.constant 0 : index
    %4 = vector.load %arg12[%c0_5, %c0_6] : memref<128x128xbf16, #tpu.memory_space<vmem>>, vector<128x128xbf16>
    %cst_7 = arith.constant dense<0.000000e+00> : vector<32x128xf32>
    %5 = tpu.matmul %3, %4, %cst_7 {dimension_numbers = #tpu.dot_dimension_numbers<[1], [0], [0], [1], [0, 0, 1, 1], [], []>} : vector<32x128xbf16>, vector<128x128xbf16>, vector<32x128xf32> -> vector<32x128xf32>
    %6 = arith.addf %2, %5 : vector<32x128xf32>
    %c0_8 = arith.constant 0 : index
    %c0_9 = arith.constant 0 : index
    %7 = vector.load %arg4[%c0_8, %c0_9] : memref<32x128xbf16, #tpu.memory_space<vmem>>, vector<32x128xbf16>
    %c0_10 = arith.constant 0 : index
    %c0_11 = arith.constant 0 : index
    %8 = vector.load %arg13[%c0_10, %c0_11] : memref<128x128xbf16, #tpu.memory_space<vmem>>, vector<128x128xbf16>
    %cst_12 = arith.constant dense<0.000000e+00> : vector<32x128xf32>
    %9 = tpu.matmul %7, %8, %cst_12 {dimension_numbers = #tpu.dot_dimension_numbers<[1], [0], [0], [1], [0, 0, 1, 1], [], []>} : vector<32x128xbf16>, vector<128x128xbf16>, vector<32x128xf32> -> vector<32x128xf32>
    %10 = arith.addf %6, %9 : vector<32x128xf32>
    %c0_13 = arith.constant 0 : index
    %c0_14 = arith.constant 0 : index
    %11 = vector.load %arg5[%c0_13, %c0_14] : memref<32x128xbf16, #tpu.memory_space<vmem>>, vector<32x128xbf16>
    %c0_15 = arith.constant 0 : index
    %c0_16 = arith.constant 0 : index
    %12 = vector.load %arg14[%c0_15, %c0_16] : memref<128x128xbf16, #tpu.memory_space<vmem>>, vector<128x128xbf16>
    %cst_17 = arith.constant dense<0.000000e+00> : vector<32x128xf32>
    %13 = tpu.matmul %11, %12, %cst_17 {dimension_numbers = #tpu.dot_dimension_numbers<[1], [0], [0], [1], [0, 0, 1, 1], [], []>} : vector<32x128xbf16>, vector<128x128xbf16>, vector<32x128xf32> -> vector<32x128xf32>
    %14 = arith.addf %10, %13 : vector<32x128xf32>
    %c0_18 = arith.constant 0 : index
    %c0_19 = arith.constant 0 : index
    %15 = vector.load %arg6[%c0_18, %c0_19] : memref<32x128xbf16, #tpu.memory_space<vmem>>, vector<32x128xbf16>
    %c0_20 = arith.constant 0 : index
    %c0_21 = arith.constant 0 : index
    %16 = vector.load %arg15[%c0_20, %c0_21] : memref<128x128xbf16, #tpu.memory_space<vmem>>, vector<128x128xbf16>
    %cst_22 = arith.constant dense<0.000000e+00> : vector<32x128xf32>
    %17 = tpu.matmul %15, %16, %cst_22 {dimension_numbers = #tpu.dot_dimension_numbers<[1], [0], [0], [1], [0, 0, 1, 1], [], []>} : vector<32x128xbf16>, vector<128x128xbf16>, vector<32x128xf32> -> vector<32x128xf32>
    %18 = arith.addf %14, %17 : vector<32x128xf32>
    %c0_23 = arith.constant 0 : index
    %c0_24 = arith.constant 0 : index
    %19 = vector.load %arg7[%c0_23, %c0_24] : memref<32x128xbf16, #tpu.memory_space<vmem>>, vector<32x128xbf16>
    %c0_25 = arith.constant 0 : index
    %c0_26 = arith.constant 0 : index
    %20 = vector.load %arg16[%c0_25, %c0_26] : memref<128x128xbf16, #tpu.memory_space<vmem>>, vector<128x128xbf16>
    %cst_27 = arith.constant dense<0.000000e+00> : vector<32x128xf32>
    %21 = tpu.matmul %19, %20, %cst_27 {dimension_numbers = #tpu.dot_dimension_numbers<[1], [0], [0], [1], [0, 0, 1, 1], [], []>} : vector<32x128xbf16>, vector<128x128xbf16>, vector<32x128xf32> -> vector<32x128xf32>
    %22 = arith.addf %18, %21 : vector<32x128xf32>
    %c0_28 = arith.constant 0 : index
    %c0_29 = arith.constant 0 : index
    %23 = vector.load %arg8[%c0_28, %c0_29] : memref<32x128xbf16, #tpu.memory_space<vmem>>, vector<32x128xbf16>
    %c0_30 = arith.constant 0 : index
    %c0_31 = arith.constant 0 : index
    %24 = vector.load %arg17[%c0_30, %c0_31] : memref<128x128xbf16, #tpu.memory_space<vmem>>, vector<128x128xbf16>
    %cst_32 = arith.constant dense<0.000000e+00> : vector<32x128xf32>
    %25 = tpu.matmul %23, %24, %cst_32 {dimension_numbers = #tpu.dot_dimension_numbers<[1], [0], [0], [1], [0, 0, 1, 1], [], []>} : vector<32x128xbf16>, vector<128x128xbf16>, vector<32x128xf32> -> vector<32x128xf32>
    %26 = arith.addf %22, %25 : vector<32x128xf32>
    %c0_33 = arith.constant 0 : index
    %c0_34 = arith.constant 0 : index
    %27 = vector.load %arg9[%c0_33, %c0_34] : memref<32x128xbf16, #tpu.memory_space<vmem>>, vector<32x128xbf16>
    %c0_35 = arith.constant 0 : index
    %c0_36 = arith.constant 0 : index
    %28 = vector.load %arg18[%c0_35, %c0_36] : memref<128x128xbf16, #tpu.memory_space<vmem>>, vector<128x128xbf16>
    %cst_37 = arith.constant dense<0.000000e+00> : vector<32x128xf32>
    %29 = tpu.matmul %27, %28, %cst_37 {dimension_numbers = #tpu.dot_dimension_numbers<[1], [0], [0], [1], [0, 0, 1, 1], [], []>} : vector<32x128xbf16>, vector<128x128xbf16>, vector<32x128xf32> -> vector<32x128xf32>
    %30 = arith.addf %26, %29 : vector<32x128xf32>
    %c0_38 = arith.constant 0 : index
    %c0_39 = arith.constant 0 : index
    %31 = vector.load %arg10[%c0_38, %c0_39] : memref<32x128xbf16, #tpu.memory_space<vmem>>, vector<32x128xbf16>
    %c0_40 = arith.constant 0 : index
    %c0_41 = arith.constant 0 : index
    %32 = vector.load %arg19[%c0_40, %c0_41] : memref<128x128xbf16, #tpu.memory_space<vmem>>, vector<128x128xbf16>
    %cst_42 = arith.constant dense<0.000000e+00> : vector<32x128xf32>
    %33 = tpu.matmul %31, %32, %cst_42 {dimension_numbers = #tpu.dot_dimension_numbers<[1], [0], [0], [1], [0, 0, 1, 1], [], []>} : vector<32x128xbf16>, vector<128x128xbf16>, vector<32x128xf32> -> vector<32x128xf32>
    %34 = arith.addf %30, %33 : vector<32x128xf32>
    %c0_43 = arith.constant 0 : index
    %c0_44 = arith.constant 0 : index
    %35 = vector.load %arg20[%c0_43, %c0_44] : memref<1x128xf32, #tpu.memory_space<vmem>>, vector<1x128xf32>
    %36 = vector.broadcast %35 : vector<1x128xf32> to vector<32x128xf32>
    %37 = arith.addf %34, %36 : vector<32x128xf32>
    %cst_45 = arith.constant 0.000000e+00 : f32
    %38 = vector.broadcast %cst_45 : f32 to vector<32x128xf32>
    %39 = arith.subf %38, %37 : vector<32x128xf32>
    %40 = math.exp %39 : vector<32x128xf32>
    %cst_46 = arith.constant 1.000000e+00 : f32
    %41 = vector.broadcast %cst_46 : f32 to vector<32x128xf32>
    %42 = arith.addf %41, %40 : vector<32x128xf32>
    %43 = tpu.reciprocal %42 {approx = true} : vector<32x128xf32> -> vector<32x128xf32>
    %44 = arith.mulf %37, %43 : vector<32x128xf32>
    %45 = arith.truncf %44 : vector<32x128xf32> to vector<32x128xbf16>
    %c0_47 = arith.constant 0 : index
    %c0_48 = arith.constant 0 : index
    %46 = vector.load %arg21[%c0_47, %c0_48] : memref<32x128xbf16, #tpu.memory_space<vmem>>, vector<32x128xbf16>
    tpu.vector_store %arg21[%c0_47, %c0_48], %45 {strides = array<i32>} : memref<32x128xbf16, #tpu.memory_space<vmem>>, vector<32x128xbf16>,
    return
  }
  func.func @transform_0(%arg0: i32, %arg1: i32) -> (i32, i32) {
    %c0_i32 = arith.constant 0 : i32
    %c0_i32_0 = arith.constant 0 : i32
    return %arg0, %c0_i32 : i32, i32
  }
  func.func @transform_1(%arg0: i32, %arg1: i32) -> (i32, i32) {
    %c0_i32 = arith.constant 0 : i32
    %c0_i32_0 = arith.constant 0 : i32
    return %arg0, %c0_i32 : i32, i32
  }
  func.func @transform_2(%arg0: i32, %arg1: i32) -> (i32, i32) {
    %c0_i32 = arith.constant 0 : i32
    %c0_i32_0 = arith.constant 0 : i32
    return %arg0, %c0_i32 : i32, i32
  }
  func.func @transform_3(%arg0: i32, %arg1: i32) -> (i32, i32) {
    %c0_i32 = arith.constant 0 : i32
    %c0_i32_0 = arith.constant 0 : i32
    return %arg0, %c0_i32 : i32, i32
  }
  func.func @transform_4(%arg0: i32, %arg1: i32) -> (i32, i32) {
    %c0_i32 = arith.constant 0 : i32
    %c0_i32_0 = arith.constant 0 : i32
    return %arg0, %c0_i32 : i32, i32
  }
  func.func @transform_5(%arg0: i32, %arg1: i32) -> (i32, i32) {
    %c0_i32 = arith.constant 0 : i32
    %c0_i32_0 = arith.constant 0 : i32
    return %arg0, %c0_i32 : i32, i32
  }
  func.func @transform_6(%arg0: i32, %arg1: i32) -> (i32, i32) {
    %c0_i32 = arith.constant 0 : i32
    %c0_i32_0 = arith.constant 0 : i32
    return %arg0, %c0_i32 : i32, i32
  }
  func.func @transform_7(%arg0: i32, %arg1: i32) -> (i32, i32) {
    %c0_i32 = arith.constant 0 : i32
    %c0_i32_0 = arith.constant 0 : i32
    return %arg0, %c0_i32 : i32, i32
  }
  func.func @transform_8(%arg0: i32, %arg1: i32) -> (i32, i32) {
    %c0_i32 = arith.constant 0 : i32
    %c0_i32_0 = arith.constant 0 : i32
    return %arg0, %c0_i32 : i32, i32
  }
  func.func @transform_9(%arg0: i32, %arg1: i32) -> (i32, i32) {
    %c0_i32 = arith.constant 0 : i32
    %c0_i32_0 = arith.constant 0 : i32
    return %c0_i32, %arg1 : i32, i32
  }
  func.func @transform_10(%arg0: i32, %arg1: i32) -> (i32, i32) {
    %c0_i32 = arith.constant 0 : i32
    %c0_i32_0 = arith.constant 0 : i32
    return %c0_i32, %arg1 : i32, i32
  }
  func.func @transform_11(%arg0: i32, %arg1: i32) -> (i32, i32) {
    %c0_i32 = arith.constant 0 : i32
    %c0_i32_0 = arith.constant 0 : i32
    return %c0_i32, %arg1 : i32, i32
  }
  func.func @transform_12(%arg0: i32, %arg1: i32) -> (i32, i32) {
    %c0_i32 = arith.constant 0 : i32
    %c0_i32_0 = arith.constant 0 : i32
    return %c0_i32, %arg1 : i32, i32
  }
  func.func @transform_13(%arg0: i32, %arg1: i32) -> (i32, i32) {
    %c0_i32 = arith.constant 0 : i32
    %c0_i32_0 = arith.constant 0 : i32
    return %c0_i32, %arg1 : i32, i32
  }
  func.func @transform_14(%arg0: i32, %arg1: i32) -> (i32, i32) {
    %c0_i32 = arith.constant 0 : i32
    %c0_i32_0 = arith.constant 0 : i32
    return %c0_i32, %arg1 : i32, i32
  }
  func.func @transform_15(%arg0: i32, %arg1: i32) -> (i32, i32) {
    %c0_i32 = arith.constant 0 : i32
    %c0_i32_0 = arith.constant 0 : i32
    return %c0_i32, %arg1 : i32, i32
  }
  func.func @transform_16(%arg0: i32, %arg1: i32) -> (i32, i32) {
    %c0_i32 = arith.constant 0 : i32
    %c0_i32_0 = arith.constant 0 : i32
    return %c0_i32, %arg1 : i32, i32
  }
  func.func @transform_17(%arg0: i32, %arg1: i32) -> (i32, i32) {
    %c0_i32 = arith.constant 0 : i32
    %c0_i32_0 = arith.constant 0 : i32
    return %c0_i32, %arg1 : i32, i32
  }
  func.func @transform_18(%arg0: i32, %arg1: i32) -> (i32, i32) {
    %c0_i32 = arith.constant 0 : i32
    %c0_i32_0 = arith.constant 0 : i32
    return %c0_i32, %arg1 : i32, i32
  }
  func.func @transform_19(%arg0: i32, %arg1: i32) -> (i32, i32) {
    %c0_i32 = arith.constant 0 : i32
    return %arg0, %arg1 : i32, i32
  }
}

module attributes {stable_mosaic.version = 11 : i64} {
  func.func @kernel(%arg0: i32, %arg1: i32, %arg2: memref<32x128xbf16, #tpu.memory_space<vmem>>, %arg3: memref<32x128xbf16, #tpu.memory_space<vmem>>, %arg4: memref<32x128xbf16, #tpu.memory_space<vmem>>, %arg5: memref<128x128xbf16, #tpu.memory_space<vmem>>, %arg6: memref<128x128xbf16, #tpu.memory_space<vmem>>, %arg7: memref<128x128xbf16, #tpu.memory_space<vmem>>, %arg8: memref<1x128xf32, #tpu.memory_space<vmem>>, %arg9: memref<32x128xbf16, #tpu.memory_space<vmem>>) attributes {dimension_semantics = [#tpu.dimension_semantics<parallel>, #tpu.dimension_semantics<parallel>], iteration_bounds = array<i64: 1, 1>, scalar_prefetch = 0 : i64, scratch_operands = 0 : i64, tpu.core_type = #tpu.core_type<tc>, window_params = [{transform_indices = @transform_0, window_bounds = array<i64: 32, 128>}, {transform_indices = @transform_1, window_bounds = array<i64: 32, 128>}, {transform_indices = @transform_2, window_bounds = array<i64: 32, 128>}, {transform_indices = @transform_3, window_bounds = array<i64: 128, 128>}, {transform_indices = @transform_4, window_bounds = array<i64: 128, 128>}, {transform_indices = @transform_5, window_bounds = array<i64: 128, 128>}, {transform_indices = @transform_6, window_bounds = array<i64: 1, 128>}, {transform_indices = @transform_7, window_bounds = array<i64: 32, 128>}]} {
    %c0 = arith.constant 0 : index
    %c0_0 = arith.constant 0 : index
    %0 = vector.load %arg2[%c0, %c0_0] : memref<32x128xbf16, #tpu.memory_space<vmem>>, vector<32x128xbf16>
    %c0_1 = arith.constant 0 : index
    %c0_2 = arith.constant 0 : index
    %1 = vector.load %arg5[%c0_1, %c0_2] : memref<128x128xbf16, #tpu.memory_space<vmem>>, vector<128x128xbf16>
    %cst = arith.constant dense<0.000000e+00> : vector<32x128xf32>
    %2 = tpu.matmul %0, %1, %cst {dimension_numbers = #tpu.dot_dimension_numbers<[1], [0], [0], [1], [0, 0, 1, 1], [], []>} : vector<32x128xbf16>, vector<128x128xbf16>, vector<32x128xf32> -> vector<32x128xf32>
    %c0_3 = arith.constant 0 : index
    %c0_4 = arith.constant 0 : index
    %3 = vector.load %arg3[%c0_3, %c0_4] : memref<32x128xbf16, #tpu.memory_space<vmem>>, vector<32x128xbf16>
    %c0_5 = arith.constant 0 : index
    %c0_6 = arith.constant 0 : index
    %4 = vector.load %arg6[%c0_5, %c0_6] : memref<128x128xbf16, #tpu.memory_space<vmem>>, vector<128x128xbf16>
    %cst_7 = arith.constant dense<0.000000e+00> : vector<32x128xf32>
    %5 = tpu.matmul %3, %4, %cst_7 {dimension_numbers = #tpu.dot_dimension_numbers<[1], [0], [0], [1], [0, 0, 1, 1], [], []>} : vector<32x128xbf16>, vector<128x128xbf16>, vector<32x128xf32> -> vector<32x128xf32>
    %6 = arith.addf %2, %5 : vector<32x128xf32>
    %c0_8 = arith.constant 0 : index
    %c0_9 = arith.constant 0 : index
    %7 = vector.load %arg4[%c0_8, %c0_9] : memref<32x128xbf16, #tpu.memory_space<vmem>>, vector<32x128xbf16>
    %c0_10 = arith.constant 0 : index
    %c0_11 = arith.constant 0 : index
    %8 = vector.load %arg7[%c0_10, %c0_11] : memref<128x128xbf16, #tpu.memory_space<vmem>>, vector<128x128xbf16>
    %cst_12 = arith.constant dense<0.000000e+00> : vector<32x128xf32>
    %9 = tpu.matmul %7, %8, %cst_12 {dimension_numbers = #tpu.dot_dimension_numbers<[1], [0], [0], [1], [0, 0, 1, 1], [], []>} : vector<32x128xbf16>, vector<128x128xbf16>, vector<32x128xf32> -> vector<32x128xf32>
    %10 = arith.addf %6, %9 : vector<32x128xf32>
    %c0_13 = arith.constant 0 : index
    %c0_14 = arith.constant 0 : index
    %11 = vector.load %arg8[%c0_13, %c0_14] : memref<1x128xf32, #tpu.memory_space<vmem>>, vector<1x128xf32>
    %12 = vector.broadcast %11 : vector<1x128xf32> to vector<32x128xf32>
    %13 = arith.addf %10, %12 : vector<32x128xf32>
    %cst_15 = arith.constant 0.000000e+00 : f32
    %14 = vector.broadcast %cst_15 : f32 to vector<32x128xf32>
    %15 = arith.subf %14, %13 : vector<32x128xf32>
    %16 = math.exp %15 : vector<32x128xf32>
    %cst_16 = arith.constant 1.000000e+00 : f32
    %17 = vector.broadcast %cst_16 : f32 to vector<32x128xf32>
    %18 = arith.addf %17, %16 : vector<32x128xf32>
    %19 = tpu.reciprocal %18 {approx = true} : vector<32x128xf32> -> vector<32x128xf32>
    %20 = arith.mulf %13, %19 : vector<32x128xf32>
    %21 = arith.truncf %20 : vector<32x128xf32> to vector<32x128xbf16>
    %c0_17 = arith.constant 0 : index
    %c0_18 = arith.constant 0 : index
    %22 = vector.load %arg9[%c0_17, %c0_18] : memref<32x128xbf16, #tpu.memory_space<vmem>>, vector<32x128xbf16>
    tpu.vector_store %arg9[%c0_17, %c0_18], %21 {strides = array<i32>} : memref<32x128xbf16, #tpu.memory_space<vmem>>, vector<32x128xbf16>,
    return
  }
  func.func @transform_0(%arg0: i32, %arg1: i32) -> (i32, i32) {
    %c0_i32 = arith.constant 0 : i32
    %c0_i32_0 = arith.constant 0 : i32
    return %arg0, %c0_i32 : i32, i32
  }
  func.func @transform_1(%arg0: i32, %arg1: i32) -> (i32, i32) {
    %c0_i32 = arith.constant 0 : i32
    %c0_i32_0 = arith.constant 0 : i32
    return %arg0, %c0_i32 : i32, i32
  }
  func.func @transform_2(%arg0: i32, %arg1: i32) -> (i32, i32) {
    %c0_i32 = arith.constant 0 : i32
    %c0_i32_0 = arith.constant 0 : i32
    return %arg0, %c0_i32 : i32, i32
  }
  func.func @transform_3(%arg0: i32, %arg1: i32) -> (i32, i32) {
    %c0_i32 = arith.constant 0 : i32
    %c0_i32_0 = arith.constant 0 : i32
    return %c0_i32, %arg1 : i32, i32
  }
  func.func @transform_4(%arg0: i32, %arg1: i32) -> (i32, i32) {
    %c0_i32 = arith.constant 0 : i32
    %c0_i32_0 = arith.constant 0 : i32
    return %c0_i32, %arg1 : i32, i32
  }
  func.func @transform_5(%arg0: i32, %arg1: i32) -> (i32, i32) {
    %c0_i32 = arith.constant 0 : i32
    %c0_i32_0 = arith.constant 0 : i32
    return %c0_i32, %arg1 : i32, i32
  }
  func.func @transform_6(%arg0: i32, %arg1: i32) -> (i32, i32) {
    %c0_i32 = arith.constant 0 : i32
    %c0_i32_0 = arith.constant 0 : i32
    return %c0_i32, %arg1 : i32, i32
  }
  func.func @transform_7(%arg0: i32, %arg1: i32) -> (i32, i32) {
    %c0_i32 = arith.constant 0 : i32
    return %arg0, %arg1 : i32, i32
  }
}

</mosaic_0001>

<bundles_post_ra>
// kernel: neck_forward.21
= control target key start
LH: loop header
LB: loop body
LE: loop exit
PB: predicated region body
PF: predicated region fallthrough
CT: control target
= control target key end

     0   :  { %s1664_s4 = inlined_call_operand.vmem [shape: bf16[128,128], index: 4, kind: input, shape index: {}]   ;;  %s1665_s3 = inlined_call_operand.vmem [shape: bf16[128,128], index: 3, kind: input, shape index: {}]   ;;  %s1666_s1 = inlined_call_operand.vmem [shape: bf16[128,128], index: 1, kind: input, shape index: {}]   ;;  %s1667_s0 = inlined_call_operand.vmem [shape: bf16[128,128], index: 0, kind: input, shape index: {}]   ;;  %s1668_s5 = inlined_call_operand.vmem [shape: bf16[128,128], index: 5, kind: input, shape index: {}]   ;;  %s1669_s2 = inlined_call_operand.vmem [shape: bf16[128,128], index: 2, kind: input, shape index: {}]   ;;  %s1670_s6 = inlined_call_operand.vmem [shape: f32[1,128], index: 6, kind: input, shape index: {}]   ;;  %s1671_s7 = inlined_call_operand.vmem [shape: bf16[128,128], index: 7, kind: output, shape index: {}]  }
   0x1   :  { %v1241_v0 = vld [vmem:[%s1664_s4] sm:$0xff]   ;;  %v1243_v2 = vld [vmem:[%s1664_s4 + $0x8] sm:$0xff]   ;;  %v1245_v4 = vld [vmem:[%s1664_s4 + $0x10] sm:$0xff]  }
   0x2   :  { %v1242_v1 = vld [vmem:[%s1665_s3] sm:$0xff]   ;;  %1097 = vmatprep.subr.bf16.mxu1 %v1241_v0  ;;  %v1244_v3 = vld [vmem:[%s1665_s3 + $0x8] sm:$0xff]   ;;  %v1246_v5 = vld [vmem:[%s1665_s3 + $0x10] sm:$0xff]  }
   0x3   :  { %1129 = vmatprep.subr.bf16.mxu0 %v1242_v1  ;;  %1098 = vmatpush3.bf16.msra.mxu1 %v1241_v0  ;;  %v1247_v6 = vld [vmem:[%s1664_s4 + $0x18] sm:$0xff]   ;;  %v1249_v8 = vld [vmem:[%s1664_s4 + $0x20] sm:$0xff]   ;;  %v1251_v10 = vld [vmem:[%s1664_s4 + $0x28] sm:$0xff]  }
   0x4   :  { %1130 = vmatpush3.bf16.msra.mxu0 %v1242_v1  ;;  %1099 = vmatprep.subr.bf16.mxu1 %v1243_v2  ;;  %v1248_v7 = vld [vmem:[%s1665_s3 + $0x18] sm:$0xff]   ;;  %v1250_v9 = vld [vmem:[%s1665_s3 + $0x20] sm:$0xff]   ;;  %v1252_v11 = vld [vmem:[%s1665_s3 + $0x28] sm:$0xff]  }
   0x5   :  { %1131 = vmatprep.subr.bf16.mxu0 %v1244_v3  ;;  %v1257_v12 = vld [vmem:[%s1666_s1] sm:$0xff]   ;;  %v1253_v14 = vld [vmem:[%s1664_s4 + $0x30] sm:$0xff]   ;;  %v1255_v16 = vld [vmem:[%s1664_s4 + $0x38] sm:$0xff]  }
   0x6   :  { %v1258_v13 = vld [vmem:[%s1667_s0] sm:$0xff]   ;;  %1113 = vmatprep.mubr.bf16.mxu1 %v1257_v12  ;;  %v1254_v15 = vld [vmem:[%s1665_s3 + $0x30] sm:$0xff]   ;;  %v1256_v17 = vld [vmem:[%s1665_s3 + $0x38] sm:$0xff]  }
   0x7   :  { %1100 = vmatpush3.bf16.msra.mxu1 %v1243_v2  ;;  %1145 = vmatprep.mubr.bf16.mxu0 %v1258_v13  ;;  %v1261_v18 = vld [vmem:[%s1668_s5] sm:$0xff]   ;;  %v1259_v19 = vld [vmem:[%s1666_s1 + $0x8] sm:$0xff]   ;;  %v1263_v22 = vld [vmem:[%s1666_s1 + $0x10] sm:$0xff]  }
   0x8   :  { %1132 = vmatpush3.bf16.msra.mxu0 %v1244_v3  ;;  %1101 = vmatprep.subr.bf16.mxu1 %v1245_v4  ;;  %v1260_v20 = vld [vmem:[%s1667_s0 + $0x8] sm:$0xff]   ;;  %v1264_v23 = vld [vmem:[%s1667_s0 + $0x10] sm:$0xff]   ;;  %v1265_v25 = vld [vmem:[%s1666_s1 + $0x18] sm:$0xff]  }
   0x9   :  { %1133 = vmatprep.subr.bf16.mxu0 %v1246_v5  ;;  %v1262_v21 = vld [vmem:[%s1668_s5 + $0x8] sm:$0xff]   ;;  %v1267_v24 = vld [vmem:[%s1668_s5 + $0x10] sm:$0xff]   ;;  %v1266_v26 = vld [vmem:[%s1667_s0 + $0x18] sm:$0xff]  }
   0xa   :  { %v1268_v27 = vld [vmem:[%s1668_s5 + $0x18] sm:$0xff]   ;;  %v1269_v28 = vld [vmem:[%s1666_s1 + $0x20] sm:$0xff]   ;;  %v1271_v31 = vld [vmem:[%s1666_s1 + $0x28] sm:$0xff]  }
   0xb   :  { %1102 = vmatpush3.bf16.msra.mxu1 %v1245_v4  ;;  %v1270_v29 = vld [vmem:[%s1667_s0 + $0x20] sm:$0xff]   ;;  %v1272_v32 = vld [vmem:[%s1667_s0 + $0x28] sm:$0xff]   ;;  %v1275_v34 = vld [vmem:[%s1666_s1 + $0x30] sm:$0xff]  }
   0xc   :  { %1134 = vmatpush3.bf16.msra.mxu0 %v1246_v5  ;;  %1103 = vmatprep.subr.bf16.mxu1 %v1247_v6  ;;  %v1273_v30 = vld [vmem:[%s1668_s5 + $0x20] sm:$0xff]   ;;  %v1274_v33 = vld [vmem:[%s1668_s5 + $0x28] sm:$0xff]   ;;  %v1276_v35 = vld [vmem:[%s1667_s0 + $0x30] sm:$0xff]  }
   0xd   :  { %1135 = vmatprep.subr.bf16.mxu0 %v1248_v7  ;;  %v1279_v36 = vld [vmem:[%s1668_s5 + $0x30] sm:$0xff]   ;;  %v1277_v37 = vld [vmem:[%s1666_s1 + $0x38] sm:$0xff]   ;;  %v1281_v40 = vld [vmem:[%s1669_s2] sm:$0xff]  }
   0xe   :  { %v1278_v38 = vld [vmem:[%s1667_s0 + $0x38] sm:$0xff]   ;;  %v1282_v41 = vld [vmem:[%s1669_s2 + $0x20] sm:$0xff]   ;;  %v1284_v42 = vld [vmem:[%s1669_s2 + $0x28] sm:$0xff]  }
   0xf   :  { %1104 = vmatpush3.bf16.msra.mxu1 %v1247_v6  ;;  %v1280_v39 = vld [vmem:[%s1668_s5 + $0x38] sm:$0xff]   ;;  %v1283_v43 = vld [vmem:[%s1669_s2 + $0x8] sm:$0xff]   ;;  %v1286_v44 = vld [vmem:[%s1669_s2 + $0x30] sm:$0xff]  }
  0x10   :  { %1136 = vmatpush3.bf16.msra.mxu0 %v1248_v7  ;;  %1105 = vmatprep.subr.bf16.mxu1 %v1249_v8  ;;  %v1285_v45 = vld [vmem:[%s1669_s2 + $0x10] sm:$0xff]   ;;  %v1288_v46 = vld [vmem:[%s1669_s2 + $0x38] sm:$0xff]  }
  0x11   :  { %1137 = vmatprep.subr.bf16.mxu0 %v1250_v9  ;;  %v1287_v47 = vld [vmem:[%s1669_s2 + $0x18] sm:$0xff]  }
  0x13   :  { %1106 = vmatpush3.bf16.msra.mxu1 %v1249_v8 }
  0x14   :  { %1138 = vmatpush3.bf16.msra.mxu0 %v1250_v9  ;;  %1107 = vmatprep.subr.bf16.mxu1 %v1251_v10 }
  0x15   :  { %1139 = vmatprep.subr.bf16.mxu0 %v1252_v11 }
  0x17   :  { %1108 = vmatpush3.bf16.msra.mxu1 %v1251_v10 }
  0x18   :  { %1140 = vmatpush3.bf16.msra.mxu0 %v1252_v11  ;;  %1109 = vmatprep.subr.bf16.mxu1 %v1253_v14 }
  0x19   :  { %1141 = vmatprep.subr.bf16.mxu0 %v1254_v15 }
  0x1b   :  { %1110 = vmatpush3.bf16.msra.mxu1 %v1253_v14 }
  0x1c   :  { %1142 = vmatpush3.bf16.msra.mxu0 %v1254_v15  ;;  %1111 = vmatprep.subr.bf16.mxu1 %v1255_v16 }
  0x1d   :  { %1143 = vmatprep.subr.bf16.mxu0 %v1256_v17 }
  0x1f   :  { %1112 = vmatpush3.bf16.msra.mxu1 %v1255_v16  ;;  %v1552_v16 = vld [vmem:[%s1670_s6] ss:$0 sm:$0xff] }
  0x20   :  { %1144 = vmatpush3.bf16.msra.mxu0 %v1256_v17  ;;  %1193 = vmatprep.subr.bf16.mxu1 %v1261_v18 }
  0x21   :  { %1161 = vmatprep.subr.bf16.mxu0 %v1261_v18 }
  0x22   :  { %1114 = vmatmul.mubr.bf16.vlgmr.msra.gmra.mrb[0].mxu1 %v1259_v19 }
  0x23   :  { %1146 = vmatmul.mubr.bf16.vlgmr.msra.gmra.mrb[0].mxu0 %v1260_v20  ;;  %1201 = vmatpush3.bf16.msra.mxu1 %v1261_v18 }
  0x24   :  { %1162 = vmatpush3.bf16.msra.mxu0 %v1261_v18  ;;  %1194 = vmatprep.subr.bf16.mxu1 %v1262_v21 }
  0x25   :  { %1163 = vmatprep.subr.bf16.mxu0 %v1262_v21  ;;  %1117 = vmatprep.mubr.bf16.mxu1 %v1263_v22 }
  0x26   :  { %1149 = vmatprep.mubr.bf16.mxu0 %v1264_v23 }
  0x27   :  { %1202 = vmatpush3.bf16.msra.mxu1 %v1262_v21 }
  0x28   :  { %1164 = vmatpush3.bf16.msra.mxu0 %v1262_v21  ;;  %1195 = vmatprep.subr.bf16.mxu1 %v1267_v24 }
  0x29   :  { %1165 = vmatprep.subr.bf16.mxu0 %v1267_v24 }
  0x2a   :  { %1118 = vmatmul.mubr.bf16.gmra.mrb[4].mxu1 %v1265_v25 }
  0x2b   :  { %1150 = vmatmul.mubr.bf16.gmra.mrb[4].mxu0 %v1266_v26  ;;  %1203 = vmatpush3.bf16.msra.mxu1 %v1267_v24 }
  0x2c   :  { %1166 = vmatpush3.bf16.msra.mxu0 %v1267_v24  ;;  %1196 = vmatprep.subr.bf16.mxu1 %v1268_v27 }
  0x2d   :  { %1167 = vmatprep.subr.bf16.mxu0 %v1268_v27  ;;  %1121 = vmatprep.mubr.bf16.mxu1 %v1269_v28 }
  0x2e   :  { %1153 = vmatprep.mubr.bf16.mxu0 %v1270_v29 }
  0x2f   :  { %1204 = vmatpush3.bf16.msra.mxu1 %v1268_v27 }
  0x30   :  { %1168 = vmatpush3.bf16.msra.mxu0 %v1268_v27  ;;  %1197 = vmatprep.subr.bf16.mxu1 %v1273_v30 }
  0x31   :  { %1169 = vmatprep.subr.bf16.mxu0 %v1273_v30 }
  0x32   :  { %1122 = vmatmul.mubr.bf16.gmra.mrb[8].mxu1 %v1271_v31 }
  0x33   :  { %1154 = vmatmul.mubr.bf16.gmra.mrb[8].mxu0 %v1272_v32  ;;  %1205 = vmatpush3.bf16.msra.mxu1 %v1273_v30 }
  0x34   :  { %1170 = vmatpush3.bf16.msra.mxu0 %v1273_v30  ;;  %1198 = vmatprep.subr.bf16.mxu1 %v1274_v33 }
  0x35   :  { %1171 = vmatprep.subr.bf16.mxu0 %v1274_v33  ;;  %1125 = vmatprep.mubr.bf16.mxu1 %v1275_v34 }
  0x36   :  { %1157 = vmatprep.mubr.bf16.mxu0 %v1276_v35 }
  0x37   :  { %1206 = vmatpush3.bf16.msra.mxu1 %v1274_v33 }
  0x38   :  { %1172 = vmatpush3.bf16.msra.mxu0 %v1274_v33  ;;  %1199 = vmatprep.subr.bf16.mxu1 %v1279_v36 }
  0x39   :  { %1173 = vmatprep.subr.bf16.mxu0 %v1279_v36 }
  0x3a   :  { %1126 = vmatmul.mubr.bf16.gmra.mrb[12].mxu1 %v1277_v37 }
  0x3b   :  { %1158 = vmatmul.mubr.bf16.gmra.mrb[12].mxu0 %v1278_v38  ;;  %1207 = vmatpush3.bf16.msra.mxu1 %v1279_v36 }
  0x3c   :  { %1174 = vmatpush3.bf16.msra.mxu0 %v1279_v36  ;;  %1200 = vmatprep.subr.bf16.mxu1 %v1280_v39 }
  0x3d   :  { %1175 = vmatprep.subr.bf16.mxu0 %v1280_v39  ;;  %1177 = vmatprep.mubr.bf16.mxu0 %v1281_v40 }
  0x3e   :  { %1185 = vmatprep.mubr.bf16.mxu1 %v1282_v41 }
  0x3f   :  { %1208 = vmatpush3.bf16.msra.mxu1 %v1280_v39 }
  0x40   :  { %1176 = vmatpush3.bf16.msra.mxu0 %v1280_v39 }
  0x42   :  { %1186 = vmatmul.mubr.bf16.vlgmr.msra.gmra.mrb[16].mxu1 %v1284_v42 }
  0x43   :  { %1178 = vmatmul.mubr.bf16.vlgmr.msra.gmra.mrb[0].mxu0 %v1283_v43  ;;  %1189 = vmatprep.mubr.bf16.mxu1 %v1286_v44 }
  0x44   :  { %1181 = vmatprep.mubr.bf16.mxu0 %v1285_v45 }
  0x4a   :  { %1190 = vmatmul.mubr.bf16.gmra.mrb[20].mxu1 %v1288_v46 }
  0x4b   :  { %1182 = vmatmul.mubr.bf16.gmra.mrb[4].mxu0 %v1287_v47 }
  0xf5   :  { %v1115_v48 = vpop.f32.mrb[0].mxu1 }
  0xf6   :  { %v221_v49 = vpop.f32.mrb[1].mxu1 }
  0xf7   :  { %v1116_v50 = vpop.f32.mrb[2].mxu1 }
  0xf8   :  { %v224_v51 = vpop.f32.mrb[3].mxu1 }
  0xfd   :  { %v1537_v52 = vpop.f32.mrb[4].mxu1 }
  0xfe   :  { %v1539_v53 = vpop.f32.mrb[5].mxu1 }
  0xff   :  { %v1541_v54 = vpop.f32.mrb[6].mxu1 }
 0x100   :  { %v1543_v55 = vpop.f32.mrb[7].mxu1 }
 0x105   :  { %v1123_v56 = vpop.f32.mrb[8].mxu1 }
 0x106   :  { %v1155_v57 = vpop.f32.mrb[8].mxu0  ;;  %v253_v58 = vpop.f32.mrb[9].mxu1 }
 0x107   :  { %v455_v59 = vadd.f32 %v1155_v57, %v1123_v56  ;;  %v446_v60 = vpop.f32.mrb[9].mxu0  ;;  %v1124_v61 = vpop.f32.mrb[10].mxu1 }
 0x108   :  { %v447_v62 = vadd.f32 %v446_v60, %v253_v58  ;;  %v1156_v63 = vpop.f32.mrb[10].mxu0  ;;  %v256_v0 = vpop.f32.mrb[11].mxu1 }
 0x109   :  { %v458_v1 = vadd.f32 %v1156_v63, %v1124_v61  ;;  %v449_v2 = vpop.f32.mrb[11].mxu0 }
 0x10a   :  { %v450_v3 = vadd.f32 %v449_v2, %v256_v0 }
 0x10d   :  { %v1127_v4 = vpop.f32.mrb[12].mxu1 }
 0x10e   :  { %v1159_v5 = vpop.f32.mrb[12].mxu0  ;;  %v269_v6 = vpop.f32.mrb[13].mxu1 }
 0x10f   :  { %v471_v7 = vadd.f32 %v1159_v5, %v1127_v4  ;;  %v462_v8 = vpop.f32.mrb[13].mxu0  ;;  %v1128_v9 = vpop.f32.mrb[14].mxu1 }
 0x110   :  { %v463_v10 = vadd.f32 %v462_v8, %v269_v6  ;;  %v1160_v11 = vpop.f32.mrb[14].mxu0  ;;  %v272_v12 = vpop.f32.mrb[15].mxu1 }
 0x111   :  { %v1545_v13 = vadd.f32 %v1160_v11, %v1128_v9  ;;  %v465_v14 = vpop.f32.mrb[15].mxu0 }
 0x112   :  { %v1547_v15 = vadd.f32 %v465_v14, %v272_v12 }
 0x115   :  { %v1187_v17 = vpop.f32.mrb[16].mxu1 }
 0x116   :  { %v1179_v18 = vpop.f32.mrb[0].mxu0  ;;  %v712_v19 = vadd.f32 %v1187_v17, %v455_v59  ;;  %v671_v20 = vpop.f32.mrb[17].mxu1 }
 0x117   :  { %v1209_v21 = vadd.f32 %v1179_v18, %v1115_v48  ;;  %v639_v22 = vpop.f32.mrb[1].mxu0  ;;  %v710_v23 = vadd.f32 %v671_v20, %v447_v62  ;;  %v1188_v24 = vpop.f32.mrb[18].mxu1 }
 0x118   :  { %v1555_v25 = vadd.f32 %v1552_v16, %v712_v19  ;;  %v1210_v26 = vadd.f32 %v639_v22, %v221_v49  ;;  %v1180_v27 = vpop.f32.mrb[2].mxu0  ;;  %v713_v28 = vadd.f32 %v1188_v24, %v458_v1  ;;  %v674_v29 = vpop.f32.mrb[19].mxu1 }
 0x119   :  { %v1558_v30 = vadd.f32 %v1209_v21, %v1552_v16  ;;  %v1561_v31 = vadd.f32 %v1552_v16, %v710_v23  ;;  %v1211_v32 = vadd.f32 %v1180_v27, %v1116_v50  ;;  %v642_v33 = vpop.f32.mrb[3].mxu0  ;;  %v711_v34 = vadd.f32 %v674_v29, %v450_v3 }
 0x11a   :  { %v751_v35 = vsub.f32 0.0, %v1555_v25  ;;  %v1565_v36 = vadd.f32 %v1210_v26, %v1552_v16  ;;  %v1568_v37 = vadd.f32 %v1552_v16, %v713_v28  ;;  %v1212_v38 = vadd.f32 %v642_v33, %v224_v51 }
 0x11b   :  { %v743_v39 = vsub.f32 0.0, %v1558_v30  ;;  %v749_v40 = vsub.f32 0.0, %v1561_v31  ;;  %v1573_v41 = vadd.f32 %v1211_v32, %v1552_v16  ;;  %v1576_v42 = vadd.f32 %v1552_v16, %v711_v34 }
 0x11c   :  { %v777_v43 = vmul.f32 1.442695, %v751_v35  ;;  %v741_v44 = vsub.f32 0.0, %v1565_v36  ;;  %v752_v45 = vsub.f32 0.0, %v1568_v37  ;;  %v1581_v46 = vadd.f32 %v1212_v38, %v1552_v16 }
 0x11d   :  { %v761_v47 = vmul.f32 1.442695, %v743_v39  ;;  %v773_v48 = vmul.f32 1.442695, %v749_v40  ;;  %v744_v49 = vsub.f32 0.0, %v1573_v41  ;;  %v750_v50 = vsub.f32 0.0, %v1576_v42 }
 0x11e   :  { %1289 = vpow2.f32 %v777_v43  ;;  %v757_v51 = vmul.f32 1.442695, %v741_v44  ;;  %v779_v56 = vmul.f32 1.442695, %v752_v45  ;;  %v742_v57 = vsub.f32 0.0, %v1581_v46  ;;  %v1183_v58 = vpop.f32.mrb[4].mxu0 }
 0x11f   :  { %1291 = vpow2.f32 %v761_v47  ;;  %v763_v59 = vmul.f32 1.442695, %v744_v49  ;;  %v775_v60 = vmul.f32 1.442695, %v750_v50  ;;  %v1213_v61 = vadd.f32 %v1183_v58, %v1537_v52  ;;  %v1191_v62 = vpop.f32.mrb[20].mxu1  ;;  %v655_v63 = vpop.f32.mrb[5].mxu0 }
 0x120   :  { %1293 = vpow2.f32 %v757_v51  ;;  %v759_v0 = vmul.f32 1.442695, %v742_v57  ;;  %v716_v1 = vadd.f32 %v1191_v62, %v471_v7  ;;  %v1214_v2 = vadd.f32 %v655_v63, %v1539_v53  ;;  %v687_v3 = vpop.f32.mrb[21].mxu1  ;;  %v1184_v4 = vpop.f32.mrb[6].mxu0 }
 0x121   :  { %1295 = vpow2.f32 %v773_v48  ;;  %v1589_v5 = vadd.f32 %v1213_v61, %v1552_v16  ;;  %v714_v6 = vadd.f32 %v687_v3, %v463_v10  ;;  %v1215_v8 = vadd.f32 %v1184_v4, %v1541_v54  ;;  %v1192_v9 = vpop.f32.mrb[22].mxu1  ;;  %v658_v11 = vpop.f32.mrb[7].mxu0 }
 0x122   :  { %1297 = vpow2.f32 %v763_v59  ;;  %v1593_v52 = vadd.f32 %v1552_v16, %v716_v1  ;;  %v1596_v12 = vadd.f32 %v1214_v2, %v1552_v16  ;;  %v717_v53 = vadd.f32 %v1192_v9, %v1545_v13  ;;  %v690_v7 = vpop.f32.mrb[23].mxu1 }
 0x123   :  { %1299 = vpow2.f32 %v779_v56  ;;  %v747_v14 = vsub.f32 0.0, %v1589_v5  ;;  %v1601_v17 = vadd.f32 %v1552_v16, %v714_v6  ;;  %v1216_v13 = vadd.f32 %v658_v11, %v1543_v55 }
 0x124   :  { %1301 = vpow2.f32 %v759_v0  ;;  %v755_v54 = vsub.f32 0.0, %v1593_v52  ;;  %v745_v10 = vsub.f32 0.0, %v1596_v12  ;;  %v1608_v23 = vadd.f32 %v1215_v8, %v1552_v16 }
 0x125   :  { %1303 = vpow2.f32 %v775_v60  ;;  %v769_v18 = vmul.f32 1.442695, %v747_v14  ;;  %v753_v19 = vsub.f32 0.0, %v1601_v17  ;;  %v715_v24 = vadd.f32 %v690_v7, %v1547_v15 }
 0x126   :  { %v785_v20 = vmul.f32 1.442695, %v755_v54  ;;  %v765_v21 = vmul.f32 1.442695, %v745_v10  ;;  %v748_v55 = vsub.f32 0.0, %v1608_v23  ;;  %v1613_v39 = vadd.f32 %v1552_v16, %v717_v53 }
 0x127   :  { %1305 = vpow2.f32 %v769_v18  ;;  %v781_v22 = vmul.f32 1.442695, %v753_v19  ;;  %v1616_v43 = vadd.f32 %v1216_v13, %v1552_v16  ;;  %v1619_v47 = vadd.f32 %v1552_v16, %v715_v24 }
 0x128   :  { %v1290_v26 = vpop.eup %1289  ;;  %1307 = vpow2.f32 %v785_v20  ;;  %v771_v50 = vmul.f32 1.442695, %v748_v55  ;;  %v756_v56 = vsub.f32 0.0, %v1613_v39 }
 0x129   :  { %v1292_v27 = vpop.eup %1291  ;;  %v799_v28 = vadd.f32 1.0, %v1290_v26  ;;  %1309 = vpow2.f32 %v765_v21  ;;  %v746_v58 = vsub.f32 0.0, %v1616_v43  ;;  %v754_v60 = vsub.f32 0.0, %v1619_v47 }
 0x12a   :  { %v1294_v29 = vpop.eup %1293  ;;  %v791_v32 = vadd.f32 1.0, %v1292_v27  ;;  %1311 = vpow2.f32 %v781_v22  ;;  %v787_v62 = vmul.f32 1.442695, %v756_v56 }
 0x12b   :  { %v1296_v33 = vpop.eup %1295  ;;  %1313 = vrcp.f32 %v799_v28  ;;  %v789_v34 = vadd.f32 1.0, %v1294_v29  ;;  %v767_v0 = vmul.f32 1.442695, %v746_v58  ;;  %v783_v2 = vmul.f32 1.442695, %v754_v60 }
 0x12c   :  { %v1298_v35 = vpop.eup %1297  ;;  %1315 = vrcp.f32 %v791_v32  ;;  %v797_v38 = vadd.f32 1.0, %v1296_v33 }
 0x12d   :  { %v1300_v15 = vpop.eup %1299  ;;  %1317 = vrcp.f32 %v789_v34  ;;  %v792_v40 = vadd.f32 1.0, %v1298_v35 }
 0x12e   :  { %v1302_v44 = vpop.eup %1301  ;;  %1319 = vrcp.f32 %v797_v38  ;;  %v800_v45 = vadd.f32 1.0, %v1300_v15 }
 0x12f   :  { %v1304_v48 = vpop.eup %1303  ;;  %1321 = vrcp.f32 %v792_v40  ;;  %v790_v49 = vadd.f32 1.0, %v1302_v44 }
 0x130   :  { %1323 = vrcp.f32 %v800_v45  ;;  %v798_v51 = vadd.f32 1.0, %v1304_v48 }
 0x131   :  { %v1306_v57 = vpop.eup %1305  ;;  %1325 = vrcp.f32 %v790_v49 }
 0x132   :  { %v1308_v59 = vpop.eup %1307  ;;  %1327 = vrcp.f32 %v798_v51  ;;  %v795_v53 = vadd.f32 1.0, %v1306_v57 }
 0x133   :  { %v1310_v61 = vpop.eup %1309  ;;  %1329 = vpow2.f32 %v771_v50 }
 0x134   :  { %v1312_v16 = vpop.eup %1311  ;;  %1331 = vpow2.f32 %v787_v62 }
 0x135   :  { %v1314_v63 = vpop.eup %1313  ;;  %1333 = vpow2.f32 %v767_v0 }
 0x136   :  { %v1316_v1 = vpop.eup %1315  ;;  %1335 = vpow2.f32 %v783_v2  ;;  %v831_v14 = vmul.f32 %v1314_v63, %v1555_v25  ;;  %v803_v25 = vadd.f32 1.0, %v1308_v59 }
 0x137   :  { %v1318_v3 = vpop.eup %1317  ;;  %v823_v9 = vmul.f32 %v1316_v1, %v1558_v30  ;;  %1337 = vrcp.f32 %v795_v53 }
 0x138   :  { %v1320_v4 = vpop.eup %1319  ;;  %v821_v18 = vmul.f32 %v1318_v3, %v1565_v36 }
 0x139   :  { %v1322_v6 = vpop.eup %1321  ;;  %v829_v13 = vmul.f32 %v1320_v4, %v1561_v31  ;;  %v801_v31 = vadd.f32 1.0, %v1312_v16 }
 0x13a   :  { %v1324_v8 = vpop.eup %1323  ;;  %v824_v11 = vmul.f32 %v1322_v6, %v1573_v41 }
 0x13b   :  { %v1326_v7 = vpop.eup %1325  ;;  %v832_v54 = vmul.f32 %v1324_v8, %v1568_v37 }
 0x13c   :  { %v1328_v10 = vpop.eup %1327  ;;  %v1010_v19 = vpack.c.bf16 %v824_v11, %v823_v9  ;;  %v822_v20 = vmul.f32 %v1326_v7, %v1581_v46  ;;  %v793_v46 = vadd.f32 1.0, %v1310_v61 }
 0x13d   :  { %v1330_v21 = vpop.eup %1329  ;;  %v1030_v22 = vpack.c.bf16 %v832_v54, %v831_v14  ;;  %v830_v30 = vmul.f32 %v1328_v10, %v1576_v42 }
 0x13e   :  { %1042 = vst [vmem:[%s1671_s7 + $0x8] sm:$0xff] %v1010_v19   ;;  %v1005_v41 = vpack.c.bf16 %v822_v20, %v821_v18  ;;  %v796_v37 = vadd.f32 1.0, %v1330_v21  ;;  %v1332_v42 = vpop.eup %1331 }
 0x13f   :  { %1046 = vst [vmem:[%s1671_s7 + $0x28] sm:$0xff] %v1030_v22   ;;  %v1025_v36 = vpack.c.bf16 %v830_v30, %v829_v13  ;;  %v1334_v24 = vpop.eup %1333  ;;  %v804_v26 = vadd.f32 1.0, %v1332_v42 }
 0x140   :  { %1006 = vst [vmem:[%s1671_s7] sm:$0xff] %v1005_v41   ;;  %1339 = vrcp.f32 %v796_v37  ;;  %v1336_v27 = vpop.eup %1335  ;;  %v794_v28 = vadd.f32 1.0, %v1334_v24 }
 0x141   :  { %1045 = vst [vmem:[%s1671_s7 + $0x20] sm:$0xff] %v1025_v36   ;;  %1341 = vrcp.f32 %v803_v25  ;;  %v802_v29 = vadd.f32 1.0, %v1336_v27  ;;  %v1338_v32 = vpop.eup %1337 }
 0x142   :  { %1343 = vrcp.f32 %v793_v46  ;;  %v827_v34 = vmul.f32 %v1338_v32, %v1589_v5 }
 0x143   :  { %1345 = vrcp.f32 %v801_v31 }
 0x144   :  { %1347 = vrcp.f32 %v804_v26 }
 0x145   :  { %1349 = vrcp.f32 %v794_v28 }
 0x146   :  { %1351 = vrcp.f32 %v802_v29 }
 0x14a   :  { %v1340_v33 = vpop.eup %1339 }
 0x14b   :  { %v828_v55 = vmul.f32 %v1340_v33, %v1608_v23  ;;  %v1342_v35 = vpop.eup %1341 }
 0x14c   :  { %v1344_v38 = vpop.eup %1343  ;;  %v835_v48 = vmul.f32 %v1342_v35, %v1593_v52 }
 0x14d   :  { %v1020_v15 = vpack.c.bf16 %v828_v55, %v827_v34  ;;  %v1346_v40 = vpop.eup %1345  ;;  %v825_v51 = vmul.f32 %v1344_v38, %v1596_v12 }
 0x14e   :  { %v1348_v44 = vpop.eup %1347  ;;  %v833_v23 = vmul.f32 %v1346_v40, %v1601_v17 }
 0x14f   :  { %1044 = vst [vmem:[%s1671_s7 + $0x18] sm:$0xff] %v1020_v15   ;;  %v1350_v45 = vpop.eup %1349  ;;  %v836_v49 = vmul.f32 %v1348_v44, %v1613_v39 }
 0x150   :  { %v1352_v50 = vpop.eup %1351  ;;  %v826_v5 = vmul.f32 %v1350_v45, %v1616_v43 }
 0x151   :  { %v1040_v56 = vpack.c.bf16 %v836_v49, %v835_v48  ;;  %v834_v57 = vmul.f32 %v1352_v50, %v1619_v47 }
 0x152   :  { %v1015_v58 = vpack.c.bf16 %v826_v5, %v825_v51 }
 0x153   :  { %1048 = vst [vmem:[%s1671_s7 + $0x38] sm:$0xff] %v1040_v56   ;;  %v1035_v59 = vpack.c.bf16 %v834_v57, %v833_v23 }
 0x154   :  { %1043 = vst [vmem:[%s1671_s7 + $0x10] sm:$0xff] %v1015_v58  }
 0x155   :  { %1047 = vst [vmem:[%s1671_s7 + $0x30] sm:$0xff] %v1035_v59  }

// kernel: neck_forward.18
= control target key start
LH: loop header
LB: loop body
LE: loop exit
PB: predicated region body
PF: predicated region fallthrough
CT: control target
= control target key end

     0   :  { %v1224_v1 = vmov 0   ;;  %v569_v49 = vlaneseq  ;;  %s1630_s3 = inlined_call_operand.vmem [shape: bf16[128,256], index: 3, kind: input, shape index: {}]   ;;  %s1631_s2 = inlined_call_operand.vmem [shape: bf16[128,256], index: 2, kind: input, shape index: {}]   ;;  %s1632_s1 = inlined_call_operand.vmem [shape: bf16[128,128], index: 1, kind: input, shape index: {}]   ;;  %s1633_s0 = inlined_call_operand.vmem [shape: bf16[128,128], index: 0, kind: input, shape index: {}]   ;;  %s1634_s4 = inlined_call_operand.vmem [shape: f32[1,256], index: 4, kind: input, shape index: {}]   ;;  %s1635_s5 = inlined_call_operand.vmem [shape: bf16[128,256], index: 5, kind: output, shape index: {}]  }
   0x1   :  { %v1032_v0 = vld [vmem:[%s1630_s3 + $0x4] ss:$8 sps:$4 sm:$0xff]   ;;  %245 = vmatprep.mubr.bf16.mxu1 %v1224_v1  ;;  %486 = vmatprep.mubr.bf16.mxu0 %v1224_v1  ;;  %v1036_v3 = vld [vmem:[%s1630_s3] ss:$8 sps:$4 sm:$0xff]   ;;  %v1038_v5 = vld [vmem:[%s1630_s3 + $0x14] ss:$8 sps:$4 sm:$0xff]  }
   0x2   :  { %v1034_v2 = vld [vmem:[%s1631_s2 + $0x4] ss:$8 sps:$4 sm:$0xff]   ;;  %213 = vmatprep.subr.bf16.mxu1 %v1032_v0  ;;  %v1037_v4 = vld [vmem:[%s1631_s2] ss:$8 sps:$4 sm:$0xff]   ;;  %v1040_v6 = vld [vmem:[%s1631_s2 + $0x14] ss:$8 sps:$4 sm:$0xff]  }
   0x3   :  { %454 = vmatprep.subr.bf16.mxu0 %v1034_v2  ;;  %214 = vmatpush1.bf16.msra.mxu1 %v1036_v3  ;;  %v1042_v7 = vld [vmem:[%s1630_s3 + $0x10] ss:$8 sps:$4 sm:$0xff]   ;;  %v1044_v9 = vld [vmem:[%s1630_s3 + $0x24] ss:$8 sps:$4 sm:$0xff]   ;;  %v1048_v11 = vld [vmem:[%s1630_s3 + $0x20] ss:$8 sps:$4 sm:$0xff]  }
   0x4   :  { %455 = vmatpush1.bf16.msra.mxu0 %v1037_v4  ;;  %215 = vmatprep.subr.bf16.mxu1 %v1038_v5  ;;  %v1043_v8 = vld [vmem:[%s1631_s2 + $0x10] ss:$8 sps:$4 sm:$0xff]   ;;  %v1046_v10 = vld [vmem:[%s1631_s2 + $0x24] ss:$8 sps:$4 sm:$0xff]   ;;  %v1049_v12 = vld [vmem:[%s1631_s2 + $0x20] ss:$8 sps:$4 sm:$0xff]  }
   0x5   :  { %456 = vmatprep.subr.bf16.mxu0 %v1040_v6  ;;  %v1050_v13 = vld [vmem:[%s1630_s3 + $0x34] ss:$8 sps:$4 sm:$0xff]   ;;  %v1054_v15 = vld [vmem:[%s1630_s3 + $0x30] ss:$8 sps:$4 sm:$0xff]   ;;  %v1056_v17 = vld [vmem:[%s1630_s3 + $0x44] ss:$8 sps:$4 sm:$0xff]  }
   0x6   :  { %v1052_v14 = vld [vmem:[%s1631_s2 + $0x34] ss:$8 sps:$4 sm:$0xff]   ;;  %v1055_v16 = vld [vmem:[%s1631_s2 + $0x30] ss:$8 sps:$4 sm:$0xff]   ;;  %v1058_v18 = vld [vmem:[%s1631_s2 + $0x44] ss:$8 sps:$4 sm:$0xff]  }
   0x7   :  { %216 = vmatpush1.bf16.msra.mxu1 %v1042_v7  ;;  %v1060_v19 = vld [vmem:[%s1630_s3 + $0x40] ss:$8 sps:$4 sm:$0xff]   ;;  %v1062_v21 = vld [vmem:[%s1630_s3 + $0x54] ss:$8 sps:$4 sm:$0xff]   ;;  %v1066_v23 = vld [vmem:[%s1630_s3 + $0x50] ss:$8 sps:$4 sm:$0xff]  }
   0x8   :  { %457 = vmatpush1.bf16.msra.mxu0 %v1043_v8  ;;  %217 = vmatprep.subr.bf16.mxu1 %v1044_v9  ;;  %v1061_v20 = vld [vmem:[%s1631_s2 + $0x40] ss:$8 sps:$4 sm:$0xff]   ;;  %v1064_v22 = vld [vmem:[%s1631_s2 + $0x54] ss:$8 sps:$4 sm:$0xff]   ;;  %v1067_v24 = vld [vmem:[%s1631_s2 + $0x50] ss:$8 sps:$4 sm:$0xff]  }
   0x9   :  { %458 = vmatprep.subr.bf16.mxu0 %v1046_v10  ;;  %v1068_v25 = vld [vmem:[%s1630_s3 + $0x64] ss:$8 sps:$4 sm:$0xff]   ;;  %v1072_v27 = vld [vmem:[%s1630_s3 + $0x60] ss:$8 sps:$4 sm:$0xff]   ;;  %v1074_v29 = vld [vmem:[%s1630_s3 + $0x74] ss:$8 sps:$4 sm:$0xff]  }
   0xa   :  { %v1070_v26 = vld [vmem:[%s1631_s2 + $0x64] ss:$8 sps:$4 sm:$0xff]   ;;  %v1073_v28 = vld [vmem:[%s1631_s2 + $0x60] ss:$8 sps:$4 sm:$0xff]   ;;  %v1076_v30 = vld [vmem:[%s1631_s2 + $0x74] ss:$8 sps:$4 sm:$0xff]  }
   0xb   :  { %218 = vmatpush1.bf16.msra.mxu1 %v1048_v11  ;;  %v1078_v31 = vld [vmem:[%s1630_s3 + $0x70] ss:$8 sps:$4 sm:$0xff]   ;;  %v1080_v33 = vld [vmem:[%s1632_s1] sm:$0xff]   ;;  %v1082_v35 = vld [vmem:[%s1632_s1 + $0x8] sm:$0xff]   ;;  %v570_v50 = vshrl.u32 %v569_v49, 7 }
   0xc   :  { %459 = vmatpush1.bf16.msra.mxu0 %v1049_v12  ;;  %219 = vmatprep.subr.bf16.mxu1 %v1050_v13  ;;  %v1079_v32 = vld [vmem:[%s1631_s2 + $0x70] ss:$8 sps:$4 sm:$0xff]   ;;  %v1081_v34 = vld [vmem:[%s1633_s0] sm:$0xff]   ;;  %v1083_v36 = vld [vmem:[%s1633_s0 + $0x8] sm:$0xff]  }
   0xd   :  { %460 = vmatprep.subr.bf16.mxu0 %v1052_v14  ;;  %v1084_v37 = vld [vmem:[%s1632_s1 + $0x10] sm:$0xff]   ;;  %v1086_v39 = vld [vmem:[%s1632_s1 + $0x18] sm:$0xff]   ;;  %v1088_v41 = vld [vmem:[%s1632_s1 + $0x20] sm:$0xff]   ;;  %v571_v51 = vsub.s32 0, %v570_v50  ;;  %v575_v53 = vsub.s32 1, %v570_v50 }
   0xe   :  { %v1085_v38 = vld [vmem:[%s1633_s0 + $0x10] sm:$0xff]   ;;  %v1087_v40 = vld [vmem:[%s1633_s0 + $0x18] sm:$0xff]   ;;  %v1089_v42 = vld [vmem:[%s1633_s0 + $0x20] sm:$0xff]  }
   0xf   :  { %220 = vmatpush1.bf16.msra.mxu1 %v1054_v15  ;;  %v1090_v43 = vld [vmem:[%s1632_s1 + $0x28] sm:$0xff]   ;;  %v1092_v45 = vld [vmem:[%s1632_s1 + $0x30] sm:$0xff]   ;;  %v1094_v47 = vld [vmem:[%s1632_s1 + $0x38] sm:$0xff]  }
  0x10   :  { %461 = vmatpush1.bf16.msra.mxu0 %v1055_v16  ;;  %221 = vmatprep.subr.bf16.mxu1 %v1056_v17  ;;  %v1091_v44 = vld [vmem:[%s1633_s0 + $0x28] sm:$0xff]   ;;  %v1093_v46 = vld [vmem:[%s1633_s0 + $0x30] sm:$0xff]   ;;  %v1095_v48 = vld [vmem:[%s1633_s0 + $0x38] sm:$0xff]  }
  0x11   :  { %462 = vmatprep.subr.bf16.mxu0 %v1058_v18  ;;  %v567_v52 = vld [vmem:[%s1634_s4] sm:$0x3] }
  0x12   :  { %v1418_v54 = vrot.slane %v567_v52, %v571_v51  ;;  %v1420_v57 = vrot.slane %v567_v52, %v575_v53 }
  0x13   :  { %222 = vmatpush1.bf16.msra.mxu1 %v1060_v19 }
  0x14   :  { %463 = vmatpush1.bf16.msra.mxu0 %v1061_v20  ;;  %223 = vmatprep.subr.bf16.mxu1 %v1062_v21 }
  0x15   :  { %464 = vmatprep.subr.bf16.mxu0 %v1064_v22 }
  0x17   :  { %224 = vmatpush1.bf16.msra.mxu1 %v1066_v23 }
  0x18   :  { %465 = vmatpush1.bf16.msra.mxu0 %v1067_v24  ;;  %225 = vmatprep.subr.bf16.mxu1 %v1068_v25 }
  0x19   :  { %466 = vmatprep.subr.bf16.mxu0 %v1070_v26 }
  0x1b   :  { %226 = vmatpush1.bf16.msra.mxu1 %v1072_v27 }
  0x1c   :  { %467 = vmatpush1.bf16.msra.mxu0 %v1073_v28  ;;  %227 = vmatprep.subr.bf16.mxu1 %v1074_v29 }
  0x1d   :  { %468 = vmatprep.subr.bf16.mxu0 %v1076_v30 }
  0x1f   :  { %228 = vmatpush1.bf16.msra.mxu1 %v1078_v31 }
  0x20   :  { %469 = vmatpush1.bf16.msra.mxu0 %v1079_v32 }
  0x22   :  { %246 = vmatmul.mubr.bf16.vlgmr.msra.gmra.mrb[0].mxu1 %v1080_v33 }
  0x23   :  { %487 = vmatmul.mubr.bf16.vlgmr.msra.gmra.mrb[0].mxu0 %v1081_v34  ;;  %255 = vmatprep.mubr.bf16.mxu1 %v1224_v1 }
  0x24   :  { %496 = vmatprep.mubr.bf16.mxu0 %v1224_v1 }
  0x2a   :  { %256 = vmatmul.mubr.bf16.gmra.mrb[4].mxu1 %v1082_v35 }
  0x2b   :  { %497 = vmatmul.mubr.bf16.gmra.mrb[4].mxu0 %v1083_v36  ;;  %265 = vmatprep.mubr.bf16.mxu1 %v1224_v1 }
  0x2c   :  { %506 = vmatprep.mubr.bf16.mxu0 %v1224_v1 }
  0x32   :  { %266 = vmatmul.mubr.bf16.gmra.mrb[8].mxu1 %v1084_v37 }
  0x33   :  { %507 = vmatmul.mubr.bf16.gmra.mrb[8].mxu0 %v1085_v38  ;;  %275 = vmatprep.mubr.bf16.mxu1 %v1224_v1 }
  0x34   :  { %516 = vmatprep.mubr.bf16.mxu0 %v1224_v1 }
  0x3a   :  { %276 = vmatmul.mubr.bf16.gmra.mrb[12].mxu1 %v1086_v39 }
  0x3b   :  { %517 = vmatmul.mubr.bf16.gmra.mrb[12].mxu0 %v1087_v40  ;;  %285 = vmatprep.mubr.bf16.mxu1 %v1224_v1 }
  0x3c   :  { %526 = vmatprep.mubr.bf16.mxu0 %v1224_v1 }
  0x42   :  { %286 = vmatmul.mubr.bf16.gmra.mrb[16].mxu1 %v1088_v41 }
  0x43   :  { %527 = vmatmul.mubr.bf16.gmra.mrb[16].mxu0 %v1089_v42  ;;  %295 = vmatprep.mubr.bf16.mxu1 %v1224_v1 }
  0x44   :  { %536 = vmatprep.mubr.bf16.mxu0 %v1224_v1 }
  0x4a   :  { %296 = vmatmul.mubr.bf16.gmra.mrb[20].mxu1 %v1090_v43 }
  0x4b   :  { %537 = vmatmul.mubr.bf16.gmra.mrb[20].mxu0 %v1091_v44  ;;  %305 = vmatprep.mubr.bf16.mxu1 %v1224_v1 }
  0x4c   :  { %546 = vmatprep.mubr.bf16.mxu0 %v1224_v1 }
  0x52   :  { %306 = vmatmul.mubr.bf16.gmra.mrb[24].mxu1 %v1092_v45 }
  0x53   :  { %547 = vmatmul.mubr.bf16.gmra.mrb[24].mxu0 %v1093_v46  ;;  %315 = vmatprep.mubr.bf16.mxu1 %v1224_v1 }
  0x54   :  { %556 = vmatprep.mubr.bf16.mxu0 %v1224_v1 }
  0x5a   :  { %316 = vmatmul.mubr.bf16.gmra.mrb[28].mxu1 %v1094_v47 }
  0x5b   :  { %557 = vmatmul.mubr.bf16.gmra.mrb[28].mxu0 %v1095_v48 }
  0xf5   :  { %v247_v55 = vpop.f32.mrb[0].mxu1 }
  0xf6   :  { %v488_v56 = vpop.f32.mrb[0].mxu0  ;;  %v249_v59 = vpop.f32.mrb[1].mxu1 }
  0xf7   :  { %v489_v58 = vadd.f32 %v488_v56, %v247_v55  ;;  %v490_v60 = vpop.f32.mrb[1].mxu0  ;;  %v251_v62 = vpop.f32.mrb[2].mxu1 }
  0xf8   :  { %v491_v61 = vadd.f32 %v490_v60, %v249_v59  ;;  %v492_v63 = vpop.f32.mrb[2].mxu0  ;;  %v253_v2 = vpop.f32.mrb[3].mxu1 }
  0xf9   :  { %v1423_v0 = vadd.f32 %v1418_v54, %v489_v58  ;;  %v493_v1 = vadd.f32 %v492_v63, %v251_v62  ;;  %v494_v3 = vpop.f32.mrb[3].mxu0 }
  0xfa   :  { %v1426_v4 = vadd.f32 %v1420_v57, %v491_v61  ;;  %v495_v5 = vadd.f32 %v494_v3, %v253_v2 }
  0xfb   :  { %v611_v6 = vsub.f32 0.0, %v1423_v0  ;;  %v1430_v7 = vadd.f32 %v1418_v54, %v493_v1 }
  0xfc   :  { %v612_v8 = vsub.f32 0.0, %v1426_v4  ;;  %v1434_v9 = vadd.f32 %v1420_v57, %v495_v5 }
  0xfd   :  { %v643_v10 = vmul.f32 1.442695, %v611_v6  ;;  %v613_v11 = vsub.f32 0.0, %v1430_v7  ;;  %v257_v14 = vpop.f32.mrb[4].mxu1 }
  0xfe   :  { %v645_v12 = vmul.f32 1.442695, %v612_v8  ;;  %v614_v13 = vsub.f32 0.0, %v1434_v9  ;;  %v498_v15 = vpop.f32.mrb[4].mxu0  ;;  %v259_v18 = vpop.f32.mrb[5].mxu1 }
  0xff   :  { %1096 = vpow2.f32 %v643_v10  ;;  %v647_v16 = vmul.f32 1.442695, %v613_v11  ;;  %v499_v17 = vadd.f32 %v498_v15, %v257_v14  ;;  %v500_v19 = vpop.f32.mrb[5].mxu0  ;;  %v261_v22 = vpop.f32.mrb[6].mxu1 }
 0x100   :  { %1098 = vpow2.f32 %v645_v12  ;;  %v649_v20 = vmul.f32 1.442695, %v614_v13  ;;  %v501_v21 = vadd.f32 %v500_v19, %v259_v18  ;;  %v502_v23 = vpop.f32.mrb[6].mxu0  ;;  %v263_v26 = vpop.f32.mrb[7].mxu1 }
 0x101   :  { %1100 = vpow2.f32 %v647_v16  ;;  %v1439_v24 = vadd.f32 %v1418_v54, %v499_v17  ;;  %v503_v25 = vadd.f32 %v502_v23, %v261_v22  ;;  %v504_v27 = vpop.f32.mrb[7].mxu0 }
 0x102   :  { %1102 = vpow2.f32 %v649_v20  ;;  %v1442_v28 = vadd.f32 %v1420_v57, %v501_v21  ;;  %v505_v29 = vadd.f32 %v504_v27, %v263_v26 }
 0x103   :  { %v615_v30 = vsub.f32 0.0, %v1439_v24  ;;  %v1446_v31 = vadd.f32 %v1418_v54, %v503_v25 }
 0x104   :  { %v616_v32 = vsub.f32 0.0, %v1442_v28  ;;  %v1450_v33 = vadd.f32 %v1420_v57, %v505_v29 }
 0x105   :  { %v651_v34 = vmul.f32 1.442695, %v615_v30  ;;  %v617_v35 = vsub.f32 0.0, %v1446_v31  ;;  %v267_v38 = vpop.f32.mrb[8].mxu1 }
 0x106   :  { %v653_v36 = vmul.f32 1.442695, %v616_v32  ;;  %v618_v37 = vsub.f32 0.0, %v1450_v33  ;;  %v508_v39 = vpop.f32.mrb[8].mxu0  ;;  %v269_v42 = vpop.f32.mrb[9].mxu1 }
 0x107   :  { %1104 = vpow2.f32 %v651_v34  ;;  %v655_v40 = vmul.f32 1.442695, %v617_v35  ;;  %v509_v41 = vadd.f32 %v508_v39, %v267_v38  ;;  %v510_v43 = vpop.f32.mrb[9].mxu0  ;;  %v271_v46 = vpop.f32.mrb[10].mxu1 }
 0x108   :  { %1106 = vpow2.f32 %v653_v36  ;;  %v657_v44 = vmul.f32 1.442695, %v618_v37  ;;  %v511_v45 = vadd.f32 %v510_v43, %v269_v42  ;;  %v512_v47 = vpop.f32.mrb[10].mxu0  ;;  %v273_v51 = vpop.f32.mrb[11].mxu1 }
 0x109   :  { %v1097_v48 = vpop.eup %1096  ;;  %1108 = vpow2.f32 %v655_v40  ;;  %v1455_v49 = vadd.f32 %v1418_v54, %v509_v41  ;;  %v513_v50 = vadd.f32 %v512_v47, %v271_v46  ;;  %v514_v52 = vpop.f32.mrb[11].mxu0 }
 0x10a   :  { %v1099_v53 = vpop.eup %1098  ;;  %v707_v55 = vadd.f32 1.0, %v1097_v48  ;;  %1110 = vpow2.f32 %v657_v44  ;;  %v1458_v56 = vadd.f32 %v1420_v57, %v511_v45  ;;  %v515_v58 = vadd.f32 %v514_v52, %v273_v51 }
 0x10b   :  { %v1101_v59 = vpop.eup %1100  ;;  %v708_v60 = vadd.f32 1.0, %v1099_v53  ;;  %v619_v61 = vsub.f32 0.0, %v1455_v49  ;;  %v1462_v62 = vadd.f32 %v1418_v54, %v513_v50 }
 0x10c   :  { %v1103_v63 = vpop.eup %1102  ;;  %1112 = vrcp.f32 %v707_v55  ;;  %v709_v1 = vadd.f32 1.0, %v1101_v59  ;;  %v620_v2 = vsub.f32 0.0, %v1458_v56  ;;  %v1466_v3 = vadd.f32 %v1420_v57, %v515_v58 }
 0x10d   :  { %1114 = vrcp.f32 %v708_v60  ;;  %v710_v5 = vadd.f32 1.0, %v1103_v63  ;;  %v659_v6 = vmul.f32 1.442695, %v619_v61  ;;  %v621_v8 = vsub.f32 0.0, %v1462_v62  ;;  %v277_v12 = vpop.f32.mrb[12].mxu1 }
 0x10e   :  { %1116 = vrcp.f32 %v709_v1  ;;  %v661_v10 = vmul.f32 1.442695, %v620_v2  ;;  %v622_v11 = vsub.f32 0.0, %v1466_v3  ;;  %v518_v13 = vpop.f32.mrb[12].mxu0  ;;  %v279_v16 = vpop.f32.mrb[13].mxu1 }
 0x10f   :  { %1118 = vrcp.f32 %v710_v5  ;;  %v663_v14 = vmul.f32 1.442695, %v621_v8  ;;  %v519_v15 = vadd.f32 %v518_v13, %v277_v12  ;;  %v520_v17 = vpop.f32.mrb[13].mxu0  ;;  %v281_v20 = vpop.f32.mrb[14].mxu1 }
 0x110   :  { %1120 = vpow2.f32 %v659_v6  ;;  %v665_v18 = vmul.f32 1.442695, %v622_v11  ;;  %v521_v19 = vadd.f32 %v520_v17, %v279_v16  ;;  %v522_v21 = vpop.f32.mrb[14].mxu0  ;;  %v283_v26 = vpop.f32.mrb[15].mxu1 }
 0x111   :  { %v1105_v22 = vpop.eup %1104  ;;  %1122 = vpow2.f32 %v661_v10  ;;  %v1471_v23 = vadd.f32 %v1418_v54, %v519_v15  ;;  %v523_v25 = vadd.f32 %v522_v21, %v281_v20  ;;  %v524_v27 = vpop.f32.mrb[15].mxu0 }
 0x112   :  { %v1107_v29 = vpop.eup %1106  ;;  %v711_v30 = vadd.f32 1.0, %v1105_v22  ;;  %1124 = vpow2.f32 %v663_v14  ;;  %v1474_v32 = vadd.f32 %v1420_v57, %v521_v19  ;;  %v525_v34 = vadd.f32 %v524_v27, %v283_v26 }
 0x113   :  { %v1109_v35 = vpop.eup %1108  ;;  %v712_v36 = vadd.f32 1.0, %v1107_v29  ;;  %1126 = vpow2.f32 %v665_v18  ;;  %v623_v37 = vsub.f32 0.0, %v1471_v23  ;;  %v1478_v38 = vadd.f32 %v1418_v54, %v523_v25 }
 0x114   :  { %v1111_v39 = vpop.eup %1110  ;;  %1128 = vrcp.f32 %v711_v30  ;;  %v713_v40 = vadd.f32 1.0, %v1109_v35  ;;  %v624_v41 = vsub.f32 0.0, %v1474_v32  ;;  %v1482_v42 = vadd.f32 %v1420_v57, %v525_v34 }
 0x115   :  { %1130 = vrcp.f32 %v712_v36  ;;  %v714_v43 = vadd.f32 1.0, %v1111_v39  ;;  %v667_v44 = vmul.f32 1.442695, %v623_v37  ;;  %v625_v45 = vsub.f32 0.0, %v1478_v38  ;;  %v287_v50 = vpop.f32.mrb[16].mxu1 }
 0x116   :  { %v1113_v46 = vpop.eup %1112  ;;  %1132 = vrcp.f32 %v713_v40  ;;  %v669_v47 = vmul.f32 1.442695, %v624_v41  ;;  %v626_v48 = vsub.f32 0.0, %v1482_v42  ;;  %v528_v51 = vpop.f32.mrb[16].mxu0 }
 0x117   :  { %v1115_v52 = vpop.eup %1114  ;;  %v771_v53 = vmul.f32 %v1113_v46, %v1423_v0  ;;  %1134 = vrcp.f32 %v714_v43  ;;  %v671_v55 = vmul.f32 1.442695, %v625_v45  ;;  %v529_v58 = vadd.f32 %v528_v51, %v287_v50  ;;  %v289_v59 = vpop.f32.mrb[17].mxu1 }
 0x118   :  { %v530_v60 = vpop.f32.mrb[17].mxu0  ;;  %v1117_v61 = vpop.eup %1116  ;;  %v772_v63 = vmul.f32 %v1115_v52, %v1426_v4  ;;  %1136 = vpow2.f32 %v667_v44  ;;  %v673_v1 = vmul.f32 1.442695, %v626_v48 }
 0x119   :  { %v531_v2 = vadd.f32 %v530_v60, %v289_v59  ;;  %v291_v5 = vpop.f32.mrb[18].mxu1  ;;  %v532_v6 = vpop.f32.mrb[18].mxu0  ;;  %v773_v10 = vmul.f32 %v1117_v61, %v1430_v7  ;;  %1138 = vpow2.f32 %v669_v47  ;;  %v1490_v11 = vadd.f32 %v1418_v54, %v529_v58 }
 0x11a   :  { %v1119_v8 = vpop.eup %1118  ;;  %v533_v0 = vadd.f32 %v532_v6, %v291_v5  ;;  %v293_v12 = vpop.f32.mrb[19].mxu1  ;;  %v983_v15 = vpack.c.bf16 %v772_v63, %v771_v53  ;;  %1140 = vpow2.f32 %v671_v55 }
 0x11b   :  { %v534_v13 = vpop.f32.mrb[19].mxu0  ;;  %v1121_v14 = vpop.eup %1120  ;;  %v774_v16 = vmul.f32 %v1119_v8, %v1434_v9  ;;  %v1494_v4 = vadd.f32 %v1420_v57, %v531_v2  ;;  %1142 = vpow2.f32 %v673_v1  ;;  %v627_v7 = vsub.f32 0.0, %v1490_v11 }
 0x11c   :  { %v1123_v17 = vpop.eup %1122  ;;  %v715_v18 = vadd.f32 1.0, %v1121_v14  ;;  %v1498_v19 = vadd.f32 %v1418_v54, %v533_v0  ;;  %899 = vst [vmem:[%s1635_s5] sm:$0xff] %v983_v15  ;;  %v535_v25 = vadd.f32 %v534_v13, %v293_v12 }
 0x11d   :  { %v1125_v20 = vpop.eup %1124  ;;  %v984_v21 = vpack.c.bf16 %v774_v16, %v773_v10  ;;  %v716_v22 = vadd.f32 1.0, %v1123_v17  ;;  %v628_v9 = vsub.f32 0.0, %v1494_v4  ;;  %v675_v29 = vmul.f32 1.442695, %v627_v7  ;;  %v297_v39 = vpop.f32.mrb[20].mxu1 }
 0x11e   :  { %v1127_v26 = vpop.eup %1126  ;;  %1144 = vrcp.f32 %v715_v18  ;;  %v717_v27 = vadd.f32 1.0, %v1125_v20  ;;  %v629_v30 = vsub.f32 0.0, %v1498_v19  ;;  %v1509_v37 = vadd.f32 %v1420_v57, %v535_v25  ;;  %v538_v40 = vpop.f32.mrb[20].mxu0 }
 0x11f   :  { %v1129_v34 = vpop.eup %1128  ;;  %900 = vst [vmem:[%s1635_s5 + $0x8] sm:$0xff] %v984_v21  ;;  %1146 = vrcp.f32 %v716_v22  ;;  %v718_v35 = vadd.f32 1.0, %v1127_v26  ;;  %v677_v36 = vmul.f32 1.442695, %v628_v9  ;;  %v539_v45 = vadd.f32 %v538_v40, %v297_v39  ;;  %v299_v46 = vpop.f32.mrb[21].mxu1 }
 0x120   :  { %v1131_v41 = vpop.eup %1130  ;;  %v775_v43 = vmul.f32 %v1129_v34, %v1439_v24  ;;  %1148 = vrcp.f32 %v717_v27  ;;  %v679_v44 = vmul.f32 1.442695, %v629_v30  ;;  %v540_v47 = vpop.f32.mrb[21].mxu0  ;;  %v630_v51 = vsub.f32 0.0, %v1509_v37 }
 0x121   :  { %v1133_v48 = vpop.eup %1132  ;;  %v776_v50 = vmul.f32 %v1131_v41, %v1442_v28  ;;  %1150 = vrcp.f32 %v718_v35  ;;  %v541_v52 = vadd.f32 %v540_v47, %v299_v46  ;;  %v301_v53 = vpop.f32.mrb[22].mxu1  ;;  %v1516_v24 = vadd.f32 %v1418_v54, %v539_v45 }
 0x122   :  { %v542_v55 = vpop.f32.mrb[22].mxu0  ;;  %v1135_v58 = vpop.eup %1134  ;;  %v777_v59 = vmul.f32 %v1133_v48, %v1446_v31  ;;  %1152 = vpow2.f32 %v675_v29  ;;  %v681_v5 = vmul.f32 1.442695, %v630_v51 }
 0x123   :  { %v543_v60 = vadd.f32 %v542_v55, %v301_v53  ;;  %v303_v61 = vpop.f32.mrb[23].mxu1  ;;  %v544_v63 = vpop.f32.mrb[23].mxu0  ;;  %v985_v2 = vpack.c.bf16 %v776_v50, %v775_v43  ;;  %v778_v28 = vmul.f32 %v1135_v58, %v1450_v33  ;;  %1154 = vpow2.f32 %v677_v36 }
 0x124   :  { %v1137_v1 = vpop.eup %1136  ;;  %1156 = vpow2.f32 %v679_v44  ;;  %v631_v10 = vsub.f32 0.0, %v1516_v24  ;;  %v1521_v31 = vadd.f32 %v1420_v57, %v541_v52  ;;  %v545_v20 = vadd.f32 %v544_v63, %v303_v61 }
 0x125   :  { %v1139_v6 = vpop.eup %1138  ;;  %v719_v8 = vadd.f32 1.0, %v1137_v1  ;;  %901 = vst [vmem:[%s1635_s5 + $0x10] sm:$0xff] %v985_v2  ;;  %v986_v12 = vpack.c.bf16 %v778_v28, %v777_v59  ;;  %1158 = vpow2.f32 %v681_v5  ;;  %v1527_v33 = vadd.f32 %v1418_v54, %v543_v60  ;;  %v307_v21 = vpop.f32.mrb[24].mxu1 }
 0x126   :  { %v1141_v0 = vpop.eup %1140  ;;  %v720_v13 = vadd.f32 1.0, %v1139_v6  ;;  %v683_v16 = vmul.f32 1.442695, %v631_v10  ;;  %v632_v17 = vsub.f32 0.0, %v1521_v31  ;;  %v548_v22 = vpop.f32.mrb[24].mxu0  ;;  %v1536_v36 = vadd.f32 %v1420_v57, %v545_v20 }
 0x127   :  { %v1143_v14 = vpop.eup %1142  ;;  %1160 = vrcp.f32 %v719_v8  ;;  %v721_v15 = vadd.f32 1.0, %v1141_v0  ;;  %902 = vst [vmem:[%s1635_s5 + $0x18] sm:$0xff] %v986_v12  ;;  %v633_v7 = vsub.f32 0.0, %v1527_v33  ;;  %v549_v26 = vadd.f32 %v548_v22, %v307_v21  ;;  %v309_v27 = vpop.f32.mrb[25].mxu1 }
 0x128   :  { %1162 = vrcp.f32 %v720_v13  ;;  %v722_v18 = vadd.f32 1.0, %v1143_v14  ;;  %v1145_v9 = vpop.eup %1144  ;;  %v685_v25 = vmul.f32 1.442695, %v632_v17  ;;  %v550_v29 = vpop.f32.mrb[25].mxu0  ;;  %v634_v50 = vsub.f32 0.0, %v1536_v36 }
 0x129   :  { %1164 = vrcp.f32 %v721_v15  ;;  %v1147_v30 = vpop.eup %1146  ;;  %v779_v34 = vmul.f32 %v1145_v9, %v1455_v49  ;;  %v687_v35 = vmul.f32 1.442695, %v633_v7  ;;  %v311_v39 = vpop.f32.mrb[26].mxu1  ;;  %v1540_v44 = vadd.f32 %v1418_v54, %v549_v26 }
 0x12a   :  { %1166 = vrcp.f32 %v722_v18  ;;  %v552_v40 = vpop.f32.mrb[26].mxu0  ;;  %v1149_v41 = vpop.eup %1148  ;;  %v780_v43 = vmul.f32 %v1147_v30, %v1458_v56  ;;  %v551_v45 = vadd.f32 %v550_v29, %v309_v27  ;;  %v689_v60 = vmul.f32 1.442695, %v634_v50 }
 0x12b   :  { %1168 = vpow2.f32 %v683_v16  ;;  %v313_v46 = vpop.f32.mrb[27].mxu1  ;;  %v554_v47 = vpop.f32.mrb[27].mxu0  ;;  %v781_v49 = vmul.f32 %v1149_v41, %v1462_v62  ;;  %v553_v51 = vadd.f32 %v552_v40, %v311_v39  ;;  %v635_v56 = vsub.f32 0.0, %v1540_v44 }
 0x12c   :  { %v1151_v48 = vpop.eup %1150  ;;  %1170 = vpow2.f32 %v685_v25  ;;  %v987_v53 = vpack.c.bf16 %v780_v43, %v779_v34  ;;  %v1547_v61 = vadd.f32 %v1420_v57, %v551_v45  ;;  %v555_v28 = vadd.f32 %v554_v47, %v313_v46 }
 0x12d   :  { %v1153_v52 = vpop.eup %1152  ;;  %v782_v55 = vmul.f32 %v1151_v48, %v1466_v3  ;;  %1172 = vpow2.f32 %v687_v35  ;;  %v1550_v63 = vadd.f32 %v1418_v54, %v553_v51  ;;  %v691_v3 = vmul.f32 1.442695, %v635_v56  ;;  %v317_v0 = vpop.f32.mrb[28].mxu1 }
 0x12e   :  { %v1155_v58 = vpop.eup %1154  ;;  %v723_v59 = vadd.f32 1.0, %v1153_v52  ;;  %903 = vst [vmem:[%s1635_s5 + $0x20] sm:$0xff] %v987_v53  ;;  %v636_v8 = vsub.f32 0.0, %v1547_v61  ;;  %v558_v12 = vpop.f32.mrb[28].mxu0  ;;  %v1561_v15 = vadd.f32 %v1420_v57, %v555_v28 }
 0x12f   :  { %v1157_v62 = vpop.eup %1156  ;;  %v988_v1 = vpack.c.bf16 %v782_v55, %v781_v49  ;;  %v724_v2 = vadd.f32 1.0, %v1155_v58  ;;  %v637_v10 = vsub.f32 0.0, %v1550_v63  ;;  %v559_v16 = vadd.f32 %v558_v12, %v317_v0  ;;  %v319_v17 = vpop.f32.mrb[29].mxu1 }
 0x130   :  { %v1159_v5 = vpop.eup %1158  ;;  %1174 = vrcp.f32 %v723_v59  ;;  %v725_v6 = vadd.f32 1.0, %v1157_v62  ;;  %v560_v18 = vpop.f32.mrb[29].mxu0  ;;  %v693_v21 = vmul.f32 1.442695, %v636_v8  ;;  %v638_v29 = vsub.f32 0.0, %v1561_v15 }
 0x131   :  { %v1161_v13 = vpop.eup %1160  ;;  %904 = vst [vmem:[%s1635_s5 + $0x28] sm:$0xff] %v988_v1  ;;  %1176 = vrcp.f32 %v724_v2  ;;  %v726_v14 = vadd.f32 1.0, %v1159_v5  ;;  %v695_v22 = vmul.f32 1.442695, %v637_v10  ;;  %v321_v9 = vpop.f32.mrb[30].mxu1  ;;  %v1567_v30 = vadd.f32 %v1418_v54, %v559_v16 }
 0x132   :  { %v1163_v7 = vpop.eup %1162  ;;  %v783_v20 = vmul.f32 %v1161_v13, %v1471_v23  ;;  %1178 = vrcp.f32 %v725_v6  ;;  %v562_v25 = vpop.f32.mrb[30].mxu0  ;;  %v561_v23 = vadd.f32 %v560_v18, %v319_v17 }
 0x133   :  { %v1165_v26 = vpop.eup %1164  ;;  %v784_v27 = vmul.f32 %v1163_v7, %v1474_v32  ;;  %1180 = vrcp.f32 %v726_v14  ;;  %v323_v34 = vpop.f32.mrb[31].mxu1  ;;  %v563_v41 = vadd.f32 %v562_v25, %v321_v9  ;;  %v697_v32 = vmul.f32 1.442695, %v638_v29 }
 0x134   :  { %v564_v35 = vpop.f32.mrb[31].mxu0  ;;  %v1167_v39 = vpop.eup %1166  ;;  %v785_v40 = vmul.f32 %v1165_v26, %v1478_v38  ;;  %1182 = vpow2.f32 %v689_v60  ;;  %v639_v49 = vsub.f32 0.0, %v1567_v30  ;;  %v1573_v50 = vadd.f32 %v1420_v57, %v561_v23 }
 0x135   :  { %v1169_v43 = vpop.eup %1168  ;;  %v989_v45 = vpack.c.bf16 %v784_v27, %v783_v20  ;;  %v786_v46 = vmul.f32 %v1167_v39, %v1482_v42  ;;  %1184 = vpow2.f32 %v691_v3  ;;  %v1579_v42 = vadd.f32 %v1418_v54, %v563_v41 }
 0x136   :  { %v1171_v47 = vpop.eup %1170  ;;  %v727_v48 = vadd.f32 1.0, %v1169_v43  ;;  %1186 = vpow2.f32 %v693_v21  ;;  %v699_v55 = vmul.f32 1.442695, %v639_v49  ;;  %v640_v56 = vsub.f32 0.0, %v1573_v50 }
 0x137   :  { %v1173_v51 = vpop.eup %1172  ;;  %905 = vst [vmem:[%s1635_s5 + $0x30] sm:$0xff] %v989_v45  ;;  %v990_v38 = vpack.c.bf16 %v786_v46, %v785_v40  ;;  %v728_v52 = vadd.f32 1.0, %v1171_v47  ;;  %1188 = vpow2.f32 %v695_v22  ;;  %v641_v58 = vsub.f32 0.0, %v1579_v42 }
 0x138   :  { %1190 = vrcp.f32 %v727_v48  ;;  %v729_v53 = vadd.f32 1.0, %v1173_v51  ;;  %v565_v59 = vadd.f32 %v564_v35, %v323_v34  ;;  %v701_v62 = vmul.f32 1.442695, %v640_v56 }
 0x139   :  { %906 = vst [vmem:[%s1635_s5 + $0x38] sm:$0xff] %v990_v38  ;;  %1192 = vrcp.f32 %v728_v52  ;;  %v703_v2 = vmul.f32 1.442695, %v641_v58 }
 0x13a   :  { %v1175_v60 = vpop.eup %1174  ;;  %1194 = vrcp.f32 %v729_v53  ;;  %v1588_v3 = vadd.f32 %v1420_v57, %v565_v59 }
 0x13b   :  { %v1177_v1 = vpop.eup %1176  ;;  %v787_v54 = vmul.f32 %v1175_v60, %v1490_v11  ;;  %1196 = vpow2.f32 %v697_v32 }
 0x13c   :  { %v1179_v28 = vpop.eup %1178  ;;  %v788_v5 = vmul.f32 %v1177_v1, %v1494_v4  ;;  %1198 = vpow2.f32 %v699_v55  ;;  %v642_v10 = vsub.f32 0.0, %v1588_v3 }
 0x13d   :  { %v1181_v6 = vpop.eup %1180  ;;  %v789_v8 = vmul.f32 %v1179_v28, %v1498_v19  ;;  %1200 = vpow2.f32 %v701_v62 }
 0x13e   :  { %v1183_v0 = vpop.eup %1182  ;;  %v991_v12 = vpack.c.bf16 %v788_v5, %v787_v54  ;;  %v790_v13 = vmul.f32 %v1181_v6, %v1509_v37  ;;  %1202 = vpow2.f32 %v703_v2  ;;  %v705_v18 = vmul.f32 1.442695, %v642_v10 }
 0x13f   :  { %v1185_v11 = vpop.eup %1184  ;;  %v730_v14 = vadd.f32 1.0, %v1183_v0 }
 0x140   :  { %v1187_v16 = vpop.eup %1186  ;;  %907 = vst [vmem:[%s1635_s5 + $0x40] sm:$0xff] %v991_v12  ;;  %v992_v57 = vpack.c.bf16 %v790_v13, %v789_v8  ;;  %v731_v4 = vadd.f32 1.0, %v1185_v11 }
 0x141   :  { %v1189_v17 = vpop.eup %1188  ;;  %1204 = vrcp.f32 %v730_v14  ;;  %v732_v19 = vadd.f32 1.0, %v1187_v16 }
 0x142   :  { %v1191_v7 = vpop.eup %1190  ;;  %908 = vst [vmem:[%s1635_s5 + $0x48] sm:$0xff] %v992_v57  ;;  %1206 = vrcp.f32 %v731_v4  ;;  %v733_v37 = vadd.f32 1.0, %v1189_v17 }
 0x143   :  { %v1193_v20 = vpop.eup %1192  ;;  %v791_v21 = vmul.f32 %v1191_v7, %v1516_v24  ;;  %1208 = vrcp.f32 %v732_v19 }
 0x144   :  { %v1195_v22 = vpop.eup %1194  ;;  %v792_v9 = vmul.f32 %v1193_v20, %v1521_v31  ;;  %1210 = vrcp.f32 %v733_v37 }
 0x145   :  { %v1197_v25 = vpop.eup %1196  ;;  %1212 = vpow2.f32 %v705_v18  ;;  %v793_v24 = vmul.f32 %v1195_v22, %v1527_v33 }
 0x146   :  { %v1199_v26 = vpop.eup %1198  ;;  %v993_v27 = vpack.c.bf16 %v792_v9, %v791_v21  ;;  %v734_v29 = vadd.f32 1.0, %v1197_v25 }
 0x147   :  { %v1201_v34 = vpop.eup %1200  ;;  %v735_v35 = vadd.f32 1.0, %v1199_v26 }
 0x148   :  { %v1203_v39 = vpop.eup %1202  ;;  %909 = vst [vmem:[%s1635_s5 + $0x50] sm:$0xff] %v993_v27  ;;  %1214 = vrcp.f32 %v734_v29  ;;  %v736_v40 = vadd.f32 1.0, %v1201_v34 }
 0x149   :  { %1216 = vrcp.f32 %v735_v35  ;;  %v737_v31 = vadd.f32 1.0, %v1203_v39 }
 0x14a   :  { %1218 = vrcp.f32 %v736_v40 }
 0x14b   :  { %v1205_v23 = vpop.eup %1204  ;;  %1220 = vrcp.f32 %v737_v31 }
 0x14c   :  { %v1207_v41 = vpop.eup %1206  ;;  %v794_v43 = vmul.f32 %v1205_v23, %v1536_v36 }
 0x14d   :  { %v1209_v45 = vpop.eup %1208  ;;  %v795_v46 = vmul.f32 %v1207_v41, %v1540_v44 }
 0x14e   :  { %v1211_v32 = vpop.eup %1210  ;;  %v994_v47 = vpack.c.bf16 %v794_v43, %v793_v24  ;;  %v796_v48 = vmul.f32 %v1209_v45, %v1547_v61 }
 0x14f   :  { %v1213_v49 = vpop.eup %1212  ;;  %v797_v38 = vmul.f32 %v1211_v32, %v1550_v63 }
 0x150   :  { %910 = vst [vmem:[%s1635_s5 + $0x58] sm:$0xff] %v994_v47  ;;  %v995_v33 = vpack.c.bf16 %v796_v48, %v795_v46  ;;  %v738_v51 = vadd.f32 1.0, %v1213_v49 }
 0x152   :  { %v1215_v52 = vpop.eup %1214  ;;  %911 = vst [vmem:[%s1635_s5 + $0x60] sm:$0xff] %v995_v33  ;;  %1222 = vrcp.f32 %v738_v51 }
 0x153   :  { %v1217_v36 = vpop.eup %1216  ;;  %v798_v44 = vmul.f32 %v1215_v52, %v1561_v15 }
 0x154   :  { %v1219_v61 = vpop.eup %1218  ;;  %v799_v53 = vmul.f32 %v1217_v36, %v1567_v30 }
 0x155   :  { %v996_v55 = vpack.c.bf16 %v798_v44, %v797_v38  ;;  %v800_v56 = vmul.f32 %v1219_v61, %v1573_v50  ;;  %v1221_v58 = vpop.eup %1220 }
 0x156   :  { %v801_v59 = vmul.f32 %v1221_v58, %v1579_v42 }
 0x157   :  { %912 = vst [vmem:[%s1635_s5 + $0x68] sm:$0xff] %v996_v55  ;;  %v997_v63 = vpack.c.bf16 %v800_v56, %v799_v53 }
 0x159   :  { %913 = vst [vmem:[%s1635_s5 + $0x70] sm:$0xff] %v997_v63 }
 0x15c   :  { %v1223_v60 = vpop.eup %1222 }
 0x15d   :  { %v802_v15 = vmul.f32 %v1223_v60, %v1588_v3 }
 0x15f   :  { %v998_v62 = vpack.c.bf16 %v802_v15, %v801_v59 }
 0x161   :  { %914 = vst [vmem:[%s1635_s5 + $0x78] sm:$0xff] %v998_v62 }

// kernel: neck_forward.19
= control target key start
LH: loop header
LB: loop body
LE: loop exit
PB: predicated region body
PF: predicated region fallthrough
CT: control target
= control target key end

     0   :  { %s4070_s10 = inlined_call_operand.vmem [shape: bf16[128,128], index: 10, kind: input, shape index: {}]   ;;  %s4071_s13 = inlined_call_operand.vmem [shape: bf16[128,128], index: 13, kind: input, shape index: {}]   ;;  %s4072_s1 = inlined_call_operand.vmem [shape: bf16[128,128], index: 1, kind: input, shape index: {}]   ;;  %s4073_s4 = inlined_call_operand.vmem [shape: bf16[128,128], index: 4, kind: input, shape index: {}]   ;;  %s4074_s9 = inlined_call_operand.vmem [shape: bf16[128,128], index: 9, kind: input, shape index: {}]   ;;  %s4075_s14 = inlined_call_operand.vmem [shape: bf16[128,128], index: 14, kind: input, shape index: {}]   ;;  %s4076_s0 = inlined_call_operand.vmem [shape: bf16[128,128], index: 0, kind: input, shape index: {}]   ;;  %s4077_s5 = inlined_call_operand.vmem [shape: bf16[128,128], index: 5, kind: input, shape index: {}]   ;;  %s4078_s11 = inlined_call_operand.vmem [shape: bf16[128,128], index: 11, kind: input, shape index: {}]   ;;  %s4079_s15 = inlined_call_operand.vmem [shape: bf16[128,128], index: 15, kind: input, shape index: {}]   ;;  %s4080_s2 = inlined_call_operand.vmem [shape: bf16[128,128], index: 2, kind: input, shape index: {}]   ;;  %s4081_s6 = inlined_call_operand.vmem [shape: bf16[128,128], index: 6, kind: input, shape index: {}]   ;;  %s4082_s12 = inlined_call_operand.vmem [shape: bf16[128,128], index: 12, kind: input, shape index: {}]   ;;  %s4083_s16 = inlined_call_operand.vmem [shape: bf16[128,128], index: 16, kind: input, shape index: {}]   ;;  %s4084_s3 = inlined_call_operand.vmem [shape: bf16[128,128], index: 3, kind: input, shape index: {}]   ;;  %s4085_s7 = inlined_call_operand.vmem [shape: bf16[128,128], index: 7, kind: input, shape index: {}]   ;;  %s4086_s17 = inlined_call_operand.vmem [shape: bf16[128,128], index: 17, kind: input, shape index: {}]   ;;  %s4087_s8 = inlined_call_operand.vmem [shape: bf16[128,128], index: 8, kind: input, shape index: {}]   ;;  %s4088_s18 = inlined_call_operand.vmem [shape: f32[1,128], index: 18, kind: input, shape index: {}]   ;;  %s4089_s19 = inlined_call_operand.vmem [shape: bf16[128,128], index: 19, kind: output, shape index: {}]  }
   0x1   :  { %4095 = sst [smem:[#allocation2_spill]] %s4070_s10  ;;  %v3222_v19 = vld [vmem:[%s4074_s9] sm:$0xff]   ;;  %v3225_v22 = vld [vmem:[%s4074_s9 + $0x8] sm:$0xff]   ;;  %v3230_v27 = vld [vmem:[%s4074_s9 + $0x10] sm:$0xff]  }
   0x2   :  { %4096 = sst [smem:[#allocation3_spill]] %s4071_s13  ;;  %s4100_s20 = sld [smem:[#allocation2_spill]]  ;;  %v3224_v20 = vld [vmem:[%s4075_s14] sm:$0xff]   ;;  %v3226_v23 = vld [vmem:[%s4075_s14 + $0x8] sm:$0xff]   ;;  %v3232_v28 = vld [vmem:[%s4075_s14 + $0x10] sm:$0xff]  }
   0x3   :  { %4097 = sst [smem:[#allocation4_spill]] %s4072_s1  ;;  %v3233_v30 = vld [vmem:[%s4074_s9 + $0x18] sm:$0xff]   ;;  %v3238_v35 = vld [vmem:[%s4074_s9 + $0x20] sm:$0xff]   ;;  %v3241_v38 = vld [vmem:[%s4074_s9 + $0x28] sm:$0xff]  }
   0x4   :  { %4098 = sst [smem:[#allocation5_spill]] %s4073_s4  ;;  %s4102_s28 = sld [smem:[#allocation4_spill]]  ;;  %v3234_v31 = vld [vmem:[%s4075_s14 + $0x18] sm:$0xff]   ;;  %v3240_v36 = vld [vmem:[%s4075_s14 + $0x20] sm:$0xff]   ;;  %v3242_v39 = vld [vmem:[%s4075_s14 + $0x28] sm:$0xff]  }
   0x5   :  { %4099 = sst [smem:[#allocation6_spill]] %s4084_s3  ;;  %s4101_s3 = sld [smem:[#allocation3_spill]]  ;;  %v3246_v43 = vld [vmem:[%s4074_s9 + $0x30] sm:$0xff]   ;;  %v3249_v46 = vld [vmem:[%s4074_s9 + $0x38] sm:$0xff]   ;;  %v3251_v48 = vld [vmem:[%s4076_s0] sm:$0xff]  }
   0x6   :  { %s4103_s30 = sld [smem:[#allocation5_spill]]  ;;  %v3248_v44 = vld [vmem:[%s4075_s14 + $0x30] sm:$0xff]   ;;  %v3250_v47 = vld [vmem:[%s4075_s14 + $0x38] sm:$0xff]   ;;  %v3252_v49 = vld [vmem:[%s4077_s5] sm:$0xff]  }
   0x7   :  { %v3253_v50 = vld [vmem:[%s4076_s0 + $0x8] sm:$0xff]   ;;  %v3254_v51 = vld [vmem:[%s4078_s11] sm:$0xff]   ;;  %v3259_v56 = vld [vmem:[%s4076_s0 + $0x10] sm:$0xff]  }
   0x8   :  { %v3203_v0 = vld [vmem:[%s4100_s20] sm:$0xff]   ;;  %v3205_v2 = vld [vmem:[%s4100_s20 + $0x8] sm:$0xff]   ;;  %v3207_v4 = vld [vmem:[%s4100_s20 + $0x10] sm:$0xff]  }
   0x9   :  { %2771 = vmatprep.subr.bf16.mxu1 %v3203_v0  ;;  %v3209_v6 = vld [vmem:[%s4100_s20 + $0x18] sm:$0xff]   ;;  %v3211_v8 = vld [vmem:[%s4100_s20 + $0x20] sm:$0xff]   ;;  %v3213_v10 = vld [vmem:[%s4100_s20 + $0x28] sm:$0xff]  }
   0xa   :  { %2772 = vmatpush3.bf16.msra.mxu1 %v3203_v0  ;;  %v3219_v12 = vld [vmem:[%s4102_s28] sm:$0xff]   ;;  %v3215_v14 = vld [vmem:[%s4100_s20 + $0x30] sm:$0xff]   ;;  %v3217_v16 = vld [vmem:[%s4100_s20 + $0x38] sm:$0xff]  }
   0xb   :  { %v3204_v1 = vld [vmem:[%s4101_s3] sm:$0xff]   ;;  %v3206_v3 = vld [vmem:[%s4101_s3 + $0x8] sm:$0xff]   ;;  %2773 = vmatprep.subr.bf16.mxu1 %v3205_v2  ;;  %v3208_v5 = vld [vmem:[%s4101_s3 + $0x10] sm:$0xff]   ;;  %2787 = vmatprep.mubr.bf16.mxu1 %v3219_v12 }
   0xc   :  { %2899 = vmatprep.subr.bf16.mxu0 %v3204_v1  ;;  %v3210_v7 = vld [vmem:[%s4101_s3 + $0x18] sm:$0xff]   ;;  %v3212_v9 = vld [vmem:[%s4101_s3 + $0x20] sm:$0xff]   ;;  %v3214_v11 = vld [vmem:[%s4101_s3 + $0x28] sm:$0xff]  }
   0xd   :  { %2900 = vmatpush3.bf16.msra.mxu0 %v3204_v1  ;;  %v3220_v13 = vld [vmem:[%s4103_s30] sm:$0xff]   ;;  %v3216_v15 = vld [vmem:[%s4101_s3 + $0x30] sm:$0xff]   ;;  %v3218_v17 = vld [vmem:[%s4101_s3 + $0x38] sm:$0xff]   ;;  %s4104_s3 = sld [smem:[#allocation6_spill]] }
   0xe   :  { %2901 = vmatprep.subr.bf16.mxu0 %v3206_v3  ;;  %2774 = vmatpush3.bf16.msra.mxu1 %v3205_v2  ;;  %v3221_v18 = vld [vmem:[%s4102_s28 + $0x8] sm:$0xff]   ;;  %v3227_v24 = vld [vmem:[%s4102_s28 + $0x10] sm:$0xff]   ;;  %v3229_v26 = vld [vmem:[%s4102_s28 + $0x18] sm:$0xff]  }
   0xf   :  { %2775 = vmatprep.subr.bf16.mxu1 %v3207_v4  ;;  %2915 = vmatprep.mubr.bf16.mxu0 %v3220_v13  ;;  %v3223_v21 = vld [vmem:[%s4103_s30 + $0x8] sm:$0xff]   ;;  %v3228_v25 = vld [vmem:[%s4103_s30 + $0x10] sm:$0xff]   ;;  %v3231_v29 = vld [vmem:[%s4103_s30 + $0x18] sm:$0xff]  }
  0x10   :  { %v3235_v32 = vld [vmem:[%s4102_s28 + $0x20] sm:$0xff]   ;;  %v3237_v34 = vld [vmem:[%s4102_s28 + $0x28] sm:$0xff]   ;;  %v3243_v40 = vld [vmem:[%s4102_s28 + $0x30] sm:$0xff]  }
  0x11   :  { %2902 = vmatpush3.bf16.msra.mxu0 %v3206_v3  ;;  %v3236_v33 = vld [vmem:[%s4103_s30 + $0x20] sm:$0xff]   ;;  %v3239_v37 = vld [vmem:[%s4103_s30 + $0x28] sm:$0xff]   ;;  %v3244_v41 = vld [vmem:[%s4103_s30 + $0x30] sm:$0xff]  }
  0x12   :  { %2903 = vmatprep.subr.bf16.mxu0 %v3208_v5  ;;  %2776 = vmatpush3.bf16.msra.mxu1 %v3207_v4  ;;  %v3245_v42 = vld [vmem:[%s4102_s28 + $0x38] sm:$0xff]   ;;  %v3256_v52 = vld [vmem:[%s4079_s15] sm:$0xff]   ;;  %v3255_v53 = vld [vmem:[%s4077_s5 + $0x8] sm:$0xff]  }
  0x13   :  { %2777 = vmatprep.subr.bf16.mxu1 %v3209_v6  ;;  %v3247_v45 = vld [vmem:[%s4103_s30 + $0x38] sm:$0xff]   ;;  %v3257_v54 = vld [vmem:[%s4078_s11 + $0x8] sm:$0xff]   ;;  %v3260_v57 = vld [vmem:[%s4077_s5 + $0x10] sm:$0xff]  }
  0x14   :  { %v3258_v55 = vld [vmem:[%s4079_s15 + $0x8] sm:$0xff]   ;;  %v3261_v58 = vld [vmem:[%s4076_s0 + $0x18] sm:$0xff]   ;;  %v3262_v59 = vld [vmem:[%s4078_s11 + $0x10] sm:$0xff]  }
  0x15   :  { %2904 = vmatpush3.bf16.msra.mxu0 %v3208_v5  ;;  %v3264_v60 = vld [vmem:[%s4079_s15 + $0x10] sm:$0xff]   ;;  %v3263_v61 = vld [vmem:[%s4077_s5 + $0x18] sm:$0xff]   ;;  %v3267_v0 = vld [vmem:[%s4076_s0 + $0x20] sm:$0xff]  }
  0x16   :  { %2905 = vmatprep.subr.bf16.mxu0 %v3210_v7  ;;  %2778 = vmatpush3.bf16.msra.mxu1 %v3209_v6  ;;  %v3265_v62 = vld [vmem:[%s4078_s11 + $0x18] sm:$0xff]   ;;  %v3268_v1 = vld [vmem:[%s4077_s5 + $0x20] sm:$0xff]   ;;  %v3269_v2 = vld [vmem:[%s4076_s0 + $0x28] sm:$0xff]  }
  0x17   :  { %2779 = vmatprep.subr.bf16.mxu1 %v3211_v8  ;;  %v3266_v63 = vld [vmem:[%s4079_s15 + $0x18] sm:$0xff]   ;;  %v3270_v3 = vld [vmem:[%s4078_s11 + $0x20] sm:$0xff]   ;;  %v3271_v5 = vld [vmem:[%s4077_s5 + $0x28] sm:$0xff]  }
  0x18   :  { %v3272_v4 = vld [vmem:[%s4079_s15 + $0x20] sm:$0xff]   ;;  %v3273_v6 = vld [vmem:[%s4078_s11 + $0x28] sm:$0xff]   ;;  %v3280_v12 = vld [vmem:[%s4079_s15 + $0x30] sm:$0xff]  }
  0x19   :  { %2906 = vmatpush3.bf16.msra.mxu0 %v3210_v7  ;;  %v3274_v7 = vld [vmem:[%s4079_s15 + $0x28] sm:$0xff]   ;;  %v3279_v13 = vld [vmem:[%s4077_s5 + $0x38] sm:$0xff]  }
  0x1a   :  { %2907 = vmatprep.subr.bf16.mxu0 %v3212_v9  ;;  %2780 = vmatpush3.bf16.msra.mxu1 %v3211_v8  ;;  %v3275_v8 = vld [vmem:[%s4076_s0 + $0x30] sm:$0xff]  }
  0x1b   :  { %2781 = vmatprep.subr.bf16.mxu1 %v3213_v10 }
  0x1d   :  { %2908 = vmatpush3.bf16.msra.mxu0 %v3212_v9  ;;  %v3276_v9 = vld [vmem:[%s4077_s5 + $0x30] sm:$0xff]  }
  0x1e   :  { %2909 = vmatprep.subr.bf16.mxu0 %v3214_v11  ;;  %2782 = vmatpush3.bf16.msra.mxu1 %v3213_v10  ;;  %v3277_v10 = vld [vmem:[%s4076_s0 + $0x38] sm:$0xff]  }
  0x1f   :  { %2783 = vmatprep.subr.bf16.mxu1 %v3215_v14 }
  0x21   :  { %2910 = vmatpush3.bf16.msra.mxu0 %v3214_v11  ;;  %v3278_v11 = vld [vmem:[%s4078_s11 + $0x30] sm:$0xff]  }
  0x22   :  { %2911 = vmatprep.subr.bf16.mxu0 %v3216_v15  ;;  %2784 = vmatpush3.bf16.msra.mxu1 %v3215_v14  ;;  %v3281_v14 = vld [vmem:[%s4078_s11 + $0x38] sm:$0xff]  }
  0x23   :  { %2785 = vmatprep.subr.bf16.mxu1 %v3217_v16 }
  0x25   :  { %2912 = vmatpush3.bf16.msra.mxu0 %v3216_v15  ;;  %v3282_v15 = vld [vmem:[%s4079_s15 + $0x38] sm:$0xff]  }
  0x26   :  { %2913 = vmatprep.subr.bf16.mxu0 %v3218_v17  ;;  %2786 = vmatpush3.bf16.msra.mxu1 %v3217_v16  ;;  %v3283_v16 = vld [vmem:[%s4080_s2] sm:$0xff]  }
  0x27   :  { %2803 = vmatprep.subr.bf16.mxu1 %v3222_v19 }
  0x29   :  { %2914 = vmatpush3.bf16.msra.mxu0 %v3218_v17  ;;  %2788 = vmatmul.mubr.bf16.vlgmr.msra.gmra.mrb[0].mxu1 %v3221_v18  ;;  %v3284_v17 = vld [vmem:[%s4081_s6] sm:$0xff]   ;;  %v3285_v18 = vld [vmem:[%s4080_s2 + $0x8] sm:$0xff]  }
  0x2a   :  { %2931 = vmatprep.subr.bf16.mxu0 %v3224_v20  ;;  %2804 = vmatpush3.bf16.msra.mxu1 %v3222_v19  ;;  %v3286_v19 = vld [vmem:[%s4082_s12] sm:$0xff]  }
  0x2b   :  { %2805 = vmatprep.subr.bf16.mxu1 %v3225_v22  ;;  %2791 = vmatprep.mubr.bf16.mxu1 %v3227_v24  ;;  %v3291_v24 = vld [vmem:[%s4080_s2 + $0x10] sm:$0xff]  }
  0x2c   :  { %2916 = vmatmul.mubr.bf16.vlgmr.msra.gmra.mrb[0].mxu0 %v3223_v21  ;;  %v3287_v21 = vld [vmem:[%s4081_s6 + $0x8] sm:$0xff]  }
  0x2d   :  { %2932 = vmatpush3.bf16.msra.mxu0 %v3224_v20  ;;  %2919 = vmatprep.mubr.bf16.mxu0 %v3228_v25  ;;  %v3288_v20 = vld [vmem:[%s4083_s16] sm:$0xff]   ;;  %v3292_v25 = vld [vmem:[%s4081_s6 + $0x10] sm:$0xff]  }
  0x2e   :  { %2933 = vmatprep.subr.bf16.mxu0 %v3226_v23  ;;  %2806 = vmatpush3.bf16.msra.mxu1 %v3225_v22  ;;  %v3289_v22 = vld [vmem:[%s4082_s12 + $0x8] sm:$0xff]  }
  0x2f   :  { %2807 = vmatprep.subr.bf16.mxu1 %v3230_v27 }
  0x31   :  { %2934 = vmatpush3.bf16.msra.mxu0 %v3226_v23  ;;  %2792 = vmatmul.mubr.bf16.gmra.mrb[4].mxu1 %v3229_v26  ;;  %v3290_v23 = vld [vmem:[%s4083_s16 + $0x8] sm:$0xff]   ;;  %v3293_v26 = vld [vmem:[%s4080_s2 + $0x18] sm:$0xff]  }
  0x32   :  { %2935 = vmatprep.subr.bf16.mxu0 %v3232_v28  ;;  %2808 = vmatpush3.bf16.msra.mxu1 %v3230_v27  ;;  %v3294_v27 = vld [vmem:[%s4082_s12 + $0x10] sm:$0xff]  }
  0x33   :  { %2809 = vmatprep.subr.bf16.mxu1 %v3233_v30  ;;  %2795 = vmatprep.mubr.bf16.mxu1 %v3235_v32  ;;  %v3299_v32 = vld [vmem:[%s4080_s2 + $0x20] sm:$0xff]  }
  0x34   :  { %2920 = vmatmul.mubr.bf16.gmra.mrb[4].mxu0 %v3231_v29  ;;  %v3295_v29 = vld [vmem:[%s4081_s6 + $0x18] sm:$0xff]  }
  0x35   :  { %2936 = vmatpush3.bf16.msra.mxu0 %v3232_v28  ;;  %2923 = vmatprep.mubr.bf16.mxu0 %v3236_v33  ;;  %v3296_v28 = vld [vmem:[%s4083_s16 + $0x10] sm:$0xff]   ;;  %v3300_v33 = vld [vmem:[%s4081_s6 + $0x20] sm:$0xff]  }
  0x36   :  { %2937 = vmatprep.subr.bf16.mxu0 %v3234_v31  ;;  %2810 = vmatpush3.bf16.msra.mxu1 %v3233_v30  ;;  %v3297_v30 = vld [vmem:[%s4082_s12 + $0x18] sm:$0xff]  }
  0x37   :  { %2811 = vmatprep.subr.bf16.mxu1 %v3238_v35 }
  0x39   :  { %2938 = vmatpush3.bf16.msra.mxu0 %v3234_v31  ;;  %2796 = vmatmul.mubr.bf16.gmra.mrb[8].mxu1 %v3237_v34  ;;  %v3298_v31 = vld [vmem:[%s4083_s16 + $0x18] sm:$0xff]   ;;  %v3301_v34 = vld [vmem:[%s4080_s2 + $0x28] sm:$0xff]  }
  0x3a   :  { %2939 = vmatprep.subr.bf16.mxu0 %v3240_v36  ;;  %2812 = vmatpush3.bf16.msra.mxu1 %v3238_v35  ;;  %v3302_v35 = vld [vmem:[%s4082_s12 + $0x20] sm:$0xff]  }
  0x3b   :  { %2813 = vmatprep.subr.bf16.mxu1 %v3241_v38  ;;  %2799 = vmatprep.mubr.bf16.mxu1 %v3243_v40  ;;  %v3307_v40 = vld [vmem:[%s4080_s2 + $0x30] sm:$0xff]  }
  0x3c   :  { %2924 = vmatmul.mubr.bf16.gmra.mrb[8].mxu0 %v3239_v37  ;;  %v3303_v37 = vld [vmem:[%s4081_s6 + $0x28] sm:$0xff]  }
  0x3d   :  { %2940 = vmatpush3.bf16.msra.mxu0 %v3240_v36  ;;  %2927 = vmatprep.mubr.bf16.mxu0 %v3244_v41  ;;  %v3304_v36 = vld [vmem:[%s4083_s16 + $0x20] sm:$0xff]   ;;  %v3308_v41 = vld [vmem:[%s4081_s6 + $0x30] sm:$0xff]  }
  0x3e   :  { %2941 = vmatprep.subr.bf16.mxu0 %v3242_v39  ;;  %2814 = vmatpush3.bf16.msra.mxu1 %v3241_v38  ;;  %v3305_v38 = vld [vmem:[%s4082_s12 + $0x28] sm:$0xff]  }
  0x3f   :  { %2815 = vmatprep.subr.bf16.mxu1 %v3246_v43 }
  0x41   :  { %2942 = vmatpush3.bf16.msra.mxu0 %v3242_v39  ;;  %2800 = vmatmul.mubr.bf16.gmra.mrb[12].mxu1 %v3245_v42  ;;  %v3306_v39 = vld [vmem:[%s4083_s16 + $0x28] sm:$0xff]   ;;  %v3309_v42 = vld [vmem:[%s4080_s2 + $0x38] sm:$0xff]  }
  0x42   :  { %2943 = vmatprep.subr.bf16.mxu0 %v3248_v44  ;;  %2816 = vmatpush3.bf16.msra.mxu1 %v3246_v43  ;;  %v3310_v43 = vld [vmem:[%s4082_s12 + $0x30] sm:$0xff]  }
  0x43   :  { %2817 = vmatprep.subr.bf16.mxu1 %v3249_v46  ;;  %2819 = vmatprep.mubr.bf16.mxu1 %v3251_v48  ;;  %v3315_v48 = vld [vmem:[%s4104_s3] sm:$0xff]  }
  0x44   :  { %2928 = vmatmul.mubr.bf16.gmra.mrb[12].mxu0 %v3247_v45  ;;  %v3311_v45 = vld [vmem:[%s4081_s6 + $0x38] sm:$0xff]  }
  0x45   :  { %2944 = vmatpush3.bf16.msra.mxu0 %v3248_v44  ;;  %2947 = vmatprep.mubr.bf16.mxu0 %v3252_v49  ;;  %v3312_v44 = vld [vmem:[%s4083_s16 + $0x30] sm:$0xff]   ;;  %v3316_v49 = vld [vmem:[%s4085_s7] sm:$0xff]  }
  0x46   :  { %2945 = vmatprep.subr.bf16.mxu0 %v3250_v47  ;;  %2818 = vmatpush3.bf16.msra.mxu1 %v3249_v46  ;;  %v3313_v46 = vld [vmem:[%s4082_s12 + $0x38] sm:$0xff]  }
  0x47   :  { %2835 = vmatprep.subr.bf16.mxu1 %v3254_v51 }
  0x49   :  { %2946 = vmatpush3.bf16.msra.mxu0 %v3250_v47  ;;  %2820 = vmatmul.mubr.bf16.vlgmr.msra.gmra.mrb[0].mxu1 %v3253_v50  ;;  %v3314_v47 = vld [vmem:[%s4083_s16 + $0x38] sm:$0xff]   ;;  %v3319_v50 = vld [vmem:[%s4086_s17] sm:$0xff]  }
  0x4a   :  { %2963 = vmatprep.subr.bf16.mxu0 %v3256_v52  ;;  %2836 = vmatpush3.bf16.msra.mxu1 %v3254_v51  ;;  %v3317_v51 = vld [vmem:[%s4104_s3 + $0x8] sm:$0xff]  }
  0x4b   :  { %2837 = vmatprep.subr.bf16.mxu1 %v3257_v54  ;;  %2823 = vmatprep.mubr.bf16.mxu1 %v3259_v56  ;;  %v3325_v56 = vld [vmem:[%s4086_s17 + $0x10] sm:$0xff]  }
  0x4c   :  { %2948 = vmatmul.mubr.bf16.vlgmr.msra.gmra.mrb[0].mxu0 %v3255_v53  ;;  %v3320_v53 = vld [vmem:[%s4086_s17 + $0x8] sm:$0xff]  }
  0x4d   :  { %2964 = vmatpush3.bf16.msra.mxu0 %v3256_v52  ;;  %2951 = vmatprep.mubr.bf16.mxu0 %v3260_v57  ;;  %v3318_v52 = vld [vmem:[%s4085_s7 + $0x8] sm:$0xff]   ;;  %v3323_v57 = vld [vmem:[%s4104_s3 + $0x18] sm:$0xff]  }
  0x4e   :  { %2965 = vmatprep.subr.bf16.mxu0 %v3258_v55  ;;  %2838 = vmatpush3.bf16.msra.mxu1 %v3257_v54  ;;  %v3321_v54 = vld [vmem:[%s4104_s3 + $0x10] sm:$0xff]  }
  0x4f   :  { %2839 = vmatprep.subr.bf16.mxu1 %v3262_v59 }
  0x51   :  { %2966 = vmatpush3.bf16.msra.mxu0 %v3258_v55  ;;  %2824 = vmatmul.mubr.bf16.gmra.mrb[4].mxu1 %v3261_v58  ;;  %v3322_v55 = vld [vmem:[%s4085_s7 + $0x10] sm:$0xff]   ;;  %v3324_v58 = vld [vmem:[%s4085_s7 + $0x18] sm:$0xff]  }
  0x52   :  { %2967 = vmatprep.subr.bf16.mxu0 %v3264_v60  ;;  %2840 = vmatpush3.bf16.msra.mxu1 %v3262_v59  ;;  %v3326_v59 = vld [vmem:[%s4086_s17 + $0x18] sm:$0xff]  }
  0x53   :  { %2841 = vmatprep.subr.bf16.mxu1 %v3265_v62  ;;  %2827 = vmatprep.mubr.bf16.mxu1 %v3267_v0  ;;  %v3330_v0 = vld [vmem:[%s4085_s7 + $0x28] sm:$0xff]  }
  0x54   :  { %2952 = vmatmul.mubr.bf16.gmra.mrb[4].mxu0 %v3263_v61  ;;  %v3328_v61 = vld [vmem:[%s4085_s7 + $0x20] sm:$0xff]  }
  0x55   :  { %2968 = vmatpush3.bf16.msra.mxu0 %v3264_v60  ;;  %2955 = vmatprep.mubr.bf16.mxu0 %v3268_v1  ;;  %v3327_v60 = vld [vmem:[%s4104_s3 + $0x20] sm:$0xff]   ;;  %v3332_v1 = vld [vmem:[%s4086_s17 + $0x28] sm:$0xff]  }
  0x56   :  { %2969 = vmatprep.subr.bf16.mxu0 %v3266_v63  ;;  %2842 = vmatpush3.bf16.msra.mxu1 %v3265_v62  ;;  %v3331_v62 = vld [vmem:[%s4086_s17 + $0x20] sm:$0xff]  }
  0x57   :  { %2843 = vmatprep.subr.bf16.mxu1 %v3270_v3 }
  0x59   :  { %2970 = vmatpush3.bf16.msra.mxu0 %v3266_v63  ;;  %2828 = vmatmul.mubr.bf16.gmra.mrb[8].mxu1 %v3269_v2  ;;  %v3329_v63 = vld [vmem:[%s4104_s3 + $0x28] sm:$0xff]   ;;  %v3333_v2 = vld [vmem:[%s4104_s3 + $0x30] sm:$0xff]  }
  0x5a   :  { %2971 = vmatprep.subr.bf16.mxu0 %v3272_v4  ;;  %2844 = vmatpush3.bf16.msra.mxu1 %v3270_v3  ;;  %v3334_v3 = vld [vmem:[%s4085_s7 + $0x30] sm:$0xff]  }
  0x5b   :  { %2845 = vmatprep.subr.bf16.mxu1 %v3273_v6  ;;  %2831 = vmatprep.mubr.bf16.mxu1 %v3275_v8  ;;  %v3339_v8 = vld [vmem:[%s4087_s8] sm:$0xff]  }
  0x5c   :  { %2956 = vmatmul.mubr.bf16.gmra.mrb[8].mxu0 %v3271_v5  ;;  %v3335_v5 = vld [vmem:[%s4104_s3 + $0x38] sm:$0xff]  }
  0x5d   :  { %2972 = vmatpush3.bf16.msra.mxu0 %v3272_v4  ;;  %2959 = vmatprep.mubr.bf16.mxu0 %v3276_v9  ;;  %v3337_v4 = vld [vmem:[%s4086_s17 + $0x30] sm:$0xff]   ;;  %v3340_v9 = vld [vmem:[%s4087_s8 + $0x20] sm:$0xff]  }
  0x5e   :  { %2973 = vmatprep.subr.bf16.mxu0 %v3274_v7  ;;  %2846 = vmatpush3.bf16.msra.mxu1 %v3273_v6  ;;  %v3336_v6 = vld [vmem:[%s4085_s7 + $0x38] sm:$0xff]  }
  0x5f   :  { %2847 = vmatprep.subr.bf16.mxu1 %v3278_v11 }
  0x61   :  { %2974 = vmatpush3.bf16.msra.mxu0 %v3274_v7  ;;  %2832 = vmatmul.mubr.bf16.gmra.mrb[12].mxu1 %v3277_v10  ;;  %v3338_v7 = vld [vmem:[%s4086_s17 + $0x38] sm:$0xff]   ;;  %v3342_v10 = vld [vmem:[%s4087_s8 + $0x28] sm:$0xff]  }
  0x62   :  { %2975 = vmatprep.subr.bf16.mxu0 %v3280_v12  ;;  %2848 = vmatpush3.bf16.msra.mxu1 %v3278_v11  ;;  %v3341_v11 = vld [vmem:[%s4087_s8 + $0x8] sm:$0xff]  }
  0x63   :  { %2849 = vmatprep.subr.bf16.mxu1 %v3281_v14  ;;  %2851 = vmatprep.mubr.bf16.mxu1 %v3283_v16 }
  0x64   :  { %2960 = vmatmul.mubr.bf16.gmra.mrb[12].mxu0 %v3279_v13  ;;  %v3343_v13 = vld [vmem:[%s4087_s8 + $0x10] sm:$0xff]  }
  0x65   :  { %2976 = vmatpush3.bf16.msra.mxu0 %v3280_v12  ;;  %2979 = vmatprep.mubr.bf16.mxu0 %v3284_v17  ;;  %v3344_v12 = vld [vmem:[%s4087_s8 + $0x30] sm:$0xff]  }
  0x66   :  { %2977 = vmatprep.subr.bf16.mxu0 %v3282_v15  ;;  %2850 = vmatpush3.bf16.msra.mxu1 %v3281_v14  ;;  %v3346_v14 = vld [vmem:[%s4087_s8 + $0x38] sm:$0xff]  }
  0x67   :  { %2867 = vmatprep.subr.bf16.mxu1 %v3286_v19 }
  0x69   :  { %2978 = vmatpush3.bf16.msra.mxu0 %v3282_v15  ;;  %2852 = vmatmul.mubr.bf16.vlgmr.msra.gmra.mrb[0].mxu1 %v3285_v18  ;;  %v3345_v15 = vld [vmem:[%s4087_s8 + $0x18] sm:$0xff]  }
  0x6a   :  { %2995 = vmatprep.subr.bf16.mxu0 %v3288_v20  ;;  %2868 = vmatpush3.bf16.msra.mxu1 %v3286_v19 }
  0x6b   :  { %2869 = vmatprep.subr.bf16.mxu1 %v3289_v22  ;;  %2855 = vmatprep.mubr.bf16.mxu1 %v3291_v24 }
  0x6c   :  { %2980 = vmatmul.mubr.bf16.vlgmr.msra.gmra.mrb[0].mxu0 %v3287_v21 }
  0x6d   :  { %2996 = vmatpush3.bf16.msra.mxu0 %v3288_v20  ;;  %2983 = vmatprep.mubr.bf16.mxu0 %v3292_v25 }
  0x6e   :  { %2997 = vmatprep.subr.bf16.mxu0 %v3290_v23  ;;  %2870 = vmatpush3.bf16.msra.mxu1 %v3289_v22 }
  0x6f   :  { %2871 = vmatprep.subr.bf16.mxu1 %v3294_v27 }
  0x71   :  { %2998 = vmatpush3.bf16.msra.mxu0 %v3290_v23  ;;  %2856 = vmatmul.mubr.bf16.gmra.mrb[4].mxu1 %v3293_v26 }
  0x72   :  { %2999 = vmatprep.subr.bf16.mxu0 %v3296_v28  ;;  %2872 = vmatpush3.bf16.msra.mxu1 %v3294_v27 }
  0x73   :  { %2873 = vmatprep.subr.bf16.mxu1 %v3297_v30  ;;  %2859 = vmatprep.mubr.bf16.mxu1 %v3299_v32 }
  0x74   :  { %2984 = vmatmul.mubr.bf16.gmra.mrb[4].mxu0 %v3295_v29 }
  0x75   :  { %3000 = vmatpush3.bf16.msra.mxu0 %v3296_v28  ;;  %2987 = vmatprep.mubr.bf16.mxu0 %v3300_v33 }
  0x76   :  { %3001 = vmatprep.subr.bf16.mxu0 %v3298_v31  ;;  %2874 = vmatpush3.bf16.msra.mxu1 %v3297_v30 }
  0x77   :  { %2875 = vmatprep.subr.bf16.mxu1 %v3302_v35 }
  0x79   :  { %3002 = vmatpush3.bf16.msra.mxu0 %v3298_v31  ;;  %2860 = vmatmul.mubr.bf16.gmra.mrb[8].mxu1 %v3301_v34 }
  0x7a   :  { %3003 = vmatprep.subr.bf16.mxu0 %v3304_v36  ;;  %2876 = vmatpush3.bf16.msra.mxu1 %v3302_v35 }
  0x7b   :  { %2877 = vmatprep.subr.bf16.mxu1 %v3305_v38  ;;  %2863 = vmatprep.mubr.bf16.mxu1 %v3307_v40 }
  0x7c   :  { %2988 = vmatmul.mubr.bf16.gmra.mrb[8].mxu0 %v3303_v37 }
  0x7d   :  { %3004 = vmatpush3.bf16.msra.mxu0 %v3304_v36  ;;  %2991 = vmatprep.mubr.bf16.mxu0 %v3308_v41 }
  0x7e   :  { %3005 = vmatprep.subr.bf16.mxu0 %v3306_v39  ;;  %2878 = vmatpush3.bf16.msra.mxu1 %v3305_v38 }
  0x7f   :  { %2879 = vmatprep.subr.bf16.mxu1 %v3310_v43 }
  0x81   :  { %3006 = vmatpush3.bf16.msra.mxu0 %v3306_v39  ;;  %2864 = vmatmul.mubr.bf16.gmra.mrb[12].mxu1 %v3309_v42 }
  0x82   :  { %3007 = vmatprep.subr.bf16.mxu0 %v3312_v44  ;;  %2880 = vmatpush3.bf16.msra.mxu1 %v3310_v43 }
  0x83   :  { %2881 = vmatprep.subr.bf16.mxu1 %v3313_v46  ;;  %2883 = vmatprep.mubr.bf16.mxu1 %v3315_v48  ;;  %v3958_v48 = vld [vmem:[%s4088_s18] ss:$0 sm:$0xff] }
  0x84   :  { %2992 = vmatmul.mubr.bf16.gmra.mrb[12].mxu0 %v3311_v45 }
  0x85   :  { %3008 = vmatpush3.bf16.msra.mxu0 %v3312_v44  ;;  %3011 = vmatprep.mubr.bf16.mxu0 %v3316_v49 }
  0x86   :  { %3009 = vmatprep.subr.bf16.mxu0 %v3314_v47  ;;  %2882 = vmatpush3.bf16.msra.mxu1 %v3313_v46 }
  0x87   :  { %3059 = vmatprep.subr.bf16.mxu1 %v3319_v50 }
  0x89   :  { %3010 = vmatpush3.bf16.msra.mxu0 %v3314_v47  ;;  %2884 = vmatmul.mubr.bf16.vlgmr.msra.gmra.mrb[0].mxu1 %v3317_v51 }
  0x8a   :  { %3027 = vmatprep.subr.bf16.mxu0 %v3319_v50  ;;  %3067 = vmatpush3.bf16.msra.mxu1 %v3319_v50 }
  0x8b   :  { %3060 = vmatprep.subr.bf16.mxu1 %v3320_v53  ;;  %2887 = vmatprep.mubr.bf16.mxu1 %v3321_v54 }
  0x8c   :  { %3012 = vmatmul.mubr.bf16.vlgmr.msra.gmra.mrb[0].mxu0 %v3318_v52 }
  0x8d   :  { %3028 = vmatpush3.bf16.msra.mxu0 %v3319_v50  ;;  %3015 = vmatprep.mubr.bf16.mxu0 %v3322_v55 }
  0x8e   :  { %3029 = vmatprep.subr.bf16.mxu0 %v3320_v53  ;;  %3068 = vmatpush3.bf16.msra.mxu1 %v3320_v53 }
  0x8f   :  { %3061 = vmatprep.subr.bf16.mxu1 %v3325_v56 }
  0x91   :  { %3030 = vmatpush3.bf16.msra.mxu0 %v3320_v53  ;;  %2888 = vmatmul.mubr.bf16.gmra.mrb[4].mxu1 %v3323_v57 }
  0x92   :  { %3031 = vmatprep.subr.bf16.mxu0 %v3325_v56  ;;  %3069 = vmatpush3.bf16.msra.mxu1 %v3325_v56 }
  0x93   :  { %3062 = vmatprep.subr.bf16.mxu1 %v3326_v59  ;;  %2891 = vmatprep.mubr.bf16.mxu1 %v3327_v60 }
  0x94   :  { %3016 = vmatmul.mubr.bf16.gmra.mrb[4].mxu0 %v3324_v58 }
  0x95   :  { %3032 = vmatpush3.bf16.msra.mxu0 %v3325_v56  ;;  %3019 = vmatprep.mubr.bf16.mxu0 %v3328_v61 }
  0x96   :  { %3033 = vmatprep.subr.bf16.mxu0 %v3326_v59  ;;  %3070 = vmatpush3.bf16.msra.mxu1 %v3326_v59 }
  0x97   :  { %3063 = vmatprep.subr.bf16.mxu1 %v3331_v62 }
  0x99   :  { %3034 = vmatpush3.bf16.msra.mxu0 %v3326_v59  ;;  %2892 = vmatmul.mubr.bf16.gmra.mrb[8].mxu1 %v3329_v63 }
  0x9a   :  { %3035 = vmatprep.subr.bf16.mxu0 %v3331_v62  ;;  %3071 = vmatpush3.bf16.msra.mxu1 %v3331_v62 }
  0x9b   :  { %3064 = vmatprep.subr.bf16.mxu1 %v3332_v1  ;;  %2895 = vmatprep.mubr.bf16.mxu1 %v3333_v2 }
  0x9c   :  { %3020 = vmatmul.mubr.bf16.gmra.mrb[8].mxu0 %v3330_v0 }
  0x9d   :  { %3036 = vmatpush3.bf16.msra.mxu0 %v3331_v62  ;;  %3023 = vmatprep.mubr.bf16.mxu0 %v3334_v3 }
  0x9e   :  { %3037 = vmatprep.subr.bf16.mxu0 %v3332_v1  ;;  %3072 = vmatpush3.bf16.msra.mxu1 %v3332_v1 }
  0x9f   :  { %3065 = vmatprep.subr.bf16.mxu1 %v3337_v4 }
  0xa1   :  { %3038 = vmatpush3.bf16.msra.mxu0 %v3332_v1  ;;  %2896 = vmatmul.mubr.bf16.gmra.mrb[12].mxu1 %v3335_v5 }
  0xa2   :  { %3039 = vmatprep.subr.bf16.mxu0 %v3337_v4  ;;  %3073 = vmatpush3.bf16.msra.mxu1 %v3337_v4 }
  0xa3   :  { %3066 = vmatprep.subr.bf16.mxu1 %v3338_v7  ;;  %3051 = vmatprep.mubr.bf16.mxu1 %v3340_v9 }
  0xa4   :  { %3024 = vmatmul.mubr.bf16.gmra.mrb[12].mxu0 %v3336_v6 }
  0xa5   :  { %3040 = vmatpush3.bf16.msra.mxu0 %v3337_v4  ;;  %3043 = vmatprep.mubr.bf16.mxu0 %v3339_v8 }
  0xa6   :  { %3041 = vmatprep.subr.bf16.mxu0 %v3338_v7  ;;  %3074 = vmatpush3.bf16.msra.mxu1 %v3338_v7 }
  0xa9   :  { %3042 = vmatpush3.bf16.msra.mxu0 %v3338_v7  ;;  %3052 = vmatmul.mubr.bf16.vlgmr.msra.gmra.mrb[16].mxu1 %v3342_v10 }
  0xaa   :  { %3055 = vmatprep.mubr.bf16.mxu1 %v3344_v12 }
  0xac   :  { %3044 = vmatmul.mubr.bf16.vlgmr.msra.gmra.mrb[0].mxu0 %v3341_v11 }
  0xad   :  { %3047 = vmatprep.mubr.bf16.mxu0 %v3343_v13 }
  0xb1   :  { %3056 = vmatmul.mubr.bf16.gmra.mrb[20].mxu1 %v3346_v14 }
  0xb4   :  { %3048 = vmatmul.mubr.bf16.gmra.mrb[4].mxu0 %v3345_v15 }
 0x15c   :  { %v2885_v16 = vpop.f32.mrb[0].mxu1 }
 0x15d   :  { %v916_v17 = vpop.f32.mrb[1].mxu1 }
 0x15e   :  { %v2886_v18 = vpop.f32.mrb[2].mxu1 }
 0x15f   :  { %v919_v19 = vpop.f32.mrb[3].mxu1 }
 0x164   :  { %v3943_v20 = vpop.f32.mrb[4].mxu1 }
 0x165   :  { %v3945_v21 = vpop.f32.mrb[5].mxu1 }
 0x166   :  { %v3947_v22 = vpop.f32.mrb[6].mxu1 }
 0x167   :  { %v3949_v23 = vpop.f32.mrb[7].mxu1 }
 0x16c   :  { %v2893_v24 = vpop.f32.mrb[8].mxu1 }
 0x16d   :  { %v948_v26 = vpop.f32.mrb[9].mxu1 }
 0x16e   :  { %v2894_v29 = vpop.f32.mrb[10].mxu1 }
 0x16f   :  { %v3021_v25 = vpop.f32.mrb[8].mxu0  ;;  %v951_v32 = vpop.f32.mrb[11].mxu1 }
 0x170   :  { %v3083_v27 = vadd.f32 %v3021_v25, %v2893_v24  ;;  %v1912_v28 = vpop.f32.mrb[9].mxu0 }
 0x171   :  { %v3085_v30 = vadd.f32 %v1912_v28, %v948_v26  ;;  %v3022_v31 = vpop.f32.mrb[10].mxu0 }
 0x172   :  { %v3087_v33 = vadd.f32 %v3022_v31, %v2894_v29  ;;  %v1915_v34 = vpop.f32.mrb[11].mxu0 }
 0x173   :  { %v3089_v35 = vadd.f32 %v1915_v34, %v951_v32 }
 0x174   :  { %v2897_v36 = vpop.f32.mrb[12].mxu1 }
 0x175   :  { %v964_v38 = vpop.f32.mrb[13].mxu1 }
 0x176   :  { %v2898_v41 = vpop.f32.mrb[14].mxu1 }
 0x177   :  { %v3025_v37 = vpop.f32.mrb[12].mxu0  ;;  %v967_v44 = vpop.f32.mrb[15].mxu1 }
 0x178   :  { %v3091_v39 = vadd.f32 %v3025_v37, %v2897_v36  ;;  %v1928_v40 = vpop.f32.mrb[13].mxu0 }
 0x179   :  { %v3093_v42 = vadd.f32 %v1928_v40, %v964_v38  ;;  %v3026_v43 = vpop.f32.mrb[14].mxu0 }
 0x17a   :  { %v3951_v45 = vadd.f32 %v3026_v43, %v2898_v41  ;;  %v1931_v46 = vpop.f32.mrb[15].mxu0 }
 0x17b   :  { %v3953_v47 = vadd.f32 %v1931_v46, %v967_v44 }
 0x17c   :  { %v3053_v49 = vpop.f32.mrb[16].mxu1 }
 0x17d   :  { %v3084_v51 = vadd.f32 %v3083_v27, %v3053_v49  ;;  %v2153_v52 = vpop.f32.mrb[17].mxu1 }
 0x17e   :  { %v3086_v55 = vadd.f32 %v3085_v30, %v2153_v52  ;;  %v3054_v56 = vpop.f32.mrb[18].mxu1 }
 0x17f   :  { %v3045_v50 = vpop.f32.mrb[0].mxu0  ;;  %v3961_v57 = vadd.f32 %v3084_v51, %v3958_v48  ;;  %v3088_v60 = vadd.f32 %v3087_v33, %v3054_v56  ;;  %v2156_v61 = vpop.f32.mrb[19].mxu1 }
 0x180   :  { %v3075_v53 = vadd.f32 %v3045_v50, %v2885_v16  ;;  %v2121_v54 = vpop.f32.mrb[1].mxu0  ;;  %v3967_v63 = vadd.f32 %v3086_v55, %v3958_v48  ;;  %v3090_v2 = vadd.f32 %v3089_v35, %v2156_v61 }
 0x181   :  { %v3076_v58 = vadd.f32 %v2121_v54, %v916_v17  ;;  %v3046_v59 = vpop.f32.mrb[2].mxu0  ;;  %v2233_v3 = vsub.f32 0.0, %v3961_v57  ;;  %v3974_v5 = vadd.f32 %v3088_v60, %v3958_v48 }
 0x182   :  { %v3964_v62 = vadd.f32 %v3075_v53, %v3958_v48  ;;  %v3077_v0 = vadd.f32 %v3046_v59, %v2886_v18  ;;  %v2124_v1 = vpop.f32.mrb[3].mxu0  ;;  %v2231_v8 = vsub.f32 0.0, %v3967_v63  ;;  %v3982_v10 = vadd.f32 %v3090_v2, %v3958_v48 }
 0x183   :  { %v3971_v4 = vadd.f32 %v3076_v58, %v3958_v48  ;;  %v3078_v6 = vadd.f32 %v2124_v1, %v919_v19  ;;  %v2259_v11 = vmul.f32 1.442695, %v2233_v3  ;;  %v2234_v13 = vsub.f32 0.0, %v3974_v5 }
 0x184   :  { %v2225_v7 = vsub.f32 0.0, %v3964_v62  ;;  %v3979_v9 = vadd.f32 %v3077_v0, %v3958_v48  ;;  %v2255_v16 = vmul.f32 1.442695, %v2231_v8  ;;  %v2232_v18 = vsub.f32 0.0, %v3982_v10  ;;  %v3057_v30 = vpop.f32.mrb[20].mxu1 }
 0x185   :  { %v2223_v12 = vsub.f32 0.0, %v3971_v4  ;;  %v3987_v14 = vadd.f32 %v3078_v6, %v3958_v48  ;;  %3347 = vpow2.f32 %v2259_v11  ;;  %v2261_v24 = vmul.f32 1.442695, %v2234_v13  ;;  %v2169_v35 = vpop.f32.mrb[21].mxu1 }
 0x186   :  { %v2243_v15 = vmul.f32 1.442695, %v2225_v7  ;;  %v2226_v17 = vsub.f32 0.0, %v3979_v9  ;;  %v2257_v28 = vmul.f32 1.442695, %v2232_v18  ;;  %v3092_v33 = vadd.f32 %v3091_v39, %v3057_v30  ;;  %v3058_v41 = vpop.f32.mrb[22].mxu1 }
 0x187   :  { %v2239_v19 = vmul.f32 1.442695, %v2223_v12  ;;  %v2224_v25 = vsub.f32 0.0, %v3987_v14  ;;  %v3049_v26 = vpop.f32.mrb[4].mxu0  ;;  %v3094_v38 = vadd.f32 %v3093_v42, %v2169_v35  ;;  %v2172_v39 = vpop.f32.mrb[23].mxu1 }
 0x188   :  { %3349 = vpow2.f32 %v2243_v15  ;;  %v2245_v27 = vmul.f32 1.442695, %v2226_v17  ;;  %v3079_v29 = vadd.f32 %v3049_v26, %v3943_v20  ;;  %v2137_v31 = vpop.f32.mrb[5].mxu0  ;;  %v3999_v20 = vadd.f32 %v3092_v33, %v3958_v48 }
 0x189   :  { %3351 = vpow2.f32 %v2239_v19  ;;  %v2241_v32 = vmul.f32 1.442695, %v2224_v25  ;;  %v3080_v34 = vadd.f32 %v2137_v31, %v3945_v21  ;;  %v3050_v36 = vpop.f32.mrb[6].mxu0  ;;  %v3096_v21 = vadd.f32 %v3951_v45, %v3058_v41 }
 0x18a   :  { %3353 = vpow2.f32 %v2255_v16  ;;  %v3995_v37 = vadd.f32 %v3079_v29, %v3958_v48  ;;  %v3081_v40 = vadd.f32 %v3050_v36, %v3947_v22  ;;  %v2140_v43 = vpop.f32.mrb[7].mxu0  ;;  %v4007_v49 = vadd.f32 %v3094_v38, %v3958_v48 }
 0x18b   :  { %3355 = vpow2.f32 %v2245_v27  ;;  %v4002_v44 = vadd.f32 %v3080_v34, %v3958_v48  ;;  %v2237_v22 = vsub.f32 0.0, %v3999_v20  ;;  %v3082_v45 = vadd.f32 %v2140_v43, %v3949_v23 }
 0x18c   :  { %3357 = vpow2.f32 %v2261_v24  ;;  %v2229_v46 = vsub.f32 0.0, %v3995_v37  ;;  %v2235_v51 = vsub.f32 0.0, %v4007_v49  ;;  %v4014_v55 = vadd.f32 %v3081_v40, %v3958_v48 }
 0x18d   :  { %3359 = vpow2.f32 %v2241_v32  ;;  %v2227_v42 = vsub.f32 0.0, %v4002_v44  ;;  %v2267_v52 = vmul.f32 1.442695, %v2237_v22  ;;  %v3098_v56 = vadd.f32 %v3953_v47, %v2172_v39 }
 0x18e   :  { %3361 = vpow2.f32 %v2257_v28  ;;  %v2251_v50 = vmul.f32 1.442695, %v2229_v46  ;;  %v2263_v54 = vmul.f32 1.442695, %v2235_v51  ;;  %v2230_v23 = vsub.f32 0.0, %v4014_v55 }
 0x18f   :  { %v2247_v53 = vmul.f32 1.442695, %v2227_v42  ;;  %v3348_v58 = vpop.eup %3347  ;;  %v4019_v7 = vadd.f32 %v3096_v21, %v3958_v48  ;;  %v4022_v11 = vadd.f32 %v3082_v45, %v3958_v48  ;;  %v4025_v15 = vadd.f32 %v3098_v56, %v3958_v48 }
 0x190   :  { %3363 = vpow2.f32 %v2251_v50  ;;  %v2281_v60 = vadd.f32 1.0, %v3348_v58  ;;  %v2253_v18 = vmul.f32 1.442695, %v2230_v23 }
 0x191   :  { %3365 = vpow2.f32 %v2267_v52  ;;  %v2238_v24 = vsub.f32 0.0, %v4019_v7  ;;  %v2228_v26 = vsub.f32 0.0, %v4022_v11  ;;  %v2236_v28 = vsub.f32 0.0, %v4025_v15 }
 0x192   :  { %v3350_v59 = vpop.eup %3349  ;;  %3367 = vpow2.f32 %v2247_v53 }
 0x193   :  { %v3352_v61 = vpop.eup %3351  ;;  %v2273_v0 = vadd.f32 1.0, %v3350_v59  ;;  %3369 = vpow2.f32 %v2263_v54  ;;  %v2269_v30 = vmul.f32 1.442695, %v2238_v24  ;;  %v2249_v32 = vmul.f32 1.442695, %v2228_v26 }
 0x194   :  { %v3354_v1 = vpop.eup %3353  ;;  %3371 = vrcp.f32 %v2281_v60  ;;  %v2271_v2 = vadd.f32 1.0, %v3352_v61  ;;  %v2265_v34 = vmul.f32 1.442695, %v2236_v28 }
 0x195   :  { %v3356_v3 = vpop.eup %3355  ;;  %3373 = vrcp.f32 %v2273_v0  ;;  %v2279_v6 = vadd.f32 1.0, %v3354_v1 }
 0x196   :  { %v3358_v47 = vpop.eup %3357  ;;  %3375 = vrcp.f32 %v2271_v2  ;;  %v2274_v8 = vadd.f32 1.0, %v3356_v3 }
 0x197   :  { %v3360_v12 = vpop.eup %3359  ;;  %3377 = vrcp.f32 %v2279_v6  ;;  %v2282_v13 = vadd.f32 1.0, %v3358_v47 }
 0x198   :  { %v3362_v16 = vpop.eup %3361  ;;  %3379 = vrcp.f32 %v2274_v8  ;;  %v2272_v17 = vadd.f32 1.0, %v3360_v12 }
 0x199   :  { %3381 = vrcp.f32 %v2282_v13  ;;  %v2280_v19 = vadd.f32 1.0, %v3362_v16 }
 0x19a   :  { %v3364_v25 = vpop.eup %3363  ;;  %3383 = vrcp.f32 %v2272_v17 }
 0x19b   :  { %v3366_v27 = vpop.eup %3365  ;;  %3385 = vrcp.f32 %v2280_v19  ;;  %v2277_v21 = vadd.f32 1.0, %v3364_v25 }
 0x19c   :  { %v3368_v29 = vpop.eup %3367  ;;  %3387 = vpow2.f32 %v2253_v18 }
 0x19d   :  { %v3370_v48 = vpop.eup %3369  ;;  %3389 = vpow2.f32 %v2269_v30 }
 0x19e   :  { %v3372_v31 = vpop.eup %3371  ;;  %3391 = vpow2.f32 %v2249_v32 }
 0x19f   :  { %v3374_v33 = vpop.eup %3373  ;;  %3393 = vpow2.f32 %v2265_v34  ;;  %v2313_v46 = vmul.f32 %v3372_v31, %v3961_v57  ;;  %v2285_v57 = vadd.f32 1.0, %v3366_v27 }
 0x1a0   :  { %v3376_v35 = vpop.eup %3375  ;;  %v2305_v41 = vmul.f32 %v3374_v33, %v3964_v62  ;;  %3395 = vrcp.f32 %v2277_v21 }
 0x1a1   :  { %v3378_v36 = vpop.eup %3377  ;;  %v2303_v50 = vmul.f32 %v3376_v35, %v3971_v4 }
 0x1a2   :  { %v3380_v38 = vpop.eup %3379  ;;  %v2311_v45 = vmul.f32 %v3378_v36, %v3967_v63  ;;  %v2283_v63 = vadd.f32 1.0, %v3370_v48 }
 0x1a3   :  { %v3382_v40 = vpop.eup %3381  ;;  %v2306_v43 = vmul.f32 %v3380_v38, %v3979_v9 }
 0x1a4   :  { %v3384_v39 = vpop.eup %3383  ;;  %v2314_v22 = vmul.f32 %v3382_v40, %v3974_v5 }
 0x1a5   :  { %v3386_v42 = vpop.eup %3385  ;;  %v2588_v51 = vpack.c.bf16 %v2306_v43, %v2305_v41  ;;  %v2304_v52 = vmul.f32 %v3384_v39, %v3987_v14  ;;  %v2275_v14 = vadd.f32 1.0, %v3368_v29 }
 0x1a6   :  { %v3388_v53 = vpop.eup %3387  ;;  %v2608_v54 = vpack.c.bf16 %v2314_v22, %v2313_v46  ;;  %v2312_v62 = vmul.f32 %v3386_v42, %v3982_v10 }
 0x1a7   :  { %2620 = vst [vmem:[%s4089_s19 + $0x8] sm:$0xff] %v2588_v51   ;;  %v2583_v9 = vpack.c.bf16 %v2304_v52, %v2303_v50  ;;  %v2278_v5 = vadd.f32 1.0, %v3388_v53  ;;  %v3390_v10 = vpop.eup %3389 }
 0x1a8   :  { %2624 = vst [vmem:[%s4089_s19 + $0x28] sm:$0xff] %v2608_v54   ;;  %v2603_v4 = vpack.c.bf16 %v2312_v62, %v2311_v45  ;;  %v3392_v56 = vpop.eup %3391  ;;  %v2286_v58 = vadd.f32 1.0, %v3390_v10 }
 0x1a9   :  { %2584 = vst [vmem:[%s4089_s19] sm:$0xff] %v2583_v9   ;;  %3397 = vrcp.f32 %v2278_v5  ;;  %v3394_v59 = vpop.eup %3393  ;;  %v2276_v60 = vadd.f32 1.0, %v3392_v56 }
 0x1aa   :  { %2623 = vst [vmem:[%s4089_s19 + $0x20] sm:$0xff] %v2603_v4   ;;  %3399 = vrcp.f32 %v2285_v57  ;;  %v2284_v61 = vadd.f32 1.0, %v3394_v59  ;;  %v3396_v0 = vpop.eup %3395 }
 0x1ab   :  { %3401 = vrcp.f32 %v2275_v14  ;;  %v2309_v2 = vmul.f32 %v3396_v0, %v3995_v37 }
 0x1ac   :  { %3403 = vrcp.f32 %v2283_v63 }
 0x1ad   :  { %3405 = vrcp.f32 %v2286_v58 }
 0x1ae   :  { %3407 = vrcp.f32 %v2276_v60 }
 0x1af   :  { %3409 = vrcp.f32 %v2284_v61 }
 0x1b3   :  { %v3398_v1 = vpop.eup %3397 }
 0x1b4   :  { %v2310_v23 = vmul.f32 %v3398_v1, %v4014_v55  ;;  %v3400_v3 = vpop.eup %3399 }
 0x1b5   :  { %v3402_v6 = vpop.eup %3401  ;;  %v2317_v16 = vmul.f32 %v3400_v3, %v3999_v20 }
 0x1b6   :  { %v2598_v47 = vpack.c.bf16 %v2310_v23, %v2309_v2  ;;  %v3404_v8 = vpop.eup %3403  ;;  %v2307_v19 = vmul.f32 %v3402_v6, %v4002_v44 }
 0x1b7   :  { %v3406_v12 = vpop.eup %3405  ;;  %v2315_v55 = vmul.f32 %v3404_v8, %v4007_v49 }
 0x1b8   :  { %2622 = vst [vmem:[%s4089_s19 + $0x18] sm:$0xff] %v2598_v47   ;;  %v3408_v13 = vpop.eup %3407  ;;  %v2318_v17 = vmul.f32 %v3406_v12, %v4019_v7 }
 0x1b9   :  { %v3410_v18 = vpop.eup %3409  ;;  %v2308_v37 = vmul.f32 %v3408_v13, %v4022_v11 }
 0x1ba   :  { %v2618_v24 = vpack.c.bf16 %v2318_v17, %v2317_v16  ;;  %v2316_v25 = vmul.f32 %v3410_v18, %v4025_v15 }
 0x1bb   :  { %v2593_v26 = vpack.c.bf16 %v2308_v37, %v2307_v19 }
 0x1bc   :  { %2626 = vst [vmem:[%s4089_s19 + $0x38] sm:$0xff] %v2618_v24   ;;  %v2613_v27 = vpack.c.bf16 %v2316_v25, %v2315_v55 }
 0x1bd   :  { %2621 = vst [vmem:[%s4089_s19 + $0x10] sm:$0xff] %v2593_v26  }
 0x1be   :  { %2625 = vst [vmem:[%s4089_s19 + $0x30] sm:$0xff] %v2613_v27  }

// kernel: neck_forward.22
= control target key start
LH: loop header
LB: loop body
LE: loop exit
PB: predicated region body
PF: predicated region fallthrough
CT: control target
= control target key end

     0   :  { %v3768_v1 = vmov 0   ;;  %s5263_s3 = inlined_call_operand.vmem [shape: bf16[128,256], index: 3, kind: input, shape index: {}]   ;;  %s5264_s2 = inlined_call_operand.vmem [shape: bf16[128,256], index: 2, kind: input, shape index: {}]   ;;  %s5265_s1 = inlined_call_operand.vmem [shape: bf16[512,128], index: 1, kind: input, shape index: {}]   ;;  %s5266_s0 = inlined_call_operand.vmem [shape: bf16[512,128], index: 0, kind: input, shape index: {}]   ;;  %s5267_s4 = inlined_call_operand.vmem [shape: f32[1,256], index: 4, kind: input, shape index: {}]   ;;  %s5268_s5 = inlined_call_operand.vmem [shape: bf16[512,256], index: 5, kind: output, shape index: {}]  }
   0x1   :  { %v3144_v0 = vld [vmem:[%s5263_s3 + $0x4] ss:$8 sps:$4 sm:$0xff]   ;;  %485 = vmatprep.mubr.bf16.mxu1 %v3768_v1  ;;  %1110 = vmatprep.mubr.bf16.mxu0 %v3768_v1  ;;  %v3148_v3 = vld [vmem:[%s5263_s3] ss:$8 sps:$4 sm:$0xff]   ;;  %v3150_v5 = vld [vmem:[%s5263_s3 + $0x14] ss:$8 sps:$4 sm:$0xff]  }
   0x2   :  { %v3146_v2 = vld [vmem:[%s5264_s2 + $0x4] ss:$8 sps:$4 sm:$0xff]   ;;  %453 = vmatprep.subr.bf16.mxu1 %v3144_v0  ;;  %v3149_v4 = vld [vmem:[%s5264_s2] ss:$8 sps:$4 sm:$0xff]   ;;  %v3152_v6 = vld [vmem:[%s5264_s2 + $0x14] ss:$8 sps:$4 sm:$0xff]  }
   0x3   :  { %1078 = vmatprep.subr.bf16.mxu0 %v3146_v2  ;;  %454 = vmatpush1.bf16.msra.mxu1 %v3148_v3  ;;  %v3154_v7 = vld [vmem:[%s5263_s3 + $0x10] ss:$8 sps:$4 sm:$0xff]   ;;  %v3156_v9 = vld [vmem:[%s5263_s3 + $0x24] ss:$8 sps:$4 sm:$0xff]   ;;  %v3160_v11 = vld [vmem:[%s5263_s3 + $0x20] ss:$8 sps:$4 sm:$0xff]  }
   0x4   :  { %1079 = vmatpush1.bf16.msra.mxu0 %v3149_v4  ;;  %455 = vmatprep.subr.bf16.mxu1 %v3150_v5  ;;  %v3155_v8 = vld [vmem:[%s5264_s2 + $0x10] ss:$8 sps:$4 sm:$0xff]   ;;  %v3158_v10 = vld [vmem:[%s5264_s2 + $0x24] ss:$8 sps:$4 sm:$0xff]   ;;  %v3161_v12 = vld [vmem:[%s5264_s2 + $0x20] ss:$8 sps:$4 sm:$0xff]  }
   0x5   :  { %1080 = vmatprep.subr.bf16.mxu0 %v3152_v6  ;;  %v3162_v13 = vld [vmem:[%s5263_s3 + $0x34] ss:$8 sps:$4 sm:$0xff]   ;;  %v3166_v15 = vld [vmem:[%s5263_s3 + $0x30] ss:$8 sps:$4 sm:$0xff]   ;;  %v3168_v17 = vld [vmem:[%s5263_s3 + $0x44] ss:$8 sps:$4 sm:$0xff]  }
   0x6   :  { %v3164_v14 = vld [vmem:[%s5264_s2 + $0x34] ss:$8 sps:$4 sm:$0xff]   ;;  %v3167_v16 = vld [vmem:[%s5264_s2 + $0x30] ss:$8 sps:$4 sm:$0xff]   ;;  %v3170_v18 = vld [vmem:[%s5264_s2 + $0x44] ss:$8 sps:$4 sm:$0xff]  }
   0x7   :  { %456 = vmatpush1.bf16.msra.mxu1 %v3154_v7  ;;  %v3172_v19 = vld [vmem:[%s5263_s3 + $0x40] ss:$8 sps:$4 sm:$0xff]   ;;  %v3174_v21 = vld [vmem:[%s5263_s3 + $0x54] ss:$8 sps:$4 sm:$0xff]   ;;  %v3178_v23 = vld [vmem:[%s5263_s3 + $0x50] ss:$8 sps:$4 sm:$0xff]  }
   0x8   :  { %1081 = vmatpush1.bf16.msra.mxu0 %v3155_v8  ;;  %457 = vmatprep.subr.bf16.mxu1 %v3156_v9  ;;  %v3173_v20 = vld [vmem:[%s5264_s2 + $0x40] ss:$8 sps:$4 sm:$0xff]   ;;  %v3176_v22 = vld [vmem:[%s5264_s2 + $0x54] ss:$8 sps:$4 sm:$0xff]   ;;  %v3179_v24 = vld [vmem:[%s5264_s2 + $0x50] ss:$8 sps:$4 sm:$0xff]  }
   0x9   :  { %1082 = vmatprep.subr.bf16.mxu0 %v3158_v10  ;;  %v3180_v25 = vld [vmem:[%s5263_s3 + $0x64] ss:$8 sps:$4 sm:$0xff]   ;;  %v3184_v27 = vld [vmem:[%s5263_s3 + $0x60] ss:$8 sps:$4 sm:$0xff]   ;;  %v3186_v29 = vld [vmem:[%s5263_s3 + $0x74] ss:$8 sps:$4 sm:$0xff]  }
   0xa   :  { %v3182_v26 = vld [vmem:[%s5264_s2 + $0x64] ss:$8 sps:$4 sm:$0xff]   ;;  %v3185_v28 = vld [vmem:[%s5264_s2 + $0x60] ss:$8 sps:$4 sm:$0xff]   ;;  %v3188_v30 = vld [vmem:[%s5264_s2 + $0x74] ss:$8 sps:$4 sm:$0xff]  }
   0xb   :  { %458 = vmatpush1.bf16.msra.mxu1 %v3160_v11  ;;  %v3190_v31 = vld [vmem:[%s5263_s3 + $0x70] ss:$8 sps:$4 sm:$0xff]   ;;  %v3192_v33 = vld [vmem:[%s5265_s1] sm:$0xff]   ;;  %v3194_v35 = vld [vmem:[%s5265_s1 + $0x8] sm:$0xff]  }
   0xc   :  { %1083 = vmatpush1.bf16.msra.mxu0 %v3161_v12  ;;  %459 = vmatprep.subr.bf16.mxu1 %v3162_v13  ;;  %v3191_v32 = vld [vmem:[%s5264_s2 + $0x70] ss:$8 sps:$4 sm:$0xff]   ;;  %v3193_v34 = vld [vmem:[%s5266_s0] sm:$0xff]   ;;  %v3195_v36 = vld [vmem:[%s5266_s0 + $0x8] sm:$0xff]  }
   0xd   :  { %1084 = vmatprep.subr.bf16.mxu0 %v3164_v14  ;;  %v3196_v37 = vld [vmem:[%s5265_s1 + $0x10] sm:$0xff]   ;;  %v3198_v39 = vld [vmem:[%s5265_s1 + $0x18] sm:$0xff]   ;;  %v3200_v41 = vld [vmem:[%s5265_s1 + $0x20] sm:$0xff]  }
   0xe   :  { %v3197_v38 = vld [vmem:[%s5266_s0 + $0x10] sm:$0xff]   ;;  %v3199_v40 = vld [vmem:[%s5266_s0 + $0x18] sm:$0xff]   ;;  %v3201_v42 = vld [vmem:[%s5266_s0 + $0x20] sm:$0xff]  }
   0xf   :  { %460 = vmatpush1.bf16.msra.mxu1 %v3166_v15  ;;  %v3202_v43 = vld [vmem:[%s5265_s1 + $0x28] sm:$0xff]   ;;  %v3204_v45 = vld [vmem:[%s5265_s1 + $0x30] sm:$0xff]   ;;  %v3206_v47 = vld [vmem:[%s5265_s1 + $0x38] sm:$0xff]  }
  0x10   :  { %1085 = vmatpush1.bf16.msra.mxu0 %v3167_v16  ;;  %461 = vmatprep.subr.bf16.mxu1 %v3168_v17  ;;  %v3203_v44 = vld [vmem:[%s5266_s0 + $0x28] sm:$0xff]   ;;  %v3205_v46 = vld [vmem:[%s5266_s0 + $0x30] sm:$0xff]   ;;  %v3207_v48 = vld [vmem:[%s5266_s0 + $0x38] sm:$0xff]  }
  0x11   :  { %1086 = vmatprep.subr.bf16.mxu0 %v3170_v18  ;;  %v3208_v49 = vld [vmem:[%s5265_s1 + $0x40] sm:$0xff]   ;;  %v3210_v51 = vld [vmem:[%s5265_s1 + $0x48] sm:$0xff]   ;;  %v3212_v53 = vld [vmem:[%s5265_s1 + $0x50] sm:$0xff]  }
  0x12   :  { %v3209_v50 = vld [vmem:[%s5266_s0 + $0x40] sm:$0xff]   ;;  %v3211_v52 = vld [vmem:[%s5266_s0 + $0x48] sm:$0xff]   ;;  %v3213_v54 = vld [vmem:[%s5266_s0 + $0x50] sm:$0xff]  }
  0x13   :  { %462 = vmatpush1.bf16.msra.mxu1 %v3172_v19  ;;  %v3214_v55 = vld [vmem:[%s5265_s1 + $0x58] sm:$0xff]   ;;  %v3216_v57 = vld [vmem:[%s5265_s1 + $0x60] sm:$0xff]   ;;  %v3218_v59 = vld [vmem:[%s5265_s1 + $0x68] sm:$0xff]  }
  0x14   :  { %1087 = vmatpush1.bf16.msra.mxu0 %v3173_v20  ;;  %463 = vmatprep.subr.bf16.mxu1 %v3174_v21  ;;  %v3215_v56 = vld [vmem:[%s5266_s0 + $0x58] sm:$0xff]   ;;  %v3217_v58 = vld [vmem:[%s5266_s0 + $0x60] sm:$0xff]   ;;  %v3219_v60 = vld [vmem:[%s5266_s0 + $0x68] sm:$0xff]  }
  0x15   :  { %1088 = vmatprep.subr.bf16.mxu0 %v3176_v22  ;;  %v3220_v61 = vld [vmem:[%s5265_s1 + $0x70] sm:$0xff]   ;;  %v3222_v63 = vld [vmem:[%s5265_s1 + $0x78] sm:$0xff]   ;;  %v3224_v2 = vld [vmem:[%s5265_s1 + $0x80] sm:$0xff]   ;;  %v1433_v22 = vlaneseq }
  0x16   :  { %v3221_v62 = vld [vmem:[%s5266_s0 + $0x70] sm:$0xff]   ;;  %v3223_v0 = vld [vmem:[%s5266_s0 + $0x78] sm:$0xff]   ;;  %v3225_v3 = vld [vmem:[%s5266_s0 + $0x80] sm:$0xff]  }
  0x17   :  { %464 = vmatpush1.bf16.msra.mxu1 %v3178_v23  ;;  %v3226_v4 = vld [vmem:[%s5265_s1 + $0x88] sm:$0xff]   ;;  %v3228_v6 = vld [vmem:[%s5265_s1 + $0x90] sm:$0xff]   ;;  %v3230_v8 = vld [vmem:[%s5265_s1 + $0x98] sm:$0xff]   ;;  %v1434_v23 = vshrl.u32 %v1433_v22, 7 }
  0x18   :  { %1089 = vmatpush1.bf16.msra.mxu0 %v3179_v24  ;;  %465 = vmatprep.subr.bf16.mxu1 %v3180_v25  ;;  %v3227_v5 = vld [vmem:[%s5266_s0 + $0x88] sm:$0xff]   ;;  %v3229_v7 = vld [vmem:[%s5266_s0 + $0x90] sm:$0xff]   ;;  %v3231_v9 = vld [vmem:[%s5266_s0 + $0x98] sm:$0xff]  }
  0x19   :  { %1090 = vmatprep.subr.bf16.mxu0 %v3182_v26  ;;  %v3232_v10 = vld [vmem:[%s5265_s1 + $0xa0] sm:$0xff]   ;;  %v3234_v12 = vld [vmem:[%s5265_s1 + $0xa8] sm:$0xff]   ;;  %v3236_v14 = vld [vmem:[%s5265_s1 + $0xb0] sm:$0xff]   ;;  %v1435_v26 = vsub.s32 0, %v1434_v23 }
  0x1a   :  { %v3233_v11 = vld [vmem:[%s5266_s0 + $0xa0] sm:$0xff]   ;;  %v3235_v13 = vld [vmem:[%s5266_s0 + $0xa8] sm:$0xff]   ;;  %v3237_v15 = vld [vmem:[%s5266_s0 + $0xb0] sm:$0xff]  }
  0x1b   :  { %466 = vmatpush1.bf16.msra.mxu1 %v3184_v27  ;;  %v3238_v16 = vld [vmem:[%s5265_s1 + $0xb8] sm:$0xff]   ;;  %v3240_v18 = vld [vmem:[%s5265_s1 + $0xc0] sm:$0xff]   ;;  %v3242_v20 = vld [vmem:[%s5265_s1 + $0xc8] sm:$0xff]  }
  0x1c   :  { %1091 = vmatpush1.bf16.msra.mxu0 %v3185_v28  ;;  %467 = vmatprep.subr.bf16.mxu1 %v3186_v29  ;;  %v3239_v17 = vld [vmem:[%s5266_s0 + $0xb8] sm:$0xff]   ;;  %v3241_v19 = vld [vmem:[%s5266_s0 + $0xc0] sm:$0xff]   ;;  %v3243_v21 = vld [vmem:[%s5266_s0 + $0xc8] sm:$0xff]   ;;  %v1439_v28 = vsub.s32 1, %v1434_v23 }
  0x1d   :  { %1092 = vmatprep.subr.bf16.mxu0 %v3188_v30  ;;  %v3244_v24 = vld [vmem:[%s5265_s1 + $0xd0] sm:$0xff]   ;;  %v1431_v27 = vld [vmem:[%s5267_s4] sm:$0x3] }
  0x1e   :  { %v3245_v25 = vld [vmem:[%s5266_s0 + $0xd0] sm:$0xff]   ;;  %v4116_v29 = vrot.slane %v1431_v27, %v1435_v26 }
  0x1f   :  { %468 = vmatpush1.bf16.msra.mxu1 %v3190_v31 }
  0x20   :  { %1093 = vmatpush1.bf16.msra.mxu0 %v3191_v32  ;;  %v4118_v32 = vrot.slane %v1431_v27, %v1439_v28 }
  0x22   :  { %486 = vmatmul.mubr.bf16.vlgmr.msra.gmra.mrb[0].mxu1 %v3192_v33 }
  0x23   :  { %1111 = vmatmul.mubr.bf16.vlgmr.msra.gmra.mrb[0].mxu0 %v3193_v34  ;;  %495 = vmatprep.mubr.bf16.mxu1 %v3768_v1 }
  0x24   :  { %1120 = vmatprep.mubr.bf16.mxu0 %v3768_v1 }
  0x2a   :  { %496 = vmatmul.mubr.bf16.gmra.mrb[4].mxu1 %v3194_v35 }
  0x2b   :  { %1121 = vmatmul.mubr.bf16.gmra.mrb[4].mxu0 %v3195_v36  ;;  %505 = vmatprep.mubr.bf16.mxu1 %v3768_v1  ;;  %v3246_v36 = vld [vmem:[%s5265_s1 + $0xd8] sm:$0xff]  }
  0x2c   :  { %1130 = vmatprep.mubr.bf16.mxu0 %v3768_v1 }
  0x32   :  { %506 = vmatmul.mubr.bf16.gmra.mrb[8].mxu1 %v3196_v37  ;;  %v3247_v37 = vld [vmem:[%s5266_s0 + $0xd8] sm:$0xff]  }
  0x33   :  { %1131 = vmatmul.mubr.bf16.gmra.mrb[8].mxu0 %v3197_v38  ;;  %515 = vmatprep.mubr.bf16.mxu1 %v3768_v1 }
  0x34   :  { %1140 = vmatprep.mubr.bf16.mxu0 %v3768_v1 }
  0x3a   :  { %516 = vmatmul.mubr.bf16.gmra.mrb[12].mxu1 %v3198_v39 }
  0x3b   :  { %1141 = vmatmul.mubr.bf16.gmra.mrb[12].mxu0 %v3199_v40  ;;  %525 = vmatprep.mubr.bf16.mxu1 %v3768_v1 }
  0x3c   :  { %1150 = vmatprep.mubr.bf16.mxu0 %v3768_v1 }
  0x42   :  { %526 = vmatmul.mubr.bf16.gmra.mrb[16].mxu1 %v3200_v41 }
  0x43   :  { %1151 = vmatmul.mubr.bf16.gmra.mrb[16].mxu0 %v3201_v42  ;;  %535 = vmatprep.mubr.bf16.mxu1 %v3768_v1 }
  0x44   :  { %1160 = vmatprep.mubr.bf16.mxu0 %v3768_v1 }
  0x4a   :  { %536 = vmatmul.mubr.bf16.gmra.mrb[20].mxu1 %v3202_v43 }
  0x4b   :  { %1161 = vmatmul.mubr.bf16.gmra.mrb[20].mxu0 %v3203_v44  ;;  %545 = vmatprep.mubr.bf16.mxu1 %v3768_v1 }
  0x4c   :  { %1170 = vmatprep.mubr.bf16.mxu0 %v3768_v1 }
  0x52   :  { %546 = vmatmul.mubr.bf16.gmra.mrb[24].mxu1 %v3204_v45 }
  0x53   :  { %1171 = vmatmul.mubr.bf16.gmra.mrb[24].mxu0 %v3205_v46  ;;  %555 = vmatprep.mubr.bf16.mxu1 %v3768_v1 }
  0x54   :  { %1180 = vmatprep.mubr.bf16.mxu0 %v3768_v1 }
  0x5a   :  { %556 = vmatmul.mubr.bf16.gmra.mrb[28].mxu1 %v3206_v47 }
  0x5b   :  { %1181 = vmatmul.mubr.bf16.gmra.mrb[28].mxu0 %v3207_v48  ;;  %565 = vmatprep.mubr.bf16.mxu1 %v3768_v1 }
  0x5c   :  { %1190 = vmatprep.mubr.bf16.mxu0 %v3768_v1 }
  0x62   :  { %566 = vmatmul.mubr.bf16.gmra.mrb[32].mxu1 %v3208_v49 }
  0x63   :  { %1191 = vmatmul.mubr.bf16.gmra.mrb[32].mxu0 %v3209_v50  ;;  %575 = vmatprep.mubr.bf16.mxu1 %v3768_v1 }
  0x64   :  { %1200 = vmatprep.mubr.bf16.mxu0 %v3768_v1 }
  0x6a   :  { %576 = vmatmul.mubr.bf16.gmra.mrb[36].mxu1 %v3210_v51 }
  0x6b   :  { %1201 = vmatmul.mubr.bf16.gmra.mrb[36].mxu0 %v3211_v52  ;;  %585 = vmatprep.mubr.bf16.mxu1 %v3768_v1 }
  0x6c   :  { %1210 = vmatprep.mubr.bf16.mxu0 %v3768_v1 }
  0x72   :  { %586 = vmatmul.mubr.bf16.gmra.mrb[40].mxu1 %v3212_v53 }
  0x73   :  { %1211 = vmatmul.mubr.bf16.gmra.mrb[40].mxu0 %v3213_v54  ;;  %595 = vmatprep.mubr.bf16.mxu1 %v3768_v1 }
  0x74   :  { %1220 = vmatprep.mubr.bf16.mxu0 %v3768_v1 }
  0x7a   :  { %596 = vmatmul.mubr.bf16.gmra.mrb[44].mxu1 %v3214_v55 }
  0x7b   :  { %1221 = vmatmul.mubr.bf16.gmra.mrb[44].mxu0 %v3215_v56  ;;  %605 = vmatprep.mubr.bf16.mxu1 %v3768_v1 }
  0x7c   :  { %1230 = vmatprep.mubr.bf16.mxu0 %v3768_v1 }
  0x82   :  { %606 = vmatmul.mubr.bf16.gmra.mrb[48].mxu1 %v3216_v57 }
  0x83   :  { %1231 = vmatmul.mubr.bf16.gmra.mrb[48].mxu0 %v3217_v58  ;;  %615 = vmatprep.mubr.bf16.mxu1 %v3768_v1 }
  0x84   :  { %1240 = vmatprep.mubr.bf16.mxu0 %v3768_v1 }
  0x8a   :  { %616 = vmatmul.mubr.bf16.gmra.mrb[52].mxu1 %v3218_v59 }
  0x8b   :  { %1241 = vmatmul.mubr.bf16.gmra.mrb[52].mxu0 %v3219_v60  ;;  %625 = vmatprep.mubr.bf16.mxu1 %v3768_v1 }
  0x8c   :  { %1250 = vmatprep.mubr.bf16.mxu0 %v3768_v1 }
  0x92   :  { %626 = vmatmul.mubr.bf16.gmra.mrb[56].mxu1 %v3220_v61  ;;  %v3248_v61 = vld [vmem:[%s5265_s1 + $0xe0] sm:$0xff]  }
  0x93   :  { %1251 = vmatmul.mubr.bf16.gmra.mrb[56].mxu0 %v3221_v62  ;;  %635 = vmatprep.mubr.bf16.mxu1 %v3768_v1  ;;  %v3249_v62 = vld [vmem:[%s5266_s0 + $0xe0] sm:$0xff]  }
  0x94   :  { %1260 = vmatprep.mubr.bf16.mxu0 %v3768_v1 }
  0x9a   :  { %636 = vmatmul.mubr.bf16.gmra.mrb[60].mxu1 %v3222_v63 }
  0x9b   :  { %1261 = vmatmul.mubr.bf16.gmra.mrb[60].mxu0 %v3223_v0  ;;  %645 = vmatprep.mubr.bf16.mxu1 %v3768_v1 }
  0x9c   :  { %1270 = vmatprep.mubr.bf16.mxu0 %v3768_v1 }
  0xa2   :  { %646 = vmatmul.mubr.bf16.gmra.mrb[64].mxu1 %v3224_v2 }
  0xa3   :  { %1271 = vmatmul.mubr.bf16.gmra.mrb[64].mxu0 %v3225_v3  ;;  %655 = vmatprep.mubr.bf16.mxu1 %v3768_v1 }
  0xa4   :  { %1280 = vmatprep.mubr.bf16.mxu0 %v3768_v1 }
  0xaa   :  { %656 = vmatmul.mubr.bf16.gmra.mrb[68].mxu1 %v3226_v4 }
  0xab   :  { %1281 = vmatmul.mubr.bf16.gmra.mrb[68].mxu0 %v3227_v5  ;;  %665 = vmatprep.mubr.bf16.mxu1 %v3768_v1 }
  0xac   :  { %1290 = vmatprep.mubr.bf16.mxu0 %v3768_v1 }
  0xb2   :  { %666 = vmatmul.mubr.bf16.gmra.mrb[72].mxu1 %v3228_v6 }
  0xb3   :  { %1291 = vmatmul.mubr.bf16.gmra.mrb[72].mxu0 %v3229_v7  ;;  %675 = vmatprep.mubr.bf16.mxu1 %v3768_v1 }
  0xb4   :  { %1300 = vmatprep.mubr.bf16.mxu0 %v3768_v1 }
  0xba   :  { %676 = vmatmul.mubr.bf16.gmra.mrb[76].mxu1 %v3230_v8 }
  0xbb   :  { %1301 = vmatmul.mubr.bf16.gmra.mrb[76].mxu0 %v3231_v9  ;;  %685 = vmatprep.mubr.bf16.mxu1 %v3768_v1 }
  0xbc   :  { %1310 = vmatprep.mubr.bf16.mxu0 %v3768_v1 }
  0xc2   :  { %686 = vmatmul.mubr.bf16.gmra.mrb[80].mxu1 %v3232_v10 }
  0xc3   :  { %1311 = vmatmul.mubr.bf16.gmra.mrb[80].mxu0 %v3233_v11  ;;  %695 = vmatprep.mubr.bf16.mxu1 %v3768_v1 }
  0xc4   :  { %1320 = vmatprep.mubr.bf16.mxu0 %v3768_v1 }
  0xca   :  { %696 = vmatmul.mubr.bf16.gmra.mrb[84].mxu1 %v3234_v12 }
  0xcb   :  { %1321 = vmatmul.mubr.bf16.gmra.mrb[84].mxu0 %v3235_v13  ;;  %705 = vmatprep.mubr.bf16.mxu1 %v3768_v1 }
  0xcc   :  { %1330 = vmatprep.mubr.bf16.mxu0 %v3768_v1 }
  0xd2   :  { %706 = vmatmul.mubr.bf16.gmra.mrb[88].mxu1 %v3236_v14 }
  0xd3   :  { %1331 = vmatmul.mubr.bf16.gmra.mrb[88].mxu0 %v3237_v15  ;;  %715 = vmatprep.mubr.bf16.mxu1 %v3768_v1 }
  0xd4   :  { %1340 = vmatprep.mubr.bf16.mxu0 %v3768_v1 }
  0xda   :  { %716 = vmatmul.mubr.bf16.gmra.mrb[92].mxu1 %v3238_v16 }
  0xdb   :  { %1341 = vmatmul.mubr.bf16.gmra.mrb[92].mxu0 %v3239_v17  ;;  %725 = vmatprep.mubr.bf16.mxu1 %v3768_v1 }
  0xdc   :  { %1350 = vmatprep.mubr.bf16.mxu0 %v3768_v1 }
  0xe2   :  { %726 = vmatmul.mubr.bf16.gmra.mrb[96].mxu1 %v3240_v18 }
  0xe3   :  { %1351 = vmatmul.mubr.bf16.gmra.mrb[96].mxu0 %v3241_v19  ;;  %735 = vmatprep.mubr.bf16.mxu1 %v3768_v1 }
  0xe4   :  { %1360 = vmatprep.mubr.bf16.mxu0 %v3768_v1 }
  0xea   :  { %736 = vmatmul.mubr.bf16.gmra.mrb[100].mxu1 %v3242_v20 }
  0xeb   :  { %1361 = vmatmul.mubr.bf16.gmra.mrb[100].mxu0 %v3243_v21  ;;  %745 = vmatprep.mubr.bf16.mxu1 %v3768_v1 }
  0xec   :  { %1370 = vmatprep.mubr.bf16.mxu0 %v3768_v1 }
  0xf2   :  { %746 = vmatmul.mubr.bf16.gmra.mrb[104].mxu1 %v3244_v24  ;;  %v3250_v24 = vld [vmem:[%s5265_s1 + $0xe8] sm:$0xff]  }
  0xf3   :  { %1371 = vmatmul.mubr.bf16.gmra.mrb[104].mxu0 %v3245_v25  ;;  %755 = vmatprep.mubr.bf16.mxu1 %v3768_v1  ;;  %v3251_v25 = vld [vmem:[%s5266_s0 + $0xe8] sm:$0xff]  }
  0xf4   :  { %1380 = vmatprep.mubr.bf16.mxu0 %v3768_v1 }
  0xf5   :  { %v487_v30 = vpop.f32.mrb[0].mxu1 }
  0xf6   :  { %v1112_v31 = vpop.f32.mrb[0].mxu0  ;;  %v489_v34 = vpop.f32.mrb[1].mxu1 }
  0xf7   :  { %v1113_v33 = vadd.f32 %v1112_v31, %v487_v30  ;;  %v1114_v35 = vpop.f32.mrb[1].mxu0  ;;  %v491_v39 = vpop.f32.mrb[2].mxu1 }
  0xf8   :  { %v1115_v38 = vadd.f32 %v1114_v35, %v489_v34  ;;  %v1116_v40 = vpop.f32.mrb[2].mxu0  ;;  %v493_v43 = vpop.f32.mrb[3].mxu1 }
  0xf9   :  { %v4127_v41 = vadd.f32 %v4116_v29, %v1113_v33  ;;  %v1117_v42 = vadd.f32 %v1116_v40, %v491_v39  ;;  %v1118_v44 = vpop.f32.mrb[3].mxu0 }
  0xfa   :  { %v4130_v45 = vadd.f32 %v4118_v32, %v1115_v38  ;;  %v1119_v46 = vadd.f32 %v1118_v44, %v493_v43  ;;  %756 = vmatmul.mubr.bf16.gmra.mrb[108].mxu1 %v3246_v36 }
  0xfb   :  { %v1571_v47 = vsub.f32 0.0, %v4127_v41  ;;  %v4134_v48 = vadd.f32 %v4116_v29, %v1117_v42  ;;  %1381 = vmatmul.mubr.bf16.gmra.mrb[108].mxu0 %v3247_v37  ;;  %765 = vmatprep.mubr.bf16.mxu1 %v3768_v1 }
  0xfc   :  { %v1572_v49 = vsub.f32 0.0, %v4130_v45  ;;  %v4138_v50 = vadd.f32 %v4118_v32, %v1119_v46  ;;  %1390 = vmatprep.mubr.bf16.mxu0 %v3768_v1 }
  0xfd   :  { %v1699_v51 = vmul.f32 1.442695, %v1571_v47  ;;  %v1573_v52 = vsub.f32 0.0, %v4134_v48  ;;  %v497_v55 = vpop.f32.mrb[4].mxu1 }
  0xfe   :  { %v1701_v53 = vmul.f32 1.442695, %v1572_v49  ;;  %v1574_v54 = vsub.f32 0.0, %v4138_v50  ;;  %v1122_v56 = vpop.f32.mrb[4].mxu0  ;;  %v499_v59 = vpop.f32.mrb[5].mxu1 }
  0xff   :  { %3256 = vpow2.f32 %v1699_v51  ;;  %v1703_v57 = vmul.f32 1.442695, %v1573_v52  ;;  %v1123_v58 = vadd.f32 %v1122_v56, %v497_v55  ;;  %v1124_v60 = vpop.f32.mrb[5].mxu0  ;;  %v501_v2 = vpop.f32.mrb[6].mxu1 }
 0x100   :  { %3258 = vpow2.f32 %v1701_v53  ;;  %v1705_v63 = vmul.f32 1.442695, %v1574_v54  ;;  %v1125_v0 = vadd.f32 %v1124_v60, %v499_v59  ;;  %v1126_v3 = vpop.f32.mrb[6].mxu0  ;;  %v503_v6 = vpop.f32.mrb[7].mxu1 }
 0x101   :  { %3260 = vpow2.f32 %v1703_v57  ;;  %v4151_v4 = vadd.f32 %v4116_v29, %v1123_v58  ;;  %v1127_v5 = vadd.f32 %v1126_v3, %v501_v2  ;;  %v1128_v7 = vpop.f32.mrb[7].mxu0  ;;  %v3253_v2 = vld [vmem:[%s5266_s0 + $0xf0] sm:$0xff]  }
 0x102   :  { %3262 = vpow2.f32 %v1705_v63  ;;  %v4154_v8 = vadd.f32 %v4118_v32, %v1125_v0  ;;  %v1129_v9 = vadd.f32 %v1128_v7, %v503_v6  ;;  %766 = vmatmul.mubr.bf16.gmra.mrb[112].mxu1 %v3248_v61  ;;  %v3252_v0 = vld [vmem:[%s5265_s1 + $0xf0] sm:$0xff]  }
 0x103   :  { %v1575_v10 = vsub.f32 0.0, %v4151_v4  ;;  %v4158_v11 = vadd.f32 %v4116_v29, %v1127_v5  ;;  %1391 = vmatmul.mubr.bf16.gmra.mrb[112].mxu0 %v3249_v62  ;;  %775 = vmatprep.mubr.bf16.mxu1 %v3768_v1 }
 0x104   :  { %v1576_v12 = vsub.f32 0.0, %v4154_v8  ;;  %v4162_v13 = vadd.f32 %v4118_v32, %v1129_v9  ;;  %1400 = vmatprep.mubr.bf16.mxu0 %v3768_v1 }
 0x105   :  { %v1707_v14 = vmul.f32 1.442695, %v1575_v10  ;;  %v1577_v15 = vsub.f32 0.0, %v4158_v11  ;;  %v507_v18 = vpop.f32.mrb[8].mxu1 }
 0x106   :  { %v1709_v16 = vmul.f32 1.442695, %v1576_v12  ;;  %v1578_v17 = vsub.f32 0.0, %v4162_v13  ;;  %v1132_v19 = vpop.f32.mrb[8].mxu0  ;;  %v509_v22 = vpop.f32.mrb[9].mxu1 }
 0x107   :  { %3264 = vpow2.f32 %v1707_v14  ;;  %v1711_v20 = vmul.f32 1.442695, %v1577_v15  ;;  %v1133_v21 = vadd.f32 %v1132_v19, %v507_v18  ;;  %v1134_v23 = vpop.f32.mrb[9].mxu0  ;;  %v511_v28 = vpop.f32.mrb[10].mxu1 }
 0x108   :  { %3266 = vpow2.f32 %v1709_v16  ;;  %v1713_v26 = vmul.f32 1.442695, %v1578_v17  ;;  %v1135_v27 = vadd.f32 %v1134_v23, %v509_v22  ;;  %v1136_v30 = vpop.f32.mrb[10].mxu0  ;;  %v513_v35 = vpop.f32.mrb[11].mxu1 }
 0x109   :  { %v3257_v31 = vpop.eup %3256  ;;  %3268 = vpow2.f32 %v1711_v20  ;;  %v4175_v33 = vadd.f32 %v4116_v29, %v1133_v21  ;;  %v1137_v34 = vadd.f32 %v1136_v30, %v511_v28  ;;  %v1138_v36 = vpop.f32.mrb[11].mxu0 }
 0x10a   :  { %v3259_v37 = vpop.eup %3258  ;;  %v1955_v38 = vadd.f32 1.0, %v3257_v31  ;;  %3270 = vpow2.f32 %v1713_v26  ;;  %v4178_v39 = vadd.f32 %v4118_v32, %v1135_v27  ;;  %v1139_v40 = vadd.f32 %v1138_v36, %v513_v35  ;;  %776 = vmatmul.mubr.bf16.gmra.mrb[116].mxu1 %v3250_v24 }
 0x10b   :  { %v3261_v42 = vpop.eup %3260  ;;  %v1956_v43 = vadd.f32 1.0, %v3259_v37  ;;  %v1579_v44 = vsub.f32 0.0, %v4175_v33  ;;  %v4182_v46 = vadd.f32 %v4116_v29, %v1137_v34  ;;  %1401 = vmatmul.mubr.bf16.gmra.mrb[116].mxu0 %v3251_v25  ;;  %785 = vmatprep.mubr.bf16.mxu1 %v3768_v1 }
 0x10c   :  { %v3263_v47 = vpop.eup %3262  ;;  %3272 = vrcp.f32 %v1955_v38  ;;  %v1957_v49 = vadd.f32 1.0, %v3261_v42  ;;  %v1580_v51 = vsub.f32 0.0, %v4178_v39  ;;  %v4186_v52 = vadd.f32 %v4118_v32, %v1139_v40  ;;  %1410 = vmatprep.mubr.bf16.mxu0 %v3768_v1 }
 0x10d   :  { %3274 = vrcp.f32 %v1956_v43  ;;  %v1958_v53 = vadd.f32 1.0, %v3263_v47  ;;  %v1715_v54 = vmul.f32 1.442695, %v1579_v44  ;;  %v1581_v55 = vsub.f32 0.0, %v4182_v46  ;;  %v517_v58 = vpop.f32.mrb[12].mxu1 }
 0x10e   :  { %3276 = vrcp.f32 %v1957_v49  ;;  %v1717_v56 = vmul.f32 1.442695, %v1580_v51  ;;  %v1582_v57 = vsub.f32 0.0, %v4186_v52  ;;  %v1142_v59 = vpop.f32.mrb[12].mxu0  ;;  %v519_v62 = vpop.f32.mrb[13].mxu1  ;;  %v3254_v49 = vld [vmem:[%s5265_s1 + $0xf8] sm:$0xff]  }
 0x10f   :  { %3278 = vrcp.f32 %v1958_v53  ;;  %v1719_v60 = vmul.f32 1.442695, %v1581_v55  ;;  %v1143_v61 = vadd.f32 %v1142_v59, %v517_v58  ;;  %v1144_v63 = vpop.f32.mrb[13].mxu0  ;;  %v521_v6 = vpop.f32.mrb[14].mxu1  ;;  %v3255_v51 = vld [vmem:[%s5266_s0 + $0xf8] sm:$0xff]  }
 0x110   :  { %3280 = vpow2.f32 %v1715_v54  ;;  %v1721_v3 = vmul.f32 1.442695, %v1582_v57  ;;  %v1145_v5 = vadd.f32 %v1144_v63, %v519_v62  ;;  %v1146_v7 = vpop.f32.mrb[14].mxu0  ;;  %v523_v14 = vpop.f32.mrb[15].mxu1 }
 0x111   :  { %v3265_v9 = vpop.eup %3264  ;;  %3282 = vpow2.f32 %v1717_v56  ;;  %v4199_v10 = vadd.f32 %v4116_v29, %v1143_v61  ;;  %v1147_v12 = vadd.f32 %v1146_v7, %v521_v6  ;;  %v1148_v15 = vpop.f32.mrb[15].mxu0 }
 0x112   :  { %v3267_v16 = vpop.eup %3266  ;;  %v1959_v17 = vadd.f32 1.0, %v3265_v9  ;;  %3284 = vpow2.f32 %v1719_v60  ;;  %v4202_v18 = vadd.f32 %v4118_v32, %v1145_v5  ;;  %v1149_v19 = vadd.f32 %v1148_v15, %v523_v14  ;;  %786 = vmatmul.mubr.bf16.gmra.mrb[120].mxu1 %v3252_v0 }
 0x113   :  { %v3269_v20 = vpop.eup %3268  ;;  %v1960_v21 = vadd.f32 1.0, %v3267_v16  ;;  %3286 = vpow2.f32 %v1721_v3  ;;  %v1583_v22 = vsub.f32 0.0, %v4199_v10  ;;  %v4206_v23 = vadd.f32 %v4116_v29, %v1147_v12  ;;  %1411 = vmatmul.mubr.bf16.gmra.mrb[120].mxu0 %v3253_v2  ;;  %795 = vmatprep.mubr.bf16.mxu1 %v3768_v1 }
 0x114   :  { %v3271_v24 = vpop.eup %3270  ;;  %3288 = vrcp.f32 %v1959_v17  ;;  %v1961_v25 = vadd.f32 1.0, %v3269_v20  ;;  %v1584_v26 = vsub.f32 0.0, %v4202_v18  ;;  %v4210_v27 = vadd.f32 %v4118_v32, %v1149_v19  ;;  %1420 = vmatprep.mubr.bf16.mxu0 %v3768_v1 }
 0x115   :  { %3290 = vrcp.f32 %v1960_v21  ;;  %v1962_v28 = vadd.f32 1.0, %v3271_v24  ;;  %v1723_v30 = vmul.f32 1.442695, %v1583_v22  ;;  %v1585_v31 = vsub.f32 0.0, %v4206_v23  ;;  %v527_v37 = vpop.f32.mrb[16].mxu1 }
 0x116   :  { %v3273_v34 = vpop.eup %3272  ;;  %3292 = vrcp.f32 %v1961_v25  ;;  %v1725_v35 = vmul.f32 1.442695, %v1584_v26  ;;  %v1586_v36 = vsub.f32 0.0, %v4210_v27  ;;  %v1152_v38 = vpop.f32.mrb[16].mxu0 }
 0x117   :  { %v3275_v40 = vpop.eup %3274  ;;  %v2211_v42 = vmul.f32 %v3273_v34, %v4127_v41  ;;  %3294 = vrcp.f32 %v1962_v28  ;;  %v1727_v43 = vmul.f32 1.442695, %v1585_v31  ;;  %v1153_v44 = vadd.f32 %v1152_v38, %v527_v37  ;;  %v529_v47 = vpop.f32.mrb[17].mxu1 }
 0x118   :  { %v1154_v1 = vpop.f32.mrb[17].mxu0  ;;  %v3277_v53 = vpop.eup %3276  ;;  %v2212_v54 = vmul.f32 %v3275_v40, %v4130_v45  ;;  %3296 = vpow2.f32 %v1723_v30  ;;  %v1729_v55 = vmul.f32 1.442695, %v1586_v36 }
 0x119   :  { %v1155_v56 = vadd.f32 %v1154_v1, %v529_v47  ;;  %v531_v41 = vpop.f32.mrb[18].mxu1  ;;  %v1156_v57 = vpop.f32.mrb[18].mxu0  ;;  %v2213_v59 = vmul.f32 %v3277_v53, %v4134_v48  ;;  %3298 = vpow2.f32 %v1725_v35  ;;  %v4226_v60 = vadd.f32 %v4116_v29, %v1153_v44 }
 0x11a   :  { %v3279_v58 = vpop.eup %3278  ;;  %v1157_v61 = vadd.f32 %v1156_v57, %v531_v41  ;;  %v533_v62 = vpop.f32.mrb[19].mxu1  ;;  %v2951_v2 = vpack.c.bf16 %v2212_v54, %v2211_v42  ;;  %3300 = vpow2.f32 %v1727_v43  ;;  %796 = vmatmul.mubr.bf16.gmra.mrb[124].mxu1 %v3254_v49 }
 0x11b   :  { %v1158_v63 = vpop.f32.mrb[19].mxu0  ;;  %v3281_v0 = vpop.eup %3280  ;;  %v2214_v3 = vmul.f32 %v3279_v58, %v4138_v50  ;;  %v4230_v45 = vadd.f32 %v4118_v32, %v1155_v56  ;;  %3302 = vpow2.f32 %v1729_v55  ;;  %v1587_v48 = vsub.f32 0.0, %v4226_v60  ;;  %1421 = vmatmul.mubr.bf16.gmra.mrb[124].mxu0 %v3255_v51 }
 0x11c   :  { %v3283_v5 = vpop.eup %3282  ;;  %v1963_v6 = vadd.f32 1.0, %v3281_v0  ;;  %v4234_v7 = vadd.f32 %v4116_v29, %v1157_v61  ;;  %2723 = vst [vmem:[%s5268_s5] sm:$0xff] %v2951_v2  ;;  %v1159_v15 = vadd.f32 %v1158_v63, %v533_v62 }
 0x11d   :  { %v3285_v9 = vpop.eup %3284  ;;  %v2952_v50 = vpack.c.bf16 %v2214_v3, %v2213_v59  ;;  %v1964_v12 = vadd.f32 1.0, %v3283_v5  ;;  %v1588_v14 = vsub.f32 0.0, %v4230_v45  ;;  %v1731_v19 = vmul.f32 1.442695, %v1587_v48  ;;  %v537_v26 = vpop.f32.mrb[20].mxu1 }
 0x11e   :  { %v3287_v16 = vpop.eup %3286  ;;  %3304 = vrcp.f32 %v1963_v6  ;;  %v1965_v17 = vadd.f32 1.0, %v3285_v9  ;;  %v1589_v20 = vsub.f32 0.0, %v4234_v7  ;;  %v4245_v25 = vadd.f32 %v4118_v32, %v1159_v15  ;;  %v1162_v28 = vpop.f32.mrb[20].mxu0 }
 0x11f   :  { %v3289_v21 = vpop.eup %3288  ;;  %2724 = vst [vmem:[%s5268_s5 + $0x8] sm:$0xff] %v2952_v50  ;;  %3306 = vrcp.f32 %v1964_v12  ;;  %v1966_v22 = vadd.f32 1.0, %v3287_v16  ;;  %v1733_v24 = vmul.f32 1.442695, %v1588_v14  ;;  %v1163_v35 = vadd.f32 %v1162_v28, %v537_v26  ;;  %v539_v36 = vpop.f32.mrb[21].mxu1 }
 0x120   :  { %v3291_v30 = vpop.eup %3290  ;;  %v2215_v31 = vmul.f32 %v3289_v21, %v4151_v4  ;;  %3308 = vrcp.f32 %v1965_v17  ;;  %v1735_v34 = vmul.f32 1.442695, %v1589_v20  ;;  %v1164_v37 = vpop.f32.mrb[21].mxu0  ;;  %v1590_v42 = vsub.f32 0.0, %v4245_v25 }
 0x121   :  { %v3293_v38 = vpop.eup %3292  ;;  %v2216_v40 = vmul.f32 %v3291_v30, %v4154_v8  ;;  %3310 = vrcp.f32 %v1966_v22  ;;  %v1165_v43 = vadd.f32 %v1164_v37, %v539_v36  ;;  %v541_v44 = vpop.f32.mrb[22].mxu1  ;;  %v4252_v4 = vadd.f32 %v4116_v29, %v1163_v35 }
 0x122   :  { %v1166_v47 = vpop.f32.mrb[22].mxu0  ;;  %v3295_v1 = vpop.eup %3294  ;;  %v2217_v49 = vmul.f32 %v3293_v38, %v4158_v11  ;;  %3312 = vpow2.f32 %v1731_v19  ;;  %v1737_v41 = vmul.f32 1.442695, %v1590_v42 }
 0x123   :  { %v1167_v51 = vadd.f32 %v1166_v47, %v541_v44  ;;  %v543_v53 = vpop.f32.mrb[23].mxu1  ;;  %v1168_v54 = vpop.f32.mrb[23].mxu0  ;;  %v2953_v56 = vpack.c.bf16 %v2216_v40, %v2215_v31  ;;  %v2218_v8 = vmul.f32 %v3295_v1, %v4162_v13  ;;  %3314 = vpow2.f32 %v1733_v24 }
 0x124   :  { %v3297_v55 = vpop.eup %3296  ;;  %3316 = vpow2.f32 %v1735_v34  ;;  %v1591_v59 = vsub.f32 0.0, %v4252_v4  ;;  %v4257_v11 = vadd.f32 %v4118_v32, %v1165_v43  ;;  %v1169_v9 = vadd.f32 %v1168_v54, %v543_v53 }
 0x125   :  { %v3299_v57 = vpop.eup %3298  ;;  %v1967_v58 = vadd.f32 1.0, %v3297_v55  ;;  %2725 = vst [vmem:[%s5268_s5 + $0x10] sm:$0xff] %v2953_v56  ;;  %v2954_v62 = vpack.c.bf16 %v2218_v8, %v2217_v49  ;;  %3318 = vpow2.f32 %v1737_v41  ;;  %v4263_v13 = vadd.f32 %v4116_v29, %v1167_v51  ;;  %v547_v50 = vpop.f32.mrb[24].mxu1 }
 0x126   :  { %v3301_v61 = vpop.eup %3300  ;;  %v1968_v63 = vadd.f32 1.0, %v3299_v57  ;;  %v1739_v3 = vmul.f32 1.442695, %v1591_v59  ;;  %v1592_v5 = vsub.f32 0.0, %v4257_v11  ;;  %v1172_v12 = vpop.f32.mrb[24].mxu0  ;;  %v4272_v24 = vadd.f32 %v4118_v32, %v1169_v9 }
 0x127   :  { %v3303_v0 = vpop.eup %3302  ;;  %3320 = vrcp.f32 %v1967_v58  ;;  %v1969_v2 = vadd.f32 1.0, %v3301_v61  ;;  %2726 = vst [vmem:[%s5268_s5 + $0x18] sm:$0xff] %v2954_v62  ;;  %v1593_v48 = vsub.f32 0.0, %v4263_v13  ;;  %v1173_v16 = vadd.f32 %v1172_v12, %v547_v50  ;;  %v549_v17 = vpop.f32.mrb[25].mxu1 }
 0x128   :  { %3322 = vrcp.f32 %v1968_v63  ;;  %v1970_v6 = vadd.f32 1.0, %v3303_v0  ;;  %v3305_v14 = vpop.eup %3304  ;;  %v1741_v15 = vmul.f32 1.442695, %v1592_v5  ;;  %v1174_v19 = vpop.f32.mrb[25].mxu0  ;;  %v1594_v40 = vsub.f32 0.0, %v4272_v24 }
 0x129   :  { %3324 = vrcp.f32 %v1969_v2  ;;  %v3307_v20 = vpop.eup %3306  ;;  %v2219_v21 = vmul.f32 %v3305_v14, %v4175_v33  ;;  %v1743_v22 = vmul.f32 1.442695, %v1593_v48  ;;  %v551_v26 = vpop.f32.mrb[26].mxu1  ;;  %v4276_v34 = vadd.f32 %v4116_v29, %v1173_v16 }
 0x12a   :  { %3326 = vrcp.f32 %v1970_v6  ;;  %v1176_v28 = vpop.f32.mrb[26].mxu0  ;;  %v3309_v30 = vpop.eup %3308  ;;  %v2220_v31 = vmul.f32 %v3307_v20, %v4178_v39  ;;  %v1175_v35 = vadd.f32 %v1174_v19, %v549_v17  ;;  %v1745_v51 = vmul.f32 1.442695, %v1594_v40 }
 0x12b   :  { %3328 = vpow2.f32 %v1739_v3  ;;  %v553_v36 = vpop.f32.mrb[27].mxu1  ;;  %v1178_v37 = vpop.f32.mrb[27].mxu0  ;;  %v2221_v33 = vmul.f32 %v3309_v30, %v4182_v46  ;;  %v1177_v42 = vadd.f32 %v1176_v28, %v551_v26  ;;  %v1595_v39 = vsub.f32 0.0, %v4276_v34 }
 0x12c   :  { %v3311_v38 = vpop.eup %3310  ;;  %3330 = vpow2.f32 %v1741_v15  ;;  %v2955_v44 = vpack.c.bf16 %v2220_v31, %v2219_v21  ;;  %v4283_v53 = vadd.f32 %v4118_v32, %v1175_v35  ;;  %v1179_v8 = vadd.f32 %v1178_v37, %v553_v36 }
 0x12d   :  { %v3313_v43 = vpop.eup %3312  ;;  %v2222_v47 = vmul.f32 %v3311_v38, %v4186_v52  ;;  %3332 = vpow2.f32 %v1743_v22  ;;  %v4286_v54 = vadd.f32 %v4116_v29, %v1177_v42  ;;  %v1747_v52 = vmul.f32 1.442695, %v1595_v39  ;;  %v557_v61 = vpop.f32.mrb[28].mxu1 }
 0x12e   :  { %v3315_v1 = vpop.eup %3314  ;;  %v1971_v49 = vadd.f32 1.0, %v3313_v43  ;;  %2727 = vst [vmem:[%s5268_s5 + $0x20] sm:$0xff] %v2955_v44  ;;  %v1596_v58 = vsub.f32 0.0, %v4283_v53  ;;  %v1182_v62 = vpop.f32.mrb[28].mxu0  ;;  %v4297_v2 = vadd.f32 %v4118_v32, %v1179_v8 }
 0x12f   :  { %v3317_v46 = vpop.eup %3316  ;;  %v2956_v55 = vpack.c.bf16 %v2222_v47, %v2221_v33  ;;  %v1972_v56 = vadd.f32 1.0, %v3315_v1  ;;  %v1597_v59 = vsub.f32 0.0, %v4286_v54  ;;  %v1183_v3 = vadd.f32 %v1182_v62, %v557_v61  ;;  %v559_v5 = vpop.f32.mrb[29].mxu1 }
 0x130   :  { %v3319_v41 = vpop.eup %3318  ;;  %3334 = vrcp.f32 %v1971_v49  ;;  %v1973_v57 = vadd.f32 1.0, %v3317_v46  ;;  %v1184_v6 = vpop.f32.mrb[29].mxu0  ;;  %v1749_v50 = vmul.f32 1.442695, %v1596_v58  ;;  %v1598_v19 = vsub.f32 0.0, %v4297_v2 }
 0x131   :  { %v3321_v63 = vpop.eup %3320  ;;  %2728 = vst [vmem:[%s5268_s5 + $0x28] sm:$0xff] %v2956_v55  ;;  %3336 = vrcp.f32 %v1972_v56  ;;  %v1974_v0 = vadd.f32 1.0, %v3319_v41  ;;  %v1751_v12 = vmul.f32 1.442695, %v1597_v59  ;;  %v561_v14 = vpop.f32.mrb[30].mxu1  ;;  %v4303_v20 = vadd.f32 %v4116_v29, %v1183_v3 }
 0x132   :  { %v3323_v48 = vpop.eup %3322  ;;  %v2223_v9 = vmul.f32 %v3321_v63, %v4199_v10  ;;  %3338 = vrcp.f32 %v1973_v57  ;;  %v1186_v15 = vpop.f32.mrb[30].mxu0  ;;  %v1185_v10 = vadd.f32 %v1184_v6, %v559_v5 }
 0x133   :  { %v3325_v16 = vpop.eup %3324  ;;  %v2224_v17 = vmul.f32 %v3323_v48, %v4202_v18  ;;  %3340 = vrcp.f32 %v1974_v0  ;;  %v563_v21 = vpop.f32.mrb[31].mxu1  ;;  %v1187_v30 = vadd.f32 %v1186_v15, %v561_v14  ;;  %v1753_v18 = vmul.f32 1.442695, %v1598_v19 }
 0x134   :  { %v1188_v22 = vpop.f32.mrb[31].mxu0  ;;  %v3327_v26 = vpop.eup %3326  ;;  %v2225_v28 = vmul.f32 %v3325_v16, %v4206_v23  ;;  %3342 = vpow2.f32 %v1745_v51  ;;  %v1599_v33 = vsub.f32 0.0, %v4303_v20  ;;  %v4309_v40 = vadd.f32 %v4118_v32, %v1185_v10 }
 0x135   :  { %v3329_v31 = vpop.eup %3328  ;;  %v2957_v35 = vpack.c.bf16 %v2224_v17, %v2223_v9  ;;  %v2226_v36 = vmul.f32 %v3327_v26, %v4210_v27  ;;  %3344 = vpow2.f32 %v1747_v52  ;;  %v4315_v27 = vadd.f32 %v4116_v29, %v1187_v30  ;;  %v567_v1 = vpop.f32.mrb[32].mxu1 }
 0x136   :  { %v3331_v37 = vpop.eup %3330  ;;  %v1975_v38 = vadd.f32 1.0, %v3329_v31  ;;  %3346 = vpow2.f32 %v1749_v50  ;;  %v1755_v47 = vmul.f32 1.442695, %v1599_v33  ;;  %v1600_v39 = vsub.f32 0.0, %v4309_v40  ;;  %v1192_v49 = vpop.f32.mrb[32].mxu0 }
 0x137   :  { %v3333_v42 = vpop.eup %3332  ;;  %2729 = vst [vmem:[%s5268_s5 + $0x30] sm:$0xff] %v2957_v35  ;;  %v2958_v23 = vpack.c.bf16 %v2226_v36, %v2225_v28  ;;  %v1976_v43 = vadd.f32 1.0, %v3331_v37  ;;  %3348 = vpow2.f32 %v1751_v12  ;;  %v1601_v51 = vsub.f32 0.0, %v4315_v27  ;;  %v569_v56 = vpop.f32.mrb[33].mxu1 }
 0x138   :  { %3350 = vrcp.f32 %v1975_v38  ;;  %v1977_v44 = vadd.f32 1.0, %v3333_v42  ;;  %v1189_v46 = vadd.f32 %v1188_v22, %v563_v21  ;;  %v1193_v55 = vadd.f32 %v1192_v49, %v567_v1  ;;  %v1194_v52 = vpop.f32.mrb[33].mxu0  ;;  %v571_v58 = vpop.f32.mrb[34].mxu1 }
 0x139   :  { %2730 = vst [vmem:[%s5268_s5 + $0x38] sm:$0xff] %v2958_v23  ;;  %3352 = vrcp.f32 %v1976_v43  ;;  %v1757_v41 = vmul.f32 1.442695, %v1600_v39  ;;  %v1195_v57 = vadd.f32 %v1194_v52, %v569_v56  ;;  %v1196_v59 = vpop.f32.mrb[34].mxu0  ;;  %v1759_v63 = vmul.f32 1.442695, %v1601_v51 }
 0x13a   :  { %v3335_v8 = vpop.eup %3334  ;;  %3354 = vrcp.f32 %v1977_v44  ;;  %v4324_v0 = vadd.f32 %v4118_v32, %v1189_v46  ;;  %v573_v3 = vpop.f32.mrb[35].mxu1  ;;  %v4328_v9 = vadd.f32 %v4116_v29, %v1193_v55  ;;  %v1197_v15 = vadd.f32 %v1196_v59, %v571_v58 }
 0x13b   :  { %v3337_v61 = vpop.eup %3336  ;;  %v2227_v62 = vmul.f32 %v3335_v8, %v4226_v60  ;;  %3356 = vpow2.f32 %v1753_v18  ;;  %v1198_v5 = vpop.f32.mrb[35].mxu0  ;;  %v4331_v50 = vadd.f32 %v4118_v32, %v1195_v57 }
 0x13c   :  { %v3339_v6 = vpop.eup %3338  ;;  %v2228_v48 = vmul.f32 %v3337_v61, %v4230_v45  ;;  %3358 = vpow2.f32 %v1755_v47  ;;  %v1602_v14 = vsub.f32 0.0, %v4324_v0  ;;  %v1603_v45 = vsub.f32 0.0, %v4328_v9 }
 0x13d   :  { %v3341_v12 = vpop.eup %3340  ;;  %v2229_v60 = vmul.f32 %v3339_v6, %v4234_v7  ;;  %3360 = vpow2.f32 %v1757_v41  ;;  %v1604_v26 = vsub.f32 0.0, %v4331_v50  ;;  %v4339_v28 = vadd.f32 %v4116_v29, %v1197_v15 }
 0x13e   :  { %v3343_v16 = vpop.eup %3342  ;;  %v2959_v17 = vpack.c.bf16 %v2228_v48, %v2227_v62  ;;  %v2230_v19 = vmul.f32 %v3341_v12, %v4245_v25  ;;  %3362 = vpow2.f32 %v1759_v63  ;;  %v1761_v31 = vmul.f32 1.442695, %v1602_v14  ;;  %v577_v25 = vpop.f32.mrb[36].mxu1 }
 0x13f   :  { %v3345_v21 = vpop.eup %3344  ;;  %v1978_v22 = vadd.f32 1.0, %v3343_v16  ;;  %v1199_v35 = vadd.f32 %v1198_v5, %v573_v3  ;;  %v1202_v36 = vpop.f32.mrb[36].mxu0  ;;  %v1763_v38 = vmul.f32 1.442695, %v1603_v45  ;;  %v1605_v33 = vsub.f32 0.0, %v4339_v28 }
 0x140   :  { %v3347_v10 = vpop.eup %3346  ;;  %2731 = vst [vmem:[%s5268_s5 + $0x40] sm:$0xff] %v2959_v17  ;;  %v2960_v7 = vpack.c.bf16 %v2230_v19, %v2229_v60  ;;  %v1979_v30 = vadd.f32 1.0, %v3345_v21  ;;  %v579_v42 = vpop.f32.mrb[37].mxu1  ;;  %v1203_v39 = vadd.f32 %v1202_v36, %v577_v25  ;;  %v1765_v55 = vmul.f32 1.442695, %v1604_v26 }
 0x141   :  { %v3349_v18 = vpop.eup %3348  ;;  %3364 = vrcp.f32 %v1978_v22  ;;  %v1980_v37 = vadd.f32 1.0, %v3347_v10  ;;  %v1204_v23 = vpop.f32.mrb[37].mxu0  ;;  %v4349_v47 = vadd.f32 %v4118_v32, %v1199_v35  ;;  %v1767_v58 = vmul.f32 1.442695, %v1605_v33 }
 0x142   :  { %v3351_v43 = vpop.eup %3350  ;;  %2732 = vst [vmem:[%s5268_s5 + $0x48] sm:$0xff] %v2960_v7  ;;  %3366 = vrcp.f32 %v1979_v30  ;;  %v1981_v44 = vadd.f32 1.0, %v3349_v18  ;;  %v581_v1 = vpop.f32.mrb[38].mxu1  ;;  %v1205_v56 = vadd.f32 %v1204_v23, %v579_v42  ;;  %v4354_v59 = vadd.f32 %v4116_v29, %v1203_v39 }
 0x143   :  { %v1206_v49 = vpop.f32.mrb[38].mxu0  ;;  %v3353_v51 = vpop.eup %3352  ;;  %v2231_v46 = vmul.f32 %v3351_v43, %v4252_v4  ;;  %3368 = vrcp.f32 %v1980_v37  ;;  %v1606_v62 = vsub.f32 0.0, %v4349_v47 }
 0x144   :  { %v583_v52 = vpop.f32.mrb[39].mxu1  ;;  %v1208_v8 = vpop.f32.mrb[39].mxu0  ;;  %v2232_v57 = vmul.f32 %v3353_v51, %v4257_v11  ;;  %3370 = vrcp.f32 %v1981_v44  ;;  %v4358_v63 = vadd.f32 %v4118_v32, %v1205_v56  ;;  %v1207_v4 = vadd.f32 %v1206_v49, %v581_v1 }
 0x145   :  { %v3355_v41 = vpop.eup %3354  ;;  %3372 = vpow2.f32 %v1761_v31  ;;  %v1607_v60 = vsub.f32 0.0, %v4354_v59  ;;  %v587_v19 = vpop.f32.mrb[40].mxu1  ;;  %v1769_v22 = vmul.f32 1.442695, %v1606_v62 }
 0x146   :  { %v3357_v61 = vpop.eup %3356  ;;  %v2961_v5 = vpack.c.bf16 %v2232_v57, %v2231_v46  ;;  %v2233_v6 = vmul.f32 %v3355_v41, %v4263_v13  ;;  %3374 = vpow2.f32 %v1763_v38  ;;  %v1608_v14 = vsub.f32 0.0, %v4358_v63  ;;  %v1212_v45 = vpop.f32.mrb[40].mxu0 }
 0x147   :  { %v3359_v3 = vpop.eup %3358  ;;  %v1982_v48 = vadd.f32 1.0, %v3357_v61  ;;  %3376 = vpow2.f32 %v1765_v55  ;;  %v4367_v17 = vadd.f32 %v4116_v29, %v1207_v4  ;;  %v1209_v13 = vadd.f32 %v1208_v8, %v583_v52  ;;  %v589_v10 = vpop.f32.mrb[41].mxu1 }
 0x148   :  { %v3361_v11 = vpop.eup %3360  ;;  %v1983_v12 = vadd.f32 1.0, %v3359_v3  ;;  %2733 = vst [vmem:[%s5268_s5 + $0x50] sm:$0xff] %v2961_v5  ;;  %v1771_v26 = vmul.f32 1.442695, %v1607_v60  ;;  %v1213_v31 = vadd.f32 %v1212_v45, %v587_v19  ;;  %v1214_v35 = vpop.f32.mrb[41].mxu0 }
 0x149   :  { %v3363_v15 = vpop.eup %3362  ;;  %3378 = vrcp.f32 %v1982_v48  ;;  %v1984_v16 = vadd.f32 1.0, %v3361_v11  ;;  %v1609_v7 = vsub.f32 0.0, %v4367_v17  ;;  %v4371_v30 = vadd.f32 %v4118_v32, %v1209_v13  ;;  %v591_v25 = vpop.f32.mrb[42].mxu1 }
 0x14a   :  { %3380 = vrcp.f32 %v1983_v12  ;;  %v1985_v21 = vadd.f32 1.0, %v3363_v15  ;;  %v1773_v18 = vmul.f32 1.442695, %v1608_v14  ;;  %v1215_v37 = vadd.f32 %v1214_v35, %v589_v10  ;;  %v1216_v38 = vpop.f32.mrb[42].mxu0  ;;  %v593_v33 = vpop.f32.mrb[43].mxu1 }
 0x14b   :  { %3382 = vrcp.f32 %v1984_v16  ;;  %v3365_v36 = vpop.eup %3364  ;;  %v1775_v43 = vmul.f32 1.442695, %v1609_v7  ;;  %v1610_v44 = vsub.f32 0.0, %v4371_v30  ;;  %v1218_v39 = vpop.f32.mrb[43].mxu0  ;;  %v4377_v51 = vadd.f32 %v4116_v29, %v1213_v31 }
 0x14c   :  { %3384 = vrcp.f32 %v1985_v21  ;;  %v3367_v42 = vpop.eup %3366  ;;  %v2234_v23 = vmul.f32 %v3365_v36, %v4272_v24  ;;  %v4380_v46 = vadd.f32 %v4118_v32, %v1215_v37  ;;  %v1217_v4 = vadd.f32 %v1216_v38, %v591_v25 }
 0x14d   :  { %3386 = vpow2.f32 %v1767_v58  ;;  %v3369_v1 = vpop.eup %3368  ;;  %v2235_v49 = vmul.f32 %v3367_v42, %v4276_v34  ;;  %v1777_v24 = vmul.f32 1.442695, %v1610_v44  ;;  %v1611_v57 = vsub.f32 0.0, %v4377_v51 }
 0x14e   :  { %3388 = vpow2.f32 %v1769_v22  ;;  %v3371_v55 = vpop.eup %3370  ;;  %v2962_v56 = vpack.c.bf16 %v2234_v23, %v2233_v6  ;;  %v2236_v52 = vmul.f32 %v3369_v1, %v4283_v53  ;;  %v1612_v34 = vsub.f32 0.0, %v4380_v46  ;;  %v597_v53 = vpop.f32.mrb[44].mxu1 }
 0x14f   :  { %3390 = vpow2.f32 %v1771_v26  ;;  %v3373_v8 = vpop.eup %3372  ;;  %v2237_v41 = vmul.f32 %v3371_v55, %v4286_v54  ;;  %v1222_v3 = vpop.f32.mrb[44].mxu0  ;;  %v1779_v54 = vmul.f32 1.442695, %v1611_v57  ;;  %v4393_v14 = vadd.f32 %v4116_v29, %v1217_v4 }
 0x150   :  { %3392 = vpow2.f32 %v1773_v18  ;;  %v3375_v58 = vpop.eup %3374  ;;  %2734 = vst [vmem:[%s5268_s5 + $0x58] sm:$0xff] %v2962_v56  ;;  %v2963_v61 = vpack.c.bf16 %v2236_v52, %v2235_v49  ;;  %v1986_v62 = vadd.f32 1.0, %v3373_v8  ;;  %v1781_v48 = vmul.f32 1.442695, %v1612_v34  ;;  %v599_v11 = vpop.f32.mrb[45].mxu1 }
 0x151   :  { %3394 = vpow2.f32 %v1775_v43  ;;  %v3377_v5 = vpop.eup %3376  ;;  %v1987_v6 = vadd.f32 1.0, %v3375_v58  ;;  %v1219_v15 = vadd.f32 %v1218_v39, %v593_v33  ;;  %v1224_v16 = vpop.f32.mrb[45].mxu0  ;;  %v1223_v21 = vadd.f32 %v1222_v3, %v597_v53 }
 0x152   :  { %3396 = vpow2.f32 %v1777_v24  ;;  %2735 = vst [vmem:[%s5268_s5 + $0x60] sm:$0xff] %v2963_v61  ;;  %v1988_v60 = vadd.f32 1.0, %v3377_v5  ;;  %v601_v13 = vpop.f32.mrb[46].mxu1  ;;  %v1225_v22 = vadd.f32 %v1224_v16, %v599_v11  ;;  %v1226_v26 = vpop.f32.mrb[46].mxu0  ;;  %v1613_v35 = vsub.f32 0.0, %v4393_v14 }
 0x153   :  { %v3379_v12 = vpop.eup %3378  ;;  %3398 = vrcp.f32 %v1986_v62  ;;  %v603_v10 = vpop.f32.mrb[47].mxu1  ;;  %v4399_v25 = vadd.f32 %v4118_v32, %v1219_v15  ;;  %v1227_v56 = vadd.f32 %v1226_v26, %v601_v13 }
 0x154   :  { %v3381_v19 = vpop.eup %3380  ;;  %v2238_v45 = vmul.f32 %v3379_v12, %v4297_v2  ;;  %3400 = vrcp.f32 %v1987_v6  ;;  %v1228_v36 = vpop.f32.mrb[47].mxu0  ;;  %v4403_v2 = vadd.f32 %v4116_v29, %v1223_v21  ;;  %v4414_v1 = vadd.f32 %v4118_v32, %v1225_v22 }
 0x155   :  { %v3383_v7 = vpop.eup %3382  ;;  %v2239_v31 = vmul.f32 %v3381_v19, %v4303_v20  ;;  %3402 = vrcp.f32 %v1988_v60  ;;  %v1783_v20 = vmul.f32 1.442695, %v1613_v35  ;;  %v1614_v23 = vsub.f32 0.0, %v4399_v25  ;;  %v607_v52 = vpop.f32.mrb[48].mxu1 }
 0x156   :  { %v3385_v18 = vpop.eup %3384  ;;  %v2964_v37 = vpack.c.bf16 %v2238_v45, %v2237_v41  ;;  %v2240_v38 = vmul.f32 %v3383_v7, %v4309_v40  ;;  %3404 = vpow2.f32 %v1779_v54  ;;  %v1615_v40 = vsub.f32 0.0, %v4403_v2  ;;  %v1232_v24 = vpop.f32.mrb[48].mxu0 }
 0x157   :  { %v3387_v33 = vpop.eup %3386  ;;  %v4406_v42 = vmul.f32 %v3385_v18, %v4315_v27  ;;  %3406 = vpow2.f32 %v1781_v48  ;;  %v1785_v27 = vmul.f32 1.442695, %v1614_v23  ;;  %v1616_v34 = vsub.f32 0.0, %v4414_v1  ;;  %v609_v58 = vpop.f32.mrb[49].mxu1 }
 0x158   :  { %v3389_v43 = vpop.eup %3388  ;;  %2736 = vst [vmem:[%s5268_s5 + $0x68] sm:$0xff] %v2964_v37  ;;  %v2965_v44 = vpack.c.bf16 %v2240_v38, %v2239_v31  ;;  %v1989_v39 = vadd.f32 1.0, %v3387_v33  ;;  %3408 = vpow2.f32 %v1783_v20  ;;  %v1787_v57 = vmul.f32 1.442695, %v1615_v40  ;;  %v1234_v61 = vpop.f32.mrb[49].mxu0 }
 0x159   :  { %v3391_v49 = vpop.eup %3390  ;;  %v1990_v55 = vadd.f32 1.0, %v3389_v43  ;;  %v4421_v53 = vadd.f32 %v4116_v29, %v1227_v56  ;;  %v1229_v3 = vadd.f32 %v1228_v36, %v603_v10  ;;  %v611_v5 = vpop.f32.mrb[50].mxu1  ;;  %v1789_v11 = vmul.f32 1.442695, %v1616_v34 }
 0x15a   :  { %v3393_v8 = vpop.eup %3392  ;;  %2737 = vst [vmem:[%s5268_s5 + $0x70] sm:$0xff] %v2965_v44  ;;  %3410 = vrcp.f32 %v1989_v39  ;;  %v1991_v41 = vadd.f32 1.0, %v3391_v49  ;;  %v1236_v6 = vpop.f32.mrb[50].mxu0  ;;  %v1233_v12 = vadd.f32 %v1232_v24, %v607_v52  ;;  %v1235_v10 = vadd.f32 %v1234_v61, %v609_v58 }
 0x15b   :  { %v3395_v62 = vpop.eup %3394  ;;  %3412 = vrcp.f32 %v1990_v55  ;;  %v1992_v4 = vadd.f32 1.0, %v3393_v8  ;;  %v613_v60 = vpop.f32.mrb[51].mxu1  ;;  %v1617_v19 = vsub.f32 0.0, %v4421_v53  ;;  %v4425_v45 = vadd.f32 %v4118_v32, %v1229_v3 }
 0x15c   :  { %v3397_v54 = vpop.eup %3396  ;;  %3414 = vrcp.f32 %v1991_v41  ;;  %v1993_v48 = vadd.f32 1.0, %v3395_v62  ;;  %v1238_v15 = vpop.f32.mrb[51].mxu0  ;;  %v4429_v26 = vadd.f32 %v4116_v29, %v1233_v12  ;;  %v4437_v43 = vadd.f32 %v4118_v32, %v1235_v10 }
 0x15d   :  { %v3399_v16 = vpop.eup %3398  ;;  %3416 = vrcp.f32 %v1992_v4  ;;  %v1994_v13 = vadd.f32 1.0, %v3397_v54  ;;  %v1791_v35 = vmul.f32 1.442695, %v1617_v19  ;;  %v1618_v36 = vsub.f32 0.0, %v4425_v45 }
 0x15e   :  { %v3401_v21 = vpop.eup %3400  ;;  %v2242_v22 = vmul.f32 %v3399_v16, %v4324_v0  ;;  %3418 = vrcp.f32 %v1993_v48  ;;  %v1619_v0 = vsub.f32 0.0, %v4429_v26  ;;  %v1242_v44 = vpop.f32.mrb[52].mxu0  ;;  %v1237_v56 = vadd.f32 %v1236_v6, %v611_v5 }
 0x15f   :  { %v3403_v7 = vpop.eup %3402  ;;  %v2243_v31 = vmul.f32 %v3401_v21, %v4328_v9  ;;  %3420 = vrcp.f32 %v1994_v13  ;;  %v1793_v23 = vmul.f32 1.442695, %v1618_v36  ;;  %v617_v9 = vpop.f32.mrb[52].mxu1  ;;  %v1239_v52 = vadd.f32 %v1238_v15, %v613_v60 }
 0x160   :  { %v3405_v18 = vpop.eup %3404  ;;  %v2966_v37 = vpack.c.bf16 %v2242_v22, %v4406_v42  ;;  %v2244_v38 = vmul.f32 %v3403_v7, %v4331_v50  ;;  %3422 = vpow2.f32 %v1785_v27  ;;  %v1795_v50 = vmul.f32 1.442695, %v1619_v0  ;;  %v619_v40 = vpop.f32.mrb[53].mxu1 }
 0x161   :  { %v3407_v33 = vpop.eup %3406  ;;  %v1995_v20 = vadd.f32 1.0, %v3405_v18  ;;  %3424 = vpow2.f32 %v1787_v57  ;;  %v1244_v49 = vpop.f32.mrb[53].mxu0  ;;  %v1620_v27 = vsub.f32 0.0, %v4437_v43  ;;  %v1243_v34 = vadd.f32 %v1242_v44, %v617_v9 }
 0x162   :  { %2738 = vst [vmem:[%s5268_s5 + $0x78] sm:$0xff] %v2966_v37  ;;  %v2967_v39 = vpack.c.bf16 %v2244_v38, %v2243_v31  ;;  %v1996_v42 = vadd.f32 1.0, %v3407_v33  ;;  %3426 = vpow2.f32 %v1789_v11  ;;  %v3409_v55 = vpop.eup %3408  ;;  %v621_v24 = vpop.f32.mrb[54].mxu1  ;;  %v1245_v58 = vadd.f32 %v1244_v49, %v619_v40 }
 0x163   :  { %3428 = vrcp.f32 %v1995_v20  ;;  %v1246_v8 = vpop.f32.mrb[54].mxu0  ;;  %v1997_v57 = vadd.f32 1.0, %v3409_v55  ;;  %v623_v61 = vpop.f32.mrb[55].mxu1  ;;  %v1797_v54 = vmul.f32 1.442695, %v1620_v27  ;;  %v4448_v5 = vadd.f32 %v4116_v29, %v1237_v56 }
 0x164   :  { %v3411_v41 = vpop.eup %3410  ;;  %2739 = vst [vmem:[%s5268_s5 + $0x80] sm:$0xff] %v2967_v39  ;;  %3430 = vrcp.f32 %v1996_v42  ;;  %v1248_v62 = vpop.f32.mrb[55].mxu0  ;;  %v4452_v11 = vadd.f32 %v4118_v32, %v1239_v52  ;;  %v4455_v12 = vadd.f32 %v4116_v29, %v1243_v34  ;;  %v4460_v16 = vadd.f32 %v4118_v32, %v1245_v58 }
 0x165   :  { %v3413_v4 = vpop.eup %3412  ;;  %v2245_v3 = vmul.f32 %v3411_v41, %v4339_v28  ;;  %3432 = vpow2.f32 %v1791_v35  ;;  %v1621_v28 = vsub.f32 0.0, %v4448_v5  ;;  %v627_v31 = vpop.f32.mrb[56].mxu1  ;;  %v1247_v9 = vadd.f32 %v1246_v8, %v621_v24 }
 0x166   :  { %v3415_v6 = vpop.eup %3414  ;;  %v2246_v48 = vmul.f32 %v3413_v4, %v4349_v47  ;;  %3434 = vrcp.f32 %v1997_v57  ;;  %v1622_v21 = vsub.f32 0.0, %v4452_v11  ;;  %v1252_v35 = vpop.f32.mrb[56].mxu0  ;;  %v1624_v38 = vsub.f32 0.0, %v4460_v16 }
 0x167   :  { %v3417_v60 = vpop.eup %3416  ;;  %v2247_v15 = vmul.f32 %v3415_v6, %v4354_v59  ;;  %3436 = vpow2.f32 %v1793_v23  ;;  %v1799_v7 = vmul.f32 1.442695, %v1621_v28  ;;  %v1623_v59 = vsub.f32 0.0, %v4455_v12  ;;  %v629_v0 = vpop.f32.mrb[57].mxu1 }
 0x168   :  { %v3419_v13 = vpop.eup %3418  ;;  %v2968_v19 = vpack.c.bf16 %v2246_v48, %v2245_v3  ;;  %v2248_v47 = vmul.f32 %v3417_v60, %v4358_v63  ;;  %3438 = vpow2.f32 %v1795_v50  ;;  %v1801_v37 = vmul.f32 1.442695, %v1622_v21  ;;  %v1254_v33 = vpop.f32.mrb[57].mxu0 }
 0x169   :  { %v3421_v22 = vpop.eup %3420  ;;  %v2249_v10 = vmul.f32 %v3419_v13, %v4367_v17  ;;  %3440 = vpow2.f32 %v1797_v54  ;;  %v1803_v23 = vmul.f32 1.442695, %v1623_v59  ;;  %v631_v44 = vpop.f32.mrb[58].mxu1  ;;  %v4475_v52 = vadd.f32 %v4116_v29, %v1247_v9 }
 0x16a   :  { %v3423_v36 = vpop.eup %3422  ;;  %2740 = vst [vmem:[%s5268_s5 + $0x88] sm:$0xff] %v2968_v19  ;;  %v2969_v18 = vpack.c.bf16 %v2248_v47, %v2247_v15  ;;  %v2250_v63 = vmul.f32 %v3421_v22, %v4371_v30  ;;  %3442 = vpow2.f32 %v1799_v7  ;;  %v1256_v39 = vpop.f32.mrb[58].mxu0  ;;  %v1805_v30 = vmul.f32 1.442695, %v1624_v38 }
 0x16b   :  { %v3425_v17 = vpop.eup %3424  ;;  %v1998_v20 = vadd.f32 1.0, %v3423_v36  ;;  %3444 = vpow2.f32 %v1801_v37  ;;  %v633_v49 = vpop.f32.mrb[59].mxu1  ;;  %v1249_v24 = vadd.f32 %v1248_v62, %v623_v61  ;;  %v1253_v57 = vadd.f32 %v1252_v35, %v627_v31 }
 0x16c   :  { %v3427_v42 = vpop.eup %3426  ;;  %2741 = vst [vmem:[%s5268_s5 + $0x90] sm:$0xff] %v2969_v18  ;;  %v2970_v50 = vpack.c.bf16 %v2250_v63, %v2249_v10  ;;  %v1999_v40 = vadd.f32 1.0, %v3425_v17  ;;  %v1258_v55 = vpop.f32.mrb[59].mxu0  ;;  %v1255_v34 = vadd.f32 %v1254_v33, %v629_v0  ;;  %v1625_v3 = vsub.f32 0.0, %v4475_v52 }
 0x16d   :  { %v3429_v27 = vpop.eup %3428  ;;  %3446 = vrcp.f32 %v1998_v20  ;;  %v2000_v56 = vadd.f32 1.0, %v3427_v42  ;;  %v4484_v54 = vadd.f32 %v4118_v32, %v1249_v24  ;;  %v4487_v6 = vadd.f32 %v4116_v29, %v1253_v57  ;;  %v637_v28 = vpop.f32.mrb[60].mxu1 }
 0x16e   :  { %v3431_v8 = vpop.eup %3430  ;;  %2742 = vst [vmem:[%s5268_s5 + $0x98] sm:$0xff] %v2970_v50  ;;  %v2251_v41 = vmul.f32 %v3429_v27, %v4377_v51  ;;  %3448 = vrcp.f32 %v1999_v40  ;;  %v4490_v51 = vadd.f32 %v4118_v32, %v1255_v34  ;;  %v1262_v13 = vpop.f32.mrb[60].mxu0  ;;  %v1257_v35 = vadd.f32 %v1256_v39, %v631_v44 }
 0x16f   :  { %v3433_v58 = vpop.eup %3432  ;;  %v2252_v4 = vmul.f32 %v3431_v8, %v4380_v46  ;;  %3450 = vrcp.f32 %v2000_v56  ;;  %v1807_v46 = vmul.f32 1.442695, %v1625_v3  ;;  %v1626_v21 = vsub.f32 0.0, %v4484_v54  ;;  %v639_v10 = vpop.f32.mrb[61].mxu1 }
 0x170   :  { %v3435_v61 = vpop.eup %3434  ;;  %v2001_v62 = vadd.f32 1.0, %v3433_v58  ;;  %3452 = vpow2.f32 %v1803_v23  ;;  %v1627_v22 = vsub.f32 0.0, %v4487_v6  ;;  %v1264_v7 = vpop.f32.mrb[61].mxu0  ;;  %v1628_v31 = vsub.f32 0.0, %v4490_v51 }
 0x171   :  { %v3437_v48 = vpop.eup %3436  ;;  %v2971_v60 = vpack.c.bf16 %v2252_v4, %v2251_v41  ;;  %v4493_v15 = vmul.f32 %v3435_v61, %v4393_v14  ;;  %3454 = vpow2.f32 %v1805_v30  ;;  %v641_v36 = vpop.f32.mrb[62].mxu1  ;;  %v1809_v37 = vmul.f32 1.442695, %v1626_v21 }
 0x172   :  { %v3439_v19 = vpop.eup %3438  ;;  %3456 = vrcp.f32 %v2001_v62  ;;  %v2002_v47 = vadd.f32 1.0, %v3437_v48  ;;  %v1266_v18 = vpop.f32.mrb[62].mxu0  ;;  %v1811_v38 = vmul.f32 1.442695, %v1627_v22  ;;  %v1813_v17 = vmul.f32 1.442695, %v1628_v31 }
 0x173   :  { %v3441_v59 = vpop.eup %3440  ;;  %2743 = vst [vmem:[%s5268_s5 + $0xa0] sm:$0xff] %v2971_v60  ;;  %v2003_v14 = vadd.f32 1.0, %v3439_v19  ;;  %3458 = vpow2.f32 %v1807_v46  ;;  %v643_v0 = vpop.f32.mrb[63].mxu1  ;;  %v4502_v20 = vadd.f32 %v4116_v29, %v1257_v35  ;;  %v1259_v23 = vadd.f32 %v1258_v55, %v633_v49 }
 0x174   :  { %3460 = vrcp.f32 %v2002_v47  ;;  %v2004_v63 = vadd.f32 1.0, %v3441_v59  ;;  %v3443_v33 = vpop.eup %3442  ;;  %v1268_v9 = vpop.f32.mrb[63].mxu0  ;;  %v1263_v40 = vadd.f32 %v1262_v13, %v637_v28  ;;  %v1265_v44 = vadd.f32 %v1264_v7, %v639_v10 }
 0x175   :  { %3462 = vrcp.f32 %v2003_v14  ;;  %v3445_v42 = vpop.eup %3444  ;;  %v2005_v50 = vadd.f32 1.0, %v3443_v33  ;;  %v1629_v27 = vsub.f32 0.0, %v4502_v20  ;;  %v4506_v56 = vadd.f32 %v4118_v32, %v1259_v23  ;;  %v647_v4 = vpop.f32.mrb[64].mxu1 }
 0x176   :  { %3464 = vrcp.f32 %v2004_v63  ;;  %v2006_v30 = vadd.f32 1.0, %v3445_v42  ;;  %v4510_v49 = vadd.f32 %v4116_v29, %v1263_v40  ;;  %v4513_v55 = vadd.f32 %v4118_v32, %v1265_v44  ;;  %v1272_v3 = vpop.f32.mrb[64].mxu0  ;;  %v649_v60 = vpop.f32.mrb[65].mxu1 }
 0x177   :  { %v3447_v39 = vpop.eup %3446  ;;  %3466 = vpow2.f32 %v1809_v37  ;;  %v1815_v34 = vmul.f32 1.442695, %v1629_v27  ;;  %v1630_v58 = vsub.f32 0.0, %v4506_v56  ;;  %v1274_v46 = vpop.f32.mrb[65].mxu0  ;;  %v1267_v63 = vadd.f32 %v1266_v18, %v641_v36 }
 0x178   :  { %v3449_v24 = vpop.eup %3448  ;;  %v2254_v8 = vmul.f32 %v3447_v39, %v4399_v25  ;;  %3468 = vrcp.f32 %v2005_v50  ;;  %v1631_v48 = vsub.f32 0.0, %v4510_v49  ;;  %v1632_v19 = vsub.f32 0.0, %v4513_v55  ;;  %v4521_v47 = vpop.f32.mrb[66].mxu1 }
 0x179   :  { %v3451_v41 = vpop.eup %3450  ;;  %v2255_v57 = vmul.f32 %v3449_v24, %v4403_v2  ;;  %3470 = vrcp.f32 %v2006_v30  ;;  %v1817_v2 = vmul.f32 1.442695, %v1630_v58  ;;  %v4523_v21 = vpop.f32.mrb[66].mxu0  ;;  %v1269_v33 = vadd.f32 %v1268_v9, %v643_v0 }
 0x17a   :  { %v3453_v61 = vpop.eup %3452  ;;  %v2972_v62 = vpack.c.bf16 %v2254_v8, %v4493_v15  ;;  %v2256_v25 = vmul.f32 %v3451_v41, %v4414_v1  ;;  %3472 = vpow2.f32 %v1811_v38  ;;  %v1819_v10 = vmul.f32 1.442695, %v1631_v48  ;;  %v653_v7 = vpop.f32.mrb[67].mxu1 }
 0x17b   :  { %v3455_v28 = vpop.eup %3454  ;;  %v2007_v13 = vadd.f32 1.0, %v3453_v61  ;;  %3474 = vpow2.f32 %v1813_v17  ;;  %v1278_v59 = vpop.f32.mrb[67].mxu0  ;;  %v1821_v35 = vmul.f32 1.442695, %v1632_v19  ;;  %v1273_v17 = vadd.f32 %v1272_v3, %v647_v4 }
 0x17c   :  { %v3457_v22 = vpop.eup %3456  ;;  %2744 = vst [vmem:[%s5268_s5 + $0xa8] sm:$0xff] %v2972_v62  ;;  %v2973_v1 = vpack.c.bf16 %v2256_v25, %v2255_v57  ;;  %v2008_v15 = vadd.f32 1.0, %v3455_v28  ;;  %3476 = vpow2.f32 %v1815_v34  ;;  %v4534_v50 = vadd.f32 %v4116_v29, %v1267_v63 }
 0x17d   :  { %v3459_v14 = vpop.eup %3458  ;;  %v2257_v31 = vmul.f32 %v3457_v22, %v4421_v53  ;;  %3478 = vrcp.f32 %v2007_v13  ;;  %v1275_v53 = vadd.f32 %v1274_v46, %v649_v60  ;;  %v4538_v18 = vadd.f32 %v4118_v32, %v1269_v33  ;;  %v657_v30 = vpop.f32.mrb[68].mxu1 }
 0x17e   :  { %v3461_v37 = vpop.eup %3460  ;;  %2745 = vst [vmem:[%s5268_s5 + $0xb0] sm:$0xff] %v2973_v1  ;;  %3480 = vrcp.f32 %v2008_v15  ;;  %v2009_v38 = vadd.f32 1.0, %v3459_v14  ;;  %v4541_v44 = vadd.f32 %v4116_v29, %v1273_v17  ;;  %v1282_v27 = vpop.f32.mrb[68].mxu0  ;;  %v1277_v1 = vadd.f32 %v4523_v21, %v4521_v47 }
 0x17f   :  { %v3463_v23 = vpop.eup %3462  ;;  %v2258_v42 = vmul.f32 %v3461_v37, %v4425_v45  ;;  %3482 = vpow2.f32 %v1817_v2  ;;  %v1633_v45 = vsub.f32 0.0, %v4534_v50  ;;  %v659_v57 = vpop.f32.mrb[69].mxu1  ;;  %v4552_v61 = vadd.f32 %v4118_v32, %v1275_v53 }
 0x180   :  { %v3465_v40 = vpop.eup %3464  ;;  %v2259_v36 = vmul.f32 %v3463_v23, %v4429_v26  ;;  %3484 = vrcp.f32 %v2009_v38  ;;  %v1634_v26 = vsub.f32 0.0, %v4538_v18  ;;  %v1635_v41 = vsub.f32 0.0, %v4541_v44  ;;  %v1284_v34 = vpop.f32.mrb[69].mxu0 }
 0x181   :  { %v3467_v0 = vpop.eup %3466  ;;  %v2974_v9 = vpack.c.bf16 %v2258_v42, %v2257_v31  ;;  %v2260_v39 = vmul.f32 %v3465_v40, %v4437_v43  ;;  %3486 = vpow2.f32 %v1819_v10  ;;  %v1823_v3 = vmul.f32 1.442695, %v1633_v45  ;;  %v4554_v62 = vpop.f32.mrb[70].mxu1 }
 0x182   :  { %v3469_v24 = vpop.eup %3468  ;;  %v2010_v8 = vadd.f32 1.0, %v3467_v0  ;;  %3488 = vpow2.f32 %v1821_v35  ;;  %v1286_v25 = vpop.f32.mrb[70].mxu0  ;;  %v1825_v46 = vmul.f32 1.442695, %v1634_v26  ;;  %v1827_v28 = vmul.f32 1.442695, %v1635_v41 }
 0x183   :  { %v3471_v58 = vpop.eup %3470  ;;  %2746 = vst [vmem:[%s5268_s5 + $0xb8] sm:$0xff] %v2974_v9  ;;  %v2975_v43 = vpack.c.bf16 %v2260_v39, %v2259_v36  ;;  %v2261_v4 = vmul.f32 %v3469_v24, %v4448_v5  ;;  %v663_v13 = vpop.f32.mrb[71].mxu1  ;;  %v1636_v22 = vsub.f32 0.0, %v4552_v61  ;;  %v1279_v14 = vadd.f32 %v1278_v59, %v653_v7 }
 0x184   :  { %v3473_v48 = vpop.eup %3472  ;;  %v2262_v60 = vmul.f32 %v3471_v58, %v4452_v11  ;;  %3490 = vrcp.f32 %v2010_v8  ;;  %v1288_v2 = vpop.f32.mrb[71].mxu0  ;;  %v4564_v37 = vadd.f32 %v4116_v29, %v1277_v1  ;;  %v1283_v21 = vadd.f32 %v1282_v27, %v657_v30 }
 0x185   :  { %v3475_v19 = vpop.eup %3474  ;;  %2747 = vst [vmem:[%s5268_s5 + $0xc0] sm:$0xff] %v2975_v43  ;;  %v2011_v5 = vadd.f32 1.0, %v3473_v48  ;;  %3492 = vpow2.f32 %v1823_v3  ;;  %v1829_v63 = vmul.f32 1.442695, %v1636_v22  ;;  %v4571_v47 = vadd.f32 %v4118_v32, %v1279_v14  ;;  %v667_v42 = vpop.f32.mrb[72].mxu1 }
 0x186   :  { %v3477_v15 = vpop.eup %3476  ;;  %v2976_v10 = vpack.c.bf16 %v2262_v60, %v2261_v4  ;;  %v2012_v11 = vadd.f32 1.0, %v3475_v19  ;;  %3494 = vpow2.f32 %v1825_v46  ;;  %v1637_v17 = vsub.f32 0.0, %v4564_v37  ;;  %v1292_v53 = vpop.f32.mrb[72].mxu0 }
 0x187   :  { %v3479_v31 = vpop.eup %3478  ;;  %3496 = vrcp.f32 %v2011_v5  ;;  %v2013_v35 = vadd.f32 1.0, %v3477_v15  ;;  %v1285_v23 = vadd.f32 %v1284_v34, %v659_v57  ;;  %v1638_v0 = vsub.f32 0.0, %v4571_v47  ;;  %v669_v9 = vpop.f32.mrb[73].mxu1 }
 0x188   :  { %v3481_v38 = vpop.eup %3480  ;;  %2748 = vst [vmem:[%s5268_s5 + $0xc8] sm:$0xff] %v2976_v10  ;;  %v2263_v33 = vmul.f32 %v3479_v31, %v4455_v12  ;;  %3498 = vrcp.f32 %v2012_v11  ;;  %v4577_v12 = vadd.f32 %v4116_v29, %v1283_v21  ;;  %v1294_v39 = vpop.f32.mrb[73].mxu0  ;;  %v1831_v27 = vmul.f32 1.442695, %v1637_v17 }
 0x189   :  { %v3483_v7 = vpop.eup %3482  ;;  %v2264_v59 = vmul.f32 %v3481_v38, %v4460_v16  ;;  %3500 = vrcp.f32 %v2013_v35  ;;  %v4580_v24 = vpop.f32.mrb[74].mxu1  ;;  %v1833_v57 = vmul.f32 1.442695, %v1638_v0  ;;  %v1287_v3 = vadd.f32 %v1286_v25, %v4554_v62 }
 0x18a   :  { %v3485_v40 = vpop.eup %3484  ;;  %v2014_v36 = vadd.f32 1.0, %v3483_v7  ;;  %3502 = vpow2.f32 %v1827_v28  ;;  %v4582_v8 = vpop.f32.mrb[74].mxu0  ;;  %v1639_v34 = vsub.f32 0.0, %v4577_v12  ;;  %v1289_v46 = vadd.f32 %v1288_v2, %v663_v13 }
 0x18b   :  { %v3487_v45 = vpop.eup %3486  ;;  %v2977_v30 = vpack.c.bf16 %v2264_v59, %v2263_v33  ;;  %v2265_v16 = vmul.f32 %v3485_v40, %v4475_v52  ;;  %3504 = vpow2.f32 %v1829_v63  ;;  %v673_v58 = vpop.f32.mrb[75].mxu1  ;;  %v4589_v52 = vadd.f32 %v4118_v32, %v1285_v23 }
 0x18c   :  { %v3489_v26 = vpop.eup %3488  ;;  %3506 = vrcp.f32 %v2014_v36  ;;  %v2015_v41 = vadd.f32 1.0, %v3487_v45  ;;  %v1298_v43 = vpop.f32.mrb[75].mxu0  ;;  %v1835_v60 = vmul.f32 1.442695, %v1639_v34  ;;  %v1293_v28 = vadd.f32 %v1292_v53, %v667_v42 }
 0x18d   :  { %2749 = vst [vmem:[%s5268_s5 + $0xd0] sm:$0xff] %v2977_v30  ;;  %v2016_v4 = vadd.f32 1.0, %v3489_v26  ;;  %3508 = vpow2.f32 %v1831_v27  ;;  %v1640_v22 = vsub.f32 0.0, %v4589_v52  ;;  %v4595_v1 = vadd.f32 %v4116_v29, %v1287_v3  ;;  %v677_v14 = vpop.f32.mrb[76].mxu1 }
 0x18e   :  { %v3491_v48 = vpop.eup %3490  ;;  %3510 = vrcp.f32 %v2015_v41  ;;  %v4598_v11 = vadd.f32 %v4118_v32, %v1289_v46  ;;  %v4601_v62 = vadd.f32 %v4116_v29, %v1293_v28  ;;  %v1302_v31 = vpop.f32.mrb[76].mxu0  ;;  %v1295_v42 = vadd.f32 %v1294_v39, %v669_v9 }
 0x18f   :  { %v3493_v19 = vpop.eup %3492  ;;  %v2266_v5 = vmul.f32 %v3491_v48, %v4484_v54  ;;  %3512 = vrcp.f32 %v2016_v4  ;;  %v1837_v54 = vmul.f32 1.442695, %v1640_v22  ;;  %v1641_v38 = vsub.f32 0.0, %v4595_v1  ;;  %v679_v21 = vpop.f32.mrb[77].mxu1 }
 0x190   :  { %v3495_v15 = vpop.eup %3494  ;;  %v2017_v10 = vadd.f32 1.0, %v3493_v19  ;;  %3514 = vpow2.f32 %v1833_v57  ;;  %v1642_v33 = vsub.f32 0.0, %v4598_v11  ;;  %v1304_v7 = vpop.f32.mrb[77].mxu0  ;;  %v1643_v23 = vsub.f32 0.0, %v4601_v62 }
 0x191   :  { %v3497_v25 = vpop.eup %3496  ;;  %v2978_v13 = vpack.c.bf16 %v2266_v5, %v2265_v16  ;;  %v2018_v2 = vadd.f32 1.0, %v3495_v15  ;;  %3516 = vpow2.f32 %v1835_v60  ;;  %v4611_v53 = vpop.f32.mrb[78].mxu1  ;;  %v1839_v0 = vmul.f32 1.442695, %v1641_v38 }
 0x192   :  { %v3499_v35 = vpop.eup %3498  ;;  %v2267_v63 = vmul.f32 %v3497_v25, %v4487_v6  ;;  %3518 = vrcp.f32 %v2017_v10  ;;  %v4613_v6 = vpop.f32.mrb[78].mxu0  ;;  %v1841_v45 = vmul.f32 1.442695, %v1642_v33  ;;  %v1843_v41 = vmul.f32 1.442695, %v1643_v23 }
 0x193   :  { %v3501_v59 = vpop.eup %3500  ;;  %2750 = vst [vmem:[%s5268_s5 + $0xd8] sm:$0xff] %v2978_v13  ;;  %v2268_v17 = vmul.f32 %v3499_v35, %v4490_v51  ;;  %3520 = vrcp.f32 %v2018_v2  ;;  %v4616_v30 = vpop.f32.mrb[79].mxu1  ;;  %v4621_v9 = vadd.f32 %v4118_v32, %v1295_v42  ;;  %v1299_v34 = vadd.f32 %v1298_v43, %v673_v58 }
 0x194   :  { %v3503_v40 = vpop.eup %3502  ;;  %v2269_v36 = vmul.f32 %v3501_v59, %v4502_v20  ;;  %3522 = vpow2.f32 %v1837_v54  ;;  %v4618_v16 = vpop.f32.mrb[79].mxu0  ;;  %v1297_v20 = vadd.f32 %v4582_v8, %v4580_v24  ;;  %v1303_v60 = vadd.f32 %v1302_v31, %v677_v14 }
 0x195   :  { %v3505_v27 = vpop.eup %3504  ;;  %v2979_v51 = vpack.c.bf16 %v2268_v17, %v2267_v63  ;;  %v2019_v26 = vadd.f32 1.0, %v3503_v40  ;;  %3524 = vpow2.f32 %v1839_v0  ;;  %v1644_v48 = vsub.f32 0.0, %v4621_v9 }
 0x196   :  { %v3507_v39 = vpop.eup %3506  ;;  %v2020_v57 = vadd.f32 1.0, %v3505_v27  ;;  %v4631_v19 = vadd.f32 %v4116_v29, %v1297_v20  ;;  %v4634_v24 = vadd.f32 %v4118_v32, %v1299_v34  ;;  %v1312_v22 = vpop.f32.mrb[80].mxu0  ;;  %v4646_v31 = vadd.f32 %v4116_v29, %v1303_v60 }
 0x197   :  { %v3509_v4 = vpop.eup %3508  ;;  %2751 = vst [vmem:[%s5268_s5 + $0xe0] sm:$0xff] %v2979_v51  ;;  %v2270_v3 = vmul.f32 %v3507_v39, %v4506_v56  ;;  %3526 = vrcp.f32 %v2019_v26  ;;  %v1845_v5 = vmul.f32 1.442695, %v1644_v48  ;;  %v687_v56 = vpop.f32.mrb[80].mxu1  ;;  %v1305_v35 = vadd.f32 %v1304_v7, %v679_v21 }
 0x198   :  { %v3511_v46 = vpop.eup %3510  ;;  %3528 = vrcp.f32 %v2020_v57  ;;  %v2021_v28 = vadd.f32 1.0, %v3509_v4  ;;  %v1645_v25 = vsub.f32 0.0, %v4631_v19  ;;  %v1646_v13 = vsub.f32 0.0, %v4634_v24  ;;  %v4640_v2 = vpop.f32.mrb[81].mxu1 }
 0x199   :  { %v3513_v8 = vpop.eup %3512  ;;  %v2980_v58 = vpack.c.bf16 %v2270_v3, %v2269_v36  ;;  %v2271_v43 = vmul.f32 %v3511_v46, %v4510_v49  ;;  %3530 = vpow2.f32 %v1841_v45  ;;  %v1314_v54 = vpop.f32.mrb[81].mxu0  ;;  %v1647_v21 = vsub.f32 0.0, %v4646_v31 }
 0x19a   :  { %v3515_v15 = vpop.eup %3514  ;;  %v2272_v10 = vmul.f32 %v3513_v8, %v4513_v55  ;;  %3532 = vrcp.f32 %v2021_v28  ;;  %v4648_v55 = vpop.f32.mrb[82].mxu1  ;;  %v1847_v17 = vmul.f32 1.442695, %v1645_v25  ;;  %v1849_v0 = vmul.f32 1.442695, %v1646_v13 }
 0x19b   :  { %v3517_v14 = vpop.eup %3516  ;;  %2752 = vst [vmem:[%s5268_s5 + $0xe8] sm:$0xff] %v2980_v58  ;;  %v2022_v49 = vadd.f32 1.0, %v3515_v15  ;;  %3534 = vpow2.f32 %v1843_v41  ;;  %v4650_v63 = vpop.f32.mrb[82].mxu0  ;;  %v4663_v27 = vadd.f32 %v4118_v32, %v1305_v35  ;;  %v1307_v51 = vadd.f32 %v4613_v6, %v4611_v53 }
 0x19c   :  { %v3519_v38 = vpop.eup %3518  ;;  %v2981_v33 = vpack.c.bf16 %v2272_v10, %v2271_v43  ;;  %v2023_v59 = vadd.f32 1.0, %v3517_v14  ;;  %3536 = vpow2.f32 %v1845_v5  ;;  %v4652_v23 = vpop.f32.mrb[83].mxu1  ;;  %v1309_v41 = vadd.f32 %v4618_v16, %v4616_v30 }
 0x19d   :  { %v4654_v42 = vpop.f32.mrb[83].mxu0  ;;  %v3521_v40 = vpop.eup %3520  ;;  %v2273_v36 = vmul.f32 %v3519_v38, %v4534_v50  ;;  %3538 = vrcp.f32 %v2022_v49  ;;  %v1851_v50 = vmul.f32 1.442695, %v1647_v21  ;;  %v1648_v20 = vsub.f32 0.0, %v4663_v27 }
 0x19e   :  { %v3523_v7 = vpop.eup %3522  ;;  %2753 = vst [vmem:[%s5268_s5 + $0xf0] sm:$0xff] %v2981_v33  ;;  %v2274_v45 = vmul.f32 %v3521_v40, %v4538_v18  ;;  %3540 = vrcp.f32 %v2023_v59  ;;  %v4671_v18 = vadd.f32 %v4116_v29, %v1307_v51  ;;  %v4674_v3 = vadd.f32 %v4118_v32, %v1309_v41  ;;  %v697_v6 = vpop.f32.mrb[84].mxu1 }
 0x19f   :  { %v2024_v26 = vadd.f32 1.0, %v3523_v7  ;;  %3542 = vpow2.f32 %v1847_v17  ;;  %v3525_v39 = vpop.eup %3524  ;;  %v1313_v53 = vadd.f32 %v1312_v22, %v687_v56  ;;  %v1322_v48 = vpop.f32.mrb[84].mxu0  ;;  %v1853_v16 = vmul.f32 1.442695, %v1648_v20 }
 0x1a0   :  { %v2982_v57 = vpack.c.bf16 %v2274_v45, %v2273_v36  ;;  %3544 = vpow2.f32 %v1849_v0  ;;  %v2025_v4 = vadd.f32 1.0, %v3525_v39  ;;  %v1649_v46 = vsub.f32 0.0, %v4671_v18  ;;  %v4681_v28 = vpop.f32.mrb[85].mxu1  ;;  %v1324_v8 = vpop.f32.mrb[85].mxu0 }
 0x1a1   :  { %v3527_v34 = vpop.eup %3526  ;;  %3546 = vrcp.f32 %v2024_v26  ;;  %v1650_v5 = vsub.f32 0.0, %v4674_v3  ;;  %v4686_v56 = vadd.f32 %v4116_v29, %v1313_v53  ;;  %v4688_v22 = vpop.f32.mrb[86].mxu1  ;;  %v1315_v13 = vadd.f32 %v1314_v54, %v4640_v2 }
 0x1a2   :  { %v3529_v60 = vpop.eup %3528  ;;  %2754 = vst [vmem:[%s5268_s5 + $0xf8] sm:$0xff] %v2982_v57  ;;  %v2275_v30 = vmul.f32 %v3527_v34, %v4541_v44  ;;  %3548 = vpow2.f32 %v1851_v50  ;;  %v4690_v15 = vpop.f32.mrb[86].mxu0  ;;  %v1855_v25 = vmul.f32 1.442695, %v1649_v46  ;;  %v1317_v2 = vadd.f32 %v4650_v63, %v4648_v55 }
 0x1a3   :  { %v3531_v58 = vpop.eup %3530  ;;  %v2276_v43 = vmul.f32 %v3529_v60, %v4552_v61  ;;  %3550 = vrcp.f32 %v2025_v4  ;;  %v4693_v14 = vpop.f32.mrb[87].mxu1  ;;  %v1857_v33 = vmul.f32 1.442695, %v1650_v5  ;;  %v1651_v59 = vsub.f32 0.0, %v4686_v56 }
 0x1a4   :  { %v3533_v44 = vpop.eup %3532  ;;  %v2026_v10 = vadd.f32 1.0, %v3531_v58  ;;  %3552 = vpow2.f32 %v1853_v16  ;;  %v4695_v49 = vpop.f32.mrb[87].mxu0  ;;  %v4700_v36 = vadd.f32 %v4118_v32, %v1315_v13  ;;  %v1319_v21 = vadd.f32 %v4654_v42, %v4652_v23 }
 0x1a5   :  { %v3535_v61 = vpop.eup %3534  ;;  %v2983_v35 = vpack.c.bf16 %v2276_v43, %v2275_v30  ;;  %v2277_v38 = vmul.f32 %v3533_v44, %v4564_v37  ;;  %v1859_v37 = vmul.f32 1.442695, %v1651_v59  ;;  %v4712_v26 = vadd.f32 %v4116_v29, %v1317_v2  ;;  %v707_v39 = vpop.f32.mrb[88].mxu1 }
 0x1a6   :  { %v3537_v17 = vpop.eup %3536  ;;  %3554 = vrcp.f32 %v2026_v10  ;;  %v2027_v40 = vadd.f32 1.0, %v3535_v61  ;;  %v1652_v51 = vsub.f32 0.0, %v4700_v36  ;;  %v4716_v50 = vadd.f32 %v4118_v32, %v1319_v21  ;;  %v1332_v57 = vpop.f32.mrb[88].mxu0 }
 0x1a7   :  { %v3539_v54 = vpop.eup %3538  ;;  %2755 = vst [vmem:[%s5268_s5 + $0x100] sm:$0xff] %v2983_v35  ;;  %v2028_v0 = vadd.f32 1.0, %v3537_v17  ;;  %3556 = vpow2.f32 %v1855_v25  ;;  %v1323_v41 = vadd.f32 %v1322_v48, %v697_v6  ;;  %v4718_v34 = vpop.f32.mrb[89].mxu1  ;;  %v1325_v43 = vadd.f32 %v1324_v8, %v4681_v28 }
 0x1a8   :  { %v3541_v7 = vpop.eup %3540  ;;  %v2278_v45 = vmul.f32 %v3539_v54, %v4571_v47  ;;  %3558 = vrcp.f32 %v2027_v40  ;;  %v1861_v47 = vmul.f32 1.442695, %v1652_v51  ;;  %v4720_v4 = vpop.f32.mrb[89].mxu0  ;;  %v1654_v30 = vsub.f32 0.0, %v4716_v50 }
 0x1a9   :  { %v3543_v55 = vpop.eup %3542  ;;  %v2279_v63 = vmul.f32 %v3541_v7, %v4577_v12  ;;  %3560 = vrcp.f32 %v2028_v0  ;;  %v1653_v12 = vsub.f32 0.0, %v4712_v26  ;;  %v4724_v16 = vpop.f32.mrb[90].mxu1  ;;  %v4733_v58 = vadd.f32 %v4116_v29, %v1323_v41 }
 0x1aa   :  { %v3545_v23 = vpop.eup %3544  ;;  %v2984_v42 = vpack.c.bf16 %v2278_v45, %v2277_v38  ;;  %v2029_v20 = vadd.f32 1.0, %v3543_v55  ;;  %3562 = vpow2.f32 %v1857_v33  ;;  %v4726_v6 = vpop.f32.mrb[90].mxu0  ;;  %v1865_v61 = vmul.f32 1.442695, %v1654_v30 }
 0x1ab   :  { %v3547_v53 = vpop.eup %3546  ;;  %v2030_v60 = vadd.f32 1.0, %v3545_v23  ;;  %3564 = vpow2.f32 %v1859_v37  ;;  %v4736_v5 = vpop.f32.mrb[91].mxu1  ;;  %v1863_v13 = vmul.f32 1.442695, %v1653_v12  ;;  %v4743_v28 = vadd.f32 %v4118_v32, %v1325_v43 }
 0x1ac   :  { %v3549_v48 = vpop.eup %3548  ;;  %2756 = vst [vmem:[%s5268_s5 + $0x108] sm:$0xff] %v2984_v42  ;;  %v2280_v46 = vmul.f32 %v3547_v53, %v4589_v52  ;;  %3566 = vrcp.f32 %v2029_v20  ;;  %v4738_v44 = vpop.f32.mrb[91].mxu0  ;;  %v1655_v52 = vsub.f32 0.0, %v4733_v58  ;;  %v1327_v8 = vadd.f32 %v4690_v15, %v4688_v22 }
 0x1ad   :  { %v3551_v10 = vpop.eup %3550  ;;  %3568 = vrcp.f32 %v2030_v60  ;;  %v2031_v25 = vadd.f32 1.0, %v3549_v48  ;;  %v1333_v2 = vadd.f32 %v1332_v57, %v707_v39  ;;  %v1656_v37 = vsub.f32 0.0, %v4743_v28  ;;  %v717_v22 = vpop.f32.mrb[92].mxu1 }
 0x1ae   :  { %v3553_v35 = vpop.eup %3552  ;;  %v2985_v38 = vpack.c.bf16 %v2280_v46, %v2279_v63  ;;  %v2281_v33 = vmul.f32 %v3551_v10, %v4595_v1  ;;  %3570 = vpow2.f32 %v1861_v47  ;;  %v1867_v40 = vmul.f32 1.442695, %v1655_v52  ;;  %v1342_v15 = vpop.f32.mrb[92].mxu0 }
 0x1af   :  { %3572 = vrcp.f32 %v2031_v25  ;;  %v2032_v59 = vadd.f32 1.0, %v3553_v35  ;;  %v1329_v1 = vadd.f32 %v4695_v49, %v4693_v14  ;;  %v4755_v21 = vadd.f32 %v4116_v29, %v1327_v8  ;;  %v4763_v49 = vpop.f32.mrb[93].mxu1 }
 0x1b0   :  { %v3555_v17 = vpop.eup %3554  ;;  %2757 = vst [vmem:[%s5268_s5 + $0x110] sm:$0xff] %v2985_v38  ;;  %3574 = vpow2.f32 %v1863_v13  ;;  %v4761_v14 = vadd.f32 %v4116_v29, %v1333_v2  ;;  %v1869_v39 = vmul.f32 1.442695, %v1656_v37  ;;  %v4768_v57 = vpop.f32.mrb[94].mxu1 }
 0x1b1   :  { %v3557_v54 = vpop.eup %3556  ;;  %v2282_v0 = vmul.f32 %v3555_v17, %v4598_v11  ;;  %3576 = vrcp.f32 %v2032_v59  ;;  %v4758_v51 = vadd.f32 %v4118_v32, %v1329_v1  ;;  %v4765_v11 = vpop.f32.mrb[93].mxu0  ;;  %v1657_v47 = vsub.f32 0.0, %v4755_v21 }
 0x1b2   :  { %v3559_v7 = vpop.eup %3558  ;;  %v2033_v45 = vadd.f32 1.0, %v3557_v54  ;;  %3578 = vpow2.f32 %v1865_v61  ;;  %v4770_v23 = vpop.f32.mrb[94].mxu0  ;;  %v1659_v48 = vsub.f32 0.0, %v4761_v14  ;;  %v1339_v59 = vadd.f32 %v4738_v44, %v4736_v5 }
 0x1b3   :  { %v3561_v55 = vpop.eup %3560  ;;  %v2986_v63 = vpack.c.bf16 %v2282_v0, %v2281_v33  ;;  %v2283_v41 = vmul.f32 %v3559_v7, %v4601_v62  ;;  %3580 = vpow2.f32 %v1867_v40  ;;  %v1658_v53 = vsub.f32 0.0, %v4758_v51  ;;  %v4775_v60 = vpop.f32.mrb[95].mxu1 }
 0x1b4   :  { %v3563_v42 = vpop.eup %3562  ;;  %v2284_v20 = vmul.f32 %v3561_v55, %v4621_v9  ;;  %3582 = vrcp.f32 %v2033_v45  ;;  %v4777_v12 = vpop.f32.mrb[95].mxu0  ;;  %v1335_v9 = vadd.f32 %v4720_v4, %v4718_v34  ;;  %v1871_v25 = vmul.f32 1.442695, %v1657_v47 }
 0x1b5   :  { %v3565_v30 = vpop.eup %3564  ;;  %2758 = vst [vmem:[%s5268_s5 + $0x118] sm:$0xff] %v2986_v63  ;;  %v2034_v62 = vadd.f32 1.0, %v3563_v42  ;;  %3584 = vpow2.f32 %v1869_v39  ;;  %v1873_v13 = vmul.f32 1.442695, %v1658_v53  ;;  %v1875_v38 = vmul.f32 1.442695, %v1659_v48 }
 0x1b6   :  { %v3567_v46 = vpop.eup %3566  ;;  %v2987_v43 = vpack.c.bf16 %v2284_v20, %v2283_v41  ;;  %v2035_v10 = vadd.f32 1.0, %v3565_v30  ;;  %v4787_v33 = vadd.f32 %v4118_v32, %v1335_v9  ;;  %v1337_v4 = vadd.f32 %v4726_v6, %v4724_v16  ;;  %v727_v1 = vpop.f32.mrb[96].mxu1 }
 0x1b7   :  { %v3569_v61 = vpop.eup %3568  ;;  %v2285_v35 = vmul.f32 %v3567_v46, %v4631_v19  ;;  %3586 = vrcp.f32 %v2034_v62  ;;  %v1343_v40 = vadd.f32 %v1342_v15, %v717_v22  ;;  %v1352_v2 = vpop.f32.mrb[96].mxu0  ;;  %v4807_v22 = vadd.f32 %v4118_v32, %v1339_v59 }
 0x1b8   :  { %v3571_v52 = vpop.eup %3570  ;;  %2759 = vst [vmem:[%s5268_s5 + $0x120] sm:$0xff] %v2987_v43  ;;  %v2286_v34 = vmul.f32 %v3569_v61, %v4634_v24  ;;  %3588 = vrcp.f32 %v2035_v10  ;;  %v1660_v17 = vsub.f32 0.0, %v4787_v33  ;;  %v4800_v24 = vadd.f32 %v4116_v29, %v1337_v4  ;;  %v4802_v16 = vpop.f32.mrb[97].mxu1 }
 0x1b9   :  { %v3573_v19 = vpop.eup %3572  ;;  %v2036_v8 = vadd.f32 1.0, %v3571_v52  ;;  %3590 = vpow2.f32 %v1871_v25  ;;  %v4804_v6 = vpop.f32.mrb[97].mxu0  ;;  %v4819_v41 = vadd.f32 %v4116_v29, %v1343_v40  ;;  %v1662_v53 = vsub.f32 0.0, %v4807_v22 }
 0x1ba   :  { %v3575_v54 = vpop.eup %3574  ;;  %v2988_v0 = vpack.c.bf16 %v2286_v34, %v2285_v35  ;;  %v2287_v37 = vmul.f32 %v3573_v19, %v4646_v31  ;;  %3592 = vpow2.f32 %v1873_v13  ;;  %v1877_v7 = vmul.f32 1.442695, %v1660_v17  ;;  %v4809_v15 = vpop.f32.mrb[98].mxu1 }
 0x1bb   :  { %v3577_v5 = vpop.eup %3576  ;;  %3594 = vrcp.f32 %v2036_v8  ;;  %v2037_v44 = vadd.f32 1.0, %v3575_v54  ;;  %v4811_v45 = vpop.f32.mrb[98].mxu0  ;;  %v1661_v63 = vsub.f32 0.0, %v4800_v24  ;;  %v1345_v30 = vadd.f32 %v4765_v11, %v4763_v49 }
 0x1bc   :  { %v3579_v31 = vpop.eup %3578  ;;  %2760 = vst [vmem:[%s5268_s5 + $0x128] sm:$0xff] %v2988_v0  ;;  %v2288_v55 = vmul.f32 %v3577_v5, %v4663_v27  ;;  %3596 = vpow2.f32 %v1875_v38  ;;  %v4821_v39 = vpop.f32.mrb[99].mxu1  ;;  %v1881_v10 = vmul.f32 1.442695, %v1662_v53  ;;  %v1663_v25 = vsub.f32 0.0, %v4819_v41 }
 0x1bd   :  { %v4823_v42 = vpop.f32.mrb[99].mxu0  ;;  %v3581_v20 = vpop.eup %3580  ;;  %3598 = vrcp.f32 %v2037_v44  ;;  %v2038_v47 = vadd.f32 1.0, %v3579_v31  ;;  %v1879_v9 = vmul.f32 1.442695, %v1661_v63  ;;  %v4834_v49 = vadd.f32 %v4118_v32, %v1345_v30 }
 0x1be   :  { %v3583_v62 = vpop.eup %3582  ;;  %v2989_v27 = vpack.c.bf16 %v2288_v55, %v2287_v37  ;;  %v2039_v48 = vadd.f32 1.0, %v3581_v20  ;;  %3600 = vpow2.f32 %v1877_v7  ;;  %v1347_v11 = vadd.f32 %v4770_v23, %v4768_v57  ;;  %v737_v52 = vpop.f32.mrb[100].mxu1 }
 0x1bf   :  { %v3585_v46 = vpop.eup %3584  ;;  %v2289_v43 = vmul.f32 %v3583_v62, %v4671_v18  ;;  %3602 = vrcp.f32 %v2038_v47  ;;  %v1883_v35 = vmul.f32 1.442695, %v1663_v25  ;;  %v1349_v18 = vadd.f32 %v4777_v12, %v4775_v60  ;;  %v1362_v34 = vpop.f32.mrb[100].mxu0 }
 0x1c0   :  { %2761 = vst [vmem:[%s5268_s5 + $0x130] sm:$0xff] %v2989_v27  ;;  %3604 = vrcp.f32 %v2039_v48  ;;  %v2040_v13 = vadd.f32 1.0, %v3585_v46  ;;  %v1353_v38 = vadd.f32 %v1352_v2, %v727_v1  ;;  %v1664_v19 = vsub.f32 0.0, %v4834_v49  ;;  %v4845_v17 = vpop.f32.mrb[101].mxu1  ;;  %v4847_v57 = vpop.f32.mrb[101].mxu0 }
 0x1c1   :  { %v3587_v61 = vpop.eup %3586  ;;  %3606 = vpow2.f32 %v1879_v9  ;;  %v4843_v8 = vadd.f32 %v4116_v29, %v1347_v11  ;;  %v4851_v60 = vadd.f32 %v4118_v32, %v1349_v18  ;;  %v4858_v1 = vpop.f32.mrb[102].mxu0  ;;  %v1355_v53 = vadd.f32 %v4804_v6, %v4802_v16 }
 0x1c2   :  { %v3589_v4 = vpop.eup %3588  ;;  %v2290_v59 = vmul.f32 %v3587_v61, %v4674_v3  ;;  %3608 = vrcp.f32 %v2040_v13  ;;  %v4854_v12 = vadd.f32 %v4116_v29, %v1353_v38  ;;  %v4856_v3 = vpop.f32.mrb[102].mxu1  ;;  %v1885_v37 = vmul.f32 1.442695, %v1664_v19 }
 0x1c3   :  { %v3591_v23 = vpop.eup %3590  ;;  %v2291_v40 = vmul.f32 %v3589_v4, %v4686_v56  ;;  %3610 = vpow2.f32 %v1881_v10  ;;  %v4860_v5 = vpop.f32.mrb[103].mxu1  ;;  %v1665_v31 = vsub.f32 0.0, %v4843_v8  ;;  %v1666_v55 = vsub.f32 0.0, %v4851_v60 }
 0x1c4   :  { %v3593_v2 = vpop.eup %3592  ;;  %v2990_v54 = vpack.c.bf16 %v2290_v59, %v2289_v43  ;;  %v2041_v0 = vadd.f32 1.0, %v3591_v23  ;;  %3612 = vpow2.f32 %v1883_v35  ;;  %v4862_v44 = vpop.f32.mrb[103].mxu0  ;;  %v1667_v63 = vsub.f32 0.0, %v4854_v12 }
 0x1c5   :  { %v3595_v56 = vpop.eup %3594  ;;  %v2042_v7 = vadd.f32 1.0, %v3593_v2  ;;  %v1357_v30 = vadd.f32 %v4811_v45, %v4809_v15  ;;  %v1887_v48 = vmul.f32 1.442695, %v1665_v31  ;;  %v1889_v9 = vmul.f32 1.442695, %v1666_v55  ;;  %v4882_v6 = vpop.f32.mrb[104].mxu1 }
 0x1c6   :  { %v3597_v20 = vpop.eup %3596  ;;  %2762 = vst [vmem:[%s5268_s5 + $0x138] sm:$0xff] %v2990_v54  ;;  %v2292_v47 = vmul.f32 %v3595_v56, %v4700_v36  ;;  %3614 = vrcp.f32 %v2041_v0  ;;  %v1891_v25 = vmul.f32 1.442695, %v1667_v63  ;;  %v4877_v11 = vadd.f32 %v4118_v32, %v1355_v53  ;;  %v4884_v15 = vpop.f32.mrb[104].mxu0 }
 0x1c7   :  { %v3599_v62 = vpop.eup %3598  ;;  %3616 = vrcp.f32 %v2042_v7  ;;  %v2043_v27 = vadd.f32 1.0, %v3597_v20  ;;  %v4880_v16 = vadd.f32 %v4116_v29, %v1357_v30  ;;  %v1359_v61 = vadd.f32 %v4823_v42, %v4821_v39  ;;  %v4892_v18 = vpop.f32.mrb[105].mxu1 }
 0x1c8   :  { %v3601_v46 = vpop.eup %3600  ;;  %v2991_v43 = vpack.c.bf16 %v2292_v47, %v2291_v40  ;;  %v2293_v10 = vmul.f32 %v3599_v62, %v4712_v26  ;;  %3618 = vpow2.f32 %v1885_v37  ;;  %v1363_v35 = vadd.f32 %v1362_v34, %v737_v52  ;;  %v4894_v38 = vpop.f32.mrb[105].mxu0 }
 0x1c9   :  { %v3603_v13 = vpop.eup %3602  ;;  %3620 = vrcp.f32 %v2043_v27  ;;  %v2044_v36 = vadd.f32 1.0, %v3601_v46  ;;  %v1668_v19 = vsub.f32 0.0, %v4877_v11  ;;  %v1669_v23 = vsub.f32 0.0, %v4880_v16  ;;  %v4899_v40 = vpop.f32.mrb[106].mxu1 }
 0x1ca   :  { %v3605_v45 = vpop.eup %3604  ;;  %2763 = vst [vmem:[%s5268_s5 + $0x140] sm:$0xff] %v2991_v43  ;;  %v2294_v26 = vmul.f32 %v3603_v13, %v4716_v50  ;;  %3622 = vpow2.f32 %v1887_v48  ;;  %v4901_v50 = vpop.f32.mrb[106].mxu0  ;;  %v4904_v42 = vadd.f32 %v4118_v32, %v1359_v61  ;;  %v4916_v63 = vadd.f32 %v4116_v29, %v1363_v35 }
 0x1cb   :  { %v3607_v4 = vpop.eup %3606  ;;  %v2295_v59 = vmul.f32 %v3605_v45, %v4733_v58  ;;  %3624 = vrcp.f32 %v2044_v36  ;;  %v4906_v52 = vpop.f32.mrb[107].mxu1  ;;  %v1893_v37 = vmul.f32 1.442695, %v1668_v19  ;;  %v1895_v56 = vmul.f32 1.442695, %v1669_v23 }
 0x1cc   :  { %v3609_v2 = vpop.eup %3608  ;;  %v2992_v54 = vpack.c.bf16 %v2294_v26, %v2293_v10  ;;  %v2045_v39 = vadd.f32 1.0, %v3607_v4  ;;  %3626 = vpow2.f32 %v1889_v9  ;;  %v4908_v34 = vpop.f32.mrb[107].mxu0  ;;  %v1670_v55 = vsub.f32 0.0, %v4904_v42 }
 0x1cd   :  { %v3611_v58 = vpop.eup %3610  ;;  %v2296_v0 = vmul.f32 %v3609_v2, %v4743_v28  ;;  %3628 = vpow2.f32 %v1891_v25  ;;  %v1365_v28 = vadd.f32 %v4847_v57, %v4845_v17  ;;  %v1671_v62 = vsub.f32 0.0, %v4916_v63  ;;  %v4932_v57 = vpop.f32.mrb[108].mxu1 }
 0x1ce   :  { %v3613_v7 = vpop.eup %3612  ;;  %2764 = vst [vmem:[%s5268_s5 + $0x148] sm:$0xff] %v2992_v54  ;;  %3630 = vrcp.f32 %v2045_v39  ;;  %v2046_v31 = vadd.f32 1.0, %v3611_v58  ;;  %v1897_v30 = vmul.f32 1.442695, %v1670_v55  ;;  %v1367_v27 = vadd.f32 %v4858_v1, %v4856_v3  ;;  %v4934_v43 = vpop.f32.mrb[108].mxu0 }
 0x1cf   :  { %v2993_v20 = vpack.c.bf16 %v2296_v0, %v2295_v59  ;;  %v2047_v47 = vadd.f32 1.0, %v3613_v7  ;;  %3632 = vpow2.f32 %v1893_v37  ;;  %v4928_v46 = vadd.f32 %v4118_v32, %v1365_v28  ;;  %v4942_v13 = vpop.f32.mrb[109].mxu0 }
 0x1d0   :  { %v3615_v53 = vpop.eup %3614  ;;  %3634 = vrcp.f32 %v2046_v31  ;;  %v1369_v17 = vadd.f32 %v4862_v44, %v4860_v5  ;;  %v1899_v1 = vmul.f32 1.442695, %v1671_v62  ;;  %v4938_v25 = vadd.f32 %v4116_v29, %v1367_v27 }
 0x1d1   :  { %v3617_v48 = vpop.eup %3616  ;;  %2765 = vst [vmem:[%s5268_s5 + $0x150] sm:$0xff] %v2993_v20  ;;  %v2297_v9 = vmul.f32 %v3615_v53, %v4755_v21  ;;  %3636 = vrcp.f32 %v2047_v47  ;;  %v4940_v21 = vpop.f32.mrb[109].mxu1  ;;  %v1672_v5 = vsub.f32 0.0, %v4928_v46  ;;  %v1375_v7 = vadd.f32 %v4894_v38, %v4892_v18 }
 0x1d2   :  { %v3619_v10 = vpop.eup %3618  ;;  %v2298_v3 = vmul.f32 %v3617_v48, %v4758_v51  ;;  %3638 = vpow2.f32 %v1895_v56  ;;  %v4946_v44 = vadd.f32 %v4118_v32, %v1369_v17  ;;  %v4948_v26 = vpop.f32.mrb[110].mxu1  ;;  %v1673_v59 = vsub.f32 0.0, %v4938_v25 }
 0x1d3   :  { %v3621_v36 = vpop.eup %3620  ;;  %v2048_v45 = vadd.f32 1.0, %v3619_v10  ;;  %3640 = vpow2.f32 %v1897_v30  ;;  %v4950_v51 = vpop.f32.mrb[110].mxu0  ;;  %v1901_v39 = vmul.f32 1.442695, %v1672_v5  ;;  %v1373_v56 = vadd.f32 %v4884_v15, %v4882_v6 }
 0x1d4   :  { %v3623_v61 = vpop.eup %3622  ;;  %v2994_v35 = vpack.c.bf16 %v2298_v3, %v2297_v9  ;;  %v2299_v4 = vmul.f32 %v3621_v36, %v4761_v14  ;;  %3642 = vpow2.f32 %v1899_v1  ;;  %v4954_v19 = vpop.f32.mrb[111].mxu1  ;;  %v1674_v58 = vsub.f32 0.0, %v4946_v44 }
 0x1d5   :  { %v4956_v23 = vpop.f32.mrb[111].mxu0  ;;  %v3625_v2 = vpop.eup %3624  ;;  %3644 = vrcp.f32 %v2048_v45  ;;  %v2049_v54 = vadd.f32 1.0, %v3623_v61  ;;  %v1903_v37 = vmul.f32 1.442695, %v1673_v59  ;;  %v1377_v47 = vadd.f32 %v4901_v50, %v4899_v40 }
 0x1d6   :  { %v3627_v0 = vpop.eup %3626  ;;  %2766 = vst [vmem:[%s5268_s5 + $0x158] sm:$0xff] %v2994_v35  ;;  %v2300_v14 = vmul.f32 %v3625_v2, %v4787_v33  ;;  %v1905_v20 = vmul.f32 1.442695, %v1674_v58  ;;  %v4970_v33 = vadd.f32 %v4116_v29, %v1373_v56  ;;  %v4974_v15 = vadd.f32 %v4118_v32, %v1375_v7  ;;  %v4979_v38 = vpop.f32.mrb[112].mxu1 }
 0x1d7   :  { %v3629_v31 = vpop.eup %3628  ;;  %3646 = vrcp.f32 %v2049_v54  ;;  %v2050_v55 = vadd.f32 1.0, %v3627_v0  ;;  %v4977_v18 = vadd.f32 %v4116_v29, %v1377_v47  ;;  %v4981_v40 = vpop.f32.mrb[112].mxu0  ;;  %v1379_v48 = vadd.f32 %v4908_v34, %v4906_v52 }
 0x1d8   :  { %v3631_v28 = vpop.eup %3630  ;;  %v2995_v53 = vpack.c.bf16 %v2300_v14, %v2299_v4  ;;  %v2051_v30 = vadd.f32 1.0, %v3629_v31  ;;  %3648 = vpow2.f32 %v1901_v39  ;;  %v4989_v9 = vpop.f32.mrb[113].mxu1  ;;  %v1676_v1 = vsub.f32 0.0, %v4974_v15 }
 0x1d9   :  { %v3633_v62 = vpop.eup %3632  ;;  %v2301_v6 = vmul.f32 %v3631_v28, %v4800_v24  ;;  %3650 = vrcp.f32 %v2050_v55  ;;  %v1675_v24 = vsub.f32 0.0, %v4970_v33  ;;  %v4991_v17 = vpop.f32.mrb[113].mxu0  ;;  %v1677_v36 = vsub.f32 0.0, %v4977_v18 }
 0x1da   :  { %v3635_v50 = vpop.eup %3634  ;;  %2767 = vst [vmem:[%s5268_s5 + $0x160] sm:$0xff] %v2995_v53  ;;  %3652 = vrcp.f32 %v2051_v30  ;;  %v2052_v27 = vadd.f32 1.0, %v3633_v62  ;;  %v4996_v45 = vpop.f32.mrb[114].mxu1  ;;  %v5002_v34 = vadd.f32 %v4118_v32, %v1379_v48  ;;  %v1909_v39 = vmul.f32 1.442695, %v1676_v1 }
 0x1db   :  { %v3637_v10 = vpop.eup %3636  ;;  %v2302_v3 = vmul.f32 %v3635_v50, %v4807_v22  ;;  %3654 = vpow2.f32 %v1903_v37  ;;  %v4998_v5 = vpop.f32.mrb[114].mxu0  ;;  %v1907_v52 = vmul.f32 1.442695, %v1675_v24  ;;  %v1911_v14 = vmul.f32 1.442695, %v1677_v36 }
 0x1dc   :  { %v3639_v61 = vpop.eup %3638  ;;  %v2303_v35 = vmul.f32 %v3637_v10, %v4819_v41  ;;  %3656 = vrcp.f32 %v2052_v27  ;;  %v5004_v4 = vpop.f32.mrb[115].mxu1  ;;  %v1678_v41 = vsub.f32 0.0, %v5002_v34  ;;  %v1383_v7 = vadd.f32 %v4934_v43, %v4932_v57 }
 0x1dd   :  { %v5006_v22 = vpop.f32.mrb[115].mxu0  ;;  %v3641_v59 = vpop.eup %3640  ;;  %v2996_v2 = vpack.c.bf16 %v2302_v3, %v2301_v6  ;;  %v2053_v54 = vadd.f32 1.0, %v3639_v61  ;;  %3658 = vpow2.f32 %v1905_v20  ;;  %v1385_v31 = vadd.f32 %v4942_v13, %v4940_v21 }
 0x1de   :  { %v3643_v58 = vpop.eup %3642  ;;  %v2054_v0 = vadd.f32 1.0, %v3641_v59  ;;  %3660 = vpow2.f32 %v1907_v52  ;;  %v1913_v20 = vmul.f32 1.442695, %v1678_v41  ;;  %v1387_v47 = vadd.f32 %v4950_v51, %v4948_v26  ;;  %v5027_v43 = vpop.f32.mrb[116].mxu1 }
 0x1df   :  { %v3645_v37 = vpop.eup %3644  ;;  %2768 = vst [vmem:[%s5268_s5 + $0x168] sm:$0xff] %v2996_v2  ;;  %3662 = vrcp.f32 %v2053_v54  ;;  %v2055_v56 = vadd.f32 1.0, %v3643_v58  ;;  %v5020_v53 = vadd.f32 %v4116_v29, %v1383_v7  ;;  %v5023_v30 = vadd.f32 %v4118_v32, %v1385_v31  ;;  %v5029_v21 = vpop.f32.mrb[116].mxu0 }
 0x1e0   :  { %v2304_v55 = vmul.f32 %v3645_v37, %v4834_v49  ;;  %3664 = vrcp.f32 %v2054_v0  ;;  %v1389_v57 = vadd.f32 %v4956_v23, %v4954_v19  ;;  %v5033_v26 = vadd.f32 %v4116_v29, %v1387_v47  ;;  %v5035_v51 = vpop.f32.mrb[117].mxu1  ;;  %v5037_v6 = vpop.f32.mrb[117].mxu0 }
 0x1e1   :  { %v3647_v28 = vpop.eup %3646  ;;  %3666 = vrcp.f32 %v2055_v56  ;;  %v1679_v19 = vsub.f32 0.0, %v5020_v53  ;;  %v1680_v23 = vsub.f32 0.0, %v5023_v30  ;;  %v5041_v24 = vpop.f32.mrb[118].mxu1  ;;  %v1393_v37 = vadd.f32 %v4981_v40, %v4979_v38 }
 0x1e2   :  { %v3649_v49 = vpop.eup %3648  ;;  %v2997_v13 = vpack.c.bf16 %v2304_v55, %v2303_v35  ;;  %v2305_v62 = vmul.f32 %v3647_v28, %v4843_v8  ;;  %3668 = vpow2.f32 %v1909_v39  ;;  %v5043_v48 = vpop.f32.mrb[118].mxu0  ;;  %v1681_v3 = vsub.f32 0.0, %v5033_v26 }
 0x1e3   :  { %v3651_v50 = vpop.eup %3650  ;;  %v2056_v27 = vadd.f32 1.0, %v3649_v49  ;;  %3670 = vpow2.f32 %v1911_v14  ;;  %v5051_v1 = vadd.f32 %v4118_v32, %v1389_v57  ;;  %v5053_v36 = vpop.f32.mrb[119].mxu1  ;;  %v1915_v59 = vmul.f32 1.442695, %v1679_v19 }
 0x1e4   :  { %v3653_v8 = vpop.eup %3652  ;;  %2769 = vst [vmem:[%s5268_s5 + $0x170] sm:$0xff] %v2997_v13  ;;  %v2306_v10 = vmul.f32 %v3651_v50, %v4851_v60  ;;  %3672 = vpow2.f32 %v1913_v20  ;;  %v5055_v61 = vpop.f32.mrb[119].mxu0  ;;  %v1917_v2 = vmul.f32 1.442695, %v1680_v23  ;;  %v1919_v60 = vmul.f32 1.442695, %v1681_v3 }
 0x1e5   :  { %v3655_v35 = vpop.eup %3654  ;;  %v2307_v52 = vmul.f32 %v3653_v8, %v4854_v12  ;;  %3674 = vrcp.f32 %v2056_v27  ;;  %v1682_v0 = vsub.f32 0.0, %v5051_v1  ;;  %v1395_v56 = vadd.f32 %v4991_v17, %v4989_v9  ;;  %v5072_v40 = vpop.f32.mrb[120].mxu1 }
 0x1e6   :  { %v3657_v54 = vpop.eup %3656  ;;  %v2998_v39 = vpack.c.bf16 %v2306_v10, %v2305_v62  ;;  %v2057_v58 = vadd.f32 1.0, %v3655_v35  ;;  %3676 = vpow2.f32 %v1915_v59  ;;  %v1397_v55 = vadd.f32 %v4998_v5, %v4996_v45  ;;  %v5074_v9 = vpop.f32.mrb[120].mxu0 }
 0x1e7   :  { %v3659_v14 = vpop.eup %3658  ;;  %v2308_v41 = vmul.f32 %v3657_v54, %v4877_v11  ;;  %v1921_v31 = vmul.f32 1.442695, %v1682_v0  ;;  %v5070_v38 = vadd.f32 %v4116_v29, %v1393_v37  ;;  %v5078_v57 = vadd.f32 %v4118_v32, %v1395_v56  ;;  %v5083_v5 = vpop.f32.mrb[121].mxu1 }
 0x1e8   :  { %v3661_v12 = vpop.eup %3660  ;;  %2770 = vst [vmem:[%s5268_s5 + $0x178] sm:$0xff] %v2998_v39  ;;  %3678 = vrcp.f32 %v2057_v58  ;;  %v2058_v7 = vadd.f32 1.0, %v3659_v14  ;;  %v5081_v45 = vadd.f32 %v4116_v29, %v1397_v55  ;;  %v5085_v49 = vpop.f32.mrb[121].mxu0  ;;  %v1399_v50 = vadd.f32 %v5006_v22, %v5004_v4 }
 0x1e9   :  { %v3663_v20 = vpop.eup %3662  ;;  %v2999_v11 = vpack.c.bf16 %v2308_v41, %v2307_v52  ;;  %v2059_v47 = vadd.f32 1.0, %v3661_v12  ;;  %3680 = vpow2.f32 %v1917_v2  ;;  %v5094_v27 = vpop.f32.mrb[122].mxu1  ;;  %v1684_v10 = vsub.f32 0.0, %v5078_v57 }
 0x1ea   :  { %v3665_v17 = vpop.eup %3664  ;;  %v2309_v28 = vmul.f32 %v3663_v20, %v4880_v16  ;;  %3682 = vrcp.f32 %v2058_v7  ;;  %v1683_v16 = vsub.f32 0.0, %v5070_v38  ;;  %v5096_v19 = vpop.f32.mrb[122].mxu0  ;;  %v1685_v3 = vsub.f32 0.0, %v5081_v45 }
 0x1eb   :  { %v3667_v13 = vpop.eup %3666  ;;  %2771 = vst [vmem:[%s5268_s5 + $0x180] sm:$0xff] %v2999_v11  ;;  %v2310_v62 = vmul.f32 %v3665_v17, %v4904_v42  ;;  %3684 = vrcp.f32 %v2059_v47  ;;  %v5101_v35 = vpop.f32.mrb[123].mxu1  ;;  %v1925_v39 = vmul.f32 1.442695, %v1684_v10  ;;  %v1403_v14 = vadd.f32 %v5029_v21, %v5027_v43 }
 0x1ec   :  { %v3669_v23 = vpop.eup %3668  ;;  %v2311_v8 = vmul.f32 %v3667_v13, %v4916_v63  ;;  %3686 = vpow2.f32 %v1919_v60  ;;  %v5103_v42 = vpop.f32.mrb[123].mxu0  ;;  %v1923_v4 = vmul.f32 1.442695, %v1683_v16  ;;  %v1927_v58 = vmul.f32 1.442695, %v1685_v3 }
 0x1ed   :  { %v3671_v52 = vpop.eup %3670  ;;  %v3000_v59 = vpack.c.bf16 %v2310_v62, %v2309_v28  ;;  %v2060_v2 = vadd.f32 1.0, %v3669_v23  ;;  %3688 = vpow2.f32 %v1921_v31  ;;  %v5106_v63 = vadd.f32 %v4118_v32, %v1399_v50  ;;  %v797_v21 = vpop.f32.mrb[124].mxu1 }
 0x1ee   :  { %v3673_v22 = vpop.eup %3672  ;;  %v2061_v54 = vadd.f32 1.0, %v3671_v52  ;;  %v1405_v41 = vadd.f32 %v5037_v6, %v5035_v51  ;;  %v1407_v12 = vadd.f32 %v5043_v48, %v5041_v24  ;;  %v5120_v31 = vadd.f32 %v4116_v29, %v1403_v14  ;;  %v1422_v51 = vpop.f32.mrb[124].mxu0 }
 0x1ef   :  { %v3675_v60 = vpop.eup %3674  ;;  %2772 = vst [vmem:[%s5268_s5 + $0x188] sm:$0xff] %v3000_v59  ;;  %3690 = vrcp.f32 %v2060_v2  ;;  %v2062_v0 = vadd.f32 1.0, %v3673_v22  ;;  %v1686_v56 = vsub.f32 0.0, %v5106_v63  ;;  %v1409_v43 = vadd.f32 %v5055_v61, %v5053_v36  ;;  %v5127_v47 = vpop.f32.mrb[125].mxu1 }
 0x1f0   :  { %v2312_v37 = vmul.f32 %v3675_v60, %v4928_v46  ;;  %3692 = vrcp.f32 %v2061_v54  ;;  %v3677_v7 = vpop.eup %3676  ;;  %v5123_v55 = vadd.f32 %v4118_v32, %v1405_v41  ;;  %v5129_v24 = vpop.f32.mrb[125].mxu0  ;;  %v1687_v28 = vsub.f32 0.0, %v5120_v31 }
 0x1f1   :  { %3694 = vrcp.f32 %v2062_v0  ;;  %v2063_v20 = vadd.f32 1.0, %v3677_v7  ;;  %v1929_v11 = vmul.f32 1.442695, %v1686_v56  ;;  %v5134_v36 = vpop.f32.mrb[126].mxu1  ;;  %v5136_v61 = vpop.f32.mrb[126].mxu0  ;;  %v5142_v50 = vadd.f32 %v4116_v29, %v1407_v12 }
 0x1f2   :  { %v3679_v46 = vpop.eup %3678  ;;  %v3001_v6 = vpack.c.bf16 %v2312_v37, %v2311_v8  ;;  %3696 = vpow2.f32 %v1923_v4  ;;  %v1688_v13 = vsub.f32 0.0, %v5123_v55  ;;  %v5147_v23 = vpop.f32.mrb[127].mxu1  ;;  %v1931_v52 = vmul.f32 1.442695, %v1687_v28 }
 0x1f3   :  { %v3681_v48 = vpop.eup %3680  ;;  %v2313_v17 = vmul.f32 %v3679_v46, %v4938_v25  ;;  %3698 = vpow2.f32 %v1925_v39  ;;  %v5145_v25 = vadd.f32 %v4118_v32, %v1409_v43  ;;  %v5149_v8 = vpop.f32.mrb[127].mxu0  ;;  %v1689_v22 = vsub.f32 0.0, %v5142_v50 }
 0x1f4   :  { %v3683_v62 = vpop.eup %3682  ;;  %2773 = vst [vmem:[%s5268_s5 + $0x190] sm:$0xff] %v3001_v6  ;;  %3700 = vrcp.f32 %v2063_v20  ;;  %v2064_v16 = vadd.f32 1.0, %v3681_v48  ;;  %v1933_v59 = vmul.f32 1.442695, %v1688_v13  ;;  %v1413_v14 = vadd.f32 %v5074_v9, %v5072_v40 }
 0x1f5   :  { %v3685_v10 = vpop.eup %3684  ;;  %v2314_v3 = vmul.f32 %v3683_v62, %v4946_v44  ;;  %3702 = vpow2.f32 %v1927_v58  ;;  %v1690_v54 = vsub.f32 0.0, %v5145_v25  ;;  %v1935_v44 = vmul.f32 1.442695, %v1689_v22 }
 0x1f6   :  { %v3687_v2 = vpop.eup %3686  ;;  %v2315_v4 = vmul.f32 %v3685_v10, %v4970_v33  ;;  %3704 = vrcp.f32 %v2064_v16  ;;  %v5161_v33 = vadd.f32 %v4116_v29, %v1413_v14  ;;  %v1415_v56 = vadd.f32 %v5085_v49, %v5083_v5 }
 0x1f7   :  { %v3689_v39 = vpop.eup %3688  ;;  %v3002_v60 = vpack.c.bf16 %v2314_v3, %v2313_v17  ;;  %v2065_v0 = vadd.f32 1.0, %v3687_v2  ;;  %3706 = vpow2.f32 %v1929_v11  ;;  %v1937_v58 = vmul.f32 1.442695, %v1690_v54 }
 0x1f8   :  { %v2066_v41 = vadd.f32 1.0, %v3689_v39  ;;  %3708 = vpow2.f32 %v1931_v52  ;;  %v1417_v12 = vadd.f32 %v5096_v19, %v5094_v27  ;;  %v1419_v7 = vadd.f32 %v5103_v42, %v5101_v35 }
 0x1f9   :  { %v3691_v37 = vpop.eup %3690  ;;  %2774 = vst [vmem:[%s5268_s5 + $0x198] sm:$0xff] %v3002_v60  ;;  %3710 = vrcp.f32 %v2065_v0  ;;  %v1423_v43 = vadd.f32 %v1422_v51, %v797_v21  ;;  %v1691_v20 = vsub.f32 0.0, %v5161_v33  ;;  %v5173_v11 = vadd.f32 %v4118_v32, %v1415_v56 }
 0x1fa   :  { %v3693_v40 = vpop.eup %3692  ;;  %v2316_v9 = vmul.f32 %v3691_v37, %v4974_v15  ;;  %3712 = vrcp.f32 %v2066_v41  ;;  %v5177_v15 = vadd.f32 %v4116_v29, %v1417_v12  ;;  %v1427_v60 = vadd.f32 %v5136_v61, %v5134_v36 }
 0x1fb   :  { %v3695_v46 = vpop.eup %3694  ;;  %v2317_v6 = vmul.f32 %v3693_v40, %v4977_v18  ;;  %3714 = vpow2.f32 %v1933_v59  ;;  %v1939_v42 = vmul.f32 1.442695, %v1691_v20  ;;  %v1692_v18 = vsub.f32 0.0, %v5173_v11 }
 0x1fc   :  { %v3697_v5 = vpop.eup %3696  ;;  %v3003_v49 = vpack.c.bf16 %v2316_v9, %v2315_v4  ;;  %v2318_v27 = vmul.f32 %v3695_v46, %v5002_v34  ;;  %3716 = vpow2.f32 %v1935_v44  ;;  %v1693_v17 = vsub.f32 0.0, %v5177_v15 }
 0x1fd   :  { %v3699_v19 = vpop.eup %3698  ;;  %v2067_v35 = vadd.f32 1.0, %v3697_v5  ;;  %3718 = vpow2.f32 %v1937_v58  ;;  %v5185_v34 = vadd.f32 %v4118_v32, %v1419_v7  ;;  %v1941_v62 = vmul.f32 1.442695, %v1692_v18 }
 0x1fe   :  { %v3701_v21 = vpop.eup %3700  ;;  %2775 = vst [vmem:[%s5268_s5 + $0x1a0] sm:$0xff] %v3003_v49  ;;  %v3004_v51 = vpack.c.bf16 %v2318_v27, %v2317_v6  ;;  %v2068_v48 = vadd.f32 1.0, %v3699_v19  ;;  %v5189_v16 = vadd.f32 %v4116_v29, %v1423_v43  ;;  %v1425_v4 = vadd.f32 %v5129_v24, %v5127_v47 }
 0x1ff   :  { %v3703_v28 = vpop.eup %3702  ;;  %v2319_v13 = vmul.f32 %v3701_v21, %v5020_v53  ;;  %3720 = vrcp.f32 %v2067_v35  ;;  %v1694_v52 = vsub.f32 0.0, %v5185_v34  ;;  %v1943_v39 = vmul.f32 1.442695, %v1693_v17 }
 0x200   :  { %v3705_v10 = vpop.eup %3704  ;;  %2776 = vst [vmem:[%s5268_s5 + $0x1a8] sm:$0xff] %v3004_v51  ;;  %3722 = vrcp.f32 %v2068_v48  ;;  %v2069_v3 = vadd.f32 1.0, %v3703_v28  ;;  %v1695_v53 = vsub.f32 0.0, %v5189_v16  ;;  %v5203_v37 = vadd.f32 %v4118_v32, %v1425_v4 }
 0x201   :  { %v3707_v59 = vpop.eup %3706  ;;  %v2320_v2 = vmul.f32 %v3705_v10, %v5023_v30  ;;  %3724 = vpow2.f32 %v1939_v42  ;;  %v1945_v44 = vmul.f32 1.442695, %v1694_v52  ;;  %v5206_v47 = vadd.f32 %v4116_v29, %v1427_v60 }
 0x202   :  { %v3709_v22 = vpop.eup %3708  ;;  %3726 = vrcp.f32 %v2069_v3  ;;  %v2070_v54 = vadd.f32 1.0, %v3707_v59  ;;  %v1947_v61 = vmul.f32 1.442695, %v1695_v53  ;;  %v1429_v56 = vadd.f32 %v5149_v8, %v5147_v23 }
 0x203   :  { %v3711_v0 = vpop.eup %3710  ;;  %v3005_v14 = vpack.c.bf16 %v2320_v2, %v2319_v13  ;;  %v2071_v41 = vadd.f32 1.0, %v3709_v22  ;;  %3728 = vpow2.f32 %v1941_v62  ;;  %v1696_v40 = vsub.f32 0.0, %v5203_v37 }
 0x204   :  { %v3713_v58 = vpop.eup %3712  ;;  %v2321_v30 = vmul.f32 %v3711_v0, %v5033_v26  ;;  %3730 = vrcp.f32 %v2070_v54  ;;  %v1697_v29 = vsub.f32 0.0, %v5206_v47  ;;  %v5217_v46 = vadd.f32 %v4118_v32, %v1429_v56 }
 0x205   :  { %v3715_v24 = vpop.eup %3714  ;;  %2777 = vst [vmem:[%s5268_s5 + $0x1b0] sm:$0xff] %v3005_v14  ;;  %v2322_v36 = vmul.f32 %v3713_v58, %v5051_v1  ;;  %3732 = vrcp.f32 %v2071_v41  ;;  %v1949_v6 = vmul.f32 1.442695, %v1696_v40 }
 0x206   :  { %v3717_v26 = vpop.eup %3716  ;;  %v2072_v12 = vadd.f32 1.0, %v3715_v24  ;;  %3734 = vpow2.f32 %v1943_v39  ;;  %v1951_v23 = vmul.f32 1.442695, %v1697_v29  ;;  %v1698_v8 = vsub.f32 0.0, %v5217_v46 }
 0x207   :  { %v3719_v9 = vpop.eup %3718  ;;  %v3006_v7 = vpack.c.bf16 %v2322_v36, %v2321_v30  ;;  %v2073_v43 = vadd.f32 1.0, %v3717_v26  ;;  %3736 = vpow2.f32 %v1945_v44 }
 0x208   :  { %3738 = vrcp.f32 %v2072_v12  ;;  %v2074_v1 = vadd.f32 1.0, %v3719_v9  ;;  %v1953_v19 = vmul.f32 1.442695, %v1698_v8 }
 0x209   :  { %v3721_v20 = vpop.eup %3720  ;;  %2778 = vst [vmem:[%s5268_s5 + $0x1b8] sm:$0xff] %v3006_v7  ;;  %3740 = vrcp.f32 %v2073_v43 }
 0x20a   :  { %v3723_v5 = vpop.eup %3722  ;;  %v2323_v49 = vmul.f32 %v3721_v20, %v5070_v38  ;;  %3742 = vrcp.f32 %v2074_v1 }
 0x20b   :  { %v3725_v27 = vpop.eup %3724  ;;  %v2324_v32 = vmul.f32 %v3723_v5, %v5078_v57  ;;  %3744 = vpow2.f32 %v1947_v61 }
 0x20c   :  { %v3727_v35 = vpop.eup %3726  ;;  %v2075_v42 = vadd.f32 1.0, %v3725_v27  ;;  %3746 = vpow2.f32 %v1949_v6 }
 0x20d   :  { %v3729_v18 = vpop.eup %3728  ;;  %v3007_v21 = vpack.c.bf16 %v2324_v32, %v2323_v49  ;;  %v2325_v51 = vmul.f32 %v3727_v35, %v5081_v45  ;;  %3748 = vpow2.f32 %v1951_v23 }
 0x20e   :  { %v3731_v48 = vpop.eup %3730  ;;  %3750 = vrcp.f32 %v2075_v42  ;;  %v2076_v17 = vadd.f32 1.0, %v3729_v18 }
 0x20f   :  { %v3733_v28 = vpop.eup %3732  ;;  %2779 = vst [vmem:[%s5268_s5 + $0x1c0] sm:$0xff] %v3007_v21  ;;  %v2326_v38 = vmul.f32 %v3731_v48, %v5106_v63  ;;  %3752 = vpow2.f32 %v1953_v19 }
 0x210   :  { %v3735_v57 = vpop.eup %3734  ;;  %3754 = vrcp.f32 %v2076_v17  ;;  %v2327_v10 = vmul.f32 %v3733_v28, %v5120_v31 }
 0x211   :  { %v3737_v13 = vpop.eup %3736  ;;  %v3008_v62 = vpack.c.bf16 %v2326_v38, %v2325_v51  ;;  %v2077_v3 = vadd.f32 1.0, %v3735_v57 }
 0x212   :  { %v3739_v45 = vpop.eup %3738  ;;  %v2078_v52 = vadd.f32 1.0, %v3737_v13 }
 0x213   :  { %v3741_v59 = vpop.eup %3740  ;;  %2780 = vst [vmem:[%s5268_s5 + $0x1c8] sm:$0xff] %v3008_v62  ;;  %v2328_v2 = vmul.f32 %v3739_v45, %v5123_v55  ;;  %3756 = vrcp.f32 %v2077_v3 }
 0x214   :  { %v3743_v53 = vpop.eup %3742  ;;  %v2329_v63 = vmul.f32 %v3741_v59, %v5142_v50  ;;  %3758 = vrcp.f32 %v2078_v52 }
 0x215   :  { %v3745_v4 = vpop.eup %3744  ;;  %v3009_v22 = vpack.c.bf16 %v2328_v2, %v2327_v10  ;;  %v2330_v54 = vmul.f32 %v3743_v53, %v5145_v25 }
 0x216   :  { %v3747_v31 = vpop.eup %3746  ;;  %v2079_v39 = vadd.f32 1.0, %v3745_v4 }
 0x217   :  { %v3749_v60 = vpop.eup %3748  ;;  %2781 = vst [vmem:[%s5268_s5 + $0x1d0] sm:$0xff] %v3009_v22  ;;  %v3010_v0 = vpack.c.bf16 %v2330_v54, %v2329_v63  ;;  %v2080_v14 = vadd.f32 1.0, %v3747_v31 }
 0x218   :  { %v3751_v41 = vpop.eup %3750  ;;  %3760 = vrcp.f32 %v2079_v39  ;;  %v2081_v55 = vadd.f32 1.0, %v3749_v60 }
 0x219   :  { %v3753_v44 = vpop.eup %3752  ;;  %2782 = vst [vmem:[%s5268_s5 + $0x1d8] sm:$0xff] %v3010_v0  ;;  %v2331_v50 = vmul.f32 %v3751_v41, %v5161_v33  ;;  %3762 = vrcp.f32 %v2080_v14 }
 0x21a   :  { %v3755_v25 = vpop.eup %3754  ;;  %3764 = vrcp.f32 %v2081_v55  ;;  %v2082_v58 = vadd.f32 1.0, %v3753_v44 }
 0x21b   :  { %v2332_v30 = vmul.f32 %v3755_v25, %v5173_v11 }
 0x21c   :  { %3766 = vrcp.f32 %v2082_v58 }
 0x21d   :  { %v3757_v24 = vpop.eup %3756  ;;  %v3011_v36 = vpack.c.bf16 %v2332_v30, %v2331_v50 }
 0x21e   :  { %v3759_v61 = vpop.eup %3758  ;;  %v2333_v56 = vmul.f32 %v3757_v24, %v5177_v15 }
 0x21f   :  { %2783 = vst [vmem:[%s5268_s5 + $0x1e0] sm:$0xff] %v3011_v36  ;;  %v2334_v26 = vmul.f32 %v3759_v61, %v5185_v34 }
 0x221   :  { %v3012_v12 = vpack.c.bf16 %v2334_v26, %v2333_v56 }
 0x222   :  { %v3761_v33 = vpop.eup %3760 }
 0x223   :  { %v3763_v40 = vpop.eup %3762  ;;  %2784 = vst [vmem:[%s5268_s5 + $0x1e8] sm:$0xff] %v3012_v12  ;;  %v2335_v11 = vmul.f32 %v3761_v33, %v5189_v16 }
 0x224   :  { %v3765_v29 = vpop.eup %3764  ;;  %v2336_v9 = vmul.f32 %v3763_v40, %v5203_v37 }
 0x225   :  { %v2337_v15 = vmul.f32 %v3765_v29, %v5206_v47 }
 0x226   :  { %v3767_v7 = vpop.eup %3766  ;;  %v3013_v43 = vpack.c.bf16 %v2336_v9, %v2335_v11 }
 0x227   :  { %v2338_v1 = vmul.f32 %v3767_v7, %v5217_v46 }
 0x228   :  { %2785 = vst [vmem:[%s5268_s5 + $0x1f0] sm:$0xff] %v3013_v43 }
 0x229   :  { %v3014_v34 = vpack.c.bf16 %v2338_v1, %v2337_v15 }
 0x22b   :  { %2786 = vst [vmem:[%s5268_s5 + $0x1f8] sm:$0xff] %v3014_v34 }

// kernel: neck_forward.25
= control target key start
LH: loop header
LB: loop body
LE: loop exit
PB: predicated region body
PF: predicated region fallthrough
CT: control target
= control target key end

     0   :  { %s4973_s4 = inlined_call_operand.vmem [shape: bf16[128,128], index: 4, kind: input, shape index: {}]   ;;  %s4974_s3 = inlined_call_operand.vmem [shape: bf16[128,128], index: 3, kind: input, shape index: {}]   ;;  %s4975_s1 = inlined_call_operand.vmem [shape: bf16[512,128], index: 1, kind: input, shape index: {}]   ;;  %s4976_s0 = inlined_call_operand.vmem [shape: bf16[512,128], index: 0, kind: input, shape index: {}]   ;;  %s4977_s5 = inlined_call_operand.vmem [shape: bf16[128,128], index: 5, kind: input, shape index: {}]   ;;  %s4978_s2 = inlined_call_operand.vmem [shape: bf16[512,128], index: 2, kind: input, shape index: {}]   ;;  %s4979_s6 = inlined_call_operand.vmem [shape: f32[1,128], index: 6, kind: input, shape index: {}]   ;;  %s4980_s7 = inlined_call_operand.vmem [shape: bf16[512,128], index: 7, kind: output, shape index: {}]  }
   0x1   :  { %v3641_v0 = vld [vmem:[%s4973_s4] sm:$0xff]   ;;  %v3643_v2 = vld [vmem:[%s4973_s4 + $0x8] sm:$0xff]   ;;  %v3645_v4 = vld [vmem:[%s4973_s4 + $0x10] sm:$0xff]  }
   0x2   :  { %v4064_v1 = vld [vmem:[%s4974_s3] sm:$0xff]   ;;  %3257 = vmatprep.subr.bf16.mxu1 %v3641_v0  ;;  %v4073_v3 = vld [vmem:[%s4974_s3 + $0x8] sm:$0xff]   ;;  %v4083_v5 = vld [vmem:[%s4974_s3 + $0x10] sm:$0xff]  }
   0x3   :  { %3337 = vmatprep.subr.bf16.mxu0 %v4064_v1  ;;  %3258 = vmatpush3.bf16.msra.mxu1 %v3641_v0  ;;  %v3647_v6 = vld [vmem:[%s4973_s4 + $0x18] sm:$0xff]   ;;  %v3649_v8 = vld [vmem:[%s4973_s4 + $0x20] sm:$0xff]   ;;  %v3651_v10 = vld [vmem:[%s4973_s4 + $0x28] sm:$0xff]  }
   0x4   :  { %3338 = vmatpush3.bf16.msra.mxu0 %v4064_v1  ;;  %3259 = vmatprep.subr.bf16.mxu1 %v3643_v2  ;;  %v4093_v7 = vld [vmem:[%s4974_s3 + $0x18] sm:$0xff]   ;;  %v4103_v9 = vld [vmem:[%s4974_s3 + $0x20] sm:$0xff]   ;;  %v4111_v11 = vld [vmem:[%s4974_s3 + $0x28] sm:$0xff]  }
   0x5   :  { %3339 = vmatprep.subr.bf16.mxu0 %v4073_v3  ;;  %v3657_v12 = vld [vmem:[%s4975_s1] sm:$0xff]   ;;  %v3653_v14 = vld [vmem:[%s4973_s4 + $0x30] sm:$0xff]   ;;  %v3655_v16 = vld [vmem:[%s4973_s4 + $0x38] sm:$0xff]  }
   0x6   :  { %v3658_v13 = vld [vmem:[%s4976_s0] sm:$0xff]   ;;  %3273 = vmatprep.mubr.bf16.mxu1 %v3657_v12  ;;  %v4129_v15 = vld [vmem:[%s4974_s3 + $0x30] sm:$0xff]   ;;  %v4139_v17 = vld [vmem:[%s4974_s3 + $0x38] sm:$0xff]  }
   0x7   :  { %3260 = vmatpush3.bf16.msra.mxu1 %v3643_v2  ;;  %3353 = vmatprep.mubr.bf16.mxu0 %v3658_v13  ;;  %v3659_v18 = vld [vmem:[%s4975_s1 + $0x8] sm:$0xff]   ;;  %v3661_v19 = vld [vmem:[%s4977_s5] sm:$0xff]   ;;  %v3662_v21 = vld [vmem:[%s4975_s1 + $0x10] sm:$0xff]  }
   0x8   :  { %3340 = vmatpush3.bf16.msra.mxu0 %v4073_v3  ;;  %3261 = vmatprep.subr.bf16.mxu1 %v3645_v4  ;;  %v3660_v20 = vld [vmem:[%s4976_s0 + $0x8] sm:$0xff]   ;;  %v3663_v22 = vld [vmem:[%s4976_s0 + $0x10] sm:$0xff]   ;;  %v3664_v24 = vld [vmem:[%s4975_s1 + $0x18] sm:$0xff]  }
   0x9   :  { %3341 = vmatprep.subr.bf16.mxu0 %v4083_v5  ;;  %v3666_v23 = vld [vmem:[%s4977_s5 + $0x8] sm:$0xff]   ;;  %v3671_v25 = vld [vmem:[%s4977_s5 + $0x10] sm:$0xff]   ;;  %v3665_v26 = vld [vmem:[%s4976_s0 + $0x18] sm:$0xff]  }
   0xa   :  { %v3667_v27 = vld [vmem:[%s4975_s1 + $0x20] sm:$0xff]   ;;  %v3676_v29 = vld [vmem:[%s4977_s5 + $0x18] sm:$0xff]   ;;  %v3669_v30 = vld [vmem:[%s4975_s1 + $0x28] sm:$0xff]  }
   0xb   :  { %3262 = vmatpush3.bf16.msra.mxu1 %v3645_v4  ;;  %v3668_v28 = vld [vmem:[%s4976_s0 + $0x20] sm:$0xff]   ;;  %v3670_v32 = vld [vmem:[%s4976_s0 + $0x28] sm:$0xff]   ;;  %v3672_v33 = vld [vmem:[%s4975_s1 + $0x30] sm:$0xff]  }
   0xc   :  { %3342 = vmatpush3.bf16.msra.mxu0 %v4083_v5  ;;  %3263 = vmatprep.subr.bf16.mxu1 %v3647_v6  ;;  %v3681_v31 = vld [vmem:[%s4977_s5 + $0x20] sm:$0xff]   ;;  %v3673_v34 = vld [vmem:[%s4976_s0 + $0x30] sm:$0xff]   ;;  %v3686_v35 = vld [vmem:[%s4977_s5 + $0x28] sm:$0xff]  }
   0xd   :  { %3343 = vmatprep.subr.bf16.mxu0 %v4093_v7  ;;  %v3674_v36 = vld [vmem:[%s4975_s1 + $0x38] sm:$0xff]   ;;  %v3691_v37 = vld [vmem:[%s4977_s5 + $0x30] sm:$0xff]   ;;  %v3677_v39 = vld [vmem:[%s4975_s1 + $0x40] sm:$0xff]  }
   0xe   :  { %v3675_v38 = vld [vmem:[%s4976_s0 + $0x38] sm:$0xff]   ;;  %v3678_v40 = vld [vmem:[%s4976_s0 + $0x40] sm:$0xff]   ;;  %v3679_v42 = vld [vmem:[%s4975_s1 + $0x48] sm:$0xff]  }
   0xf   :  { %3264 = vmatpush3.bf16.msra.mxu1 %v3647_v6  ;;  %v3696_v41 = vld [vmem:[%s4977_s5 + $0x38] sm:$0xff]   ;;  %v3680_v43 = vld [vmem:[%s4976_s0 + $0x48] sm:$0xff]   ;;  %v3682_v44 = vld [vmem:[%s4975_s1 + $0x50] sm:$0xff]  }
  0x10   :  { %3344 = vmatpush3.bf16.msra.mxu0 %v4093_v7  ;;  %3265 = vmatprep.subr.bf16.mxu1 %v3649_v8  ;;  %v3683_v45 = vld [vmem:[%s4976_s0 + $0x50] sm:$0xff]   ;;  %v3684_v46 = vld [vmem:[%s4975_s1 + $0x58] sm:$0xff]   ;;  %v3687_v48 = vld [vmem:[%s4975_s1 + $0x60] sm:$0xff]  }
  0x11   :  { %3345 = vmatprep.subr.bf16.mxu0 %v4103_v9  ;;  %v3685_v47 = vld [vmem:[%s4976_s0 + $0x58] sm:$0xff]   ;;  %v3688_v49 = vld [vmem:[%s4976_s0 + $0x60] sm:$0xff]   ;;  %v3689_v50 = vld [vmem:[%s4975_s1 + $0x68] sm:$0xff]  }
  0x12   :  { %v3690_v51 = vld [vmem:[%s4976_s0 + $0x68] sm:$0xff]   ;;  %v3692_v52 = vld [vmem:[%s4975_s1 + $0x70] sm:$0xff]   ;;  %v3694_v54 = vld [vmem:[%s4975_s1 + $0x78] sm:$0xff]  }
  0x13   :  { %3266 = vmatpush3.bf16.msra.mxu1 %v3649_v8  ;;  %v3693_v53 = vld [vmem:[%s4976_s0 + $0x70] sm:$0xff]   ;;  %v3695_v55 = vld [vmem:[%s4976_s0 + $0x78] sm:$0xff]   ;;  %v3697_v56 = vld [vmem:[%s4975_s1 + $0x80] sm:$0xff]  }
  0x14   :  { %3346 = vmatpush3.bf16.msra.mxu0 %v4103_v9  ;;  %3267 = vmatprep.subr.bf16.mxu1 %v3651_v10  ;;  %v3698_v57 = vld [vmem:[%s4978_s2] sm:$0xff]   ;;  %v3699_v58 = vld [vmem:[%s4975_s1 + $0x88] sm:$0xff]   ;;  %v3701_v60 = vld [vmem:[%s4975_s1 + $0x90] sm:$0xff]  }
  0x15   :  { %3347 = vmatprep.subr.bf16.mxu0 %v4111_v11  ;;  %v3700_v59 = vld [vmem:[%s4978_s2 + $0x8] sm:$0xff]   ;;  %v3702_v61 = vld [vmem:[%s4978_s2 + $0x10] sm:$0xff]   ;;  %v3703_v62 = vld [vmem:[%s4975_s1 + $0x98] sm:$0xff]  }
  0x16   :  { %v3704_v63 = vld [vmem:[%s4978_s2 + $0x18] sm:$0xff]   ;;  %v3705_v0 = vld [vmem:[%s4975_s1 + $0xa0] sm:$0xff]   ;;  %v3707_v2 = vld [vmem:[%s4975_s1 + $0xa8] sm:$0xff]  }
  0x17   :  { %3268 = vmatpush3.bf16.msra.mxu1 %v3651_v10  ;;  %v3709_v4 = vld [vmem:[%s4975_s1 + $0xb0] sm:$0xff]   ;;  %v3711_v6 = vld [vmem:[%s4975_s1 + $0xb8] sm:$0xff]   ;;  %v3713_v8 = vld [vmem:[%s4975_s1 + $0xc0] sm:$0xff]  }
  0x18   :  { %3348 = vmatpush3.bf16.msra.mxu0 %v4111_v11  ;;  %3269 = vmatprep.subr.bf16.mxu1 %v3653_v14  ;;  %v3715_v10 = vld [vmem:[%s4975_s1 + $0xc8] sm:$0xff]   ;;  %v3717_v12 = vld [vmem:[%s4975_s1 + $0xd0] sm:$0xff]  }
  0x19   :  { %3349 = vmatprep.subr.bf16.mxu0 %v4129_v15  ;;  %v3718_v13 = vld [vmem:[%s4978_s2 + $0x50] sm:$0xff]  }
  0x1b   :  { %3270 = vmatpush3.bf16.msra.mxu1 %v3653_v14  ;;  %v3719_v14 = vld [vmem:[%s4975_s1 + $0xd8] sm:$0xff]  }
  0x1c   :  { %3350 = vmatpush3.bf16.msra.mxu0 %v4129_v15  ;;  %3271 = vmatprep.subr.bf16.mxu1 %v3655_v16 }
  0x1d   :  { %3351 = vmatprep.subr.bf16.mxu0 %v4139_v17 }
  0x1f   :  { %3272 = vmatpush3.bf16.msra.mxu1 %v3655_v16  ;;  %v3721_v16 = vld [vmem:[%s4975_s1 + $0xe0] sm:$0xff]  }
  0x20   :  { %3352 = vmatpush3.bf16.msra.mxu0 %v4139_v17  ;;  %3497 = vmatprep.subr.bf16.mxu1 %v4064_v1 }
  0x21   :  { %3417 = vmatprep.subr.bf16.mxu0 %v3661_v19 }
  0x22   :  { %3274 = vmatmul.mubr.bf16.vlgmr.msra.gmra.mrb[0].mxu1 %v3659_v18  ;;  %v3723_v18 = vld [vmem:[%s4975_s1 + $0xe8] sm:$0xff]  }
  0x23   :  { %3354 = vmatmul.mubr.bf16.vlgmr.msra.gmra.mrb[0].mxu0 %v3660_v20  ;;  %3505 = vmatpush3.bf16.msra.mxu1 %v4064_v1  ;;  %v3706_v1 = vld [vmem:[%s4978_s2 + $0x20] sm:$0xff]   ;;  %v3725_v20 = vld [vmem:[%s4975_s1 + $0xf0] sm:$0xff]  }
  0x24   :  { %3418 = vmatpush3.bf16.msra.mxu0 %v3661_v19  ;;  %3277 = vmatprep.mubr.bf16.mxu1 %v3662_v21  ;;  %v3724_v19 = vld [vmem:[%s4978_s2 + $0x68] sm:$0xff]   ;;  %v3726_v21 = vld [vmem:[%s4978_s2 + $0x70] sm:$0xff]  }
  0x25   :  { %3357 = vmatprep.mubr.bf16.mxu0 %v3663_v22  ;;  %3419 = vmatprep.subr.bf16.mxu0 %v3666_v23  ;;  %v3727_v22 = vld [vmem:[%s4975_s1 + $0xf8] sm:$0xff]  }
  0x26   :  { %3498 = vmatprep.subr.bf16.mxu1 %v4073_v3 }
  0x27   :  { %3506 = vmatpush3.bf16.msra.mxu1 %v4073_v3  ;;  %v3708_v3 = vld [vmem:[%s4978_s2 + $0x28] sm:$0xff]  }
  0x28   :  { %3420 = vmatpush3.bf16.msra.mxu0 %v3666_v23  ;;  %3499 = vmatprep.subr.bf16.mxu1 %v4083_v5  ;;  %v3728_v23 = vld [vmem:[%s4978_s2 + $0x78] sm:$0xff]  }
  0x29   :  { %3421 = vmatprep.subr.bf16.mxu0 %v3671_v25 }
  0x2a   :  { %3278 = vmatmul.mubr.bf16.gmra.mrb[4].mxu1 %v3664_v24  ;;  %v3729_v24 = vld [vmem:[%s4976_s0 + $0x80] sm:$0xff]  }
  0x2b   :  { %3358 = vmatmul.mubr.bf16.gmra.mrb[4].mxu0 %v3665_v26  ;;  %3281 = vmatprep.mubr.bf16.mxu1 %v3667_v27  ;;  %v3731_v26 = vld [vmem:[%s4976_s0 + $0x88] sm:$0xff]  }
  0x2c   :  { %3361 = vmatprep.mubr.bf16.mxu0 %v3668_v28  ;;  %3422 = vmatpush3.bf16.msra.mxu0 %v3671_v25  ;;  %v3730_v25 = vld [vmem:[%s4978_s2 + $0x80] sm:$0xff]   ;;  %v3732_v27 = vld [vmem:[%s4978_s2 + $0x88] sm:$0xff]   ;;  %v3733_v28 = vld [vmem:[%s4976_s0 + $0x90] sm:$0xff]  }
  0x2d   :  { %3423 = vmatprep.subr.bf16.mxu0 %v3676_v29  ;;  %3507 = vmatpush3.bf16.msra.mxu1 %v4083_v5  ;;  %v3710_v5 = vld [vmem:[%s4978_s2 + $0x30] sm:$0xff]  }
  0x2e   :  { %3500 = vmatprep.subr.bf16.mxu1 %v4093_v7 }
  0x30   :  { %3424 = vmatpush3.bf16.msra.mxu0 %v3676_v29  ;;  %v3734_v29 = vld [vmem:[%s4978_s2 + $0x90] sm:$0xff]  }
  0x31   :  { %3425 = vmatprep.subr.bf16.mxu0 %v3681_v31  ;;  %3508 = vmatpush3.bf16.msra.mxu1 %v4093_v7  ;;  %v3712_v7 = vld [vmem:[%s4978_s2 + $0x38] sm:$0xff]  }
  0x32   :  { %3282 = vmatmul.mubr.bf16.gmra.mrb[8].mxu1 %v3669_v30  ;;  %3501 = vmatprep.subr.bf16.mxu1 %v4103_v9  ;;  %v3735_v30 = vld [vmem:[%s4976_s0 + $0x98] sm:$0xff]  }
  0x33   :  { %3362 = vmatmul.mubr.bf16.gmra.mrb[8].mxu0 %v3670_v32  ;;  %3285 = vmatprep.mubr.bf16.mxu1 %v3672_v33  ;;  %v3737_v32 = vld [vmem:[%s4976_s0 + $0xa0] sm:$0xff]  }
  0x34   :  { %3365 = vmatprep.mubr.bf16.mxu0 %v3673_v34  ;;  %3426 = vmatpush3.bf16.msra.mxu0 %v3681_v31  ;;  %v3736_v31 = vld [vmem:[%s4978_s2 + $0x98] sm:$0xff]   ;;  %v3738_v33 = vld [vmem:[%s4978_s2 + $0xa0] sm:$0xff]   ;;  %v3739_v34 = vld [vmem:[%s4976_s0 + $0xa8] sm:$0xff]  }
  0x35   :  { %3427 = vmatprep.subr.bf16.mxu0 %v3686_v35  ;;  %3509 = vmatpush3.bf16.msra.mxu1 %v4103_v9  ;;  %v3714_v9 = vld [vmem:[%s4978_s2 + $0x40] sm:$0xff]  }
  0x36   :  { %3502 = vmatprep.subr.bf16.mxu1 %v4111_v11 }
  0x38   :  { %3428 = vmatpush3.bf16.msra.mxu0 %v3686_v35  ;;  %v3740_v35 = vld [vmem:[%s4978_s2 + $0xa8] sm:$0xff]  }
  0x39   :  { %3429 = vmatprep.subr.bf16.mxu0 %v3691_v37  ;;  %3510 = vmatpush3.bf16.msra.mxu1 %v4111_v11  ;;  %v3716_v11 = vld [vmem:[%s4978_s2 + $0x48] sm:$0xff]  }
  0x3a   :  { %3286 = vmatmul.mubr.bf16.gmra.mrb[12].mxu1 %v3674_v36  ;;  %3503 = vmatprep.subr.bf16.mxu1 %v4129_v15  ;;  %v3741_v36 = vld [vmem:[%s4976_s0 + $0xb0] sm:$0xff]  }
  0x3b   :  { %3366 = vmatmul.mubr.bf16.gmra.mrb[12].mxu0 %v3675_v38  ;;  %3289 = vmatprep.mubr.bf16.mxu1 %v3677_v39  ;;  %v3743_v38 = vld [vmem:[%s4976_s0 + $0xb8] sm:$0xff]  }
  0x3c   :  { %3369 = vmatprep.mubr.bf16.mxu0 %v3678_v40  ;;  %3430 = vmatpush3.bf16.msra.mxu0 %v3691_v37  ;;  %v3742_v37 = vld [vmem:[%s4978_s2 + $0xb0] sm:$0xff]   ;;  %v3744_v39 = vld [vmem:[%s4978_s2 + $0xb8] sm:$0xff]   ;;  %v3745_v40 = vld [vmem:[%s4976_s0 + $0xc0] sm:$0xff]  }
  0x3d   :  { %3431 = vmatprep.subr.bf16.mxu0 %v3696_v41  ;;  %3511 = vmatpush3.bf16.msra.mxu1 %v4129_v15  ;;  %v3720_v15 = vld [vmem:[%s4978_s2 + $0x58] sm:$0xff]  }
  0x3e   :  { %3504 = vmatprep.subr.bf16.mxu1 %v4139_v17 }
  0x40   :  { %3432 = vmatpush3.bf16.msra.mxu0 %v3696_v41  ;;  %v3746_v41 = vld [vmem:[%s4978_s2 + $0xc0] sm:$0xff]  }
  0x41   :  { %3512 = vmatpush3.bf16.msra.mxu1 %v4139_v17  ;;  %v3722_v17 = vld [vmem:[%s4978_s2 + $0x60] sm:$0xff]  }
  0x42   :  { %3290 = vmatmul.mubr.bf16.gmra.mrb[16].mxu1 %v3679_v42  ;;  %v3747_v42 = vld [vmem:[%s4976_s0 + $0xc8] sm:$0xff]  }
  0x43   :  { %3370 = vmatmul.mubr.bf16.gmra.mrb[16].mxu0 %v3680_v43  ;;  %3293 = vmatprep.mubr.bf16.mxu1 %v3682_v44  ;;  %v3748_v43 = vld [vmem:[%s4978_s2 + $0xc8] sm:$0xff]   ;;  %v3749_v44 = vld [vmem:[%s4976_s0 + $0xd0] sm:$0xff]  }
  0x44   :  { %3373 = vmatprep.mubr.bf16.mxu0 %v3683_v45  ;;  %v3750_v45 = vld [vmem:[%s4978_s2 + $0xd0] sm:$0xff]  }
  0x4a   :  { %3294 = vmatmul.mubr.bf16.gmra.mrb[20].mxu1 %v3684_v46  ;;  %v3751_v46 = vld [vmem:[%s4976_s0 + $0xd8] sm:$0xff]  }
  0x4b   :  { %3374 = vmatmul.mubr.bf16.gmra.mrb[20].mxu0 %v3685_v47  ;;  %3297 = vmatprep.mubr.bf16.mxu1 %v3687_v48  ;;  %v3752_v47 = vld [vmem:[%s4978_s2 + $0xd8] sm:$0xff]   ;;  %v3753_v48 = vld [vmem:[%s4976_s0 + $0xe0] sm:$0xff]  }
  0x4c   :  { %3377 = vmatprep.mubr.bf16.mxu0 %v3688_v49  ;;  %v3754_v49 = vld [vmem:[%s4978_s2 + $0xe0] sm:$0xff]  }
  0x52   :  { %3298 = vmatmul.mubr.bf16.gmra.mrb[24].mxu1 %v3689_v50  ;;  %v3755_v50 = vld [vmem:[%s4976_s0 + $0xe8] sm:$0xff]  }
  0x53   :  { %3378 = vmatmul.mubr.bf16.gmra.mrb[24].mxu0 %v3690_v51  ;;  %3301 = vmatprep.mubr.bf16.mxu1 %v3692_v52  ;;  %v3756_v51 = vld [vmem:[%s4978_s2 + $0xe8] sm:$0xff]   ;;  %v3757_v52 = vld [vmem:[%s4976_s0 + $0xf0] sm:$0xff]  }
  0x54   :  { %3381 = vmatprep.mubr.bf16.mxu0 %v3693_v53  ;;  %v3758_v53 = vld [vmem:[%s4978_s2 + $0xf0] sm:$0xff]  }
  0x5a   :  { %3302 = vmatmul.mubr.bf16.gmra.mrb[28].mxu1 %v3694_v54  ;;  %v3759_v54 = vld [vmem:[%s4976_s0 + $0xf8] sm:$0xff]  }
  0x5b   :  { %3382 = vmatmul.mubr.bf16.gmra.mrb[28].mxu0 %v3695_v55  ;;  %3305 = vmatprep.mubr.bf16.mxu1 %v3697_v56  ;;  %v3760_v55 = vld [vmem:[%s4978_s2 + $0xf8] sm:$0xff]  }
  0x5c   :  { %3433 = vmatprep.mubr.bf16.mxu0 %v3698_v57 }
  0x62   :  { %3306 = vmatmul.mubr.bf16.gmra.mrb[32].mxu1 %v3699_v58 }
  0x63   :  { %3434 = vmatmul.mubr.bf16.vlgmr.msra.gmra.mrb[0].mxu0 %v3700_v59  ;;  %3309 = vmatprep.mubr.bf16.mxu1 %v3701_v60 }
  0x64   :  { %3437 = vmatprep.mubr.bf16.mxu0 %v3702_v61 }
  0x6a   :  { %3310 = vmatmul.mubr.bf16.gmra.mrb[36].mxu1 %v3703_v62 }
  0x6b   :  { %3438 = vmatmul.mubr.bf16.gmra.mrb[4].mxu0 %v3704_v63  ;;  %3313 = vmatprep.mubr.bf16.mxu1 %v3705_v0 }
  0x6c   :  { %3441 = vmatprep.mubr.bf16.mxu0 %v3706_v1 }
  0x72   :  { %3314 = vmatmul.mubr.bf16.gmra.mrb[40].mxu1 %v3707_v2 }
  0x73   :  { %3442 = vmatmul.mubr.bf16.gmra.mrb[8].mxu0 %v3708_v3  ;;  %3317 = vmatprep.mubr.bf16.mxu1 %v3709_v4 }
  0x74   :  { %3445 = vmatprep.mubr.bf16.mxu0 %v3710_v5 }
  0x7a   :  { %3318 = vmatmul.mubr.bf16.gmra.mrb[44].mxu1 %v3711_v6 }
  0x7b   :  { %3446 = vmatmul.mubr.bf16.gmra.mrb[12].mxu0 %v3712_v7  ;;  %3321 = vmatprep.mubr.bf16.mxu1 %v3713_v8 }
  0x7c   :  { %3449 = vmatprep.mubr.bf16.mxu0 %v3714_v9 }
  0x82   :  { %3322 = vmatmul.mubr.bf16.gmra.mrb[48].mxu1 %v3715_v10 }
  0x83   :  { %3450 = vmatmul.mubr.bf16.gmra.mrb[16].mxu0 %v3716_v11  ;;  %3325 = vmatprep.mubr.bf16.mxu1 %v3717_v12 }
  0x84   :  { %3453 = vmatprep.mubr.bf16.mxu0 %v3718_v13 }
  0x8a   :  { %3326 = vmatmul.mubr.bf16.gmra.mrb[52].mxu1 %v3719_v14 }
  0x8b   :  { %3454 = vmatmul.mubr.bf16.gmra.mrb[20].mxu0 %v3720_v15  ;;  %3329 = vmatprep.mubr.bf16.mxu1 %v3721_v16 }
  0x8c   :  { %3457 = vmatprep.mubr.bf16.mxu0 %v3722_v17 }
  0x92   :  { %3330 = vmatmul.mubr.bf16.gmra.mrb[56].mxu1 %v3723_v18 }
  0x93   :  { %3458 = vmatmul.mubr.bf16.gmra.mrb[24].mxu0 %v3724_v19  ;;  %3333 = vmatprep.mubr.bf16.mxu1 %v3725_v20 }
  0x94   :  { %3461 = vmatprep.mubr.bf16.mxu0 %v3726_v21 }
  0x9a   :  { %3334 = vmatmul.mubr.bf16.gmra.mrb[60].mxu1 %v3727_v22 }
  0x9b   :  { %3462 = vmatmul.mubr.bf16.gmra.mrb[28].mxu0 %v3728_v23  ;;  %3385 = vmatprep.mubr.bf16.mxu1 %v3729_v24 }
  0x9c   :  { %3465 = vmatprep.mubr.bf16.mxu0 %v3730_v25  ;;  %v4517_v25 = vld [vmem:[%s4979_s6] ss:$0 sm:$0xff] }
  0xa2   :  { %3386 = vmatmul.mubr.bf16.vlgmr.msra.gmra.mrb[32].mxu1 %v3731_v26 }
  0xa3   :  { %3466 = vmatmul.mubr.bf16.gmra.mrb[32].mxu0 %v3732_v27  ;;  %3389 = vmatprep.mubr.bf16.mxu1 %v3733_v28 }
  0xa4   :  { %3469 = vmatprep.mubr.bf16.mxu0 %v3734_v29 }
  0xaa   :  { %3390 = vmatmul.mubr.bf16.gmra.mrb[36].mxu1 %v3735_v30 }
  0xab   :  { %3470 = vmatmul.mubr.bf16.gmra.mrb[36].mxu0 %v3736_v31  ;;  %3393 = vmatprep.mubr.bf16.mxu1 %v3737_v32 }
  0xac   :  { %3473 = vmatprep.mubr.bf16.mxu0 %v3738_v33 }
  0xb2   :  { %3394 = vmatmul.mubr.bf16.gmra.mrb[40].mxu1 %v3739_v34 }
  0xb3   :  { %3474 = vmatmul.mubr.bf16.gmra.mrb[40].mxu0 %v3740_v35  ;;  %3397 = vmatprep.mubr.bf16.mxu1 %v3741_v36 }
  0xb4   :  { %3477 = vmatprep.mubr.bf16.mxu0 %v3742_v37 }
  0xba   :  { %3398 = vmatmul.mubr.bf16.gmra.mrb[44].mxu1 %v3743_v38 }
  0xbb   :  { %3478 = vmatmul.mubr.bf16.gmra.mrb[44].mxu0 %v3744_v39  ;;  %3401 = vmatprep.mubr.bf16.mxu1 %v3745_v40 }
  0xbc   :  { %3481 = vmatprep.mubr.bf16.mxu0 %v3746_v41 }
  0xc2   :  { %3402 = vmatmul.mubr.bf16.gmra.mrb[48].mxu1 %v3747_v42 }
  0xc3   :  { %3482 = vmatmul.mubr.bf16.gmra.mrb[48].mxu0 %v3748_v43  ;;  %3405 = vmatprep.mubr.bf16.mxu1 %v3749_v44 }
  0xc4   :  { %3485 = vmatprep.mubr.bf16.mxu0 %v3750_v45 }
  0xca   :  { %3406 = vmatmul.mubr.bf16.gmra.mrb[52].mxu1 %v3751_v46 }
  0xcb   :  { %3486 = vmatmul.mubr.bf16.gmra.mrb[52].mxu0 %v3752_v47  ;;  %3409 = vmatprep.mubr.bf16.mxu1 %v3753_v48 }
  0xcc   :  { %3489 = vmatprep.mubr.bf16.mxu0 %v3754_v49 }
  0xd2   :  { %3410 = vmatmul.mubr.bf16.gmra.mrb[56].mxu1 %v3755_v50 }
  0xd3   :  { %3490 = vmatmul.mubr.bf16.gmra.mrb[56].mxu0 %v3756_v51  ;;  %3413 = vmatprep.mubr.bf16.mxu1 %v3757_v52 }
  0xd4   :  { %3493 = vmatprep.mubr.bf16.mxu0 %v3758_v53 }
  0xda   :  { %3414 = vmatmul.mubr.bf16.gmra.mrb[60].mxu1 %v3759_v54 }
  0xdb   :  { %3494 = vmatmul.mubr.bf16.gmra.mrb[60].mxu0 %v3760_v55 }
  0xf5   :  { %v3275_v56 = vpop.f32.mrb[0].mxu1 }
  0xf6   :  { %v461_v57 = vpop.f32.mrb[1].mxu1 }
  0xf7   :  { %v3276_v58 = vpop.f32.mrb[2].mxu1 }
  0xf8   :  { %v464_v59 = vpop.f32.mrb[3].mxu1 }
  0xfd   :  { %v3279_v60 = vpop.f32.mrb[4].mxu1 }
  0xfe   :  { %v477_v61 = vpop.f32.mrb[5].mxu1 }
  0xff   :  { %v3280_v62 = vpop.f32.mrb[6].mxu1 }
 0x100   :  { %v480_v63 = vpop.f32.mrb[7].mxu1 }
 0x105   :  { %v4466_v0 = vpop.f32.mrb[8].mxu1 }
 0x106   :  { %v4468_v1 = vpop.f32.mrb[9].mxu1 }
 0x107   :  { %v4470_v2 = vpop.f32.mrb[10].mxu1 }
 0x108   :  { %v4472_v3 = vpop.f32.mrb[11].mxu1 }
 0x10d   :  { %v4474_v4 = vpop.f32.mrb[12].mxu1 }
 0x10e   :  { %v4476_v5 = vpop.f32.mrb[13].mxu1 }
 0x10f   :  { %v4478_v6 = vpop.f32.mrb[14].mxu1 }
 0x110   :  { %v4480_v7 = vpop.f32.mrb[15].mxu1 }
 0x115   :  { %v4482_v8 = vpop.f32.mrb[16].mxu1 }
 0x116   :  { %v4484_v9 = vpop.f32.mrb[17].mxu1 }
 0x117   :  { %v4486_v10 = vpop.f32.mrb[18].mxu1 }
 0x118   :  { %v4488_v11 = vpop.f32.mrb[19].mxu1 }
 0x11d   :  { %v4490_v12 = vpop.f32.mrb[20].mxu1 }
 0x11e   :  { %v4492_v13 = vpop.f32.mrb[21].mxu1 }
 0x11f   :  { %v4494_v14 = vpop.f32.mrb[22].mxu1 }
 0x120   :  { %v4496_v15 = vpop.f32.mrb[23].mxu1 }
 0x125   :  { %v4498_v16 = vpop.f32.mrb[24].mxu1 }
 0x126   :  { %v4500_v17 = vpop.f32.mrb[25].mxu1 }
 0x127   :  { %v4502_v18 = vpop.f32.mrb[26].mxu1 }
 0x128   :  { %v4504_v19 = vpop.f32.mrb[27].mxu1 }
 0x12d   :  { %v4506_v20 = vpop.f32.mrb[28].mxu1 }
 0x12e   :  { %v4508_v21 = vpop.f32.mrb[29].mxu1 }
 0x12f   :  { %v4510_v22 = vpop.f32.mrb[30].mxu1 }
 0x130   :  { %v4512_v23 = vpop.f32.mrb[31].mxu1 }
 0x136   :  { %v3435_v24 = vpop.f32.mrb[0].mxu0 }
 0x137   :  { %v3513_v26 = vadd.f32 %v3435_v24, %v3275_v56  ;;  %v1599_v27 = vpop.f32.mrb[1].mxu0 }
 0x138   :  { %v3514_v28 = vadd.f32 %v1599_v27, %v461_v57  ;;  %v3436_v29 = vpop.f32.mrb[2].mxu0 }
 0x139   :  { %v4520_v30 = vadd.f32 %v3513_v26, %v4517_v25  ;;  %v3515_v31 = vadd.f32 %v3436_v29, %v3276_v58  ;;  %v1602_v32 = vpop.f32.mrb[3].mxu0 }
 0x13a   :  { %v4523_v33 = vadd.f32 %v3514_v28, %v4517_v25  ;;  %v3516_v34 = vadd.f32 %v1602_v32, %v464_v59 }
 0x13b   :  { %v1991_v35 = vsub.f32 0.0, %v4520_v30  ;;  %v4527_v36 = vadd.f32 %v3515_v31, %v4517_v25 }
 0x13c   :  { %v1989_v37 = vsub.f32 0.0, %v4523_v33  ;;  %v4531_v38 = vadd.f32 %v3516_v34, %v4517_v25 }
 0x13d   :  { %v2057_v39 = vmul.f32 1.442695, %v1991_v35  ;;  %v1992_v40 = vsub.f32 0.0, %v4527_v36 }
 0x13e   :  { %v2053_v41 = vmul.f32 1.442695, %v1989_v37  ;;  %v1990_v42 = vsub.f32 0.0, %v4531_v38  ;;  %v3439_v43 = vpop.f32.mrb[4].mxu0 }
 0x13f   :  { %3761 = vpow2.f32 %v2057_v39  ;;  %v2059_v44 = vmul.f32 1.442695, %v1992_v40  ;;  %v3517_v45 = vadd.f32 %v3439_v43, %v3279_v60  ;;  %v1615_v46 = vpop.f32.mrb[5].mxu0 }
 0x140   :  { %3763 = vpow2.f32 %v2053_v41  ;;  %v2055_v47 = vmul.f32 1.442695, %v1990_v42  ;;  %v3518_v48 = vadd.f32 %v1615_v46, %v477_v61  ;;  %v3440_v49 = vpop.f32.mrb[6].mxu0 }
 0x141   :  { %3765 = vpow2.f32 %v2059_v44  ;;  %v4536_v50 = vadd.f32 %v3517_v45, %v4517_v25  ;;  %v3519_v51 = vadd.f32 %v3440_v49, %v3280_v62  ;;  %v1618_v52 = vpop.f32.mrb[7].mxu0 }
 0x142   :  { %3767 = vpow2.f32 %v2055_v47  ;;  %v4539_v53 = vadd.f32 %v3518_v48, %v4517_v25  ;;  %v3520_v54 = vadd.f32 %v1618_v52, %v480_v63 }
 0x143   :  { %v1995_v55 = vsub.f32 0.0, %v4536_v50  ;;  %v4543_v56 = vadd.f32 %v3519_v51, %v4517_v25 }
 0x144   :  { %v1993_v57 = vsub.f32 0.0, %v4539_v53  ;;  %v4547_v58 = vadd.f32 %v3520_v54, %v4517_v25 }
 0x145   :  { %v2065_v59 = vmul.f32 1.442695, %v1995_v55  ;;  %v1996_v60 = vsub.f32 0.0, %v4543_v56 }
 0x146   :  { %v2061_v61 = vmul.f32 1.442695, %v1993_v57  ;;  %v1994_v62 = vsub.f32 0.0, %v4547_v58  ;;  %v3443_v24 = vpop.f32.mrb[8].mxu0 }
 0x147   :  { %3769 = vpow2.f32 %v2065_v59  ;;  %v2067_v26 = vmul.f32 1.442695, %v1996_v60  ;;  %v3521_v63 = vadd.f32 %v3443_v24, %v4466_v0  ;;  %v1631_v27 = vpop.f32.mrb[9].mxu0 }
 0x148   :  { %3771 = vpow2.f32 %v2061_v61  ;;  %v2063_v28 = vmul.f32 1.442695, %v1994_v62  ;;  %v3522_v29 = vadd.f32 %v1631_v27, %v4468_v1  ;;  %v3444_v31 = vpop.f32.mrb[10].mxu0 }
 0x149   :  { %v3762_v32 = vpop.eup %3761  ;;  %3773 = vpow2.f32 %v2067_v26  ;;  %v4554_v34 = vadd.f32 %v3521_v63, %v4517_v25  ;;  %v3523_v35 = vadd.f32 %v3444_v31, %v4470_v2  ;;  %v1634_v37 = vpop.f32.mrb[11].mxu0 }
 0x14a   :  { %v3764_v39 = vpop.eup %3763  ;;  %v2183_v40 = vadd.f32 1.0, %v3762_v32  ;;  %3775 = vpow2.f32 %v2063_v28  ;;  %v4558_v41 = vadd.f32 %v3522_v29, %v4517_v25  ;;  %v3524_v0 = vadd.f32 %v1634_v37, %v4472_v3 }
 0x14b   :  { %v3766_v42 = vpop.eup %3765  ;;  %v2181_v43 = vadd.f32 1.0, %v3764_v39  ;;  %v1999_v1 = vsub.f32 0.0, %v4554_v34  ;;  %v4563_v44 = vadd.f32 %v3523_v35, %v4517_v25 }
 0x14c   :  { %v3768_v45 = vpop.eup %3767  ;;  %3777 = vrcp.f32 %v2183_v40  ;;  %v2184_v46 = vadd.f32 1.0, %v3766_v42  ;;  %v1997_v2 = vsub.f32 0.0, %v4558_v41  ;;  %v4567_v47 = vadd.f32 %v3524_v0, %v4517_v25 }
 0x14d   :  { %3779 = vrcp.f32 %v2181_v43  ;;  %v2182_v48 = vadd.f32 1.0, %v3768_v45  ;;  %v2073_v49 = vmul.f32 1.442695, %v1999_v1  ;;  %v2000_v3 = vsub.f32 0.0, %v4563_v44 }
 0x14e   :  { %3781 = vrcp.f32 %v2184_v46  ;;  %v2069_v51 = vmul.f32 1.442695, %v1997_v2  ;;  %v1998_v52 = vsub.f32 0.0, %v4567_v47  ;;  %v3447_v54 = vpop.f32.mrb[12].mxu0 }
 0x14f   :  { %3783 = vrcp.f32 %v2182_v48  ;;  %v2075_v55 = vmul.f32 1.442695, %v2000_v3  ;;  %v3525_v57 = vadd.f32 %v3447_v54, %v4474_v4  ;;  %v1647_v59 = vpop.f32.mrb[13].mxu0 }
 0x150   :  { %3785 = vpow2.f32 %v2073_v49  ;;  %v2071_v60 = vmul.f32 1.442695, %v1998_v52  ;;  %v3526_v61 = vadd.f32 %v1647_v59, %v4476_v5  ;;  %v3448_v62 = vpop.f32.mrb[14].mxu0 }
 0x151   :  { %v3770_v24 = vpop.eup %3769  ;;  %3787 = vpow2.f32 %v2069_v51  ;;  %v4574_v26 = vadd.f32 %v3525_v57, %v4517_v25  ;;  %v3527_v63 = vadd.f32 %v3448_v62, %v4478_v6  ;;  %v1650_v27 = vpop.f32.mrb[15].mxu0 }
 0x152   :  { %v3772_v28 = vpop.eup %3771  ;;  %v2187_v29 = vadd.f32 1.0, %v3770_v24  ;;  %3789 = vpow2.f32 %v2075_v55  ;;  %v4578_v31 = vadd.f32 %v3526_v61, %v4517_v25  ;;  %v3528_v4 = vadd.f32 %v1650_v27, %v4480_v7 }
 0x153   :  { %v3774_v32 = vpop.eup %3773  ;;  %v2185_v35 = vadd.f32 1.0, %v3772_v28  ;;  %3791 = vpow2.f32 %v2071_v60  ;;  %v2003_v5 = vsub.f32 0.0, %v4574_v26  ;;  %v4583_v37 = vadd.f32 %v3527_v63, %v4517_v25 }
 0x154   :  { %v3776_v39 = vpop.eup %3775  ;;  %3793 = vrcp.f32 %v2187_v29  ;;  %v2188_v6 = vadd.f32 1.0, %v3774_v32  ;;  %v2001_v40 = vsub.f32 0.0, %v4578_v31  ;;  %v4587_v0 = vadd.f32 %v3528_v4, %v4517_v25 }
 0x155   :  { %3795 = vrcp.f32 %v2185_v35  ;;  %v2186_v42 = vadd.f32 1.0, %v3776_v39  ;;  %v2081_v43 = vmul.f32 1.442695, %v2003_v5  ;;  %v2004_v7 = vsub.f32 0.0, %v4583_v37 }
 0x156   :  { %v3778_v1 = vpop.eup %3777  ;;  %3797 = vrcp.f32 %v2188_v6  ;;  %v2077_v45 = vmul.f32 1.442695, %v2001_v40  ;;  %v2002_v46 = vsub.f32 0.0, %v4587_v0  ;;  %v3451_v2 = vpop.f32.mrb[16].mxu0 }
 0x157   :  { %v3780_v48 = vpop.eup %3779  ;;  %v2311_v49 = vmul.f32 %v3778_v1, %v4520_v30  ;;  %3799 = vrcp.f32 %v2186_v42  ;;  %v2083_v3 = vmul.f32 1.442695, %v2004_v7  ;;  %v3529_v51 = vadd.f32 %v3451_v2, %v4482_v8  ;;  %v1663_v52 = vpop.f32.mrb[17].mxu0 }
 0x158   :  { %v3782_v54 = vpop.eup %3781  ;;  %v2309_v55 = vmul.f32 %v3780_v48, %v4523_v33  ;;  %3801 = vpow2.f32 %v2081_v43  ;;  %v2079_v57 = vmul.f32 1.442695, %v2002_v46  ;;  %v3530_v59 = vadd.f32 %v1663_v52, %v4484_v9  ;;  %v3452_v60 = vpop.f32.mrb[18].mxu0 }
 0x159   :  { %v3784_v61 = vpop.eup %3783  ;;  %v2312_v62 = vmul.f32 %v3782_v54, %v4527_v36  ;;  %3803 = vpow2.f32 %v2077_v45  ;;  %v4597_v24 = vadd.f32 %v3529_v51, %v4517_v25  ;;  %v3531_v30 = vadd.f32 %v3452_v60, %v4486_v10  ;;  %v1666_v63 = vpop.f32.mrb[19].mxu0 }
 0x15a   :  { %v3786_v8 = vpop.eup %3785  ;;  %v2310_v27 = vmul.f32 %v3784_v61, %v4531_v38  ;;  %3805 = vpow2.f32 %v2083_v3  ;;  %v4602_v33 = vadd.f32 %v3530_v59, %v4517_v25  ;;  %v3532_v9 = vadd.f32 %v1666_v63, %v4488_v11 }
 0x15b   :  { %v3788_v28 = vpop.eup %3787  ;;  %v2954_v29 = vpack.c.bf16 %v2312_v62, %v2311_v49  ;;  %v2191_v4 = vadd.f32 1.0, %v3786_v8  ;;  %3807 = vpow2.f32 %v2079_v57  ;;  %v2007_v36 = vsub.f32 0.0, %v4597_v24 }
 0x15c   :  { %v3790_v32 = vpop.eup %3789  ;;  %v2949_v35 = vpack.c.bf16 %v2310_v27, %v2309_v55  ;;  %v2189_v5 = vadd.f32 1.0, %v3788_v28  ;;  %v2005_v10 = vsub.f32 0.0, %v4602_v33  ;;  %v4608_v39 = vadd.f32 %v3531_v30, %v4517_v25 }
 0x15d   :  { %v3792_v38 = vpop.eup %3791  ;;  %3106 = vst [vmem:[%s4980_s7 + $0x8] sm:$0xff] %v2954_v29   ;;  %3809 = vrcp.f32 %v2191_v4  ;;  %v2192_v11 = vadd.f32 1.0, %v3790_v32  ;;  %v2089_v6 = vmul.f32 1.442695, %v2007_v36  ;;  %v4614_v40 = vadd.f32 %v3532_v9, %v4517_v25 }
 0x15e   :  { %v3794_v42 = vpop.eup %3793  ;;  %2950 = vst [vmem:[%s4980_s7] sm:$0xff] %v2949_v35   ;;  %3811 = vrcp.f32 %v2189_v5  ;;  %v2190_v43 = vadd.f32 1.0, %v3792_v38  ;;  %v2085_v7 = vmul.f32 1.442695, %v2005_v10  ;;  %v2008_v1 = vsub.f32 0.0, %v4608_v39  ;;  %v3455_v45 = vpop.f32.mrb[20].mxu0 }
 0x15f   :  { %v3796_v46 = vpop.eup %3795  ;;  %v2315_v2 = vmul.f32 %v3794_v42, %v4536_v50  ;;  %3813 = vrcp.f32 %v2192_v11  ;;  %v2006_v48 = vsub.f32 0.0, %v4614_v40  ;;  %v3533_v49 = vadd.f32 %v3455_v45, %v4490_v12  ;;  %v1679_v3 = vpop.f32.mrb[21].mxu0 }
 0x160   :  { %v3798_v51 = vpop.eup %3797  ;;  %v2313_v52 = vmul.f32 %v3796_v46, %v4539_v53  ;;  %3815 = vrcp.f32 %v2190_v43  ;;  %v2091_v54 = vmul.f32 1.442695, %v2008_v1  ;;  %v3534_v55 = vadd.f32 %v1679_v3, %v4492_v13  ;;  %v3456_v57 = vpop.f32.mrb[22].mxu0 }
 0x161   :  { %v3800_v59 = vpop.eup %3799  ;;  %v2316_v60 = vmul.f32 %v3798_v51, %v4543_v56  ;;  %3817 = vpow2.f32 %v2089_v6  ;;  %v2087_v61 = vmul.f32 1.442695, %v2006_v48  ;;  %v4627_v50 = vadd.f32 %v3533_v49, %v4517_v25  ;;  %v1682_v62 = vpop.f32.mrb[23].mxu0 }
 0x162   :  { %v3802_v30 = vpop.eup %3801  ;;  %v2314_v12 = vmul.f32 %v3800_v59, %v4547_v58  ;;  %3819 = vpow2.f32 %v2085_v7  ;;  %v4631_v53 = vadd.f32 %v3534_v55, %v4517_v25  ;;  %v3535_v63 = vadd.f32 %v3456_v57, %v4494_v14 }
 0x163   :  { %v3804_v13 = vpop.eup %3803  ;;  %v2964_v8 = vpack.c.bf16 %v2316_v60, %v2315_v2  ;;  %v2195_v27 = vadd.f32 1.0, %v3802_v30  ;;  %3821 = vpow2.f32 %v2091_v54  ;;  %v2011_v56 = vsub.f32 0.0, %v4627_v50 }
 0x164   :  { %v3806_v9 = vpop.eup %3805  ;;  %v2959_v28 = vpack.c.bf16 %v2314_v12, %v2313_v52  ;;  %v2193_v29 = vadd.f32 1.0, %v3804_v13  ;;  %3823 = vpow2.f32 %v2087_v61  ;;  %v2009_v4 = vsub.f32 0.0, %v4631_v53 }
 0x165   :  { %v3808_v36 = vpop.eup %3807  ;;  %3108 = vst [vmem:[%s4980_s7 + $0x18] sm:$0xff] %v2964_v8   ;;  %3825 = vrcp.f32 %v2195_v27  ;;  %v2196_v58 = vadd.f32 1.0, %v3806_v9  ;;  %v2097_v14 = vmul.f32 1.442695, %v2011_v56  ;;  %v4640_v32 = vadd.f32 %v3535_v63, %v4517_v25 }
 0x166   :  { %3107 = vst [vmem:[%s4980_s7 + $0x10] sm:$0xff] %v2959_v28   ;;  %3827 = vrcp.f32 %v2193_v29  ;;  %v2194_v35 = vadd.f32 1.0, %v3808_v36  ;;  %v2093_v5 = vmul.f32 1.442695, %v2009_v4  ;;  %v3536_v10 = vadd.f32 %v1682_v62, %v4496_v15  ;;  %v3459_v38 = vpop.f32.mrb[24].mxu0 }
 0x167   :  { %v3810_v11 = vpop.eup %3809  ;;  %3829 = vrcp.f32 %v2196_v58  ;;  %v2012_v6 = vsub.f32 0.0, %v4640_v32  ;;  %v3537_v42 = vadd.f32 %v3459_v38, %v4498_v16  ;;  %v1695_v43 = vpop.f32.mrb[25].mxu0 }
 0x168   :  { %v3812_v7 = vpop.eup %3811  ;;  %v2319_v1 = vmul.f32 %v3810_v11, %v4554_v34  ;;  %3831 = vrcp.f32 %v2194_v35  ;;  %v4650_v45 = vadd.f32 %v3536_v10, %v4517_v25  ;;  %v3538_v46 = vadd.f32 %v1695_v43, %v4500_v17  ;;  %v3460_v2 = vpop.f32.mrb[26].mxu0 }
 0x169   :  { %v3814_v48 = vpop.eup %3813  ;;  %v2317_v15 = vmul.f32 %v3812_v7, %v4558_v41  ;;  %3833 = vpow2.f32 %v2097_v14  ;;  %v2099_v49 = vmul.f32 1.442695, %v2012_v6  ;;  %v4655_v3 = vadd.f32 %v3537_v42, %v4517_v25  ;;  %v1698_v16 = vpop.f32.mrb[27].mxu0 }
 0x16a   :  { %v3816_v51 = vpop.eup %3815  ;;  %v2320_v52 = vmul.f32 %v3814_v48, %v4563_v44  ;;  %3835 = vpow2.f32 %v2093_v5  ;;  %v2010_v34 = vsub.f32 0.0, %v4650_v45  ;;  %v4660_v54 = vadd.f32 %v3538_v46, %v4517_v25 }
 0x16b   :  { %v3818_v17 = vpop.eup %3817  ;;  %v2318_v55 = vmul.f32 %v3816_v51, %v4567_v47  ;;  %3837 = vpow2.f32 %v2099_v49  ;;  %v2015_v41 = vsub.f32 0.0, %v4655_v3  ;;  %v3539_v57 = vadd.f32 %v3460_v2, %v4502_v18 }
 0x16c   :  { %v3820_v59 = vpop.eup %3819  ;;  %v2974_v60 = vpack.c.bf16 %v2320_v52, %v2319_v1  ;;  %v2199_v61 = vadd.f32 1.0, %v3818_v17  ;;  %v2095_v62 = vmul.f32 1.442695, %v2010_v34  ;;  %v2013_v44 = vsub.f32 0.0, %v4660_v54 }
 0x16d   :  { %v3822_v30 = vpop.eup %3821  ;;  %v2969_v12 = vpack.c.bf16 %v2318_v55, %v2317_v15  ;;  %v2197_v63 = vadd.f32 1.0, %v3820_v59  ;;  %v2105_v13 = vmul.f32 1.442695, %v2015_v41  ;;  %v4667_v8 = vadd.f32 %v3539_v57, %v4517_v25 }
 0x16e   :  { %v3824_v27 = vpop.eup %3823  ;;  %3110 = vst [vmem:[%s4980_s7 + $0x28] sm:$0xff] %v2974_v60   ;;  %3839 = vrcp.f32 %v2199_v61  ;;  %v2200_v18 = vadd.f32 1.0, %v3822_v30  ;;  %v2101_v47 = vmul.f32 1.442695, %v2013_v44  ;;  %v3540_v56 = vadd.f32 %v1698_v16, %v4504_v19  ;;  %v3463_v9 = vpop.f32.mrb[28].mxu0 }
 0x16f   :  { %v3826_v28 = vpop.eup %3825  ;;  %3109 = vst [vmem:[%s4980_s7 + $0x20] sm:$0xff] %v2969_v12   ;;  %3841 = vrcp.f32 %v2197_v63  ;;  %v2198_v29 = vadd.f32 1.0, %v3824_v27  ;;  %v2016_v4 = vsub.f32 0.0, %v4667_v8  ;;  %v3541_v36 = vadd.f32 %v3463_v9, %v4506_v20  ;;  %v1711_v58 = vpop.f32.mrb[29].mxu0 }
 0x170   :  { %v3828_v14 = vpop.eup %3827  ;;  %v2323_v35 = vmul.f32 %v3826_v28, %v4574_v26  ;;  %3843 = vrcp.f32 %v2200_v18  ;;  %v4680_v5 = vadd.f32 %v3540_v56, %v4517_v25  ;;  %v3542_v19 = vadd.f32 %v1711_v58, %v4508_v21  ;;  %v3464_v10 = vpop.f32.mrb[30].mxu0 }
 0x171   :  { %v3830_v38 = vpop.eup %3829  ;;  %v2321_v11 = vmul.f32 %v3828_v14, %v4578_v31  ;;  %3845 = vrcp.f32 %v2198_v29  ;;  %v2107_v6 = vmul.f32 1.442695, %v2016_v4  ;;  %v4685_v42 = vadd.f32 %v3541_v36, %v4517_v25  ;;  %v1714_v20 = vpop.f32.mrb[31].mxu0 }
 0x172   :  { %v3832_v43 = vpop.eup %3831  ;;  %v2324_v7 = vmul.f32 %v3830_v38, %v4583_v37  ;;  %3847 = vpow2.f32 %v2095_v62  ;;  %v2014_v26 = vsub.f32 0.0, %v4680_v5  ;;  %v4690_v1 = vadd.f32 %v3542_v19, %v4517_v25 }
 0x173   :  { %v3834_v21 = vpop.eup %3833  ;;  %v2322_v46 = vmul.f32 %v3832_v43, %v4587_v0  ;;  %3849 = vpow2.f32 %v2105_v13  ;;  %v2019_v31 = vsub.f32 0.0, %v4685_v42  ;;  %v3543_v2 = vadd.f32 %v3464_v10, %v4510_v22 }
 0x174   :  { %v3836_v48 = vpop.eup %3835  ;;  %v2984_v15 = vpack.c.bf16 %v2324_v7, %v2323_v35  ;;  %v2203_v49 = vadd.f32 1.0, %v3834_v21  ;;  %3851 = vpow2.f32 %v2101_v47  ;;  %v2103_v16 = vmul.f32 1.442695, %v2014_v26 }
 0x175   :  { %v3838_v37 = vpop.eup %3837  ;;  %v2979_v51 = vpack.c.bf16 %v2322_v46, %v2321_v11  ;;  %v2201_v52 = vadd.f32 1.0, %v3836_v48  ;;  %3853 = vpow2.f32 %v2107_v6  ;;  %v2113_v34 = vmul.f32 1.442695, %v2019_v31  ;;  %v3387_v17 = vpop.f32.mrb[32].mxu1 }
 0x176   :  { %3112 = vst [vmem:[%s4980_s7 + $0x38] sm:$0xff] %v2984_v15   ;;  %3855 = vrcp.f32 %v2203_v49  ;;  %v2204_v0 = vadd.f32 1.0, %v3838_v37  ;;  %v2017_v55 = vsub.f32 0.0, %v4690_v1  ;;  %v4700_v22 = vadd.f32 %v3543_v2, %v4517_v25  ;;  %v3467_v41 = vpop.f32.mrb[32].mxu0  ;;  %v1118_v57 = vpop.f32.mrb[33].mxu1 }
 0x177   :  { %3111 = vst [vmem:[%s4980_s7 + $0x30] sm:$0xff] %v2979_v51   ;;  %3857 = vrcp.f32 %v2201_v52  ;;  %v3544_v59 = vadd.f32 %v1714_v20, %v4512_v23  ;;  %v3545_v60 = vadd.f32 %v3467_v41, %v3387_v17  ;;  %v1727_v61 = vpop.f32.mrb[33].mxu0  ;;  %v3388_v62 = vpop.f32.mrb[34].mxu1 }
 0x178   :  { %v3840_v44 = vpop.eup %3839  ;;  %3859 = vrcp.f32 %v2204_v0  ;;  %v2109_v30 = vmul.f32 1.442695, %v2017_v55  ;;  %v2020_v12 = vsub.f32 0.0, %v4700_v22  ;;  %v3546_v63 = vadd.f32 %v1727_v61, %v1118_v57  ;;  %v3468_v13 = vpop.f32.mrb[34].mxu0 }
 0x179   :  { %v1121_v27 = vpop.f32.mrb[35].mxu1  ;;  %v3842_v18 = vpop.eup %3841  ;;  %v2327_v47 = vmul.f32 %v3840_v44, %v4597_v24  ;;  %3861 = vpow2.f32 %v2103_v16  ;;  %v4709_v56 = vadd.f32 %v3544_v59, %v4517_v25  ;;  %v4712_v23 = vadd.f32 %v3545_v60, %v4517_v25 }
 0x17a   :  { %v1730_v9 = vpop.f32.mrb[35].mxu0  ;;  %v3844_v28 = vpop.eup %3843  ;;  %v2325_v29 = vmul.f32 %v3842_v18, %v4602_v33  ;;  %3863 = vpow2.f32 %v2113_v34  ;;  %v2115_v4 = vmul.f32 1.442695, %v2020_v12  ;;  %v4716_v36 = vadd.f32 %v3546_v63, %v4517_v25 }
 0x17b   :  { %v3846_v58 = vpop.eup %3845  ;;  %v2328_v14 = vmul.f32 %v3844_v28, %v4608_v39  ;;  %3865 = vpow2.f32 %v2109_v30  ;;  %v2018_v24 = vsub.f32 0.0, %v4709_v56  ;;  %v2023_v35 = vsub.f32 0.0, %v4712_v23 }
 0x17c   :  { %v3848_v19 = vpop.eup %3847  ;;  %v2326_v10 = vmul.f32 %v3846_v58, %v4614_v40  ;;  %3867 = vpow2.f32 %v2115_v4  ;;  %v2021_v38 = vsub.f32 0.0, %v4716_v36  ;;  %v3547_v33 = vadd.f32 %v3468_v13, %v3388_v62 }
 0x17d   :  { %v3850_v11 = vpop.eup %3849  ;;  %v2994_v6 = vpack.c.bf16 %v2328_v14, %v2327_v47  ;;  %v2202_v20 = vadd.f32 1.0, %v3848_v19  ;;  %v2111_v43 = vmul.f32 1.442695, %v2018_v24  ;;  %v3391_v7 = vpop.f32.mrb[36].mxu1  ;;  %v2121_v46 = vmul.f32 1.442695, %v2023_v35 }
 0x17e   :  { %v3852_v26 = vpop.eup %3851  ;;  %v2989_v21 = vpack.c.bf16 %v2326_v10, %v2325_v29  ;;  %v2207_v39 = vadd.f32 1.0, %v3850_v11  ;;  %v4724_v31 = vadd.f32 %v3547_v33, %v4517_v25  ;;  %v3471_v2 = vpop.f32.mrb[36].mxu0  ;;  %v3548_v49 = vadd.f32 %v1730_v9, %v1121_v27 }
 0x17f   :  { %v1134_v48 = vpop.f32.mrb[37].mxu1  ;;  %v3854_v15 = vpop.eup %3853  ;;  %3114 = vst [vmem:[%s4980_s7 + $0x48] sm:$0xff] %v2994_v6   ;;  %3869 = vrcp.f32 %v2202_v20  ;;  %v2205_v40 = vadd.f32 1.0, %v3852_v26  ;;  %v3549_v16 = vadd.f32 %v3471_v2, %v3391_v7  ;;  %v2117_v17 = vmul.f32 1.442695, %v2021_v38 }
 0x180   :  { %v1743_v37 = vpop.f32.mrb[37].mxu0  ;;  %v3392_v51 = vpop.f32.mrb[38].mxu1  ;;  %3113 = vst [vmem:[%s4980_s7 + $0x40] sm:$0xff] %v2989_v21   ;;  %3871 = vrcp.f32 %v2207_v39  ;;  %v2208_v34 = vadd.f32 1.0, %v3854_v15  ;;  %v2024_v59 = vsub.f32 0.0, %v4724_v31  ;;  %v4734_v60 = vadd.f32 %v3548_v49, %v4517_v25 }
 0x181   :  { %v3856_v52 = vpop.eup %3855  ;;  %v3550_v0 = vadd.f32 %v1743_v37, %v1134_v48  ;;  %v3472_v55 = vpop.f32.mrb[38].mxu0  ;;  %3873 = vrcp.f32 %v2205_v40  ;;  %v4737_v61 = vadd.f32 %v3549_v16, %v4517_v25 }
 0x182   :  { %v1137_v41 = vpop.f32.mrb[39].mxu1  ;;  %v3858_v57 = vpop.eup %3857  ;;  %v2331_v30 = vmul.f32 %v3856_v52, %v4627_v50  ;;  %3875 = vrcp.f32 %v2208_v34  ;;  %v2022_v18 = vsub.f32 0.0, %v4734_v60  ;;  %v3551_v29 = vadd.f32 %v3472_v55, %v3392_v51 }
 0x183   :  { %v1746_v62 = vpop.f32.mrb[39].mxu0  ;;  %v3860_v44 = vpop.eup %3859  ;;  %v4741_v12 = vmul.f32 %v3858_v57, %v4631_v53  ;;  %v4744_v63 = vadd.f32 %v3550_v0, %v4517_v25  ;;  %3877 = vpow2.f32 %v2111_v43  ;;  %v2027_v47 = vsub.f32 0.0, %v4737_v61 }
 0x184   :  { %v3862_v13 = vpop.eup %3861  ;;  %v2332_v27 = vmul.f32 %v3860_v44, %v4640_v32  ;;  %3879 = vpow2.f32 %v2121_v46  ;;  %v2123_v14 = vmul.f32 1.442695, %v2024_v59  ;;  %v2119_v19 = vmul.f32 1.442695, %v2022_v18 }
 0x185   :  { %v3864_v9 = vpop.eup %3863  ;;  %v2206_v28 = vadd.f32 1.0, %v3862_v13  ;;  %v2025_v50 = vsub.f32 0.0, %v4744_v63  ;;  %3881 = vpow2.f32 %v2117_v17  ;;  %v3395_v24 = vpop.f32.mrb[40].mxu1  ;;  %v2129_v10 = vmul.f32 1.442695, %v2027_v47 }
 0x186   :  { %v3866_v53 = vpop.eup %3865  ;;  %v3004_v4 = vpack.c.bf16 %v2332_v27, %v2331_v30  ;;  %v2211_v58 = vadd.f32 1.0, %v3864_v9  ;;  %v3475_v38 = vpop.f32.mrb[40].mxu0  ;;  %v4754_v11 = vadd.f32 %v3551_v29, %v4517_v25  ;;  %v3552_v6 = vadd.f32 %v1746_v62, %v1137_v41 }
 0x187   :  { %v3868_v35 = vpop.eup %3867  ;;  %3883 = vrcp.f32 %v2206_v28  ;;  %v2209_v32 = vadd.f32 1.0, %v3866_v53  ;;  %v1150_v20 = vpop.f32.mrb[41].mxu1  ;;  %v2125_v7 = vmul.f32 1.442695, %v2025_v50  ;;  %v3553_v26 = vadd.f32 %v3475_v38, %v3395_v24 }
 0x188   :  { %3116 = vst [vmem:[%s4980_s7 + $0x58] sm:$0xff] %v3004_v4   ;;  %3885 = vrcp.f32 %v2211_v58  ;;  %v2212_v33 = vadd.f32 1.0, %v3868_v35  ;;  %v1759_v43 = vpop.f32.mrb[41].mxu0  ;;  %v3396_v39 = vpop.f32.mrb[42].mxu1  ;;  %v2028_v48 = vsub.f32 0.0, %v4754_v11  ;;  %v4758_v15 = vadd.f32 %v3552_v6, %v4517_v25 }
 0x189   :  { %3887 = vrcp.f32 %v2209_v32  ;;  %v3554_v21 = vadd.f32 %v1759_v43, %v1150_v20  ;;  %v3476_v46 = vpop.f32.mrb[42].mxu0  ;;  %v3870_v2 = vpop.eup %3869  ;;  %v4762_v52 = vadd.f32 %v3553_v26, %v4517_v25 }
 0x18a   :  { %3889 = vrcp.f32 %v2212_v33  ;;  %v3555_v40 = vadd.f32 %v3476_v46, %v3396_v39  ;;  %v1153_v49 = vpop.f32.mrb[43].mxu1  ;;  %v1762_v16 = vpop.f32.mrb[43].mxu0  ;;  %v2330_v51 = vmul.f32 %v3870_v2, %v4650_v45  ;;  %v2131_v55 = vmul.f32 1.442695, %v2028_v48 }
 0x18b   :  { %v3872_v37 = vpop.eup %3871  ;;  %3891 = vpow2.f32 %v2123_v14  ;;  %v4765_v34 = vadd.f32 %v3554_v21, %v4517_v25  ;;  %v2026_v41 = vsub.f32 0.0, %v4758_v15  ;;  %v2031_v45 = vsub.f32 0.0, %v4762_v52 }
 0x18c   :  { %v3874_v17 = vpop.eup %3873  ;;  %v2335_v0 = vmul.f32 %v3872_v37, %v4655_v3  ;;  %3893 = vpow2.f32 %v2119_v19  ;;  %v2999_v59 = vpack.c.bf16 %v2330_v51, %v4741_v12  ;;  %v3556_v32 = vadd.f32 %v1762_v16, %v1153_v49 }
 0x18d   :  { %v3876_v57 = vpop.eup %3875  ;;  %v2333_v62 = vmul.f32 %v3874_v17, %v4660_v54  ;;  %3895 = vpow2.f32 %v2129_v10  ;;  %v2127_v13 = vmul.f32 1.442695, %v2026_v41  ;;  %v2029_v27 = vsub.f32 0.0, %v4765_v34  ;;  %v3399_v3 = vpop.f32.mrb[44].mxu1 }
 0x18e   :  { %v3878_v44 = vpop.eup %3877  ;;  %v2336_v30 = vmul.f32 %v3876_v57, %v4667_v8  ;;  %3897 = vpow2.f32 %v2125_v7  ;;  %3115 = vst [vmem:[%s4980_s7 + $0x50] sm:$0xff] %v2999_v59   ;;  %v2137_v12 = vmul.f32 1.442695, %v2031_v45  ;;  %v4778_v54 = vadd.f32 %v3555_v40, %v4517_v25  ;;  %v3479_v9 = vpop.f32.mrb[44].mxu0 }
 0x18f   :  { %v3880_v18 = vpop.eup %3879  ;;  %v2210_v47 = vadd.f32 1.0, %v3878_v44  ;;  %3899 = vpow2.f32 %v2131_v55  ;;  %v1166_v28 = vpop.f32.mrb[45].mxu1  ;;  %v2133_v53 = vmul.f32 1.442695, %v2029_v27  ;;  %v3557_v6 = vadd.f32 %v3479_v9, %v3399_v3 }
 0x190   :  { %v3882_v50 = vpop.eup %3881  ;;  %v3014_v8 = vpack.c.bf16 %v2336_v30, %v2335_v0  ;;  %v2215_v29 = vadd.f32 1.0, %v3880_v18  ;;  %3901 = vpow2.f32 %v2127_v13  ;;  %v1775_v4 = vpop.f32.mrb[45].mxu0  ;;  %v2032_v35 = vsub.f32 0.0, %v4778_v54 }
 0x191   :  { %v3400_v58 = vpop.f32.mrb[46].mxu1  ;;  %v3884_v14 = vpop.eup %3883  ;;  %3903 = vrcp.f32 %v2210_v47  ;;  %v2213_v24 = vadd.f32 1.0, %v3882_v50  ;;  %v3558_v20 = vadd.f32 %v1775_v4, %v1166_v28  ;;  %v4787_v39 = vadd.f32 %v3556_v32, %v4517_v25 }
 0x192   :  { %v3480_v19 = vpop.f32.mrb[46].mxu0  ;;  %v1169_v10 = vpop.f32.mrb[47].mxu1  ;;  %3118 = vst [vmem:[%s4980_s7 + $0x68] sm:$0xff] %v3014_v8   ;;  %v2334_v33 = vmul.f32 %v3884_v14, %v4680_v5  ;;  %3905 = vrcp.f32 %v2215_v29  ;;  %v2139_v21 = vmul.f32 1.442695, %v2032_v35  ;;  %v4793_v5 = vadd.f32 %v3557_v6, %v4517_v25 }
 0x193   :  { %v3886_v38 = vpop.eup %3885  ;;  %v1778_v43 = vpop.f32.mrb[47].mxu0  ;;  %3907 = vrcp.f32 %v2213_v24  ;;  %v4798_v16 = vadd.f32 %v3558_v20, %v4517_v25  ;;  %v3559_v17 = vadd.f32 %v3480_v19, %v3400_v58  ;;  %v4815_v35 = vld [vmem:[%s4979_s6] ss:$0 sm:$0xff] }
 0x194   :  { %v3888_v7 = vpop.eup %3887  ;;  %v2339_v26 = vmul.f32 %v3886_v38, %v4685_v42  ;;  %v3009_v2 = vpack.c.bf16 %v2334_v33, %v2333_v62  ;;  %3909 = vpow2.f32 %v2137_v12  ;;  %v2030_v42 = vsub.f32 0.0, %v4787_v39 }
 0x195   :  { %v3890_v46 = vpop.eup %3889  ;;  %v4790_v48 = vmul.f32 %v3888_v7, %v4690_v1  ;;  %3911 = vpow2.f32 %v2133_v53  ;;  %v2035_v51 = vsub.f32 0.0, %v4793_v5  ;;  %v3403_v0 = vpop.f32.mrb[48].mxu1  ;;  %v2033_v59 = vsub.f32 0.0, %v4798_v16 }
 0x196   :  { %v3892_v40 = vpop.eup %3891  ;;  %v2340_v49 = vmul.f32 %v3890_v46, %v4700_v22  ;;  %3117 = vst [vmem:[%s4980_s7 + $0x60] sm:$0xff] %v3009_v2   ;;  %3913 = vpow2.f32 %v2139_v21  ;;  %v2135_v57 = vmul.f32 1.442695, %v2030_v42  ;;  %v3483_v62 = vpop.f32.mrb[48].mxu0  ;;  %v4806_v27 = vadd.f32 %v3559_v17, %v4517_v25 }
 0x197   :  { %v3894_v37 = vpop.eup %3893  ;;  %v2216_v1 = vadd.f32 1.0, %v3892_v40  ;;  %v1182_v45 = vpop.f32.mrb[49].mxu1  ;;  %v2145_v13 = vmul.f32 1.442695, %v2035_v51  ;;  %v2141_v9 = vmul.f32 1.442695, %v2033_v59  ;;  %v3560_v28 = vadd.f32 %v1778_v43, %v1169_v10 }
 0x198   :  { %v3896_v55 = vpop.eup %3895  ;;  %v3024_v41 = vpack.c.bf16 %v2340_v49, %v2339_v26  ;;  %v2214_v22 = vadd.f32 1.0, %v3894_v37  ;;  %v1791_v3 = vpop.f32.mrb[49].mxu0  ;;  %v2036_v4 = vsub.f32 0.0, %v4806_v27  ;;  %v3561_v25 = vadd.f32 %v3483_v62, %v3403_v0 }
 0x199   :  { %v3898_v44 = vpop.eup %3897  ;;  %3915 = vrcp.f32 %v2216_v1  ;;  %v2219_v30 = vadd.f32 1.0, %v3896_v55  ;;  %v3404_v18 = vpop.f32.mrb[50].mxu1  ;;  %v4818_v32 = vadd.f32 %v4815_v35, %v3560_v28  ;;  %v3562_v19 = vadd.f32 %v1791_v3, %v1182_v45 }
 0x19a   :  { %v3900_v47 = vpop.eup %3899  ;;  %3120 = vst [vmem:[%s4980_s7 + $0x78] sm:$0xff] %v3024_v41   ;;  %3917 = vrcp.f32 %v2214_v22  ;;  %v2217_v12 = vadd.f32 1.0, %v3898_v44  ;;  %v3484_v50 = vpop.f32.mrb[50].mxu0  ;;  %v2147_v33 = vmul.f32 1.442695, %v2036_v4  ;;  %v4822_v6 = vadd.f32 %v4815_v35, %v3561_v25 }
 0x19b   :  { %v1185_v8 = vpop.f32.mrb[51].mxu1  ;;  %v3902_v29 = vpop.eup %3901  ;;  %3919 = vrcp.f32 %v2219_v30  ;;  %v2220_v53 = vadd.f32 1.0, %v3900_v47  ;;  %v2034_v7 = vsub.f32 0.0, %v4818_v32  ;;  %v4827_v26 = vadd.f32 %v4815_v35, %v3562_v19 }
 0x19c   :  { %v1794_v58 = vpop.f32.mrb[51].mxu0  ;;  %v3904_v14 = vpop.eup %3903  ;;  %3921 = vrcp.f32 %v2217_v12  ;;  %v2218_v24 = vadd.f32 1.0, %v3902_v29  ;;  %v3563_v0 = vadd.f32 %v3484_v50, %v3404_v18 }
 0x19d   :  { %v3906_v10 = vpop.eup %3905  ;;  %v2338_v38 = vmul.f32 %v3904_v14, %v4709_v56  ;;  %3923 = vrcp.f32 %v2220_v53  ;;  %v2039_v56 = vsub.f32 0.0, %v4822_v6  ;;  %v3407_v40 = vpop.f32.mrb[52].mxu1  ;;  %v2143_v37 = vmul.f32 1.442695, %v2034_v7 }
 0x19e   :  { %v3908_v20 = vpop.eup %3907  ;;  %v2343_v43 = vmul.f32 %v3906_v10, %v4712_v23  ;;  %3925 = vrcp.f32 %v2218_v24  ;;  %v2037_v23 = vsub.f32 0.0, %v4827_v26  ;;  %v3487_v1 = vpop.f32.mrb[52].mxu0  ;;  %v3564_v59 = vadd.f32 %v1794_v58, %v1185_v8 }
 0x19f   :  { %v3910_v21 = vpop.eup %3909  ;;  %v3019_v46 = vpack.c.bf16 %v2338_v38, %v4790_v48  ;;  %v2341_v2 = vmul.f32 %v3908_v20, %v4716_v36  ;;  %3927 = vpow2.f32 %v2135_v57  ;;  %v1198_v51 = vpop.f32.mrb[53].mxu1  ;;  %v2153_v36 = vmul.f32 1.442695, %v2039_v56 }
 0x1a0   :  { %v3912_v49 = vpop.eup %3911  ;;  %v2223_v42 = vadd.f32 1.0, %v3910_v21  ;;  %3929 = vpow2.f32 %v2145_v13  ;;  %v1807_v55 = vpop.f32.mrb[53].mxu0  ;;  %v2149_v57 = vmul.f32 1.442695, %v2037_v23  ;;  %v4837_v30 = vadd.f32 %v4815_v35, %v3563_v0 }
 0x1a1   :  { %v3914_v17 = vpop.eup %3913  ;;  %3119 = vst [vmem:[%s4980_s7 + $0x70] sm:$0xff] %v3019_v46   ;;  %v2221_v48 = vadd.f32 1.0, %v3912_v49  ;;  %3931 = vpow2.f32 %v2141_v9  ;;  %v3408_v41 = vpop.f32.mrb[54].mxu1  ;;  %v3565_v13 = vadd.f32 %v3487_v1, %v3407_v40  ;;  %v3566_v3 = vadd.f32 %v1807_v55, %v1198_v51 }
 0x1a2   :  { %3933 = vrcp.f32 %v2223_v42  ;;  %v2224_v22 = vadd.f32 1.0, %v3914_v17  ;;  %v3488_v62 = vpop.f32.mrb[54].mxu0  ;;  %v1201_v45 = vpop.f32.mrb[55].mxu1  ;;  %v4841_v18 = vadd.f32 %v4815_v35, %v3564_v59  ;;  %v2040_v29 = vsub.f32 0.0, %v4837_v30 }
 0x1a3   :  { %v3916_v44 = vpop.eup %3915  ;;  %3935 = vrcp.f32 %v2221_v48  ;;  %v1810_v47 = vpop.f32.mrb[55].mxu0  ;;  %v3567_v28 = vadd.f32 %v3488_v62, %v3408_v41  ;;  %v4846_v53 = vadd.f32 %v4815_v35, %v3565_v13  ;;  %v4861_v46 = vadd.f32 %v4815_v35, %v3566_v3 }
 0x1a4   :  { %v3918_v12 = vpop.eup %3917  ;;  %v2344_v9 = vmul.f32 %v3916_v44, %v4724_v31  ;;  %3937 = vrcp.f32 %v2224_v22  ;;  %v2038_v31 = vsub.f32 0.0, %v4841_v18  ;;  %v2155_v10 = vmul.f32 1.442695, %v2040_v29 }
 0x1a5   :  { %v3920_v50 = vpop.eup %3919  ;;  %v2342_v8 = vmul.f32 %v3918_v12, %v4734_v60  ;;  %3939 = vpow2.f32 %v2147_v33  ;;  %v3411_v60 = vpop.f32.mrb[56].mxu1  ;;  %v3568_v22 = vadd.f32 %v1810_v47, %v1201_v45 }
 0x1a6   :  { %v3922_v4 = vpop.eup %3921  ;;  %v3034_v25 = vpack.c.bf16 %v2344_v9, %v2343_v43  ;;  %v2347_v58 = vmul.f32 %v3920_v50, %v4737_v61  ;;  %3941 = vpow2.f32 %v2143_v37  ;;  %v2151_v20 = vmul.f32 1.442695, %v2038_v31  ;;  %v3491_v43 = vpop.f32.mrb[56].mxu0 }
 0x1a7   :  { %v3924_v14 = vpop.eup %3923  ;;  %v3029_v24 = vpack.c.bf16 %v2342_v8, %v2341_v2  ;;  %v2345_v19 = vmul.f32 %v3922_v4, %v4744_v63  ;;  %3943 = vpow2.f32 %v2153_v36  ;;  %v2043_v61 = vsub.f32 0.0, %v4846_v53  ;;  %v1214_v7 = vpop.f32.mrb[57].mxu1 }
 0x1a8   :  { %v3926_v38 = vpop.eup %3925  ;;  %3122 = vst [vmem:[%s4980_s7 + $0x88] sm:$0xff] %v3034_v25   ;;  %v2348_v33 = vmul.f32 %v3924_v14, %v4754_v11  ;;  %3945 = vpow2.f32 %v2149_v57  ;;  %v4864_v2 = vadd.f32 %v4815_v35, %v3567_v28  ;;  %v1823_v11 = vpop.f32.mrb[57].mxu0  ;;  %v3569_v57 = vadd.f32 %v3491_v43, %v3411_v60 }
 0x1a9   :  { %v3928_v21 = vpop.eup %3927  ;;  %3121 = vst [vmem:[%s4980_s7 + $0x80] sm:$0xff] %v3029_v24   ;;  %v2346_v63 = vmul.f32 %v3926_v38, %v4758_v15  ;;  %3947 = vpow2.f32 %v2155_v10  ;;  %v3412_v56 = vpop.f32.mrb[58].mxu1  ;;  %v2161_v37 = vmul.f32 1.442695, %v2043_v61  ;;  %v2041_v15 = vsub.f32 0.0, %v4861_v46 }
 0x1aa   :  { %v3930_v40 = vpop.eup %3929  ;;  %v3044_v49 = vpack.c.bf16 %v2348_v33, %v2347_v58  ;;  %v2222_v42 = vadd.f32 1.0, %v3928_v21  ;;  %3949 = vpow2.f32 %v2151_v20  ;;  %v3492_v23 = vpop.f32.mrb[58].mxu0  ;;  %v2044_v36 = vsub.f32 0.0, %v4864_v2 }
 0x1ab   :  { %v1217_v1 = vpop.f32.mrb[59].mxu1  ;;  %v3932_v51 = vpop.eup %3931  ;;  %v3039_v17 = vpack.c.bf16 %v2346_v63, %v2345_v19  ;;  %v2227_v48 = vadd.f32 1.0, %v3930_v40  ;;  %v2157_v44 = vmul.f32 1.442695, %v2041_v15  ;;  %v4879_v9 = vadd.f32 %v4815_v35, %v3568_v22 }
 0x1ac   :  { %v1826_v0 = vpop.f32.mrb[59].mxu0  ;;  %v3934_v55 = vpop.eup %3933  ;;  %3124 = vst [vmem:[%s4980_s7 + $0x98] sm:$0xff] %v3044_v49   ;;  %3951 = vrcp.f32 %v2222_v42  ;;  %v2225_v41 = vadd.f32 1.0, %v3932_v51  ;;  %v2163_v13 = vmul.f32 1.442695, %v2044_v36  ;;  %v4882_v45 = vadd.f32 %v4815_v35, %v3569_v57 }
 0x1ad   :  { %v3936_v59 = vpop.eup %3935  ;;  %3123 = vst [vmem:[%s4980_s7 + $0x90] sm:$0xff] %v3039_v17   ;;  %v2351_v62 = vmul.f32 %v3934_v55, %v4762_v52  ;;  %3953 = vrcp.f32 %v2227_v48  ;;  %v3570_v50 = vadd.f32 %v1823_v11, %v1214_v7  ;;  %v3571_v52 = vadd.f32 %v3492_v23, %v3412_v56  ;;  %v3415_v8 = vpop.f32.mrb[60].mxu1 }
 0x1ae   :  { %v3938_v3 = vpop.eup %3937  ;;  %v4876_v12 = vmul.f32 %v3936_v59, %v4765_v34  ;;  %3955 = vrcp.f32 %v2225_v41  ;;  %v2042_v34 = vsub.f32 0.0, %v4879_v9  ;;  %v2047_v25 = vsub.f32 0.0, %v4882_v45  ;;  %v3495_v58 = vpop.f32.mrb[60].mxu0 }
 0x1af   :  { %v3940_v47 = vpop.eup %3939  ;;  %v2352_v28 = vmul.f32 %v3938_v3, %v4778_v54  ;;  %3957 = vpow2.f32 %v2161_v37  ;;  %v1230_v31 = vpop.f32.mrb[61].mxu1  ;;  %v4888_v10 = vadd.f32 %v4815_v35, %v3570_v50  ;;  %v4895_v11 = vadd.f32 %v4815_v35, %v3571_v52 }
 0x1b0   :  { %v3942_v29 = vpop.eup %3941  ;;  %v2228_v4 = vadd.f32 1.0, %v3940_v47  ;;  %3959 = vpow2.f32 %v2157_v44  ;;  %v1839_v54 = vpop.f32.mrb[61].mxu0  ;;  %v2159_v20 = vmul.f32 1.442695, %v2042_v34  ;;  %v2169_v61 = vmul.f32 1.442695, %v2047_v25 }
 0x1b1   :  { %v3944_v14 = vpop.eup %3943  ;;  %v3054_v24 = vpack.c.bf16 %v2352_v28, %v2351_v62  ;;  %v2226_v19 = vadd.f32 1.0, %v3942_v29  ;;  %3961 = vpow2.f32 %v2163_v13  ;;  %v3416_v60 = vpop.f32.mrb[62].mxu1  ;;  %v2045_v63 = vsub.f32 0.0, %v4888_v10 }
 0x1b2   :  { %v3946_v38 = vpop.eup %3945  ;;  %3963 = vrcp.f32 %v2228_v4  ;;  %v2231_v33 = vadd.f32 1.0, %v3944_v14  ;;  %v3496_v43 = vpop.f32.mrb[62].mxu0  ;;  %v3572_v37 = vadd.f32 %v1826_v0, %v1217_v1  ;;  %v3573_v23 = vadd.f32 %v3495_v58, %v3415_v8 }
 0x1b3   :  { %v3948_v7 = vpop.eup %3947  ;;  %3126 = vst [vmem:[%s4980_s7 + $0xa8] sm:$0xff] %v3054_v24   ;;  %3965 = vrcp.f32 %v2226_v19  ;;  %v2229_v21 = vadd.f32 1.0, %v3946_v38  ;;  %v1233_v56 = vpop.f32.mrb[63].mxu1  ;;  %v2165_v17 = vmul.f32 1.442695, %v2045_v63  ;;  %v2048_v48 = vsub.f32 0.0, %v4895_v11 }
 0x1b4   :  { %v1842_v40 = vpop.f32.mrb[63].mxu0  ;;  %v3950_v49 = vpop.eup %3949  ;;  %3967 = vrcp.f32 %v2231_v33  ;;  %v2232_v42 = vadd.f32 1.0, %v3948_v7  ;;  %v4899_v36 = vadd.f32 %v4815_v35, %v3572_v37  ;;  %v4902_v55 = vadd.f32 %v4815_v35, %v3573_v23 }
 0x1b5   :  { %3969 = vrcp.f32 %v2229_v21  ;;  %v2230_v51 = vadd.f32 1.0, %v3950_v49  ;;  %v3574_v41 = vadd.f32 %v1839_v54, %v1230_v31  ;;  %v2171_v1 = vmul.f32 1.442695, %v2048_v48 }
 0x1b6   :  { %v3952_v15 = vpop.eup %3951  ;;  %3971 = vrcp.f32 %v2232_v42  ;;  %v3575_v0 = vadd.f32 %v3496_v43, %v3416_v60  ;;  %v2046_v62 = vsub.f32 0.0, %v4899_v36  ;;  %v2051_v44 = vsub.f32 0.0, %v4902_v55 }
 0x1b7   :  { %v3954_v22 = vpop.eup %3953  ;;  %v2350_v57 = vmul.f32 %v3952_v15, %v4787_v39  ;;  %3973 = vrcp.f32 %v2230_v51  ;;  %v4909_v47 = vadd.f32 %v4815_v35, %v3574_v41  ;;  %v3576_v25 = vadd.f32 %v1842_v40, %v1233_v56 }
 0x1b8   :  { %v3956_v59 = vpop.eup %3955  ;;  %3975 = vpow2.f32 %v2159_v20  ;;  %v2167_v52 = vmul.f32 1.442695, %v2046_v62  ;;  %v4916_v29 = vadd.f32 %v4815_v35, %v3575_v0  ;;  %v2177_v34 = vmul.f32 1.442695, %v2051_v44 }
 0x1b9   :  { %v3958_v13 = vpop.eup %3957  ;;  %v3049_v3 = vpack.c.bf16 %v2350_v57, %v4876_v12  ;;  %3977 = vpow2.f32 %v2169_v61  ;;  %v2049_v8 = vsub.f32 0.0, %v4909_v47  ;;  %v2355_v31 = vmul.f32 %v3954_v22, %v4793_v5 }
 0x1ba   :  { %v3960_v28 = vpop.eup %3959  ;;  %v2235_v50 = vadd.f32 1.0, %v3958_v13  ;;  %3979 = vpow2.f32 %v2165_v17  ;;  %v2052_v19 = vsub.f32 0.0, %v4916_v29  ;;  %v2353_v60 = vmul.f32 %v3956_v59, %v4798_v16 }
 0x1bb   :  { %v3962_v39 = vpop.eup %3961  ;;  %3125 = vst [vmem:[%s4980_s7 + $0xa0] sm:$0xff] %v3049_v3   ;;  %3981 = vpow2.f32 %v2171_v1  ;;  %v2173_v24 = vmul.f32 1.442695, %v2049_v8  ;;  %v4924_v33 = vadd.f32 %v4815_v35, %v3576_v25  ;;  %v2233_v43 = vadd.f32 1.0, %v3960_v28 }
 0x1bc   :  { %v3964_v12 = vpop.eup %3963  ;;  %3983 = vrcp.f32 %v2235_v50  ;;  %v2236_v4 = vadd.f32 1.0, %v3962_v39  ;;  %v2179_v7 = vmul.f32 1.442695, %v2052_v19 }
 0x1bd   :  { %v3966_v58 = vpop.eup %3965  ;;  %v2356_v14 = vmul.f32 %v3964_v12, %v4806_v27  ;;  %v2050_v27 = vsub.f32 0.0, %v4924_v33 }
 0x1be   :  { %v3968_v54 = vpop.eup %3967  ;;  %v2354_v38 = vmul.f32 %v3966_v58, %v4818_v32  ;;  %3985 = vrcp.f32 %v2236_v4 }
 0x1bf   :  { %v3970_v20 = vpop.eup %3969  ;;  %v3064_v61 = vpack.c.bf16 %v2356_v14, %v2355_v31  ;;  %3987 = vpow2.f32 %v2167_v52  ;;  %v2359_v16 = vmul.f32 %v3968_v54, %v4822_v6  ;;  %v2175_v49 = vmul.f32 1.442695, %v2050_v27 }
 0x1c0   :  { %v3972_v5 = vpop.eup %3971  ;;  %v3059_v21 = vpack.c.bf16 %v2354_v38, %v2353_v60  ;;  %3989 = vpow2.f32 %v2177_v34  ;;  %v2357_v56 = vmul.f32 %v3970_v20, %v4827_v26 }
 0x1c1   :  { %v3974_v63 = vpop.eup %3973  ;;  %3128 = vst [vmem:[%s4980_s7 + $0xb8] sm:$0xff] %v3064_v61   ;;  %v2360_v35 = vmul.f32 %v3972_v5, %v4837_v30  ;;  %3991 = vpow2.f32 %v2173_v24 }
 0x1c2   :  { %v3976_v32 = vpop.eup %3975  ;;  %3127 = vst [vmem:[%s4980_s7 + $0xb0] sm:$0xff] %v3059_v21   ;;  %v2358_v40 = vmul.f32 %v3974_v63, %v4841_v18  ;;  %3993 = vpow2.f32 %v2179_v7 }
 0x1c3   :  { %v3978_v42 = vpop.eup %3977  ;;  %v3074_v37 = vpack.c.bf16 %v2360_v35, %v2359_v16  ;;  %3995 = vrcp.f32 %v2233_v43  ;;  %v2234_v23 = vadd.f32 1.0, %v3976_v32 }
 0x1c4   :  { %v3980_v51 = vpop.eup %3979  ;;  %v3069_v6 = vpack.c.bf16 %v2358_v40, %v2357_v56  ;;  %v2239_v17 = vadd.f32 1.0, %v3978_v42  ;;  %3997 = vpow2.f32 %v2175_v49 }
 0x1c5   :  { %v3982_v30 = vpop.eup %3981  ;;  %3130 = vst [vmem:[%s4980_s7 + $0xc8] sm:$0xff] %v3074_v37   ;;  %3999 = vrcp.f32 %v2234_v23  ;;  %v2237_v26 = vadd.f32 1.0, %v3980_v51 }
 0x1c6   :  { %v3984_v48 = vpop.eup %3983  ;;  %3129 = vst [vmem:[%s4980_s7 + $0xc0] sm:$0xff] %v3069_v6   ;;  %4001 = vrcp.f32 %v2239_v17  ;;  %v2240_v18 = vadd.f32 1.0, %v3982_v30 }
 0x1c7   :  { %v2363_v22 = vmul.f32 %v3984_v48, %v4846_v53 }
 0x1c8   :  { %v3986_v15 = vpop.eup %3985  ;;  %4003 = vrcp.f32 %v2240_v18 }
 0x1c9   :  { %v3988_v41 = vpop.eup %3987  ;;  %v2364_v57 = vmul.f32 %v3986_v15, %v4864_v2  ;;  %4005 = vrcp.f32 %v2237_v26 }
 0x1ca   :  { %v3990_v1 = vpop.eup %3989  ;;  %v2238_v0 = vadd.f32 1.0, %v3988_v41 }
 0x1cb   :  { %v3992_v59 = vpop.eup %3991  ;;  %v3084_v62 = vpack.c.bf16 %v2364_v57, %v2363_v22  ;;  %v2243_v44 = vadd.f32 1.0, %v3990_v1 }
 0x1cc   :  { %v3994_v13 = vpop.eup %3993  ;;  %4007 = vrcp.f32 %v2238_v0  ;;  %v2241_v3 = vadd.f32 1.0, %v3992_v59 }
 0x1cd   :  { %v3996_v28 = vpop.eup %3995  ;;  %3132 = vst [vmem:[%s4980_s7 + $0xd8] sm:$0xff] %v3084_v62   ;;  %4009 = vrcp.f32 %v2243_v44  ;;  %v2244_v50 = vadd.f32 1.0, %v3994_v13 }
 0x1ce   :  { %v3998_v39 = vpop.eup %3997  ;;  %4011 = vrcp.f32 %v2241_v3  ;;  %v2361_v8 = vmul.f32 %v3996_v28, %v4861_v46 }
 0x1cf   :  { %v4000_v53 = vpop.eup %3999  ;;  %4013 = vrcp.f32 %v2244_v50  ;;  %v2242_v2 = vadd.f32 1.0, %v3998_v39 }
 0x1d0   :  { %v4002_v52 = vpop.eup %4001  ;;  %v2362_v12 = vmul.f32 %v4000_v53, %v4879_v9 }
 0x1d1   :  { %4015 = vrcp.f32 %v2242_v2  ;;  %v2367_v25 = vmul.f32 %v4002_v52, %v4882_v45 }
 0x1d2   :  { %v4004_v4 = vpop.eup %4003  ;;  %v3079_v34 = vpack.c.bf16 %v2362_v12, %v2361_v8 }
 0x1d3   :  { %v2368_v58 = vmul.f32 %v4004_v4, %v4895_v11  ;;  %v4006_v31 = vpop.eup %4005 }
 0x1d4   :  { %3131 = vst [vmem:[%s4980_s7 + $0xd0] sm:$0xff] %v3079_v34   ;;  %v2365_v54 = vmul.f32 %v4006_v31, %v4888_v10 }
 0x1d5   :  { %v3094_v14 = vpack.c.bf16 %v2368_v58, %v2367_v25 }
 0x1d6   :  { %v4008_v24 = vpop.eup %4007 }
 0x1d7   :  { %v4010_v19 = vpop.eup %4009  ;;  %3134 = vst [vmem:[%s4980_s7 + $0xe8] sm:$0xff] %v3094_v14   ;;  %v2366_v46 = vmul.f32 %v4008_v24, %v4899_v36 }
 0x1d8   :  { %v4012_v9 = vpop.eup %4011  ;;  %v2371_v11 = vmul.f32 %v4010_v19, %v4902_v55 }
 0x1d9   :  { %v4014_v45 = vpop.eup %4013  ;;  %v3089_v60 = vpack.c.bf16 %v2366_v46, %v2365_v54  ;;  %v2369_v10 = vmul.f32 %v4012_v9, %v4909_v47 }
 0x1da   :  { %v2372_v38 = vmul.f32 %v4014_v45, %v4916_v29 }
 0x1db   :  { %v4016_v20 = vpop.eup %4015  ;;  %3133 = vst [vmem:[%s4980_s7 + $0xe0] sm:$0xff] %v3089_v60  }
 0x1dc   :  { %v3104_v61 = vpack.c.bf16 %v2372_v38, %v2371_v11  ;;  %v2370_v43 = vmul.f32 %v4016_v20, %v4924_v33 }
 0x1de   :  { %3136 = vst [vmem:[%s4980_s7 + $0xf8] sm:$0xff] %v3104_v61   ;;  %v3099_v36 = vpack.c.bf16 %v2370_v43, %v2369_v10 }
 0x1e0   :  { %3135 = vst [vmem:[%s4980_s7 + $0xf0] sm:$0xff] %v3099_v36  }

// kernel: neck_forward.23
= control target key start
LH: loop header
LB: loop body
LE: loop exit
PB: predicated region body
PF: predicated region fallthrough
CT: control target
= control target key end

     0   :  { %s11415_s10 = inlined_call_operand.vmem [shape: bf16[128,128], index: 10, kind: input, shape index: {}]   ;;  %s11416_s13 = inlined_call_operand.vmem [shape: bf16[128,128], index: 13, kind: input, shape index: {}]   ;;  %s11417_s1 = inlined_call_operand.vmem [shape: bf16[512,128], index: 1, kind: input, shape index: {}]   ;;  %s11418_s4 = inlined_call_operand.vmem [shape: bf16[512,128], index: 4, kind: input, shape index: {}]   ;;  %s11419_s9 = inlined_call_operand.vmem [shape: bf16[128,128], index: 9, kind: input, shape index: {}]   ;;  %s11420_s14 = inlined_call_operand.vmem [shape: bf16[128,128], index: 14, kind: input, shape index: {}]   ;;  %s11421_s5 = inlined_call_operand.vmem [shape: bf16[512,128], index: 5, kind: input, shape index: {}]   ;;  %s11422_s15 = inlined_call_operand.vmem [shape: bf16[128,128], index: 15, kind: input, shape index: {}]   ;;  %s11423_s0 = inlined_call_operand.vmem [shape: bf16[512,128], index: 0, kind: input, shape index: {}]   ;;  %s11424_s11 = inlined_call_operand.vmem [shape: bf16[128,128], index: 11, kind: input, shape index: {}]   ;;  %s11425_s6 = inlined_call_operand.vmem [shape: bf16[512,128], index: 6, kind: input, shape index: {}]   ;;  %s11426_s16 = inlined_call_operand.vmem [shape: bf16[128,128], index: 16, kind: input, shape index: {}]   ;;  %s11427_s2 = inlined_call_operand.vmem [shape: bf16[512,128], index: 2, kind: input, shape index: {}]   ;;  %s11428_s12 = inlined_call_operand.vmem [shape: bf16[128,128], index: 12, kind: input, shape index: {}]   ;;  %s11429_s7 = inlined_call_operand.vmem [shape: bf16[512,128], index: 7, kind: input, shape index: {}]   ;;  %s11430_s17 = inlined_call_operand.vmem [shape: bf16[128,128], index: 17, kind: input, shape index: {}]   ;;  %s11431_s3 = inlined_call_operand.vmem [shape: bf16[512,128], index: 3, kind: input, shape index: {}]   ;;  %s11432_s8 = inlined_call_operand.vmem [shape: bf16[512,128], index: 8, kind: input, shape index: {}]   ;;  %s11433_s18 = inlined_call_operand.vmem [shape: f32[1,128], index: 18, kind: input, shape index: {}]   ;;  %s11434_s19 = inlined_call_operand.vmem [shape: bf16[512,128], index: 19, kind: output, shape index: {}]  }
   0x1   :  { %11440 = sst [smem:[#allocation2_spill]] %s11415_s10  ;;  %v9078_v19 = vld [vmem:[%s11419_s9] sm:$0xff]   ;;  %v9085_v24 = vld [vmem:[%s11420_s14 + $0x8] sm:$0xff]   ;;  %v9091_v28 = vld [vmem:[%s11420_s14 + $0x10] sm:$0xff]  }
   0x2   :  { %11441 = sst [smem:[#allocation3_spill]] %s11416_s13  ;;  %s11445_s20 = sld [smem:[#allocation2_spill]]  ;;  %v9080_v20 = vld [vmem:[%s11420_s14] sm:$0xff]   ;;  %v9089_v25 = vld [vmem:[%s11419_s9 + $0x8] sm:$0xff]   ;;  %v9096_v31 = vld [vmem:[%s11420_s14 + $0x18] sm:$0xff]  }
   0x3   :  { %11442 = sst [smem:[#allocation4_spill]] %s11417_s1  ;;  %v9100_v32 = vld [vmem:[%s11419_s9 + $0x10] sm:$0xff]   ;;  %v9102_v34 = vld [vmem:[%s11420_s14 + $0x20] sm:$0xff]   ;;  %v9107_v38 = vld [vmem:[%s11420_s14 + $0x28] sm:$0xff]  }
   0x4   :  { %11443 = sst [smem:[#allocation5_spill]] %s11418_s4  ;;  %s11447_s28 = sld [smem:[#allocation4_spill]]  ;;  %v9111_v40 = vld [vmem:[%s11419_s9 + $0x18] sm:$0xff]   ;;  %v9113_v42 = vld [vmem:[%s11420_s14 + $0x30] sm:$0xff]   ;;  %v9122_v49 = vld [vmem:[%s11419_s9 + $0x20] sm:$0xff]  }
   0x5   :  { %11444 = sst [smem:[#allocation6_spill]] %s11429_s7  ;;  %s11446_s7 = sld [smem:[#allocation3_spill]]  ;;  %v9118_v45 = vld [vmem:[%s11420_s14 + $0x38] sm:$0xff]   ;;  %v9124_v51 = vld [vmem:[%s11422_s15] sm:$0xff]   ;;  %v9132_v56 = vld [vmem:[%s11419_s9 + $0x28] sm:$0xff]  }
   0x6   :  { %s11448_s30 = sld [smem:[#allocation5_spill]]  ;;  %v9142_v61 = vld [vmem:[%s11419_s9 + $0x30] sm:$0xff]  }
   0x8   :  { %v9059_v0 = vld [vmem:[%s11445_s20] sm:$0xff]   ;;  %v9061_v2 = vld [vmem:[%s11445_s20 + $0x8] sm:$0xff]   ;;  %v9063_v4 = vld [vmem:[%s11445_s20 + $0x10] sm:$0xff]  }
   0x9   :  { %7811 = vmatprep.subr.bf16.mxu1 %v9059_v0  ;;  %v9065_v6 = vld [vmem:[%s11445_s20 + $0x18] sm:$0xff]   ;;  %v9067_v8 = vld [vmem:[%s11445_s20 + $0x20] sm:$0xff]   ;;  %v9069_v10 = vld [vmem:[%s11445_s20 + $0x28] sm:$0xff]  }
   0xa   :  { %7812 = vmatpush3.bf16.msra.mxu1 %v9059_v0  ;;  %v9075_v12 = vld [vmem:[%s11447_s28] sm:$0xff]   ;;  %v9071_v14 = vld [vmem:[%s11445_s20 + $0x30] sm:$0xff]   ;;  %v9073_v16 = vld [vmem:[%s11445_s20 + $0x38] sm:$0xff]  }
   0xb   :  { %v9060_v1 = vld [vmem:[%s11446_s7] sm:$0xff]   ;;  %v9062_v3 = vld [vmem:[%s11446_s7 + $0x8] sm:$0xff]   ;;  %7813 = vmatprep.subr.bf16.mxu1 %v9061_v2  ;;  %v9064_v5 = vld [vmem:[%s11446_s7 + $0x10] sm:$0xff]   ;;  %7827 = vmatprep.mubr.bf16.mxu1 %v9075_v12 }
   0xc   :  { %8131 = vmatprep.subr.bf16.mxu0 %v9060_v1  ;;  %v9066_v7 = vld [vmem:[%s11446_s7 + $0x18] sm:$0xff]   ;;  %v9068_v9 = vld [vmem:[%s11446_s7 + $0x20] sm:$0xff]   ;;  %v9070_v11 = vld [vmem:[%s11446_s7 + $0x28] sm:$0xff]  }
   0xd   :  { %8132 = vmatpush3.bf16.msra.mxu0 %v9060_v1  ;;  %v9076_v13 = vld [vmem:[%s11448_s30] sm:$0xff]   ;;  %v9072_v15 = vld [vmem:[%s11446_s7 + $0x30] sm:$0xff]   ;;  %v9074_v17 = vld [vmem:[%s11446_s7 + $0x38] sm:$0xff]  }
   0xe   :  { %8133 = vmatprep.subr.bf16.mxu0 %v9062_v3  ;;  %7814 = vmatpush3.bf16.msra.mxu1 %v9061_v2  ;;  %v9077_v18 = vld [vmem:[%s11447_s28 + $0x8] sm:$0xff]   ;;  %v9081_v22 = vld [vmem:[%s11447_s28 + $0x10] sm:$0xff]   ;;  %v9083_v26 = vld [vmem:[%s11447_s28 + $0x18] sm:$0xff]  }
   0xf   :  { %7815 = vmatprep.subr.bf16.mxu1 %v9063_v4  ;;  %8147 = vmatprep.mubr.bf16.mxu0 %v9076_v13  ;;  %v9079_v21 = vld [vmem:[%s11448_s30 + $0x8] sm:$0xff]   ;;  %v9082_v23 = vld [vmem:[%s11448_s30 + $0x10] sm:$0xff]   ;;  %v9084_v27 = vld [vmem:[%s11448_s30 + $0x18] sm:$0xff]  }
  0x10   :  { %v9086_v29 = vld [vmem:[%s11447_s28 + $0x20] sm:$0xff]   ;;  %v9088_v33 = vld [vmem:[%s11447_s28 + $0x28] sm:$0xff]   ;;  %v9092_v36 = vld [vmem:[%s11447_s28 + $0x30] sm:$0xff]  }
  0x11   :  { %8134 = vmatpush3.bf16.msra.mxu0 %v9062_v3  ;;  %v9087_v30 = vld [vmem:[%s11448_s30 + $0x20] sm:$0xff]   ;;  %v9090_v35 = vld [vmem:[%s11448_s30 + $0x28] sm:$0xff]   ;;  %v9093_v37 = vld [vmem:[%s11448_s30 + $0x30] sm:$0xff]  }
  0x12   :  { %8135 = vmatprep.subr.bf16.mxu0 %v9064_v5  ;;  %7816 = vmatpush3.bf16.msra.mxu1 %v9063_v4  ;;  %v9094_v39 = vld [vmem:[%s11447_s28 + $0x38] sm:$0xff]   ;;  %v9097_v43 = vld [vmem:[%s11447_s28 + $0x40] sm:$0xff]   ;;  %v9099_v46 = vld [vmem:[%s11447_s28 + $0x48] sm:$0xff]  }
  0x13   :  { %7817 = vmatprep.subr.bf16.mxu1 %v9065_v6  ;;  %v9095_v41 = vld [vmem:[%s11448_s30 + $0x38] sm:$0xff]   ;;  %v9098_v44 = vld [vmem:[%s11448_s30 + $0x40] sm:$0xff]   ;;  %v9101_v47 = vld [vmem:[%s11448_s30 + $0x48] sm:$0xff]  }
  0x14   :  { %v9103_v48 = vld [vmem:[%s11447_s28 + $0x50] sm:$0xff]   ;;  %v9105_v52 = vld [vmem:[%s11447_s28 + $0x58] sm:$0xff]   ;;  %v9108_v54 = vld [vmem:[%s11447_s28 + $0x60] sm:$0xff]  }
  0x15   :  { %8136 = vmatpush3.bf16.msra.mxu0 %v9064_v5  ;;  %v9104_v50 = vld [vmem:[%s11448_s30 + $0x50] sm:$0xff]   ;;  %v9106_v53 = vld [vmem:[%s11448_s30 + $0x58] sm:$0xff]   ;;  %v9109_v55 = vld [vmem:[%s11448_s30 + $0x60] sm:$0xff]  }
  0x16   :  { %8137 = vmatprep.subr.bf16.mxu0 %v9066_v7  ;;  %7818 = vmatpush3.bf16.msra.mxu1 %v9065_v6  ;;  %v9110_v57 = vld [vmem:[%s11447_s28 + $0x68] sm:$0xff]   ;;  %v9114_v59 = vld [vmem:[%s11447_s28 + $0x70] sm:$0xff]   ;;  %v9116_v62 = vld [vmem:[%s11447_s28 + $0x78] sm:$0xff]  }
  0x17   :  { %7819 = vmatprep.subr.bf16.mxu1 %v9067_v8  ;;  %v9112_v58 = vld [vmem:[%s11448_s30 + $0x68] sm:$0xff]   ;;  %v9115_v60 = vld [vmem:[%s11448_s30 + $0x70] sm:$0xff]   ;;  %v9117_v63 = vld [vmem:[%s11448_s30 + $0x78] sm:$0xff]  }
  0x18   :  { %v9119_v0 = vld [vmem:[%s11447_s28 + $0x80] sm:$0xff]   ;;  %v9121_v2 = vld [vmem:[%s11447_s28 + $0x88] sm:$0xff]   ;;  %v9152_v3 = vld [vmem:[%s11419_s9 + $0x38] sm:$0xff]   ;;  %s11449_s9 = sld [smem:[#allocation6_spill]] }
  0x19   :  { %8138 = vmatpush3.bf16.msra.mxu0 %v9066_v7  ;;  %v9120_v1 = vld [vmem:[%s11421_s5] sm:$0xff]   ;;  %v9123_v4 = vld [vmem:[%s11421_s5 + $0x8] sm:$0xff]   ;;  %v9125_v5 = vld [vmem:[%s11447_s28 + $0x90] sm:$0xff]  }
  0x1a   :  { %8139 = vmatprep.subr.bf16.mxu0 %v9068_v9  ;;  %7820 = vmatpush3.bf16.msra.mxu1 %v9067_v8  ;;  %v9126_v6 = vld [vmem:[%s11421_s5 + $0x10] sm:$0xff]   ;;  %v9134_v7 = vld [vmem:[%s11422_s15 + $0x8] sm:$0xff]   ;;  %v9127_v8 = vld [vmem:[%s11447_s28 + $0x98] sm:$0xff]  }
  0x1b   :  { %7821 = vmatprep.subr.bf16.mxu1 %v9069_v10  ;;  %v10015_v12 = vld [vmem:[%s11424_s11] sm:$0xff]  }
  0x1c   :  { %v9130_v13 = vld [vmem:[%s11421_s5 + $0x20] sm:$0xff]  }
  0x1d   :  { %8140 = vmatpush3.bf16.msra.mxu0 %v9068_v9  ;;  %v9128_v9 = vld [vmem:[%s11421_s5 + $0x18] sm:$0xff]  }
  0x1e   :  { %8141 = vmatprep.subr.bf16.mxu0 %v9070_v11  ;;  %7822 = vmatpush3.bf16.msra.mxu1 %v9069_v10  ;;  %v9144_v10 = vld [vmem:[%s11422_s15 + $0x10] sm:$0xff]  }
  0x1f   :  { %7823 = vmatprep.subr.bf16.mxu1 %v9071_v14 }
  0x21   :  { %8142 = vmatpush3.bf16.msra.mxu0 %v9070_v11  ;;  %v9129_v11 = vld [vmem:[%s11447_s28 + $0xa0] sm:$0xff]  }
  0x22   :  { %8143 = vmatprep.subr.bf16.mxu0 %v9072_v15  ;;  %7824 = vmatpush3.bf16.msra.mxu1 %v9071_v14  ;;  %v9154_v14 = vld [vmem:[%s11422_s15 + $0x18] sm:$0xff]  }
  0x23   :  { %7825 = vmatprep.subr.bf16.mxu1 %v9073_v16 }
  0x25   :  { %8144 = vmatpush3.bf16.msra.mxu0 %v9072_v15  ;;  %v9131_v15 = vld [vmem:[%s11447_s28 + $0xa8] sm:$0xff]  }
  0x26   :  { %8145 = vmatprep.subr.bf16.mxu0 %v9074_v17  ;;  %7826 = vmatpush3.bf16.msra.mxu1 %v9073_v16  ;;  %v9164_v16 = vld [vmem:[%s11422_s15 + $0x20] sm:$0xff]  }
  0x27   :  { %7891 = vmatprep.subr.bf16.mxu1 %v9078_v19 }
  0x29   :  { %8146 = vmatpush3.bf16.msra.mxu0 %v9074_v17  ;;  %7828 = vmatmul.mubr.bf16.vlgmr.msra.gmra.mrb[0].mxu1 %v9077_v18  ;;  %v9133_v17 = vld [vmem:[%s11421_s5 + $0x28] sm:$0xff]   ;;  %v9135_v18 = vld [vmem:[%s11447_s28 + $0xb0] sm:$0xff]  }
  0x2a   :  { %8211 = vmatprep.subr.bf16.mxu0 %v9080_v20  ;;  %7892 = vmatpush3.bf16.msra.mxu1 %v9078_v19  ;;  %v9136_v19 = vld [vmem:[%s11421_s5 + $0x30] sm:$0xff]  }
  0x2b   :  { %7831 = vmatprep.mubr.bf16.mxu1 %v9081_v22  ;;  %7893 = vmatprep.subr.bf16.mxu1 %v9089_v25  ;;  %v9138_v22 = vld [vmem:[%s11421_s5 + $0x38] sm:$0xff]  }
  0x2c   :  { %8148 = vmatmul.mubr.bf16.vlgmr.msra.gmra.mrb[0].mxu0 %v9079_v21  ;;  %v9137_v21 = vld [vmem:[%s11447_s28 + $0xb8] sm:$0xff]  }
  0x2d   :  { %8212 = vmatpush3.bf16.msra.mxu0 %v9080_v20  ;;  %8151 = vmatprep.mubr.bf16.mxu0 %v9082_v23  ;;  %v9174_v20 = vld [vmem:[%s11422_s15 + $0x28] sm:$0xff]   ;;  %v9139_v23 = vld [vmem:[%s11447_s28 + $0xc0] sm:$0xff]  }
  0x2e   :  { %8213 = vmatprep.subr.bf16.mxu0 %v9085_v24  ;;  %7894 = vmatpush3.bf16.msra.mxu1 %v9089_v25  ;;  %v9141_v25 = vld [vmem:[%s11447_s28 + $0xc8] sm:$0xff]  }
  0x2f   :  { %7895 = vmatprep.subr.bf16.mxu1 %v9100_v32 }
  0x31   :  { %8214 = vmatpush3.bf16.msra.mxu0 %v9085_v24  ;;  %7832 = vmatmul.mubr.bf16.gmra.mrb[4].mxu1 %v9083_v26  ;;  %v9140_v24 = vld [vmem:[%s11421_s5 + $0x40] sm:$0xff]   ;;  %v9184_v26 = vld [vmem:[%s11422_s15 + $0x30] sm:$0xff]  }
  0x32   :  { %8215 = vmatprep.subr.bf16.mxu0 %v9091_v28  ;;  %7835 = vmatprep.mubr.bf16.mxu1 %v9086_v29  ;;  %v9146_v29 = vld [vmem:[%s11421_s5 + $0x50] sm:$0xff]  }
  0x33   :  { %7896 = vmatpush3.bf16.msra.mxu1 %v9100_v32  ;;  %v9149_v32 = vld [vmem:[%s11447_s28 + $0xe0] sm:$0xff]  }
  0x34   :  { %8152 = vmatmul.mubr.bf16.gmra.mrb[4].mxu0 %v9084_v27  ;;  %7897 = vmatprep.subr.bf16.mxu1 %v9111_v40  ;;  %v9143_v27 = vld [vmem:[%s11421_s5 + $0x48] sm:$0xff]  }
  0x35   :  { %8155 = vmatprep.mubr.bf16.mxu0 %v9087_v30  ;;  %8216 = vmatpush3.bf16.msra.mxu0 %v9091_v28  ;;  %v9145_v28 = vld [vmem:[%s11447_s28 + $0xd0] sm:$0xff]   ;;  %v9147_v30 = vld [vmem:[%s11447_s28 + $0xd8] sm:$0xff]  }
  0x36   :  { %8217 = vmatprep.subr.bf16.mxu0 %v9096_v31 }
  0x37   :  { %7898 = vmatpush3.bf16.msra.mxu1 %v9111_v40  ;;  %v9157_v40 = vld [vmem:[%s11447_s28 + $0xf8] sm:$0xff]  }
  0x38   :  { %7899 = vmatprep.subr.bf16.mxu1 %v9122_v49 }
  0x39   :  { %8218 = vmatpush3.bf16.msra.mxu0 %v9096_v31  ;;  %7836 = vmatmul.mubr.bf16.gmra.mrb[8].mxu1 %v9088_v33  ;;  %v9148_v31 = vld [vmem:[%s11421_s5 + $0x58] sm:$0xff]  }
  0x3a   :  { %8219 = vmatprep.subr.bf16.mxu0 %v9102_v34  ;;  %7839 = vmatprep.mubr.bf16.mxu1 %v9092_v36  ;;  %v9194_v33 = vld [vmem:[%s11422_s15 + $0x38] sm:$0xff]   ;;  %v9153_v36 = vld [vmem:[%s11421_s5 + $0x68] sm:$0xff]  }
  0x3b   :  { %7900 = vmatpush3.bf16.msra.mxu1 %v9122_v49  ;;  %v9182_v49 = vld [vmem:[%s11424_s11 + $0x10] sm:$0xff]  }
  0x3c   :  { %8156 = vmatmul.mubr.bf16.gmra.mrb[8].mxu0 %v9090_v35  ;;  %7901 = vmatprep.subr.bf16.mxu1 %v9132_v56  ;;  %v9151_v35 = vld [vmem:[%s11447_s28 + $0xe8] sm:$0xff]  }
  0x3d   :  { %8159 = vmatprep.mubr.bf16.mxu0 %v9093_v37  ;;  %8220 = vmatpush3.bf16.msra.mxu0 %v9102_v34  ;;  %v9150_v34 = vld [vmem:[%s11421_s5 + $0x60] sm:$0xff]   ;;  %v9155_v37 = vld [vmem:[%s11447_s28 + $0xf0] sm:$0xff]  }
  0x3e   :  { %8221 = vmatprep.subr.bf16.mxu0 %v9107_v38 }
  0x3f   :  { %7902 = vmatpush3.bf16.msra.mxu1 %v9132_v56  ;;  %v9202_v56 = vld [vmem:[%s11424_s11 + $0x20] sm:$0xff]  }
  0x40   :  { %7903 = vmatprep.subr.bf16.mxu1 %v9142_v61 }
  0x41   :  { %8222 = vmatpush3.bf16.msra.mxu0 %v9107_v38  ;;  %7840 = vmatmul.mubr.bf16.gmra.mrb[12].mxu1 %v9094_v39  ;;  %v9156_v38 = vld [vmem:[%s11421_s5 + $0x70] sm:$0xff]   ;;  %v10099_v39 = vld [vmem:[%s11426_s16] sm:$0xff]  }
  0x42   :  { %8223 = vmatprep.subr.bf16.mxu0 %v9113_v42  ;;  %7843 = vmatprep.mubr.bf16.mxu1 %v9097_v43  ;;  %v9160_v43 = vld [vmem:[%s11421_s5 + $0x80] sm:$0xff]  }
  0x43   :  { %7904 = vmatpush3.bf16.msra.mxu1 %v9142_v61  ;;  %v9177_v61 = vld [vmem:[%s11423_s0 + $0x38] sm:$0xff]  }
  0x44   :  { %8160 = vmatmul.mubr.bf16.gmra.mrb[12].mxu0 %v9095_v41  ;;  %7905 = vmatprep.subr.bf16.mxu1 %v9152_v3  ;;  %v9158_v41 = vld [vmem:[%s11421_s5 + $0x78] sm:$0xff]  }
  0x45   :  { %8163 = vmatprep.mubr.bf16.mxu0 %v9098_v44  ;;  %8224 = vmatpush3.bf16.msra.mxu0 %v9113_v42  ;;  %v9159_v42 = vld [vmem:[%s11423_s0] sm:$0xff]   ;;  %v9161_v44 = vld [vmem:[%s11423_s0 + $0x8] sm:$0xff]  }
  0x46   :  { %8225 = vmatprep.subr.bf16.mxu0 %v9118_v45 }
  0x47   :  { %7906 = vmatpush3.bf16.msra.mxu1 %v9152_v3  ;;  %v9181_v3 = vld [vmem:[%s11423_s0 + $0x48] sm:$0xff]  }
  0x48   :  { %7971 = vmatprep.subr.bf16.mxu1 %v10015_v12 }
  0x49   :  { %8226 = vmatpush3.bf16.msra.mxu0 %v9118_v45  ;;  %7844 = vmatmul.mubr.bf16.gmra.mrb[16].mxu1 %v9099_v46  ;;  %v9163_v45 = vld [vmem:[%s11421_s5 + $0x88] sm:$0xff]   ;;  %v9165_v46 = vld [vmem:[%s11423_s0 + $0x10] sm:$0xff]  }
  0x4a   :  { %7847 = vmatprep.mubr.bf16.mxu1 %v9103_v48  ;;  %8291 = vmatprep.subr.bf16.mxu0 %v9124_v51  ;;  %v9172_v48 = vld [vmem:[%s11424_s11 + $0x8] sm:$0xff]  }
  0x4c   :  { %8164 = vmatmul.mubr.bf16.gmra.mrb[16].mxu0 %v9101_v47  ;;  %v9166_v47 = vld [vmem:[%s11421_s5 + $0x90] sm:$0xff]  }
  0x4d   :  { %8167 = vmatprep.mubr.bf16.mxu0 %v9104_v50  ;;  %v9167_v50 = vld [vmem:[%s11423_s0 + $0x18] sm:$0xff]  }
  0x51   :  { %7848 = vmatmul.mubr.bf16.gmra.mrb[20].mxu1 %v9105_v52  ;;  %v9169_v52 = vld [vmem:[%s11423_s0 + $0x20] sm:$0xff]  }
  0x52   :  { %7851 = vmatprep.mubr.bf16.mxu1 %v9108_v54  ;;  %v9192_v54 = vld [vmem:[%s11424_s11 + $0x18] sm:$0xff]  }
  0x54   :  { %8168 = vmatmul.mubr.bf16.gmra.mrb[20].mxu0 %v9106_v53  ;;  %v9170_v53 = vld [vmem:[%s11421_s5 + $0xa0] sm:$0xff]  }
  0x55   :  { %8171 = vmatprep.mubr.bf16.mxu0 %v9109_v55  ;;  %v9171_v55 = vld [vmem:[%s11423_s0 + $0x28] sm:$0xff]  }
  0x59   :  { %7852 = vmatmul.mubr.bf16.gmra.mrb[24].mxu1 %v9110_v57  ;;  %v9173_v57 = vld [vmem:[%s11421_s5 + $0xa8] sm:$0xff]  }
  0x5a   :  { %7855 = vmatprep.mubr.bf16.mxu1 %v9114_v59  ;;  %v9176_v59 = vld [vmem:[%s11421_s5 + $0xb0] sm:$0xff]  }
  0x5c   :  { %8172 = vmatmul.mubr.bf16.gmra.mrb[24].mxu0 %v9112_v58  ;;  %v9175_v58 = vld [vmem:[%s11423_s0 + $0x30] sm:$0xff]  }
  0x5d   :  { %8175 = vmatprep.mubr.bf16.mxu0 %v9115_v60  ;;  %v9212_v60 = vld [vmem:[%s11424_s11 + $0x28] sm:$0xff]  }
  0x61   :  { %7856 = vmatmul.mubr.bf16.gmra.mrb[28].mxu1 %v9116_v62  ;;  %v9222_v62 = vld [vmem:[%s11424_s11 + $0x30] sm:$0xff]  }
  0x62   :  { %7859 = vmatprep.mubr.bf16.mxu1 %v9119_v0  ;;  %v9179_v0 = vld [vmem:[%s11423_s0 + $0x40] sm:$0xff]  }
  0x64   :  { %8176 = vmatmul.mubr.bf16.gmra.mrb[28].mxu0 %v9117_v63  ;;  %v9178_v63 = vld [vmem:[%s11421_s5 + $0xb8] sm:$0xff]  }
  0x65   :  { %8227 = vmatprep.mubr.bf16.mxu0 %v9120_v1  ;;  %v9180_v1 = vld [vmem:[%s11421_s5 + $0xc0] sm:$0xff]  }
  0x69   :  { %7860 = vmatmul.mubr.bf16.gmra.mrb[32].mxu1 %v9121_v2  ;;  %v9232_v2 = vld [vmem:[%s11424_s11 + $0x38] sm:$0xff]  }
  0x6a   :  { %7863 = vmatprep.mubr.bf16.mxu1 %v9125_v5  ;;  %v9183_v5 = vld [vmem:[%s11421_s5 + $0xc8] sm:$0xff]  }
  0x6c   :  { %8228 = vmatmul.mubr.bf16.vlgmr.msra.gmra.mrb[0].mxu0 %v9123_v4  ;;  %v10190_v4 = vld [vmem:[%s11428_s12] sm:$0xff]  }
  0x6d   :  { %8292 = vmatpush3.bf16.msra.mxu0 %v9124_v51  ;;  %8231 = vmatprep.mubr.bf16.mxu0 %v9126_v6  ;;  %v9168_v51 = vld [vmem:[%s11421_s5 + $0x98] sm:$0xff]   ;;  %v9185_v6 = vld [vmem:[%s11423_s0 + $0x50] sm:$0xff]  }
  0x6e   :  { %8293 = vmatprep.subr.bf16.mxu0 %v9134_v7 }
  0x71   :  { %8294 = vmatpush3.bf16.msra.mxu0 %v9134_v7  ;;  %7864 = vmatmul.mubr.bf16.gmra.mrb[36].mxu1 %v9127_v8  ;;  %v9186_v7 = vld [vmem:[%s11421_s5 + $0xd0] sm:$0xff]   ;;  %v9187_v8 = vld [vmem:[%s11423_s0 + $0x58] sm:$0xff]  }
  0x72   :  { %8295 = vmatprep.subr.bf16.mxu0 %v9144_v10  ;;  %7867 = vmatprep.mubr.bf16.mxu1 %v9129_v11  ;;  %v9190_v11 = vld [vmem:[%s11421_s5 + $0xe0] sm:$0xff]  }
  0x74   :  { %8232 = vmatmul.mubr.bf16.gmra.mrb[4].mxu0 %v9128_v9  ;;  %v9188_v9 = vld [vmem:[%s11421_s5 + $0xd8] sm:$0xff]  }
  0x75   :  { %8235 = vmatprep.mubr.bf16.mxu0 %v9130_v13  ;;  %8296 = vmatpush3.bf16.msra.mxu0 %v9144_v10  ;;  %v9189_v10 = vld [vmem:[%s11423_s0 + $0x60] sm:$0xff]   ;;  %v9193_v13 = vld [vmem:[%s11421_s5 + $0xe8] sm:$0xff]  }
  0x76   :  { %8297 = vmatprep.subr.bf16.mxu0 %v9154_v14 }
  0x79   :  { %8298 = vmatpush3.bf16.msra.mxu0 %v9154_v14  ;;  %7868 = vmatmul.mubr.bf16.gmra.mrb[40].mxu1 %v9131_v15  ;;  %v9195_v14 = vld [vmem:[%s11423_s0 + $0x70] sm:$0xff]  }
  0x7a   :  { %8299 = vmatprep.subr.bf16.mxu0 %v9164_v16  ;;  %7871 = vmatprep.mubr.bf16.mxu1 %v9135_v18  ;;  %v9196_v15 = vld [vmem:[%s11421_s5 + $0xf0] sm:$0xff]   ;;  %v9199_v18 = vld [vmem:[%s11423_s0 + $0x80] sm:$0xff]  }
  0x7c   :  { %8236 = vmatmul.mubr.bf16.gmra.mrb[8].mxu0 %v9133_v17  ;;  %v9198_v17 = vld [vmem:[%s11421_s5 + $0xf8] sm:$0xff]  }
  0x7d   :  { %8239 = vmatprep.mubr.bf16.mxu0 %v9136_v19  ;;  %8300 = vmatpush3.bf16.msra.mxu0 %v9164_v16  ;;  %v9197_v16 = vld [vmem:[%s11423_s0 + $0x78] sm:$0xff]   ;;  %v9200_v19 = vld [vmem:[%s11425_s6] sm:$0xff]  }
  0x7e   :  { %8301 = vmatprep.subr.bf16.mxu0 %v9174_v20 }
  0x81   :  { %8302 = vmatpush3.bf16.msra.mxu0 %v9174_v20  ;;  %7872 = vmatmul.mubr.bf16.gmra.mrb[44].mxu1 %v9137_v21  ;;  %v9201_v20 = vld [vmem:[%s11423_s0 + $0x88] sm:$0xff]  }
  0x82   :  { %7875 = vmatprep.mubr.bf16.mxu1 %v9139_v23  ;;  %8303 = vmatprep.subr.bf16.mxu0 %v9184_v26  ;;  %v9203_v21 = vld [vmem:[%s11425_s6 + $0x8] sm:$0xff]   ;;  %v9206_v23 = vld [vmem:[%s11425_s6 + $0x10] sm:$0xff]  }
  0x84   :  { %8240 = vmatmul.mubr.bf16.gmra.mrb[12].mxu0 %v9138_v22  ;;  %v9205_v22 = vld [vmem:[%s11423_s0 + $0x90] sm:$0xff]  }
  0x85   :  { %8243 = vmatprep.mubr.bf16.mxu0 %v9140_v24  ;;  %8304 = vmatpush3.bf16.msra.mxu0 %v9184_v26  ;;  %v9214_v24 = vld [vmem:[%s11426_s16 + $0x8] sm:$0xff]   ;;  %v9208_v26 = vld [vmem:[%s11425_s6 + $0x18] sm:$0xff]  }
  0x86   :  { %8305 = vmatprep.subr.bf16.mxu0 %v9194_v33 }
  0x89   :  { %7876 = vmatmul.mubr.bf16.gmra.mrb[48].mxu1 %v9141_v25  ;;  %8306 = vmatpush3.bf16.msra.mxu0 %v9194_v33  ;;  %v9207_v25 = vld [vmem:[%s11423_s0 + $0x98] sm:$0xff]   ;;  %v9213_v33 = vld [vmem:[%s11425_s6 + $0x28] sm:$0xff]  }
  0x8a   :  { %7879 = vmatprep.mubr.bf16.mxu1 %v9145_v28  ;;  %8371 = vmatprep.subr.bf16.mxu0 %v10099_v39  ;;  %v9224_v28 = vld [vmem:[%s11426_s16 + $0x10] sm:$0xff]  }
  0x8c   :  { %8244 = vmatmul.mubr.bf16.gmra.mrb[16].mxu0 %v9143_v27  ;;  %v9209_v27 = vld [vmem:[%s11423_s0 + $0xa0] sm:$0xff]  }
  0x8d   :  { %8247 = vmatprep.mubr.bf16.mxu0 %v9146_v29  ;;  %v9210_v29 = vld [vmem:[%s11425_s6 + $0x20] sm:$0xff]  }
  0x91   :  { %7880 = vmatmul.mubr.bf16.gmra.mrb[52].mxu1 %v9147_v30  ;;  %v9234_v30 = vld [vmem:[%s11426_s16 + $0x18] sm:$0xff]  }
  0x92   :  { %7883 = vmatprep.mubr.bf16.mxu1 %v9149_v32  ;;  %v9244_v32 = vld [vmem:[%s11426_s16 + $0x20] sm:$0xff]  }
  0x94   :  { %8248 = vmatmul.mubr.bf16.gmra.mrb[20].mxu0 %v9148_v31  ;;  %v9211_v31 = vld [vmem:[%s11423_s0 + $0xa8] sm:$0xff]  }
  0x95   :  { %8251 = vmatprep.mubr.bf16.mxu0 %v9150_v34  ;;  %v9215_v34 = vld [vmem:[%s11423_s0 + $0xb0] sm:$0xff]  }
  0x99   :  { %7884 = vmatmul.mubr.bf16.gmra.mrb[56].mxu1 %v9151_v35  ;;  %v9216_v35 = vld [vmem:[%s11425_s6 + $0x30] sm:$0xff]  }
  0x9a   :  { %7887 = vmatprep.mubr.bf16.mxu1 %v9155_v37  ;;  %v9217_v37 = vld [vmem:[%s11423_s0 + $0xb8] sm:$0xff]  }
  0x9c   :  { %8252 = vmatmul.mubr.bf16.gmra.mrb[24].mxu0 %v9153_v36  ;;  %v9254_v36 = vld [vmem:[%s11426_s16 + $0x28] sm:$0xff]  }
  0x9d   :  { %8255 = vmatprep.mubr.bf16.mxu0 %v9156_v38  ;;  %v9264_v38 = vld [vmem:[%s11426_s16 + $0x30] sm:$0xff]  }
  0xa1   :  { %7888 = vmatmul.mubr.bf16.gmra.mrb[60].mxu1 %v9157_v40  ;;  %v9219_v40 = vld [vmem:[%s11423_s0 + $0xc0] sm:$0xff]  }
  0xa2   :  { %7907 = vmatprep.mubr.bf16.mxu1 %v9159_v42  ;;  %v9274_v42 = vld [vmem:[%s11426_s16 + $0x38] sm:$0xff]  }
  0xa4   :  { %8256 = vmatmul.mubr.bf16.gmra.mrb[28].mxu0 %v9158_v41  ;;  %v9220_v41 = vld [vmem:[%s11425_s6 + $0x40] sm:$0xff]  }
  0xa5   :  { %8259 = vmatprep.mubr.bf16.mxu0 %v9160_v43  ;;  %v9221_v43 = vld [vmem:[%s11423_s0 + $0xc8] sm:$0xff]  }
  0xa9   :  { %7908 = vmatmul.mubr.bf16.vlgmr.msra.gmra.mrb[0].mxu1 %v9161_v44  ;;  %v10314_v44 = vld [vmem:[%s11430_s17] sm:$0xff]  }
  0xaa   :  { %7972 = vmatpush3.bf16.msra.mxu1 %v10015_v12  ;;  %7911 = vmatprep.mubr.bf16.mxu1 %v9165_v46  ;;  %v9191_v12 = vld [vmem:[%s11423_s0 + $0x68] sm:$0xff]   ;;  %v9225_v46 = vld [vmem:[%s11423_s0 + $0xd0] sm:$0xff]  }
  0xab   :  { %7973 = vmatprep.subr.bf16.mxu1 %v9172_v48 }
  0xac   :  { %8260 = vmatmul.mubr.bf16.gmra.mrb[32].mxu0 %v9163_v45  ;;  %v9223_v45 = vld [vmem:[%s11425_s6 + $0x48] sm:$0xff]  }
  0xad   :  { %8263 = vmatprep.mubr.bf16.mxu0 %v9166_v47  ;;  %v9226_v47 = vld [vmem:[%s11425_s6 + $0x50] sm:$0xff]  }
  0xae   :  { %7974 = vmatpush3.bf16.msra.mxu1 %v9172_v48  ;;  %v9227_v48 = vld [vmem:[%s11423_s0 + $0xd8] sm:$0xff]  }
  0xaf   :  { %7975 = vmatprep.subr.bf16.mxu1 %v9182_v49 }
  0xb1   :  { %7912 = vmatmul.mubr.bf16.gmra.mrb[4].mxu1 %v9167_v50  ;;  %v9229_v50 = vld [vmem:[%s11423_s0 + $0xe0] sm:$0xff]  }
  0xb2   :  { %7915 = vmatprep.mubr.bf16.mxu1 %v9169_v52  ;;  %7976 = vmatpush3.bf16.msra.mxu1 %v9182_v49  ;;  %v9228_v49 = vld [vmem:[%s11425_s6 + $0x58] sm:$0xff]   ;;  %v9231_v52 = vld [vmem:[%s11423_s0 + $0xe8] sm:$0xff]  }
  0xb3   :  { %7977 = vmatprep.subr.bf16.mxu1 %v9192_v54 }
  0xb4   :  { %8264 = vmatmul.mubr.bf16.gmra.mrb[36].mxu0 %v9168_v51  ;;  %v9230_v51 = vld [vmem:[%s11425_s6 + $0x60] sm:$0xff]  }
  0xb5   :  { %8267 = vmatprep.mubr.bf16.mxu0 %v9170_v53  ;;  %v9233_v53 = vld [vmem:[%s11425_s6 + $0x68] sm:$0xff]  }
  0xb6   :  { %7978 = vmatpush3.bf16.msra.mxu1 %v9192_v54  ;;  %v9235_v54 = vld [vmem:[%s11423_s0 + $0xf0] sm:$0xff]  }
  0xb7   :  { %7979 = vmatprep.subr.bf16.mxu1 %v9202_v56 }
  0xb9   :  { %7916 = vmatmul.mubr.bf16.gmra.mrb[8].mxu1 %v9171_v55  ;;  %v9236_v55 = vld [vmem:[%s11425_s6 + $0x70] sm:$0xff]  }
  0xba   :  { %7919 = vmatprep.mubr.bf16.mxu1 %v9175_v58  ;;  %7980 = vmatpush3.bf16.msra.mxu1 %v9202_v56  ;;  %v9237_v56 = vld [vmem:[%s11423_s0 + $0xf8] sm:$0xff]   ;;  %v9239_v58 = vld [vmem:[%s11427_s2] sm:$0xff]  }
  0xbb   :  { %7981 = vmatprep.subr.bf16.mxu1 %v9212_v60 }
  0xbc   :  { %8268 = vmatmul.mubr.bf16.gmra.mrb[40].mxu0 %v9173_v57  ;;  %v9238_v57 = vld [vmem:[%s11425_s6 + $0x78] sm:$0xff]  }
  0xbd   :  { %8271 = vmatprep.mubr.bf16.mxu0 %v9176_v59  ;;  %v9240_v59 = vld [vmem:[%s11425_s6 + $0x80] sm:$0xff]  }
  0xbe   :  { %7982 = vmatpush3.bf16.msra.mxu1 %v9212_v60  ;;  %v9241_v60 = vld [vmem:[%s11427_s2 + $0x8] sm:$0xff]  }
  0xbf   :  { %7983 = vmatprep.subr.bf16.mxu1 %v9222_v62 }
  0xc1   :  { %7920 = vmatmul.mubr.bf16.gmra.mrb[12].mxu1 %v9177_v61  ;;  %v9243_v61 = vld [vmem:[%s11425_s6 + $0x88] sm:$0xff]  }
  0xc2   :  { %7923 = vmatprep.mubr.bf16.mxu1 %v9179_v0  ;;  %7984 = vmatpush3.bf16.msra.mxu1 %v9222_v62  ;;  %v9245_v62 = vld [vmem:[%s11427_s2 + $0x10] sm:$0xff]   ;;  %v9252_v0 = vld [vmem:[%s11428_s12 + $0x8] sm:$0xff]  }
  0xc3   :  { %7985 = vmatprep.subr.bf16.mxu1 %v9232_v2 }
  0xc4   :  { %8272 = vmatmul.mubr.bf16.gmra.mrb[44].mxu0 %v9178_v63  ;;  %v9246_v63 = vld [vmem:[%s11425_s6 + $0x90] sm:$0xff]  }
  0xc5   :  { %8275 = vmatprep.mubr.bf16.mxu0 %v9180_v1  ;;  %v9247_v1 = vld [vmem:[%s11427_s2 + $0x18] sm:$0xff]  }
  0xc6   :  { %7986 = vmatpush3.bf16.msra.mxu1 %v9232_v2  ;;  %v9262_v2 = vld [vmem:[%s11428_s12 + $0x10] sm:$0xff]  }
  0xc7   :  { %8051 = vmatprep.subr.bf16.mxu1 %v10190_v4 }
  0xc9   :  { %7924 = vmatmul.mubr.bf16.gmra.mrb[16].mxu1 %v9181_v3  ;;  %v9248_v3 = vld [vmem:[%s11425_s6 + $0x98] sm:$0xff]  }
  0xca   :  { %7927 = vmatprep.mubr.bf16.mxu1 %v9185_v6  ;;  %v9272_v6 = vld [vmem:[%s11428_s12 + $0x18] sm:$0xff]  }
  0xcc   :  { %8276 = vmatmul.mubr.bf16.gmra.mrb[48].mxu0 %v9183_v5  ;;  %v9249_v5 = vld [vmem:[%s11427_s2 + $0x20] sm:$0xff]  }
  0xcd   :  { %8279 = vmatprep.mubr.bf16.mxu0 %v9186_v7  ;;  %v9251_v7 = vld [vmem:[%s11427_s2 + $0x28] sm:$0xff]  }
  0xd1   :  { %7928 = vmatmul.mubr.bf16.gmra.mrb[20].mxu1 %v9187_v8  ;;  %v9282_v8 = vld [vmem:[%s11428_s12 + $0x20] sm:$0xff]  }
  0xd2   :  { %7931 = vmatprep.mubr.bf16.mxu1 %v9189_v10  ;;  %v9255_v10 = vld [vmem:[%s11427_s2 + $0x30] sm:$0xff]  }
  0xd4   :  { %8280 = vmatmul.mubr.bf16.gmra.mrb[52].mxu0 %v9188_v9  ;;  %v9253_v9 = vld [vmem:[%s11425_s6 + $0xa8] sm:$0xff]  }
  0xd5   :  { %8283 = vmatprep.mubr.bf16.mxu0 %v9190_v11  ;;  %v9256_v11 = vld [vmem:[%s11425_s6 + $0xb0] sm:$0xff]  }
  0xd9   :  { %7932 = vmatmul.mubr.bf16.gmra.mrb[24].mxu1 %v9191_v12  ;;  %v9292_v12 = vld [vmem:[%s11428_s12 + $0x28] sm:$0xff]  }
  0xda   :  { %7935 = vmatprep.mubr.bf16.mxu1 %v9195_v14  ;;  %v9302_v14 = vld [vmem:[%s11428_s12 + $0x30] sm:$0xff]  }
  0xdc   :  { %8284 = vmatmul.mubr.bf16.gmra.mrb[56].mxu0 %v9193_v13  ;;  %v9257_v13 = vld [vmem:[%s11427_s2 + $0x38] sm:$0xff]  }
  0xdd   :  { %8287 = vmatprep.mubr.bf16.mxu0 %v9196_v15  ;;  %v9258_v15 = vld [vmem:[%s11425_s6 + $0xb8] sm:$0xff]  }
  0xe1   :  { %7936 = vmatmul.mubr.bf16.gmra.mrb[28].mxu1 %v9197_v16  ;;  %v9259_v16 = vld [vmem:[%s11427_s2 + $0x40] sm:$0xff]  }
  0xe2   :  { %7939 = vmatprep.mubr.bf16.mxu1 %v9199_v18  ;;  %v9312_v18 = vld [vmem:[%s11428_s12 + $0x38] sm:$0xff]  }
  0xe4   :  { %8288 = vmatmul.mubr.bf16.gmra.mrb[60].mxu0 %v9198_v17  ;;  %v9260_v17 = vld [vmem:[%s11425_s6 + $0xc0] sm:$0xff]  }
  0xe5   :  { %8307 = vmatprep.mubr.bf16.mxu0 %v9200_v19  ;;  %v9261_v19 = vld [vmem:[%s11427_s2 + $0x48] sm:$0xff]  }
  0xe9   :  { %7940 = vmatmul.mubr.bf16.gmra.mrb[32].mxu1 %v9201_v20  ;;  %v9263_v20 = vld [vmem:[%s11425_s6 + $0xc8] sm:$0xff]  }
  0xea   :  { %7943 = vmatprep.mubr.bf16.mxu1 %v9205_v22  ;;  %v9266_v22 = vld [vmem:[%s11425_s6 + $0xd0] sm:$0xff]  }
  0xec   :  { %8308 = vmatmul.mubr.bf16.vlgmr.msra.gmra.mrb[0].mxu0 %v9203_v21  ;;  %v9265_v21 = vld [vmem:[%s11427_s2 + $0x50] sm:$0xff]  }
  0xed   :  { %8372 = vmatpush3.bf16.msra.mxu0 %v10099_v39  ;;  %8311 = vmatprep.mubr.bf16.mxu0 %v9206_v23  ;;  %v9218_v39 = vld [vmem:[%s11425_s6 + $0x38] sm:$0xff]   ;;  %v10447_v23 = vld [vmem:[%s11446_s7] sm:$0xff]  }
  0xee   :  { %8373 = vmatprep.subr.bf16.mxu0 %v9214_v24 }
  0xf1   :  { %8374 = vmatpush3.bf16.msra.mxu0 %v9214_v24  ;;  %7944 = vmatmul.mubr.bf16.gmra.mrb[36].mxu1 %v9207_v25  ;;  %v9267_v24 = vld [vmem:[%s11427_s2 + $0x58] sm:$0xff]  }
  0xf2   :  { %8375 = vmatprep.subr.bf16.mxu0 %v9224_v28  ;;  %7947 = vmatprep.mubr.bf16.mxu1 %v9209_v27  ;;  %v9268_v25 = vld [vmem:[%s11425_s6 + $0xd8] sm:$0xff]   ;;  %v9270_v27 = vld [vmem:[%s11425_s6 + $0xe0] sm:$0xff]  }
  0xf4   :  { %8312 = vmatmul.mubr.bf16.gmra.mrb[4].mxu0 %v9208_v26  ;;  %v9269_v26 = vld [vmem:[%s11427_s2 + $0x60] sm:$0xff]  }
  0xf5   :  { %8315 = vmatprep.mubr.bf16.mxu0 %v9210_v29  ;;  %8376 = vmatpush3.bf16.msra.mxu0 %v9224_v28  ;;  %v9271_v28 = vld [vmem:[%s11427_s2 + $0x68] sm:$0xff]  }
  0xf6   :  { %8377 = vmatprep.subr.bf16.mxu0 %v9234_v30  ;;  %v9273_v29 = vld [vmem:[%s11425_s6 + $0xe8] sm:$0xff]  }
  0xf9   :  { %8378 = vmatpush3.bf16.msra.mxu0 %v9234_v30  ;;  %7948 = vmatmul.mubr.bf16.gmra.mrb[40].mxu1 %v9211_v31  ;;  %v9275_v30 = vld [vmem:[%s11427_s2 + $0x70] sm:$0xff]  }
  0xfa   :  { %8379 = vmatprep.subr.bf16.mxu0 %v9244_v32  ;;  %7951 = vmatprep.mubr.bf16.mxu1 %v9215_v34  ;;  %v9276_v31 = vld [vmem:[%s11425_s6 + $0xf0] sm:$0xff]   ;;  %v9279_v34 = vld [vmem:[%s11427_s2 + $0x80] sm:$0xff]  }
  0xfc   :  { %8316 = vmatmul.mubr.bf16.gmra.mrb[8].mxu0 %v9213_v33  ;;  %v9278_v33 = vld [vmem:[%s11425_s6 + $0xf8] sm:$0xff]  }
  0xfd   :  { %8319 = vmatprep.mubr.bf16.mxu0 %v9216_v35  ;;  %8380 = vmatpush3.bf16.msra.mxu0 %v9244_v32  ;;  %v9277_v32 = vld [vmem:[%s11427_s2 + $0x78] sm:$0xff]   ;;  %v9280_v35 = vld [vmem:[%s11449_s9] sm:$0xff]  }
  0xfe   :  { %8381 = vmatprep.subr.bf16.mxu0 %v9254_v36 }
 0x101   :  { %8382 = vmatpush3.bf16.msra.mxu0 %v9254_v36  ;;  %7952 = vmatmul.mubr.bf16.gmra.mrb[44].mxu1 %v9217_v37  ;;  %v9281_v36 = vld [vmem:[%s11427_s2 + $0x88] sm:$0xff]  }
 0x102   :  { %8383 = vmatprep.subr.bf16.mxu0 %v9264_v38  ;;  %7955 = vmatprep.mubr.bf16.mxu1 %v9219_v40  ;;  %v9283_v37 = vld [vmem:[%s11449_s9 + $0x8] sm:$0xff]  }
 0x103   :  { %v9294_v40 = vld [vmem:[%s11430_s17 + $0x8] sm:$0xff]  }
 0x104   :  { %8320 = vmatmul.mubr.bf16.gmra.mrb[12].mxu0 %v9218_v39  ;;  %v9286_v39 = vld [vmem:[%s11449_s9 + $0x10] sm:$0xff]  }
 0x105   :  { %8323 = vmatprep.mubr.bf16.mxu0 %v9220_v41  ;;  %8384 = vmatpush3.bf16.msra.mxu0 %v9264_v38  ;;  %v9285_v38 = vld [vmem:[%s11427_s2 + $0x90] sm:$0xff]   ;;  %v9287_v41 = vld [vmem:[%s11427_s2 + $0x98] sm:$0xff]  }
 0x106   :  { %8385 = vmatprep.subr.bf16.mxu0 %v9274_v42 }
 0x109   :  { %8386 = vmatpush3.bf16.msra.mxu0 %v9274_v42  ;;  %7956 = vmatmul.mubr.bf16.gmra.mrb[48].mxu1 %v9221_v43  ;;  %v9304_v42 = vld [vmem:[%s11430_s17 + $0x10] sm:$0xff]   ;;  %v9288_v43 = vld [vmem:[%s11449_s9 + $0x18] sm:$0xff]  }
 0x10a   :  { %8451 = vmatprep.subr.bf16.mxu0 %v10314_v44  ;;  %7959 = vmatprep.mubr.bf16.mxu1 %v9225_v46  ;;  %v9314_v46 = vld [vmem:[%s11430_s17 + $0x18] sm:$0xff]  }
 0x10c   :  { %8324 = vmatmul.mubr.bf16.gmra.mrb[16].mxu0 %v9223_v45  ;;  %v9289_v45 = vld [vmem:[%s11427_s2 + $0xa0] sm:$0xff]  }
 0x10d   :  { %8327 = vmatprep.mubr.bf16.mxu0 %v9226_v47  ;;  %v9291_v47 = vld [vmem:[%s11427_s2 + $0xa8] sm:$0xff]  }
 0x111   :  { %7960 = vmatmul.mubr.bf16.gmra.mrb[52].mxu1 %v9227_v48  ;;  %v9323_v48 = vld [vmem:[%s11430_s17 + $0x20] sm:$0xff]  }
 0x112   :  { %7963 = vmatprep.mubr.bf16.mxu1 %v9229_v50  ;;  %v9295_v50 = vld [vmem:[%s11427_s2 + $0xb0] sm:$0xff]  }
 0x114   :  { %8328 = vmatmul.mubr.bf16.gmra.mrb[20].mxu0 %v9228_v49  ;;  %v9293_v49 = vld [vmem:[%s11449_s9 + $0x28] sm:$0xff]  }
 0x115   :  { %8331 = vmatprep.mubr.bf16.mxu0 %v9230_v51  ;;  %v9296_v51 = vld [vmem:[%s11449_s9 + $0x30] sm:$0xff]  }
 0x119   :  { %7964 = vmatmul.mubr.bf16.gmra.mrb[56].mxu1 %v9231_v52  ;;  %v9332_v52 = vld [vmem:[%s11430_s17 + $0x28] sm:$0xff]  }
 0x11a   :  { %7967 = vmatprep.mubr.bf16.mxu1 %v9235_v54  ;;  %v9297_v54 = vld [vmem:[%s11427_s2 + $0xb8] sm:$0xff]  }
 0x11c   :  { %8332 = vmatmul.mubr.bf16.gmra.mrb[24].mxu0 %v9233_v53  ;;  %v9341_v53 = vld [vmem:[%s11430_s17 + $0x30] sm:$0xff]  }
 0x11d   :  { %8335 = vmatprep.mubr.bf16.mxu0 %v9236_v55  ;;  %v9298_v55 = vld [vmem:[%s11449_s9 + $0x38] sm:$0xff]  }
 0x121   :  { %7968 = vmatmul.mubr.bf16.gmra.mrb[60].mxu1 %v9237_v56  ;;  %v9299_v56 = vld [vmem:[%s11427_s2 + $0xc0] sm:$0xff]  }
 0x122   :  { %7987 = vmatprep.mubr.bf16.mxu1 %v9239_v58  ;;  %v9350_v58 = vld [vmem:[%s11430_s17 + $0x38] sm:$0xff]  }
 0x124   :  { %8336 = vmatmul.mubr.bf16.gmra.mrb[28].mxu0 %v9238_v57  ;;  %v9300_v57 = vld [vmem:[%s11449_s9 + $0x40] sm:$0xff]  }
 0x125   :  { %8339 = vmatprep.mubr.bf16.mxu0 %v9240_v59  ;;  %v9301_v59 = vld [vmem:[%s11427_s2 + $0xc8] sm:$0xff]  }
 0x129   :  { %7988 = vmatmul.mubr.bf16.vlgmr.msra.gmra.mrb[0].mxu1 %v9241_v60  ;;  %v9303_v60 = vld [vmem:[%s11449_s9 + $0x48] sm:$0xff]  }
 0x12a   :  { %8052 = vmatpush3.bf16.msra.mxu1 %v10190_v4  ;;  %7991 = vmatprep.mubr.bf16.mxu1 %v9245_v62  ;;  %v9250_v4 = vld [vmem:[%s11425_s6 + $0xa0] sm:$0xff]   ;;  %v9306_v62 = vld [vmem:[%s11449_s9 + $0x50] sm:$0xff]  }
 0x12b   :  { %8053 = vmatprep.subr.bf16.mxu1 %v9252_v0 }
 0x12c   :  { %8340 = vmatmul.mubr.bf16.gmra.mrb[32].mxu0 %v9243_v61  ;;  %v9305_v61 = vld [vmem:[%s11427_s2 + $0xd0] sm:$0xff]  }
 0x12d   :  { %8343 = vmatprep.mubr.bf16.mxu0 %v9246_v63  ;;  %v9307_v63 = vld [vmem:[%s11427_s2 + $0xd8] sm:$0xff]  }
 0x12e   :  { %8054 = vmatpush3.bf16.msra.mxu1 %v9252_v0  ;;  %v9308_v0 = vld [vmem:[%s11449_s9 + $0x58] sm:$0xff]  }
 0x12f   :  { %8055 = vmatprep.subr.bf16.mxu1 %v9262_v2 }
 0x131   :  { %7992 = vmatmul.mubr.bf16.gmra.mrb[4].mxu1 %v9247_v1  ;;  %v9309_v1 = vld [vmem:[%s11427_s2 + $0xe0] sm:$0xff]  }
 0x132   :  { %7995 = vmatprep.mubr.bf16.mxu1 %v9249_v5  ;;  %8056 = vmatpush3.bf16.msra.mxu1 %v9262_v2  ;;  %v9310_v2 = vld [vmem:[%s11449_s9 + $0x60] sm:$0xff]   ;;  %v9313_v5 = vld [vmem:[%s11449_s9 + $0x68] sm:$0xff]  }
 0x133   :  { %8057 = vmatprep.subr.bf16.mxu1 %v9272_v6 }
 0x134   :  { %8344 = vmatmul.mubr.bf16.gmra.mrb[36].mxu0 %v9248_v3  ;;  %v9311_v3 = vld [vmem:[%s11427_s2 + $0xe8] sm:$0xff]  }
 0x135   :  { %8347 = vmatprep.mubr.bf16.mxu0 %v9250_v4  ;;  %v9315_v4 = vld [vmem:[%s11427_s2 + $0xf0] sm:$0xff]  }
 0x136   :  { %8058 = vmatpush3.bf16.msra.mxu1 %v9272_v6  ;;  %v9316_v6 = vld [vmem:[%s11449_s9 + $0x70] sm:$0xff]  }
 0x137   :  { %8059 = vmatprep.subr.bf16.mxu1 %v9282_v8 }
 0x139   :  { %7996 = vmatmul.mubr.bf16.gmra.mrb[8].mxu1 %v9251_v7  ;;  %v9317_v7 = vld [vmem:[%s11427_s2 + $0xf8] sm:$0xff]  }
 0x13a   :  { %7999 = vmatprep.mubr.bf16.mxu1 %v9255_v10  ;;  %8060 = vmatpush3.bf16.msra.mxu1 %v9282_v8  ;;  %v9318_v8 = vld [vmem:[%s11449_s9 + $0x78] sm:$0xff]   ;;  %v9320_v10 = vld [vmem:[%s11449_s9 + $0x80] sm:$0xff]  }
 0x13b   :  { %8061 = vmatprep.subr.bf16.mxu1 %v9292_v12 }
 0x13c   :  { %8348 = vmatmul.mubr.bf16.gmra.mrb[40].mxu0 %v9253_v9  ;;  %v9319_v9 = vld [vmem:[%s11431_s3] sm:$0xff]  }
 0x13d   :  { %8351 = vmatprep.mubr.bf16.mxu0 %v9256_v11  ;;  %v9321_v11 = vld [vmem:[%s11431_s3 + $0x8] sm:$0xff]  }
 0x13e   :  { %8062 = vmatpush3.bf16.msra.mxu1 %v9292_v12  ;;  %v9322_v12 = vld [vmem:[%s11449_s9 + $0x88] sm:$0xff]  }
 0x13f   :  { %8063 = vmatprep.subr.bf16.mxu1 %v9302_v14 }
 0x141   :  { %8000 = vmatmul.mubr.bf16.gmra.mrb[12].mxu1 %v9257_v13  ;;  %v9324_v13 = vld [vmem:[%s11431_s3 + $0x10] sm:$0xff]  }
 0x142   :  { %8003 = vmatprep.mubr.bf16.mxu1 %v9259_v16  ;;  %8064 = vmatpush3.bf16.msra.mxu1 %v9302_v14  ;;  %v9325_v14 = vld [vmem:[%s11449_s9 + $0x90] sm:$0xff]   ;;  %v9326_v16 = vld [vmem:[%s11431_s3 + $0x18] sm:$0xff]  }
 0x143   :  { %8065 = vmatprep.subr.bf16.mxu1 %v9312_v18 }
 0x144   :  { %8352 = vmatmul.mubr.bf16.gmra.mrb[44].mxu0 %v9258_v15  ;;  %v9676_v15 = vld [vmem:[%s11446_s7 + $0x8] sm:$0xff]  }
 0x145   :  { %8355 = vmatprep.mubr.bf16.mxu0 %v9260_v17  ;;  %v9327_v17 = vld [vmem:[%s11449_s9 + $0x98] sm:$0xff]  }
 0x146   :  { %8066 = vmatpush3.bf16.msra.mxu1 %v9312_v18  ;;  %v9328_v18 = vld [vmem:[%s11431_s3 + $0x20] sm:$0xff]  }
 0x147   :  { %8531 = vmatprep.subr.bf16.mxu1 %v10447_v23 }
 0x149   :  { %8004 = vmatmul.mubr.bf16.gmra.mrb[16].mxu1 %v9261_v19  ;;  %v9329_v19 = vld [vmem:[%s11449_s9 + $0xa0] sm:$0xff]  }
 0x14a   :  { %8007 = vmatprep.mubr.bf16.mxu1 %v9265_v21  ;;  %v9678_v21 = vld [vmem:[%s11446_s7 + $0x18] sm:$0xff]  }
 0x14c   :  { %8356 = vmatmul.mubr.bf16.gmra.mrb[48].mxu0 %v9263_v20  ;;  %v9677_v20 = vld [vmem:[%s11446_s7 + $0x10] sm:$0xff]  }
 0x14d   :  { %8359 = vmatprep.mubr.bf16.mxu0 %v9266_v22  ;;  %v9330_v22 = vld [vmem:[%s11431_s3 + $0x28] sm:$0xff]  }
 0x151   :  { %8008 = vmatmul.mubr.bf16.gmra.mrb[20].mxu1 %v9267_v24  ;;  %v9333_v24 = vld [vmem:[%s11431_s3 + $0x30] sm:$0xff]  }
 0x152   :  { %8011 = vmatprep.mubr.bf16.mxu1 %v9269_v26  ;;  %v9679_v26 = vld [vmem:[%s11446_s7 + $0x20] sm:$0xff]  }
 0x154   :  { %8360 = vmatmul.mubr.bf16.gmra.mrb[52].mxu0 %v9268_v25  ;;  %v9334_v25 = vld [vmem:[%s11449_s9 + $0xb0] sm:$0xff]  }
 0x155   :  { %8363 = vmatprep.mubr.bf16.mxu0 %v9270_v27  ;;  %v9680_v27 = vld [vmem:[%s11446_s7 + $0x28] sm:$0xff]  }
 0x159   :  { %8012 = vmatmul.mubr.bf16.gmra.mrb[24].mxu1 %v9271_v28  ;;  %v9335_v28 = vld [vmem:[%s11431_s3 + $0x38] sm:$0xff]  }
 0x15a   :  { %8015 = vmatprep.mubr.bf16.mxu1 %v9275_v30  ;;  %v9337_v30 = vld [vmem:[%s11431_s3 + $0x40] sm:$0xff]  }
 0x15c   :  { %8364 = vmatmul.mubr.bf16.gmra.mrb[56].mxu0 %v9273_v29  ;;  %v9336_v29 = vld [vmem:[%s11449_s9 + $0xb8] sm:$0xff]  }
 0x15d   :  { %8367 = vmatprep.mubr.bf16.mxu0 %v9276_v31  ;;  %v9338_v31 = vld [vmem:[%s11449_s9 + $0xc0] sm:$0xff]  }
 0x161   :  { %8016 = vmatmul.mubr.bf16.gmra.mrb[28].mxu1 %v9277_v32  ;;  %v9681_v32 = vld [vmem:[%s11446_s7 + $0x30] sm:$0xff]  }
 0x162   :  { %8019 = vmatprep.mubr.bf16.mxu1 %v9279_v34  ;;  %v9339_v34 = vld [vmem:[%s11431_s3 + $0x48] sm:$0xff]  }
 0x164   :  { %8368 = vmatmul.mubr.bf16.gmra.mrb[60].mxu0 %v9278_v33  ;;  %v9682_v33 = vld [vmem:[%s11446_s7 + $0x38] sm:$0xff]  }
 0x165   :  { %8387 = vmatprep.mubr.bf16.mxu0 %v9280_v35  ;;  %v9340_v35 = vld [vmem:[%s11449_s9 + $0xc8] sm:$0xff]  }
 0x169   :  { %8020 = vmatmul.mubr.bf16.gmra.mrb[32].mxu1 %v9281_v36  ;;  %v9342_v36 = vld [vmem:[%s11431_s3 + $0x50] sm:$0xff]  }
 0x16a   :  { %8023 = vmatprep.mubr.bf16.mxu1 %v9285_v38  ;;  %v9344_v38 = vld [vmem:[%s11431_s3 + $0x58] sm:$0xff]  }
 0x16c   :  { %8388 = vmatmul.mubr.bf16.vlgmr.msra.gmra.mrb[0].mxu0 %v9283_v37  ;;  %v9343_v37 = vld [vmem:[%s11449_s9 + $0xd0] sm:$0xff]  }
 0x16d   :  { %8452 = vmatpush3.bf16.msra.mxu0 %v10314_v44  ;;  %8391 = vmatprep.mubr.bf16.mxu0 %v9286_v39  ;;  %v9290_v44 = vld [vmem:[%s11449_s9 + $0x20] sm:$0xff]   ;;  %v9345_v39 = vld [vmem:[%s11449_s9 + $0xd8] sm:$0xff]  }
 0x16e   :  { %8453 = vmatprep.subr.bf16.mxu0 %v9294_v40 }
 0x171   :  { %8454 = vmatpush3.bf16.msra.mxu0 %v9294_v40  ;;  %8024 = vmatmul.mubr.bf16.gmra.mrb[36].mxu1 %v9287_v41  ;;  %v9346_v40 = vld [vmem:[%s11431_s3 + $0x60] sm:$0xff]  }
 0x172   :  { %8455 = vmatprep.subr.bf16.mxu0 %v9304_v42  ;;  %8027 = vmatprep.mubr.bf16.mxu1 %v9289_v45  ;;  %v9347_v41 = vld [vmem:[%s11449_s9 + $0xe0] sm:$0xff]   ;;  %v9351_v45 = vld [vmem:[%s11431_s3 + $0x70] sm:$0xff]  }
 0x174   :  { %8392 = vmatmul.mubr.bf16.gmra.mrb[4].mxu0 %v9288_v43  ;;  %v9349_v43 = vld [vmem:[%s11449_s9 + $0xe8] sm:$0xff]  }
 0x175   :  { %8395 = vmatprep.mubr.bf16.mxu0 %v9290_v44  ;;  %8456 = vmatpush3.bf16.msra.mxu0 %v9304_v42  ;;  %v9348_v42 = vld [vmem:[%s11431_s3 + $0x68] sm:$0xff]   ;;  %v9352_v44 = vld [vmem:[%s11449_s9 + $0xf0] sm:$0xff]  }
 0x176   :  { %8457 = vmatprep.subr.bf16.mxu0 %v9314_v46 }
 0x179   :  { %8458 = vmatpush3.bf16.msra.mxu0 %v9314_v46  ;;  %8028 = vmatmul.mubr.bf16.gmra.mrb[40].mxu1 %v9291_v47  ;;  %v9353_v46 = vld [vmem:[%s11431_s3 + $0x78] sm:$0xff]  }
 0x17a   :  { %8459 = vmatprep.subr.bf16.mxu0 %v9323_v48  ;;  %8031 = vmatprep.mubr.bf16.mxu1 %v9295_v50  ;;  %v9354_v47 = vld [vmem:[%s11449_s9 + $0xf8] sm:$0xff]   ;;  %v9357_v50 = vld [vmem:[%s11431_s3 + $0x88] sm:$0xff]  }
 0x17c   :  { %8396 = vmatmul.mubr.bf16.gmra.mrb[8].mxu0 %v9293_v49  ;;  %v9356_v49 = vld [vmem:[%s11432_s8] sm:$0xff]  }
 0x17d   :  { %8399 = vmatprep.mubr.bf16.mxu0 %v9296_v51  ;;  %8460 = vmatpush3.bf16.msra.mxu0 %v9323_v48  ;;  %v9355_v48 = vld [vmem:[%s11431_s3 + $0x80] sm:$0xff]   ;;  %v9358_v51 = vld [vmem:[%s11432_s8 + $0x8] sm:$0xff]  }
 0x17e   :  { %8461 = vmatprep.subr.bf16.mxu0 %v9332_v52 }
 0x181   :  { %8462 = vmatpush3.bf16.msra.mxu0 %v9332_v52  ;;  %8032 = vmatmul.mubr.bf16.gmra.mrb[44].mxu1 %v9297_v54  ;;  %v9359_v52 = vld [vmem:[%s11431_s3 + $0x90] sm:$0xff]   ;;  %v9361_v54 = vld [vmem:[%s11431_s3 + $0x98] sm:$0xff]  }
 0x182   :  { %8463 = vmatprep.subr.bf16.mxu0 %v9341_v53  ;;  %8035 = vmatprep.mubr.bf16.mxu1 %v9299_v56  ;;  %v9363_v56 = vld [vmem:[%s11431_s3 + $0xa0] sm:$0xff]  }
 0x184   :  { %8400 = vmatmul.mubr.bf16.gmra.mrb[12].mxu0 %v9298_v55  ;;  %v9362_v55 = vld [vmem:[%s11432_s8 + $0x18] sm:$0xff]  }
 0x185   :  { %8403 = vmatprep.mubr.bf16.mxu0 %v9300_v57  ;;  %8464 = vmatpush3.bf16.msra.mxu0 %v9341_v53  ;;  %v9360_v53 = vld [vmem:[%s11432_s8 + $0x10] sm:$0xff]   ;;  %v9364_v57 = vld [vmem:[%s11432_s8 + $0x20] sm:$0xff]  }
 0x186   :  { %8465 = vmatprep.subr.bf16.mxu0 %v9350_v58 }
 0x189   :  { %8466 = vmatpush3.bf16.msra.mxu0 %v9350_v58  ;;  %8036 = vmatmul.mubr.bf16.gmra.mrb[48].mxu1 %v9301_v59  ;;  %v9365_v58 = vld [vmem:[%s11431_s3 + $0xa8] sm:$0xff]  }
 0x18a   :  { %8039 = vmatprep.mubr.bf16.mxu1 %v9305_v61  ;;  %v9366_v59 = vld [vmem:[%s11432_s8 + $0x28] sm:$0xff]   ;;  %v9368_v61 = vld [vmem:[%s11432_s8 + $0x30] sm:$0xff]  }
 0x18c   :  { %8404 = vmatmul.mubr.bf16.gmra.mrb[16].mxu0 %v9303_v60  ;;  %v9367_v60 = vld [vmem:[%s11431_s3 + $0xb0] sm:$0xff]  }
 0x18d   :  { %8407 = vmatprep.mubr.bf16.mxu0 %v9306_v62  ;;  %v9369_v62 = vld [vmem:[%s11431_s3 + $0xb8] sm:$0xff]  }
 0x191   :  { %8040 = vmatmul.mubr.bf16.gmra.mrb[52].mxu1 %v9307_v63  ;;  %v9370_v63 = vld [vmem:[%s11432_s8 + $0x38] sm:$0xff]  }
 0x192   :  { %8043 = vmatprep.mubr.bf16.mxu1 %v9309_v1  ;;  %v9372_v1 = vld [vmem:[%s11432_s8 + $0x40] sm:$0xff]  }
 0x194   :  { %8408 = vmatmul.mubr.bf16.gmra.mrb[20].mxu0 %v9308_v0  ;;  %v9371_v0 = vld [vmem:[%s11431_s3 + $0xc0] sm:$0xff]  }
 0x195   :  { %8411 = vmatprep.mubr.bf16.mxu0 %v9310_v2  ;;  %v9373_v2 = vld [vmem:[%s11431_s3 + $0xc8] sm:$0xff]  }
 0x199   :  { %8044 = vmatmul.mubr.bf16.gmra.mrb[56].mxu1 %v9311_v3  ;;  %v9374_v3 = vld [vmem:[%s11432_s8 + $0x48] sm:$0xff]  }
 0x19a   :  { %8047 = vmatprep.mubr.bf16.mxu1 %v9315_v4  ;;  %v9376_v4 = vld [vmem:[%s11432_s8 + $0x50] sm:$0xff]  }
 0x19c   :  { %8412 = vmatmul.mubr.bf16.gmra.mrb[24].mxu0 %v9313_v5  ;;  %v9375_v5 = vld [vmem:[%s11431_s3 + $0xd0] sm:$0xff]  }
 0x19d   :  { %8415 = vmatprep.mubr.bf16.mxu0 %v9316_v6  ;;  %v9377_v6 = vld [vmem:[%s11431_s3 + $0xd8] sm:$0xff]  }
 0x1a1   :  { %8048 = vmatmul.mubr.bf16.gmra.mrb[60].mxu1 %v9317_v7  ;;  %v9378_v7 = vld [vmem:[%s11432_s8 + $0x58] sm:$0xff]  }
 0x1a2   :  { %8067 = vmatprep.mubr.bf16.mxu1 %v9319_v9  ;;  %v9380_v9 = vld [vmem:[%s11432_s8 + $0x60] sm:$0xff]  }
 0x1a4   :  { %8416 = vmatmul.mubr.bf16.gmra.mrb[28].mxu0 %v9318_v8  ;;  %v9379_v8 = vld [vmem:[%s11431_s3 + $0xe0] sm:$0xff]  }
 0x1a5   :  { %8419 = vmatprep.mubr.bf16.mxu0 %v9320_v10  ;;  %v9381_v10 = vld [vmem:[%s11431_s3 + $0xe8] sm:$0xff]  }
 0x1a9   :  { %8068 = vmatmul.mubr.bf16.vlgmr.msra.gmra.mrb[0].mxu1 %v9321_v11  ;;  %v9382_v11 = vld [vmem:[%s11432_s8 + $0x68] sm:$0xff]  }
 0x1aa   :  { %8539 = vmatpush3.bf16.msra.mxu1 %v10447_v23  ;;  %8071 = vmatprep.mubr.bf16.mxu1 %v9324_v13  ;;  %v9331_v23 = vld [vmem:[%s11449_s9 + $0xa8] sm:$0xff]   ;;  %v9384_v13 = vld [vmem:[%s11432_s8 + $0x70] sm:$0xff]  }
 0x1ab   :  { %8532 = vmatprep.subr.bf16.mxu1 %v9676_v15 }
 0x1ac   :  { %8420 = vmatmul.mubr.bf16.gmra.mrb[32].mxu0 %v9322_v12  ;;  %v9383_v12 = vld [vmem:[%s11431_s3 + $0xf0] sm:$0xff]  }
 0x1ad   :  { %8423 = vmatprep.mubr.bf16.mxu0 %v9325_v14  ;;  %v9385_v14 = vld [vmem:[%s11431_s3 + $0xf8] sm:$0xff]  }
 0x1ae   :  { %8540 = vmatpush3.bf16.msra.mxu1 %v9676_v15  ;;  %v9386_v15 = vld [vmem:[%s11432_s8 + $0x78] sm:$0xff]  }
 0x1af   :  { %8533 = vmatprep.subr.bf16.mxu1 %v9677_v20 }
 0x1b1   :  { %8072 = vmatmul.mubr.bf16.gmra.mrb[4].mxu1 %v9326_v16  ;;  %v9387_v16 = vld [vmem:[%s11448_s30 + $0x80] sm:$0xff]  }
 0x1b2   :  { %8075 = vmatprep.mubr.bf16.mxu1 %v9328_v18  ;;  %8541 = vmatpush3.bf16.msra.mxu1 %v9677_v20  ;;  %v9389_v18 = vld [vmem:[%s11448_s30 + $0x88] sm:$0xff]   ;;  %v9391_v20 = vld [vmem:[%s11448_s30 + $0x90] sm:$0xff]  }
 0x1b3   :  { %8534 = vmatprep.subr.bf16.mxu1 %v9678_v21 }
 0x1b4   :  { %8424 = vmatmul.mubr.bf16.gmra.mrb[36].mxu0 %v9327_v17  ;;  %v9388_v17 = vld [vmem:[%s11432_s8 + $0x80] sm:$0xff]  }
 0x1b5   :  { %8427 = vmatprep.mubr.bf16.mxu0 %v9329_v19  ;;  %v9390_v19 = vld [vmem:[%s11432_s8 + $0x88] sm:$0xff]  }
 0x1b6   :  { %8542 = vmatpush3.bf16.msra.mxu1 %v9678_v21  ;;  %v9392_v21 = vld [vmem:[%s11432_s8 + $0x90] sm:$0xff]  }
 0x1b7   :  { %8535 = vmatprep.subr.bf16.mxu1 %v9679_v26 }
 0x1b9   :  { %8076 = vmatmul.mubr.bf16.gmra.mrb[8].mxu1 %v9330_v22  ;;  %v9393_v22 = vld [vmem:[%s11448_s30 + $0x98] sm:$0xff]  }
 0x1ba   :  { %8079 = vmatprep.mubr.bf16.mxu1 %v9333_v24  ;;  %8543 = vmatpush3.bf16.msra.mxu1 %v9679_v26  ;;  %v9395_v24 = vld [vmem:[%s11448_s30 + $0xa0] sm:$0xff]   ;;  %v9397_v26 = vld [vmem:[%s11448_s30 + $0xa8] sm:$0xff]  }
 0x1bb   :  { %8536 = vmatprep.subr.bf16.mxu1 %v9680_v27 }
 0x1bc   :  { %8428 = vmatmul.mubr.bf16.gmra.mrb[40].mxu0 %v9331_v23  ;;  %v9394_v23 = vld [vmem:[%s11432_s8 + $0x98] sm:$0xff]  }
 0x1bd   :  { %8431 = vmatprep.mubr.bf16.mxu0 %v9334_v25  ;;  %v9396_v25 = vld [vmem:[%s11432_s8 + $0xa0] sm:$0xff]  }
 0x1be   :  { %8544 = vmatpush3.bf16.msra.mxu1 %v9680_v27  ;;  %v9398_v27 = vld [vmem:[%s11432_s8 + $0xa8] sm:$0xff]  }
 0x1bf   :  { %8537 = vmatprep.subr.bf16.mxu1 %v9681_v32 }
 0x1c1   :  { %8080 = vmatmul.mubr.bf16.gmra.mrb[12].mxu1 %v9335_v28  ;;  %v9399_v28 = vld [vmem:[%s11448_s30 + $0xb0] sm:$0xff]  }
 0x1c2   :  { %8083 = vmatprep.mubr.bf16.mxu1 %v9337_v30  ;;  %8545 = vmatpush3.bf16.msra.mxu1 %v9681_v32  ;;  %v9401_v30 = vld [vmem:[%s11448_s30 + $0xb8] sm:$0xff]   ;;  %v9403_v32 = vld [vmem:[%s11448_s30 + $0xc0] sm:$0xff]  }
 0x1c3   :  { %8538 = vmatprep.subr.bf16.mxu1 %v9682_v33 }
 0x1c4   :  { %8432 = vmatmul.mubr.bf16.gmra.mrb[44].mxu0 %v9336_v29  ;;  %v9400_v29 = vld [vmem:[%s11432_s8 + $0xb0] sm:$0xff]  }
 0x1c5   :  { %8435 = vmatprep.mubr.bf16.mxu0 %v9338_v31  ;;  %v9402_v31 = vld [vmem:[%s11432_s8 + $0xb8] sm:$0xff]  }
 0x1c6   :  { %8546 = vmatpush3.bf16.msra.mxu1 %v9682_v33  ;;  %v9404_v33 = vld [vmem:[%s11432_s8 + $0xc0] sm:$0xff]  }
 0x1c9   :  { %8084 = vmatmul.mubr.bf16.gmra.mrb[16].mxu1 %v9339_v34  ;;  %v9405_v34 = vld [vmem:[%s11448_s30 + $0xc8] sm:$0xff]  }
 0x1ca   :  { %8087 = vmatprep.mubr.bf16.mxu1 %v9342_v36  ;;  %v9407_v36 = vld [vmem:[%s11448_s30 + $0xd0] sm:$0xff]  }
 0x1cc   :  { %8436 = vmatmul.mubr.bf16.gmra.mrb[48].mxu0 %v9340_v35  ;;  %v9406_v35 = vld [vmem:[%s11432_s8 + $0xc8] sm:$0xff]  }
 0x1cd   :  { %8439 = vmatprep.mubr.bf16.mxu0 %v9343_v37  ;;  %v9408_v37 = vld [vmem:[%s11432_s8 + $0xd0] sm:$0xff]  }
 0x1d1   :  { %8088 = vmatmul.mubr.bf16.gmra.mrb[20].mxu1 %v9344_v38  ;;  %v9409_v38 = vld [vmem:[%s11448_s30 + $0xd8] sm:$0xff]  }
 0x1d2   :  { %8091 = vmatprep.mubr.bf16.mxu1 %v9346_v40  ;;  %v9411_v40 = vld [vmem:[%s11448_s30 + $0xe0] sm:$0xff]  }
 0x1d4   :  { %8440 = vmatmul.mubr.bf16.gmra.mrb[52].mxu0 %v9345_v39  ;;  %v9410_v39 = vld [vmem:[%s11432_s8 + $0xd8] sm:$0xff]  }
 0x1d5   :  { %8443 = vmatprep.mubr.bf16.mxu0 %v9347_v41  ;;  %v9412_v41 = vld [vmem:[%s11432_s8 + $0xe0] sm:$0xff]  }
 0x1d9   :  { %8092 = vmatmul.mubr.bf16.gmra.mrb[24].mxu1 %v9348_v42  ;;  %v9413_v42 = vld [vmem:[%s11448_s30 + $0xe8] sm:$0xff]  }
 0x1da   :  { %8095 = vmatprep.mubr.bf16.mxu1 %v9351_v45  ;;  %v9415_v45 = vld [vmem:[%s11448_s30 + $0xf0] sm:$0xff]  }
 0x1dc   :  { %8444 = vmatmul.mubr.bf16.gmra.mrb[56].mxu0 %v9349_v43  ;;  %v9414_v43 = vld [vmem:[%s11432_s8 + $0xe8] sm:$0xff]  }
 0x1dd   :  { %8447 = vmatprep.mubr.bf16.mxu0 %v9352_v44  ;;  %v9416_v44 = vld [vmem:[%s11432_s8 + $0xf0] sm:$0xff]  }
 0x1e1   :  { %8096 = vmatmul.mubr.bf16.gmra.mrb[28].mxu1 %v9353_v46  ;;  %v9417_v46 = vld [vmem:[%s11448_s30 + $0xf8] sm:$0xff]  }
 0x1e2   :  { %8099 = vmatprep.mubr.bf16.mxu1 %v9355_v48 }
 0x1e4   :  { %8448 = vmatmul.mubr.bf16.gmra.mrb[60].mxu0 %v9354_v47  ;;  %v9418_v47 = vld [vmem:[%s11432_s8 + $0xf8] sm:$0xff]  }
 0x1e5   :  { %8467 = vmatprep.mubr.bf16.mxu0 %v9356_v49 }
 0x1e9   :  { %8100 = vmatmul.mubr.bf16.gmra.mrb[32].mxu1 %v9357_v50 }
 0x1ea   :  { %8103 = vmatprep.mubr.bf16.mxu1 %v9359_v52 }
 0x1ec   :  { %8468 = vmatmul.mubr.bf16.vlgmr.msra.gmra.mrb[0].mxu0 %v9358_v51 }
 0x1ed   :  { %8471 = vmatprep.mubr.bf16.mxu0 %v9360_v53 }
 0x1f1   :  { %8104 = vmatmul.mubr.bf16.gmra.mrb[36].mxu1 %v9361_v54 }
 0x1f2   :  { %8107 = vmatprep.mubr.bf16.mxu1 %v9363_v56 }
 0x1f4   :  { %8472 = vmatmul.mubr.bf16.gmra.mrb[4].mxu0 %v9362_v55 }
 0x1f5   :  { %8475 = vmatprep.mubr.bf16.mxu0 %v9364_v57 }
 0x1f9   :  { %8108 = vmatmul.mubr.bf16.gmra.mrb[40].mxu1 %v9365_v58 }
 0x1fa   :  { %8111 = vmatprep.mubr.bf16.mxu1 %v9367_v60 }
 0x1fc   :  { %8476 = vmatmul.mubr.bf16.gmra.mrb[8].mxu0 %v9366_v59 }
 0x1fd   :  { %8479 = vmatprep.mubr.bf16.mxu0 %v9368_v61 }
 0x201   :  { %8112 = vmatmul.mubr.bf16.gmra.mrb[44].mxu1 %v9369_v62 }
 0x202   :  { %8115 = vmatprep.mubr.bf16.mxu1 %v9371_v0 }
 0x204   :  { %8480 = vmatmul.mubr.bf16.gmra.mrb[12].mxu0 %v9370_v63 }
 0x205   :  { %8483 = vmatprep.mubr.bf16.mxu0 %v9372_v1 }
 0x209   :  { %8116 = vmatmul.mubr.bf16.gmra.mrb[48].mxu1 %v9373_v2 }
 0x20a   :  { %8119 = vmatprep.mubr.bf16.mxu1 %v9375_v5 }
 0x20c   :  { %8484 = vmatmul.mubr.bf16.gmra.mrb[16].mxu0 %v9374_v3 }
 0x20d   :  { %8487 = vmatprep.mubr.bf16.mxu0 %v9376_v4 }
 0x211   :  { %8120 = vmatmul.mubr.bf16.gmra.mrb[52].mxu1 %v9377_v6 }
 0x212   :  { %8123 = vmatprep.mubr.bf16.mxu1 %v9379_v8 }
 0x214   :  { %8488 = vmatmul.mubr.bf16.gmra.mrb[20].mxu0 %v9378_v7 }
 0x215   :  { %8491 = vmatprep.mubr.bf16.mxu0 %v9380_v9 }
 0x219   :  { %8124 = vmatmul.mubr.bf16.gmra.mrb[56].mxu1 %v9381_v10 }
 0x21a   :  { %8127 = vmatprep.mubr.bf16.mxu1 %v9383_v12 }
 0x21c   :  { %8492 = vmatmul.mubr.bf16.gmra.mrb[24].mxu0 %v9382_v11 }
 0x21d   :  { %8495 = vmatprep.mubr.bf16.mxu0 %v9384_v13 }
 0x221   :  { %8128 = vmatmul.mubr.bf16.gmra.mrb[60].mxu1 %v9385_v14 }
 0x222   :  { %8179 = vmatprep.mubr.bf16.mxu1 %v9387_v16 }
 0x224   :  { %8496 = vmatmul.mubr.bf16.gmra.mrb[28].mxu0 %v9386_v15 }
 0x225   :  { %8499 = vmatprep.mubr.bf16.mxu0 %v9388_v17  ;;  %v10959_v17 = vld [vmem:[%s11433_s18] ss:$0 sm:$0xff] }
 0x229   :  { %8180 = vmatmul.mubr.bf16.vlgmr.msra.gmra.mrb[32].mxu1 %v9389_v18 }
 0x22a   :  { %8183 = vmatprep.mubr.bf16.mxu1 %v9391_v20 }
 0x22c   :  { %8500 = vmatmul.mubr.bf16.gmra.mrb[32].mxu0 %v9390_v19 }
 0x22d   :  { %8503 = vmatprep.mubr.bf16.mxu0 %v9392_v21 }
 0x231   :  { %8184 = vmatmul.mubr.bf16.gmra.mrb[36].mxu1 %v9393_v22 }
 0x232   :  { %8187 = vmatprep.mubr.bf16.mxu1 %v9395_v24 }
 0x234   :  { %8504 = vmatmul.mubr.bf16.gmra.mrb[36].mxu0 %v9394_v23 }
 0x235   :  { %8507 = vmatprep.mubr.bf16.mxu0 %v9396_v25 }
 0x239   :  { %8188 = vmatmul.mubr.bf16.gmra.mrb[40].mxu1 %v9397_v26 }
 0x23a   :  { %8191 = vmatprep.mubr.bf16.mxu1 %v9399_v28 }
 0x23c   :  { %8508 = vmatmul.mubr.bf16.gmra.mrb[40].mxu0 %v9398_v27 }
 0x23d   :  { %8511 = vmatprep.mubr.bf16.mxu0 %v9400_v29 }
 0x241   :  { %8192 = vmatmul.mubr.bf16.gmra.mrb[44].mxu1 %v9401_v30 }
 0x242   :  { %8195 = vmatprep.mubr.bf16.mxu1 %v9403_v32 }
 0x244   :  { %8512 = vmatmul.mubr.bf16.gmra.mrb[44].mxu0 %v9402_v31 }
 0x245   :  { %8515 = vmatprep.mubr.bf16.mxu0 %v9404_v33 }
 0x249   :  { %8196 = vmatmul.mubr.bf16.gmra.mrb[48].mxu1 %v9405_v34 }
 0x24a   :  { %8199 = vmatprep.mubr.bf16.mxu1 %v9407_v36 }
 0x24c   :  { %8516 = vmatmul.mubr.bf16.gmra.mrb[48].mxu0 %v9406_v35 }
 0x24d   :  { %8519 = vmatprep.mubr.bf16.mxu0 %v9408_v37 }
 0x251   :  { %8200 = vmatmul.mubr.bf16.gmra.mrb[52].mxu1 %v9409_v38 }
 0x252   :  { %8203 = vmatprep.mubr.bf16.mxu1 %v9411_v40 }
 0x254   :  { %8520 = vmatmul.mubr.bf16.gmra.mrb[52].mxu0 %v9410_v39 }
 0x255   :  { %8523 = vmatprep.mubr.bf16.mxu0 %v9412_v41 }
 0x259   :  { %8204 = vmatmul.mubr.bf16.gmra.mrb[56].mxu1 %v9413_v42 }
 0x25a   :  { %8207 = vmatprep.mubr.bf16.mxu1 %v9415_v45 }
 0x25c   :  { %8524 = vmatmul.mubr.bf16.gmra.mrb[56].mxu0 %v9414_v43 }
 0x25d   :  { %8527 = vmatprep.mubr.bf16.mxu0 %v9416_v44 }
 0x261   :  { %8208 = vmatmul.mubr.bf16.gmra.mrb[60].mxu1 %v9417_v46 }
 0x264   :  { %8528 = vmatmul.mubr.bf16.gmra.mrb[60].mxu0 %v9418_v47 }
 0x27c   :  { %v8069_v48 = vpop.f32.mrb[0].mxu1 }
 0x27d   :  { %v2308_v49 = vpop.f32.mrb[1].mxu1 }
 0x27e   :  { %v8070_v50 = vpop.f32.mrb[2].mxu1 }
 0x27f   :  { %v2311_v51 = vpop.f32.mrb[3].mxu1 }
 0x284   :  { %v8073_v52 = vpop.f32.mrb[4].mxu1 }
 0x285   :  { %v2324_v53 = vpop.f32.mrb[5].mxu1 }
 0x286   :  { %v8074_v54 = vpop.f32.mrb[6].mxu1 }
 0x287   :  { %v2327_v55 = vpop.f32.mrb[7].mxu1 }
 0x28c   :  { %v10908_v56 = vpop.f32.mrb[8].mxu1 }
 0x28d   :  { %v10910_v57 = vpop.f32.mrb[9].mxu1 }
 0x28e   :  { %v10912_v58 = vpop.f32.mrb[10].mxu1 }
 0x28f   :  { %v10914_v59 = vpop.f32.mrb[11].mxu1 }
 0x294   :  { %v10916_v60 = vpop.f32.mrb[12].mxu1 }
 0x295   :  { %v10918_v61 = vpop.f32.mrb[13].mxu1 }
 0x296   :  { %v10920_v62 = vpop.f32.mrb[14].mxu1 }
 0x297   :  { %v10922_v63 = vpop.f32.mrb[15].mxu1 }
 0x29c   :  { %v10924_v0 = vpop.f32.mrb[16].mxu1 }
 0x29d   :  { %v10926_v1 = vpop.f32.mrb[17].mxu1 }
 0x29e   :  { %v10928_v2 = vpop.f32.mrb[18].mxu1 }
 0x29f   :  { %v10930_v3 = vpop.f32.mrb[19].mxu1 }
 0x2a4   :  { %v10932_v5 = vpop.f32.mrb[20].mxu1 }
 0x2a5   :  { %v10934_v4 = vpop.f32.mrb[21].mxu1 }
 0x2a6   :  { %v10936_v6 = vpop.f32.mrb[22].mxu1 }
 0x2a7   :  { %v10938_v7 = vpop.f32.mrb[23].mxu1 }
 0x2ac   :  { %v10940_v8 = vpop.f32.mrb[24].mxu1 }
 0x2ad   :  { %v10942_v9 = vpop.f32.mrb[25].mxu1 }
 0x2ae   :  { %v10944_v10 = vpop.f32.mrb[26].mxu1 }
 0x2af   :  { %v10946_v11 = vpop.f32.mrb[27].mxu1 }
 0x2b4   :  { %v10948_v12 = vpop.f32.mrb[28].mxu1 }
 0x2b5   :  { %v10950_v13 = vpop.f32.mrb[29].mxu1 }
 0x2b6   :  { %v10952_v14 = vpop.f32.mrb[30].mxu1 }
 0x2b7   :  { %v10954_v15 = vpop.f32.mrb[31].mxu1 }
 0x2bf   :  { %v8469_v16 = vpop.f32.mrb[0].mxu0 }
 0x2c0   :  { %v8547_v18 = vadd.f32 %v8469_v16, %v8069_v48  ;;  %v5673_v19 = vpop.f32.mrb[1].mxu0 }
 0x2c1   :  { %v8548_v20 = vadd.f32 %v5673_v19, %v2308_v49  ;;  %v8470_v21 = vpop.f32.mrb[2].mxu0 }
 0x2c2   :  { %v10962_v22 = vadd.f32 %v8547_v18, %v10959_v17  ;;  %v8549_v23 = vadd.f32 %v8470_v21, %v8070_v50  ;;  %v5676_v24 = vpop.f32.mrb[3].mxu0 }
 0x2c3   :  { %v10965_v25 = vadd.f32 %v8548_v20, %v10959_v17  ;;  %v8550_v26 = vadd.f32 %v5676_v24, %v2311_v51 }
 0x2c4   :  { %v6065_v27 = vsub.f32 0.0, %v10962_v22  ;;  %v10969_v28 = vadd.f32 %v8549_v23, %v10959_v17 }
 0x2c5   :  { %v6063_v29 = vsub.f32 0.0, %v10965_v25  ;;  %v10973_v30 = vadd.f32 %v8550_v26, %v10959_v17 }
 0x2c6   :  { %v6131_v31 = vmul.f32 1.442695, %v6065_v27  ;;  %v6066_v32 = vsub.f32 0.0, %v10969_v28 }
 0x2c7   :  { %v6127_v33 = vmul.f32 1.442695, %v6063_v29  ;;  %v6064_v34 = vsub.f32 0.0, %v10973_v30  ;;  %v8473_v35 = vpop.f32.mrb[4].mxu0 }
 0x2c8   :  { %9419 = vpow2.f32 %v6131_v31  ;;  %v6133_v36 = vmul.f32 1.442695, %v6066_v32  ;;  %v8551_v37 = vadd.f32 %v8473_v35, %v8073_v52  ;;  %v5689_v38 = vpop.f32.mrb[5].mxu0 }
 0x2c9   :  { %9421 = vpow2.f32 %v6127_v33  ;;  %v6129_v39 = vmul.f32 1.442695, %v6064_v34  ;;  %v8552_v40 = vadd.f32 %v5689_v38, %v2324_v53  ;;  %v8474_v41 = vpop.f32.mrb[6].mxu0 }
 0x2ca   :  { %9423 = vpow2.f32 %v6133_v36  ;;  %v10978_v42 = vadd.f32 %v8551_v37, %v10959_v17  ;;  %v8553_v43 = vadd.f32 %v8474_v41, %v8074_v54  ;;  %v5692_v45 = vpop.f32.mrb[7].mxu0 }
 0x2cb   :  { %9425 = vpow2.f32 %v6129_v39  ;;  %v10981_v44 = vadd.f32 %v8552_v40, %v10959_v17  ;;  %v8554_v46 = vadd.f32 %v5692_v45, %v2327_v55 }
 0x2cc   :  { %v6069_v47 = vsub.f32 0.0, %v10978_v42  ;;  %v10985_v48 = vadd.f32 %v8553_v43, %v10959_v17 }
 0x2cd   :  { %v6067_v49 = vsub.f32 0.0, %v10981_v44  ;;  %v10989_v50 = vadd.f32 %v8554_v46, %v10959_v17 }
 0x2ce   :  { %v6139_v51 = vmul.f32 1.442695, %v6069_v47  ;;  %v6070_v52 = vsub.f32 0.0, %v10985_v48 }
 0x2cf   :  { %v6135_v53 = vmul.f32 1.442695, %v6067_v49  ;;  %v6068_v54 = vsub.f32 0.0, %v10989_v50  ;;  %v8477_v16 = vpop.f32.mrb[8].mxu0 }
 0x2d0   :  { %9427 = vpow2.f32 %v6139_v51  ;;  %v6141_v18 = vmul.f32 1.442695, %v6070_v52  ;;  %v8555_v55 = vadd.f32 %v8477_v16, %v10908_v56  ;;  %v5705_v19 = vpop.f32.mrb[9].mxu0 }
 0x2d1   :  { %9429 = vpow2.f32 %v6135_v53  ;;  %v6137_v20 = vmul.f32 1.442695, %v6068_v54  ;;  %v8556_v21 = vadd.f32 %v5705_v19, %v10910_v57  ;;  %v8478_v23 = vpop.f32.mrb[10].mxu0 }
 0x2d2   :  { %v9420_v24 = vpop.eup %9419  ;;  %9431 = vpow2.f32 %v6141_v18  ;;  %v10996_v26 = vadd.f32 %v8555_v55, %v10959_v17  ;;  %v8557_v27 = vadd.f32 %v8478_v23, %v10912_v58  ;;  %v5708_v29 = vpop.f32.mrb[11].mxu0 }
 0x2d3   :  { %v9422_v31 = vpop.eup %9421  ;;  %v6257_v32 = vadd.f32 1.0, %v9420_v24  ;;  %9433 = vpow2.f32 %v6137_v20  ;;  %v11000_v33 = vadd.f32 %v8556_v21, %v10959_v17  ;;  %v8558_v56 = vadd.f32 %v5708_v29, %v10914_v59 }
 0x2d4   :  { %v9424_v34 = vpop.eup %9423  ;;  %v6255_v35 = vadd.f32 1.0, %v9422_v31  ;;  %v6073_v57 = vsub.f32 0.0, %v10996_v26  ;;  %v11005_v36 = vadd.f32 %v8557_v27, %v10959_v17 }
 0x2d5   :  { %v9426_v37 = vpop.eup %9425  ;;  %9435 = vrcp.f32 %v6257_v32  ;;  %v6258_v38 = vadd.f32 1.0, %v9424_v34  ;;  %v6071_v58 = vsub.f32 0.0, %v11000_v33  ;;  %v11009_v39 = vadd.f32 %v8558_v56, %v10959_v17 }
 0x2d6   :  { %9437 = vrcp.f32 %v6255_v35  ;;  %v6256_v40 = vadd.f32 1.0, %v9426_v37  ;;  %v6147_v41 = vmul.f32 1.442695, %v6073_v57  ;;  %v6074_v59 = vsub.f32 0.0, %v11005_v36 }
 0x2d7   :  { %9439 = vrcp.f32 %v6258_v38  ;;  %v6143_v43 = vmul.f32 1.442695, %v6071_v58  ;;  %v6072_v45 = vsub.f32 0.0, %v11009_v39  ;;  %v8481_v46 = vpop.f32.mrb[12].mxu0 }
 0x2d8   :  { %9441 = vrcp.f32 %v6256_v40  ;;  %v6149_v47 = vmul.f32 1.442695, %v6074_v59  ;;  %v8559_v49 = vadd.f32 %v8481_v46, %v10916_v60  ;;  %v5721_v51 = vpop.f32.mrb[13].mxu0 }
 0x2d9   :  { %9443 = vpow2.f32 %v6147_v41  ;;  %v6145_v52 = vmul.f32 1.442695, %v6072_v45  ;;  %v8560_v53 = vadd.f32 %v5721_v51, %v10918_v61  ;;  %v8482_v54 = vpop.f32.mrb[14].mxu0 }
 0x2da   :  { %v9428_v16 = vpop.eup %9427  ;;  %9445 = vpow2.f32 %v6143_v43  ;;  %v11016_v18 = vadd.f32 %v8559_v49, %v10959_v17  ;;  %v8561_v55 = vadd.f32 %v8482_v54, %v10920_v62  ;;  %v5724_v19 = vpop.f32.mrb[15].mxu0 }
 0x2db   :  { %v9430_v20 = vpop.eup %9429  ;;  %v6261_v21 = vadd.f32 1.0, %v9428_v16  ;;  %9447 = vpow2.f32 %v6149_v47  ;;  %v11020_v23 = vadd.f32 %v8560_v53, %v10959_v17  ;;  %v8562_v60 = vadd.f32 %v5724_v19, %v10922_v63 }
 0x2dc   :  { %v9432_v24 = vpop.eup %9431  ;;  %v6259_v27 = vadd.f32 1.0, %v9430_v20  ;;  %9449 = vpow2.f32 %v6145_v52  ;;  %v6077_v61 = vsub.f32 0.0, %v11016_v18  ;;  %v11025_v29 = vadd.f32 %v8561_v55, %v10959_v17 }
 0x2dd   :  { %v9434_v31 = vpop.eup %9433  ;;  %9451 = vrcp.f32 %v6261_v21  ;;  %v6262_v62 = vadd.f32 1.0, %v9432_v24  ;;  %v6075_v32 = vsub.f32 0.0, %v11020_v23  ;;  %v11029_v56 = vadd.f32 %v8562_v60, %v10959_v17 }
 0x2de   :  { %9453 = vrcp.f32 %v6259_v27  ;;  %v6260_v34 = vadd.f32 1.0, %v9434_v31  ;;  %v6155_v35 = vmul.f32 1.442695, %v6077_v61  ;;  %v6078_v63 = vsub.f32 0.0, %v11025_v29 }
 0x2df   :  { %v9436_v57 = vpop.eup %9435  ;;  %9455 = vrcp.f32 %v6262_v62  ;;  %v6151_v37 = vmul.f32 1.442695, %v6075_v32  ;;  %v6076_v38 = vsub.f32 0.0, %v11029_v56  ;;  %v8485_v58 = vpop.f32.mrb[16].mxu0 }
 0x2e0   :  { %v9438_v40 = vpop.eup %9437  ;;  %v6385_v41 = vmul.f32 %v9436_v57, %v10962_v22  ;;  %9457 = vrcp.f32 %v6260_v34  ;;  %v6157_v59 = vmul.f32 1.442695, %v6078_v63  ;;  %v8563_v43 = vadd.f32 %v8485_v58, %v10924_v0  ;;  %v5737_v45 = vpop.f32.mrb[17].mxu0 }
 0x2e1   :  { %v9440_v46 = vpop.eup %9439  ;;  %v6383_v47 = vmul.f32 %v9438_v40, %v10965_v25  ;;  %9459 = vpow2.f32 %v6155_v35  ;;  %v6153_v49 = vmul.f32 1.442695, %v6076_v38  ;;  %v8564_v51 = vadd.f32 %v5737_v45, %v10926_v1  ;;  %v8486_v52 = vpop.f32.mrb[18].mxu0 }
 0x2e2   :  { %v9442_v53 = vpop.eup %9441  ;;  %v6386_v54 = vmul.f32 %v9440_v46, %v10969_v28  ;;  %9461 = vpow2.f32 %v6151_v37  ;;  %v11039_v16 = vadd.f32 %v8563_v43, %v10959_v17  ;;  %v8565_v22 = vadd.f32 %v8486_v52, %v10928_v2  ;;  %v5740_v55 = vpop.f32.mrb[19].mxu0 }
 0x2e3   :  { %v9444_v0 = vpop.eup %9443  ;;  %v6384_v19 = vmul.f32 %v9442_v53, %v10973_v30  ;;  %9463 = vpow2.f32 %v6157_v59  ;;  %v11044_v25 = vadd.f32 %v8564_v51, %v10959_v17  ;;  %v8566_v1 = vadd.f32 %v5740_v55, %v10930_v3 }
 0x2e4   :  { %v9446_v20 = vpop.eup %9445  ;;  %v7268_v21 = vpack.c.bf16 %v6386_v54, %v6385_v41  ;;  %v6265_v60 = vadd.f32 1.0, %v9444_v0  ;;  %9465 = vpow2.f32 %v6153_v49  ;;  %v6081_v28 = vsub.f32 0.0, %v11039_v16 }
 0x2e5   :  { %v9448_v24 = vpop.eup %9447  ;;  %v7263_v27 = vpack.c.bf16 %v6384_v19, %v6383_v47  ;;  %v6263_v61 = vadd.f32 1.0, %v9446_v20  ;;  %v6079_v2 = vsub.f32 0.0, %v11044_v25  ;;  %v11050_v31 = vadd.f32 %v8565_v22, %v10959_v17 }
 0x2e6   :  { %v9450_v30 = vpop.eup %9449  ;;  %7420 = vst [vmem:[%s11434_s19 + $0x8] sm:$0xff] %v7268_v21   ;;  %9467 = vrcp.f32 %v6265_v60  ;;  %v6266_v3 = vadd.f32 1.0, %v9448_v24  ;;  %v6163_v62 = vmul.f32 1.442695, %v6081_v28  ;;  %v11056_v32 = vadd.f32 %v8566_v1, %v10959_v17 }
 0x2e7   :  { %v9452_v34 = vpop.eup %9451  ;;  %7264 = vst [vmem:[%s11434_s19] sm:$0xff] %v7263_v27   ;;  %9469 = vrcp.f32 %v6263_v61  ;;  %v6264_v35 = vadd.f32 1.0, %v9450_v30  ;;  %v6159_v63 = vmul.f32 1.442695, %v6079_v2  ;;  %v6082_v57 = vsub.f32 0.0, %v11050_v31  ;;  %v8489_v37 = vpop.f32.mrb[20].mxu0 }
 0x2e8   :  { %v9454_v38 = vpop.eup %9453  ;;  %v6389_v58 = vmul.f32 %v9452_v34, %v10978_v42  ;;  %9471 = vrcp.f32 %v6266_v3  ;;  %v6080_v40 = vsub.f32 0.0, %v11056_v32  ;;  %v8567_v41 = vadd.f32 %v8489_v37, %v10932_v5  ;;  %v5753_v59 = vpop.f32.mrb[21].mxu0 }
 0x2e9   :  { %v9456_v43 = vpop.eup %9455  ;;  %v6387_v45 = vmul.f32 %v9454_v38, %v10981_v44  ;;  %9473 = vrcp.f32 %v6264_v35  ;;  %v6165_v46 = vmul.f32 1.442695, %v6082_v57  ;;  %v8568_v47 = vadd.f32 %v5753_v59, %v10934_v4  ;;  %v8490_v49 = vpop.f32.mrb[22].mxu0 }
 0x2ea   :  { %v9458_v51 = vpop.eup %9457  ;;  %v6390_v52 = vmul.f32 %v9456_v43, %v10985_v48  ;;  %9475 = vpow2.f32 %v6163_v62  ;;  %v6161_v53 = vmul.f32 1.442695, %v6080_v40  ;;  %v11069_v42 = vadd.f32 %v8567_v41, %v10959_v17  ;;  %v5756_v54 = vpop.f32.mrb[23].mxu0 }
 0x2eb   :  { %v9460_v22 = vpop.eup %9459  ;;  %v6388_v5 = vmul.f32 %v9458_v51, %v10989_v50  ;;  %9477 = vpow2.f32 %v6159_v63  ;;  %v11073_v44 = vadd.f32 %v8568_v47, %v10959_v17  ;;  %v8569_v55 = vadd.f32 %v8490_v49, %v10936_v6 }
 0x2ec   :  { %v9462_v4 = vpop.eup %9461  ;;  %v7278_v0 = vpack.c.bf16 %v6390_v52, %v6389_v58  ;;  %v6269_v19 = vadd.f32 1.0, %v9460_v22  ;;  %9479 = vpow2.f32 %v6165_v46  ;;  %v6085_v48 = vsub.f32 0.0, %v11069_v42 }
 0x2ed   :  { %v9464_v1 = vpop.eup %9463  ;;  %v7273_v20 = vpack.c.bf16 %v6388_v5, %v6387_v45  ;;  %v6267_v21 = vadd.f32 1.0, %v9462_v4  ;;  %9481 = vpow2.f32 %v6161_v53  ;;  %v6083_v60 = vsub.f32 0.0, %v11073_v44 }
 0x2ee   :  { %v9466_v28 = vpop.eup %9465  ;;  %7422 = vst [vmem:[%s11434_s19 + $0x18] sm:$0xff] %v7278_v0   ;;  %9483 = vrcp.f32 %v6269_v19  ;;  %v6270_v50 = vadd.f32 1.0, %v9464_v1  ;;  %v6171_v6 = vmul.f32 1.442695, %v6085_v48  ;;  %v11082_v24 = vadd.f32 %v8569_v55, %v10959_v17 }
 0x2ef   :  { %7421 = vst [vmem:[%s11434_s19 + $0x10] sm:$0xff] %v7273_v20   ;;  %9485 = vrcp.f32 %v6267_v21  ;;  %v6268_v27 = vadd.f32 1.0, %v9466_v28  ;;  %v6167_v61 = vmul.f32 1.442695, %v6083_v60  ;;  %v8570_v2 = vadd.f32 %v5756_v54, %v10938_v7  ;;  %v8493_v30 = vpop.f32.mrb[24].mxu0 }
 0x2f0   :  { %v9468_v3 = vpop.eup %9467  ;;  %9487 = vrcp.f32 %v6270_v50  ;;  %v6086_v62 = vsub.f32 0.0, %v11082_v24  ;;  %v8571_v34 = vadd.f32 %v8493_v30, %v10940_v8  ;;  %v5769_v35 = vpop.f32.mrb[25].mxu0 }
 0x2f1   :  { %v9470_v63 = vpop.eup %9469  ;;  %v6393_v57 = vmul.f32 %v9468_v3, %v10996_v26  ;;  %9489 = vrcp.f32 %v6268_v27  ;;  %v11092_v37 = vadd.f32 %v8570_v2, %v10959_v17  ;;  %v8572_v38 = vadd.f32 %v5769_v35, %v10942_v9  ;;  %v8494_v58 = vpop.f32.mrb[26].mxu0 }
 0x2f2   :  { %v9472_v40 = vpop.eup %9471  ;;  %v6391_v7 = vmul.f32 %v9470_v63, %v11000_v33  ;;  %9491 = vpow2.f32 %v6171_v6  ;;  %v6173_v41 = vmul.f32 1.442695, %v6086_v62  ;;  %v11097_v59 = vadd.f32 %v8571_v34, %v10959_v17  ;;  %v5772_v8 = vpop.f32.mrb[27].mxu0 }
 0x2f3   :  { %v9474_v43 = vpop.eup %9473  ;;  %v6394_v45 = vmul.f32 %v9472_v40, %v11005_v36  ;;  %9493 = vpow2.f32 %v6167_v61  ;;  %v6084_v26 = vsub.f32 0.0, %v11092_v37  ;;  %v11102_v46 = vadd.f32 %v8572_v38, %v10959_v17 }
 0x2f4   :  { %v9476_v9 = vpop.eup %9475  ;;  %v6392_v47 = vmul.f32 %v9474_v43, %v11009_v39  ;;  %9495 = vpow2.f32 %v6173_v41  ;;  %v6089_v33 = vsub.f32 0.0, %v11097_v59  ;;  %v8573_v49 = vadd.f32 %v8494_v58, %v10944_v10 }
 0x2f5   :  { %v9478_v51 = vpop.eup %9477  ;;  %v7288_v52 = vpack.c.bf16 %v6394_v45, %v6393_v57  ;;  %v6273_v53 = vadd.f32 1.0, %v9476_v9  ;;  %v6169_v54 = vmul.f32 1.442695, %v6084_v26  ;;  %v6087_v36 = vsub.f32 0.0, %v11102_v46 }
 0x2f6   :  { %v9480_v22 = vpop.eup %9479  ;;  %v7283_v5 = vpack.c.bf16 %v6392_v47, %v6391_v7  ;;  %v6271_v55 = vadd.f32 1.0, %v9478_v51  ;;  %v6179_v4 = vmul.f32 1.442695, %v6089_v33  ;;  %v11109_v0 = vadd.f32 %v8573_v49, %v10959_v17 }
 0x2f7   :  { %v9482_v19 = vpop.eup %9481  ;;  %7424 = vst [vmem:[%s11434_s19 + $0x28] sm:$0xff] %v7288_v52   ;;  %9497 = vrcp.f32 %v6273_v53  ;;  %v6274_v10 = vadd.f32 1.0, %v9480_v22  ;;  %v6175_v39 = vmul.f32 1.442695, %v6087_v36  ;;  %v8574_v48 = vadd.f32 %v5772_v8, %v10946_v11  ;;  %v8497_v1 = vpop.f32.mrb[28].mxu0 }
 0x2f8   :  { %v9484_v20 = vpop.eup %9483  ;;  %7423 = vst [vmem:[%s11434_s19 + $0x20] sm:$0xff] %v7283_v5   ;;  %9499 = vrcp.f32 %v6271_v55  ;;  %v6272_v21 = vadd.f32 1.0, %v9482_v19  ;;  %v6090_v60 = vsub.f32 0.0, %v11109_v0  ;;  %v8575_v28 = vadd.f32 %v8497_v1, %v10948_v12  ;;  %v5785_v50 = vpop.f32.mrb[29].mxu0 }
 0x2f9   :  { %v9486_v6 = vpop.eup %9485  ;;  %v6397_v27 = vmul.f32 %v9484_v20, %v11016_v18  ;;  %9501 = vrcp.f32 %v6274_v10  ;;  %v11122_v61 = vadd.f32 %v8574_v48, %v10959_v17  ;;  %v8576_v11 = vadd.f32 %v5785_v50, %v10950_v13  ;;  %v8498_v2 = vpop.f32.mrb[30].mxu0 }
 0x2fa   :  { %v9488_v30 = vpop.eup %9487  ;;  %v6395_v3 = vmul.f32 %v9486_v6, %v11020_v23  ;;  %9503 = vrcp.f32 %v6272_v21  ;;  %v6181_v62 = vmul.f32 1.442695, %v6090_v60  ;;  %v11127_v34 = vadd.f32 %v8575_v28, %v10959_v17  ;;  %v5788_v12 = vpop.f32.mrb[31].mxu0 }
 0x2fb   :  { %v9490_v35 = vpop.eup %9489  ;;  %v6398_v63 = vmul.f32 %v9488_v30, %v11025_v29  ;;  %9505 = vpow2.f32 %v6169_v54  ;;  %v6088_v18 = vsub.f32 0.0, %v11122_v61  ;;  %v11132_v57 = vadd.f32 %v8576_v11, %v10959_v17 }
 0x2fc   :  { %v9492_v13 = vpop.eup %9491  ;;  %v6396_v38 = vmul.f32 %v9490_v35, %v11029_v56  ;;  %9507 = vpow2.f32 %v6179_v4  ;;  %v6093_v23 = vsub.f32 0.0, %v11127_v34  ;;  %v8577_v58 = vadd.f32 %v8498_v2, %v10952_v14  ;;  %v8181_v9 = vpop.f32.mrb[32].mxu1 }
 0x2fd   :  { %v9494_v40 = vpop.eup %9493  ;;  %v7298_v7 = vpack.c.bf16 %v6398_v63, %v6397_v27  ;;  %v6277_v41 = vadd.f32 1.0, %v9492_v13  ;;  %9509 = vpow2.f32 %v6175_v39  ;;  %v6177_v8 = vmul.f32 1.442695, %v6088_v18  ;;  %v3109_v49 = vpop.f32.mrb[33].mxu1 }
 0x2fe   :  { %v9496_v29 = vpop.eup %9495  ;;  %v7293_v43 = vpack.c.bf16 %v6396_v38, %v6395_v3  ;;  %v6275_v45 = vadd.f32 1.0, %v9494_v40  ;;  %9511 = vpow2.f32 %v6181_v62  ;;  %v6187_v26 = vmul.f32 1.442695, %v6093_v23  ;;  %v8182_v54 = vpop.f32.mrb[34].mxu1 }
 0x2ff   :  { %7426 = vst [vmem:[%s11434_s19 + $0x38] sm:$0xff] %v7298_v7   ;;  %9513 = vrcp.f32 %v6277_v41  ;;  %v6278_v56 = vadd.f32 1.0, %v9496_v29  ;;  %v6091_v47 = vsub.f32 0.0, %v11132_v57  ;;  %v11142_v14 = vadd.f32 %v8577_v58, %v10959_v17  ;;  %v8501_v33 = vpop.f32.mrb[32].mxu0  ;;  %v3112_v19 = vpop.f32.mrb[35].mxu1 }
 0x300   :  { %7425 = vst [vmem:[%s11434_s19 + $0x30] sm:$0xff] %v7293_v43   ;;  %9515 = vrcp.f32 %v6275_v45  ;;  %v8578_v51 = vadd.f32 %v5788_v12, %v10954_v15  ;;  %v8579_v52 = vadd.f32 %v8501_v33, %v8181_v9  ;;  %v5801_v53 = vpop.f32.mrb[33].mxu0 }
 0x301   :  { %v9498_v36 = vpop.eup %9497  ;;  %9517 = vrcp.f32 %v6278_v56  ;;  %v6183_v22 = vmul.f32 1.442695, %v6091_v47  ;;  %v6094_v5 = vsub.f32 0.0, %v11142_v14  ;;  %v8580_v55 = vadd.f32 %v5801_v53, %v3109_v49  ;;  %v8502_v4 = vpop.f32.mrb[34].mxu0 }
 0x302   :  { %v9500_v10 = vpop.eup %9499  ;;  %v6401_v39 = vmul.f32 %v9498_v36, %v11039_v16  ;;  %9519 = vpow2.f32 %v6177_v8  ;;  %v11151_v48 = vadd.f32 %v8578_v51, %v10959_v17  ;;  %v11154_v15 = vadd.f32 %v8579_v52, %v10959_v17  ;;  %v5804_v1 = vpop.f32.mrb[35].mxu0 }
 0x303   :  { %v9502_v20 = vpop.eup %9501  ;;  %v6399_v21 = vmul.f32 %v9500_v10, %v11044_v25  ;;  %9521 = vpow2.f32 %v6187_v26  ;;  %v6189_v60 = vmul.f32 1.442695, %v6094_v5  ;;  %v11158_v28 = vadd.f32 %v8580_v55, %v10959_v17 }
 0x304   :  { %v9504_v50 = vpop.eup %9503  ;;  %v6402_v6 = vmul.f32 %v9502_v20, %v11050_v31  ;;  %9523 = vpow2.f32 %v6183_v22  ;;  %v6092_v16 = vsub.f32 0.0, %v11151_v48  ;;  %v6097_v27 = vsub.f32 0.0, %v11154_v15  ;;  %v8185_v63 = vpop.f32.mrb[36].mxu1 }
 0x305   :  { %v9506_v11 = vpop.eup %9505  ;;  %v6400_v2 = vmul.f32 %v9504_v50, %v11056_v32  ;;  %9525 = vpow2.f32 %v6189_v60  ;;  %v6095_v30 = vsub.f32 0.0, %v11158_v28  ;;  %v8581_v25 = vadd.f32 %v8502_v4, %v8182_v54  ;;  %v3125_v40 = vpop.f32.mrb[37].mxu1 }
 0x306   :  { %v9508_v3 = vpop.eup %9507  ;;  %v7308_v62 = vpack.c.bf16 %v6402_v6, %v6401_v39  ;;  %v6276_v12 = vadd.f32 1.0, %v9506_v11  ;;  %v6185_v35 = vmul.f32 1.442695, %v6092_v16  ;;  %v6195_v38 = vmul.f32 1.442695, %v6097_v27  ;;  %v8186_v43 = vpop.f32.mrb[38].mxu1 }
 0x307   :  { %v9510_v18 = vpop.eup %9509  ;;  %v7303_v13 = vpack.c.bf16 %v6400_v2, %v6399_v21  ;;  %v6281_v31 = vadd.f32 1.0, %v9508_v3  ;;  %v11166_v23 = vadd.f32 %v8581_v25, %v10959_v17  ;;  %v8505_v58 = vpop.f32.mrb[36].mxu0  ;;  %v8582_v41 = vadd.f32 %v5804_v1, %v3112_v19 }
 0x308   :  { %v9512_v7 = vpop.eup %9511  ;;  %7428 = vst [vmem:[%s11434_s19 + $0x48] sm:$0xff] %v7308_v62   ;;  %9527 = vrcp.f32 %v6276_v12  ;;  %v6279_v32 = vadd.f32 1.0, %v9510_v18  ;;  %v8583_v8 = vadd.f32 %v8505_v58, %v8185_v63  ;;  %v5817_v29 = vpop.f32.mrb[37].mxu0  ;;  %v6191_v9 = vmul.f32 1.442695, %v6095_v30 }
 0x309   :  { %v9514_v45 = vpop.eup %9513  ;;  %7427 = vst [vmem:[%s11434_s19 + $0x40] sm:$0xff] %v7303_v13   ;;  %9529 = vrcp.f32 %v6281_v31  ;;  %v6282_v26 = vadd.f32 1.0, %v9512_v7  ;;  %v8584_v56 = vadd.f32 %v5817_v29, %v3125_v40  ;;  %v8506_v47 = vpop.f32.mrb[38].mxu0  ;;  %v6098_v51 = vsub.f32 0.0, %v11166_v23 }
 0x30a   :  { %v3128_v33 = vpop.f32.mrb[39].mxu1  ;;  %v9516_v49 = vpop.eup %9515  ;;  %9531 = vrcp.f32 %v6279_v32  ;;  %v11176_v52 = vadd.f32 %v8582_v41, %v10959_v17  ;;  %v11179_v53 = vadd.f32 %v8583_v8, %v10959_v17  ;;  %v6405_v22 = vmul.f32 %v9514_v45, %v11069_v42 }
 0x30b   :  { %v5820_v54 = vpop.f32.mrb[39].mxu0  ;;  %v9518_v36 = vpop.eup %9517  ;;  %v11183_v5 = vmul.f32 %v9516_v49, %v11073_v44  ;;  %9533 = vrcp.f32 %v6282_v26  ;;  %v11186_v55 = vadd.f32 %v8584_v56, %v10959_v17  ;;  %v8585_v21 = vadd.f32 %v8506_v47, %v8186_v43 }
 0x30c   :  { %v9520_v4 = vpop.eup %9519  ;;  %v6406_v19 = vmul.f32 %v9518_v36, %v11082_v24  ;;  %9535 = vpow2.f32 %v6185_v35  ;;  %v6096_v10 = vsub.f32 0.0, %v11176_v52  ;;  %v6101_v39 = vsub.f32 0.0, %v11179_v53  ;;  %v8189_v16 = vpop.f32.mrb[40].mxu1 }
 0x30d   :  { %v9522_v1 = vpop.eup %9521  ;;  %v6280_v20 = vadd.f32 1.0, %v9520_v4  ;;  %9537 = vpow2.f32 %v6195_v38  ;;  %v6099_v42 = vsub.f32 0.0, %v11186_v55  ;;  %v6197_v6 = vmul.f32 1.442695, %v6098_v51  ;;  %v3141_v12 = vpop.f32.mrb[41].mxu1 }
 0x30e   :  { %v9524_v44 = vpop.eup %9523  ;;  %v7318_v60 = vpack.c.bf16 %v6406_v19, %v6405_v22  ;;  %v6285_v50 = vadd.f32 1.0, %v9522_v1  ;;  %9539 = vpow2.f32 %v6191_v9  ;;  %v6193_v11 = vmul.f32 1.442695, %v6096_v10  ;;  %v8190_v31 = vpop.f32.mrb[42].mxu1 }
 0x30f   :  { %v9526_v27 = vpop.eup %9525  ;;  %9541 = vrcp.f32 %v6280_v20  ;;  %v6283_v24 = vadd.f32 1.0, %v9524_v44  ;;  %v6203_v2 = vmul.f32 1.442695, %v6101_v39  ;;  %v8509_v30 = vpop.f32.mrb[40].mxu0  ;;  %v11196_v3 = vadd.f32 %v8585_v21, %v10959_v17 }
 0x310   :  { %7430 = vst [vmem:[%s11434_s19 + $0x58] sm:$0xff] %v7318_v60   ;;  %9543 = vrcp.f32 %v6285_v50  ;;  %v6286_v25 = vadd.f32 1.0, %v9526_v27  ;;  %v8586_v62 = vadd.f32 %v5820_v54, %v3128_v33  ;;  %v5833_v35 = vpop.f32.mrb[41].mxu0  ;;  %v6199_v63 = vmul.f32 1.442695, %v6099_v42  ;;  %v3144_v41 = vpop.f32.mrb[43].mxu1 }
 0x311   :  { %9545 = vrcp.f32 %v6283_v24  ;;  %v8587_v18 = vadd.f32 %v8509_v30, %v8189_v16  ;;  %v8588_v13 = vadd.f32 %v5833_v35, %v3141_v12  ;;  %v8510_v38 = vpop.f32.mrb[42].mxu0  ;;  %v6102_v40 = vsub.f32 0.0, %v11196_v3 }
 0x312   :  { %v9528_v58 = vpop.eup %9527  ;;  %9547 = vrcp.f32 %v6286_v25  ;;  %v11200_v7 = vadd.f32 %v8586_v62, %v10959_v17  ;;  %v8589_v32 = vadd.f32 %v8510_v38, %v8190_v31  ;;  %v5836_v8 = vpop.f32.mrb[43].mxu0 }
 0x313   :  { %v9530_v29 = vpop.eup %9529  ;;  %v6404_v43 = vmul.f32 %v9528_v58, %v11092_v37  ;;  %9549 = vpow2.f32 %v6197_v6  ;;  %v11204_v45 = vadd.f32 %v8587_v18, %v10959_v17  ;;  %v11207_v26 = vadd.f32 %v8588_v13, %v10959_v17 }
 0x314   :  { %v9532_v9 = vpop.eup %9531  ;;  %v6409_v56 = vmul.f32 %v9530_v29, %v11097_v59  ;;  %9551 = vpow2.f32 %v6193_v11  ;;  %v6205_v47 = vmul.f32 1.442695, %v6102_v40  ;;  %v6100_v33 = vsub.f32 0.0, %v11200_v7  ;;  %v8193_v59 = vpop.f32.mrb[44].mxu1 }
 0x315   :  { %v9534_v49 = vpop.eup %9533  ;;  %v7313_v51 = vpack.c.bf16 %v6404_v43, %v11183_v5  ;;  %v6407_v54 = vmul.f32 %v9532_v9, %v11102_v46  ;;  %9553 = vpow2.f32 %v6203_v2  ;;  %v6105_v37 = vsub.f32 0.0, %v11204_v45  ;;  %v3157_v20 = vpop.f32.mrb[45].mxu1 }
 0x316   :  { %v9536_v36 = vpop.eup %9535  ;;  %v6410_v22 = vmul.f32 %v9534_v49, %v11109_v0  ;;  %9555 = vpow2.f32 %v6199_v63  ;;  %v6201_v4 = vmul.f32 1.442695, %v6100_v33  ;;  %v6103_v19 = vsub.f32 0.0, %v11207_v26  ;;  %v8194_v50 = vpop.f32.mrb[46].mxu1 }
 0x317   :  { %v9538_v10 = vpop.eup %9537  ;;  %7429 = vst [vmem:[%s11434_s19 + $0x50] sm:$0xff] %v7313_v51   ;;  %v6284_v39 = vadd.f32 1.0, %v9536_v36  ;;  %9557 = vpow2.f32 %v6205_v47  ;;  %v6211_v5 = vmul.f32 1.442695, %v6105_v37  ;;  %v11220_v46 = vadd.f32 %v8589_v32, %v10959_v17  ;;  %v8513_v1 = vpop.f32.mrb[44].mxu0 }
 0x318   :  { %v9540_v42 = vpop.eup %9539  ;;  %v7328_v0 = vpack.c.bf16 %v6410_v22, %v6409_v56  ;;  %v6289_v21 = vadd.f32 1.0, %v9538_v10  ;;  %9559 = vpow2.f32 %v6201_v4  ;;  %v6207_v44 = vmul.f32 1.442695, %v6103_v19  ;;  %v5849_v60 = vpop.f32.mrb[45].mxu0 }
 0x319   :  { %v9542_v6 = vpop.eup %9541  ;;  %9561 = vrcp.f32 %v6284_v39  ;;  %v6287_v16 = vadd.f32 1.0, %v9540_v42  ;;  %v6106_v27 = vsub.f32 0.0, %v11220_v46  ;;  %v8590_v24 = vadd.f32 %v5836_v8, %v3144_v41  ;;  %v8514_v11 = vpop.f32.mrb[46].mxu0 }
 0x31a   :  { %v3160_v2 = vpop.f32.mrb[47].mxu1  ;;  %v9544_v30 = vpop.eup %9543  ;;  %7432 = vst [vmem:[%s11434_s19 + $0x68] sm:$0xff] %v7328_v0   ;;  %v6408_v25 = vmul.f32 %v9542_v6, %v11122_v61  ;;  %9563 = vrcp.f32 %v6289_v21  ;;  %v8591_v62 = vadd.f32 %v8513_v1, %v8193_v59  ;;  %v8592_v12 = vadd.f32 %v5849_v60, %v3157_v20 }
 0x31b   :  { %v5852_v35 = vpop.f32.mrb[47].mxu0  ;;  %v9546_v63 = vpop.eup %9545  ;;  %v6413_v18 = vmul.f32 %v9544_v30, %v11127_v34  ;;  %9565 = vrcp.f32 %v6287_v16  ;;  %v6213_v13 = vmul.f32 1.442695, %v6106_v27  ;;  %v11229_v31 = vadd.f32 %v8590_v24, %v10959_v17  ;;  %v11257_v27 = vld [vmem:[%s11433_s18] ss:$0 sm:$0xff] }
 0x31c   :  { %v9548_v38 = vpop.eup %9547  ;;  %v7323_v58 = vpack.c.bf16 %v6408_v25, %v6407_v54  ;;  %v11232_v40 = vmul.f32 %v9546_v63, %v11132_v57  ;;  %9567 = vpow2.f32 %v6211_v5  ;;  %v11235_v61 = vadd.f32 %v8591_v62, %v10959_v17  ;;  %v8197_v56 = vpop.f32.mrb[48].mxu1 }
 0x31d   :  { %v9550_v32 = vpop.eup %9549  ;;  %v6414_v41 = vmul.f32 %v9548_v38, %v11142_v14  ;;  %9569 = vpow2.f32 %v6207_v44  ;;  %v6104_v34 = vsub.f32 0.0, %v11229_v31  ;;  %v11240_v8 = vadd.f32 %v8592_v12, %v10959_v17  ;;  %v3173_v37 = vpop.f32.mrb[49].mxu1 }
 0x31e   :  { %v9552_v29 = vpop.eup %9551  ;;  %7431 = vst [vmem:[%s11434_s19 + $0x60] sm:$0xff] %v7323_v58   ;;  %v6290_v57 = vadd.f32 1.0, %v9550_v32  ;;  %9571 = vpow2.f32 %v6213_v13  ;;  %v6109_v43 = vsub.f32 0.0, %v11235_v61  ;;  %v8593_v9 = vadd.f32 %v8514_v11, %v8194_v50  ;;  %v8198_v10 = vpop.f32.mrb[50].mxu1 }
 0x31f   :  { %v9554_v47 = vpop.eup %9553  ;;  %v7338_v33 = vpack.c.bf16 %v6414_v41, %v6413_v18  ;;  %v6288_v14 = vadd.f32 1.0, %v9552_v29  ;;  %v6209_v49 = vmul.f32 1.442695, %v6104_v34  ;;  %v6107_v51 = vsub.f32 0.0, %v11240_v8  ;;  %v8517_v54 = vpop.f32.mrb[48].mxu0 }
 0x320   :  { %v9556_v36 = vpop.eup %9555  ;;  %9573 = vrcp.f32 %v6290_v57  ;;  %v6293_v22 = vadd.f32 1.0, %v9554_v47  ;;  %v6219_v4 = vmul.f32 1.442695, %v6109_v43  ;;  %v11248_v19 = vadd.f32 %v8593_v9, %v10959_v17  ;;  %v5865_v59 = vpop.f32.mrb[49].mxu0 }
 0x321   :  { %v9558_v39 = vpop.eup %9557  ;;  %7434 = vst [vmem:[%s11434_s19 + $0x78] sm:$0xff] %v7338_v33   ;;  %9575 = vrcp.f32 %v6288_v14  ;;  %v6291_v5 = vadd.f32 1.0, %v9556_v36  ;;  %v6215_v1 = vmul.f32 1.442695, %v6107_v51  ;;  %v8594_v20 = vadd.f32 %v5852_v35, %v3160_v2  ;;  %v8518_v42 = vpop.f32.mrb[50].mxu0 }
 0x322   :  { %v3176_v0 = vpop.f32.mrb[51].mxu1  ;;  %v9560_v21 = vpop.eup %9559  ;;  %9577 = vrcp.f32 %v6293_v22  ;;  %v6294_v44 = vadd.f32 1.0, %v9558_v39  ;;  %v6110_v60 = vsub.f32 0.0, %v11248_v19  ;;  %v8595_v17 = vadd.f32 %v8517_v54, %v8197_v56 }
 0x323   :  { %v5868_v50 = vpop.f32.mrb[51].mxu0  ;;  %v9562_v6 = vpop.eup %9561  ;;  %9579 = vrcp.f32 %v6291_v5  ;;  %v6292_v16 = vadd.f32 1.0, %v9560_v21  ;;  %v11260_v24 = vadd.f32 %v11257_v27, %v8594_v20  ;;  %v8596_v11 = vadd.f32 %v5865_v59, %v3173_v37 }
 0x324   :  { %v9564_v2 = vpop.eup %9563  ;;  %v6412_v30 = vmul.f32 %v9562_v6, %v11151_v48  ;;  %9581 = vrcp.f32 %v6294_v44  ;;  %v6221_v25 = vmul.f32 1.442695, %v6110_v60  ;;  %v11264_v62 = vadd.f32 %v11257_v27, %v8595_v17  ;;  %v8201_v32 = vpop.f32.mrb[52].mxu1 }
 0x325   :  { %v9566_v12 = vpop.eup %9565  ;;  %v6417_v35 = vmul.f32 %v9564_v2, %v11154_v15  ;;  %9583 = vrcp.f32 %v6292_v16  ;;  %v6108_v63 = vsub.f32 0.0, %v11260_v24  ;;  %v11269_v18 = vadd.f32 %v11257_v27, %v8596_v11  ;;  %v3189_v43 = vpop.f32.mrb[53].mxu1 }
 0x326   :  { %v9568_v13 = vpop.eup %9567  ;;  %v7333_v38 = vpack.c.bf16 %v6412_v30, %v11232_v40  ;;  %v6415_v58 = vmul.f32 %v9566_v12, %v11158_v28  ;;  %9585 = vpow2.f32 %v6209_v49  ;;  %v6113_v48 = vsub.f32 0.0, %v11264_v62  ;;  %v8202_v33 = vpop.f32.mrb[54].mxu1 }
 0x327   :  { %v9570_v41 = vpop.eup %9569  ;;  %v6297_v34 = vadd.f32 1.0, %v9568_v13  ;;  %9587 = vpow2.f32 %v6219_v4  ;;  %v6217_v29 = vmul.f32 1.442695, %v6108_v63  ;;  %v6111_v15 = vsub.f32 0.0, %v11269_v18  ;;  %v8521_v57 = vpop.f32.mrb[52].mxu0 }
 0x328   :  { %v9572_v9 = vpop.eup %9571  ;;  %7433 = vst [vmem:[%s11434_s19 + $0x70] sm:$0xff] %v7333_v38   ;;  %v6295_v40 = vadd.f32 1.0, %v9570_v41  ;;  %9589 = vpow2.f32 %v6215_v1  ;;  %v6227_v28 = vmul.f32 1.442695, %v6113_v48  ;;  %v8597_v56 = vadd.f32 %v8518_v42, %v8198_v10  ;;  %v5881_v47 = vpop.f32.mrb[53].mxu0 }
 0x329   :  { %9591 = vrcp.f32 %v6297_v34  ;;  %v6298_v14 = vadd.f32 1.0, %v9572_v9  ;;  %v6223_v49 = vmul.f32 1.442695, %v6111_v15  ;;  %v8598_v51 = vadd.f32 %v5868_v50, %v3176_v0  ;;  %v8522_v54 = vpop.f32.mrb[54].mxu0  ;;  %v3192_v37 = vpop.f32.mrb[55].mxu1 }
 0x32a   :  { %v9574_v36 = vpop.eup %9573  ;;  %9593 = vrcp.f32 %v6295_v40  ;;  %v11279_v22 = vadd.f32 %v11257_v27, %v8597_v56  ;;  %v8599_v4 = vadd.f32 %v8521_v57, %v8201_v32  ;;  %v8600_v59 = vadd.f32 %v5881_v47, %v3189_v43  ;;  %v5884_v39 = vpop.f32.mrb[55].mxu0 }
 0x32b   :  { %v9576_v5 = vpop.eup %9575  ;;  %v6418_v1 = vmul.f32 %v9574_v36, %v11166_v23  ;;  %9595 = vrcp.f32 %v6298_v14  ;;  %v11283_v10 = vadd.f32 %v11257_v27, %v8598_v51  ;;  %v8601_v20 = vadd.f32 %v8522_v54, %v8202_v33 }
 0x32c   :  { %v9578_v42 = vpop.eup %9577  ;;  %v6416_v0 = vmul.f32 %v9576_v5, %v11176_v52  ;;  %9597 = vpow2.f32 %v6221_v25  ;;  %v6114_v21 = vsub.f32 0.0, %v11279_v22  ;;  %v11288_v44 = vadd.f32 %v11257_v27, %v8599_v4  ;;  %v8205_v52 = vpop.f32.mrb[56].mxu1 }
 0x32d   :  { %v9580_v60 = vpop.eup %9579  ;;  %v7348_v17 = vpack.c.bf16 %v6418_v1, %v6417_v35  ;;  %v6421_v50 = vmul.f32 %v9578_v42, %v11179_v53  ;;  %9599 = vpow2.f32 %v6217_v29  ;;  %v6112_v23 = vsub.f32 0.0, %v11283_v10  ;;  %v3205_v63 = vpop.f32.mrb[57].mxu1 }
 0x32e   :  { %v9582_v6 = vpop.eup %9581  ;;  %v7343_v16 = vpack.c.bf16 %v6416_v0, %v6415_v58  ;;  %v6419_v11 = vmul.f32 %v9580_v60, %v11186_v55  ;;  %9601 = vpow2.f32 %v6227_v28  ;;  %v6229_v2 = vmul.f32 1.442695, %v6114_v21  ;;  %v8206_v48 = vpop.f32.mrb[58].mxu1 }
 0x32f   :  { %v9584_v30 = vpop.eup %9583  ;;  %7436 = vst [vmem:[%s11434_s19 + $0x88] sm:$0xff] %v7348_v17   ;;  %v6422_v25 = vmul.f32 %v9582_v6, %v11196_v3  ;;  %9603 = vpow2.f32 %v6223_v49  ;;  %v6225_v12 = vmul.f32 1.442695, %v6112_v23  ;;  %v6117_v53 = vsub.f32 0.0, %v11288_v44  ;;  %v8525_v35 = vpop.f32.mrb[56].mxu0 }
 0x330   :  { %v9586_v13 = vpop.eup %9585  ;;  %7435 = vst [vmem:[%s11434_s19 + $0x80] sm:$0xff] %v7343_v16   ;;  %v6420_v55 = vmul.f32 %v9584_v30, %v11200_v7  ;;  %9605 = vpow2.f32 %v6229_v2  ;;  %v11303_v38 = vadd.f32 %v11257_v27, %v8600_v59  ;;  %v11306_v58 = vadd.f32 %v11257_v27, %v8601_v20  ;;  %v5897_v3 = vpop.f32.mrb[57].mxu0 }
 0x331   :  { %v9588_v32 = vpop.eup %9587  ;;  %v7358_v41 = vpack.c.bf16 %v6422_v25, %v6421_v50  ;;  %v6296_v34 = vadd.f32 1.0, %v9586_v13  ;;  %9607 = vpow2.f32 %v6225_v12  ;;  %v6235_v29 = vmul.f32 1.442695, %v6117_v53  ;;  %v8526_v15 = vpop.f32.mrb[58].mxu0 }
 0x332   :  { %v3208_v57 = vpop.f32.mrb[59].mxu1  ;;  %v9590_v43 = vpop.eup %9589  ;;  %v7353_v9 = vpack.c.bf16 %v6420_v55, %v6419_v11  ;;  %v6301_v40 = vadd.f32 1.0, %v9588_v32  ;;  %v6115_v7 = vsub.f32 0.0, %v11303_v38  ;;  %v6118_v28 = vsub.f32 0.0, %v11306_v58 }
 0x333   :  { %v5900_v56 = vpop.f32.mrb[59].mxu0  ;;  %v9592_v47 = vpop.eup %9591  ;;  %7438 = vst [vmem:[%s11434_s19 + $0x98] sm:$0xff] %v7358_v41   ;;  %9609 = vrcp.f32 %v6296_v34  ;;  %v6299_v33 = vadd.f32 1.0, %v9590_v43  ;;  %v8602_v14 = vadd.f32 %v5884_v39, %v3192_v37  ;;  %v8603_v49 = vadd.f32 %v8525_v35, %v8205_v52 }
 0x334   :  { %v9594_v51 = vpop.eup %9593  ;;  %7437 = vst [vmem:[%s11434_s19 + $0x90] sm:$0xff] %v7353_v9   ;;  %v6425_v54 = vmul.f32 %v9592_v47, %v11204_v45  ;;  %9611 = vrcp.f32 %v6301_v40  ;;  %v6231_v36 = vmul.f32 1.442695, %v6115_v7  ;;  %v6237_v4 = vmul.f32 1.442695, %v6118_v28  ;;  %v8209_v0 = vpop.f32.mrb[60].mxu1 }
 0x335   :  { %v9596_v59 = vpop.eup %9595  ;;  %v11318_v5 = vmul.f32 %v9594_v51, %v11207_v26  ;;  %9613 = vrcp.f32 %v6299_v33  ;;  %v11321_v1 = vadd.f32 %v11257_v27, %v8602_v14  ;;  %v11324_v37 = vadd.f32 %v11257_v27, %v8603_v49  ;;  %v3221_v23 = vpop.f32.mrb[61].mxu1 }
 0x336   :  { %v9598_v39 = vpop.eup %9597  ;;  %v6426_v20 = vmul.f32 %v9596_v59, %v11220_v46  ;;  %9615 = vpow2.f32 %v6235_v29  ;;  %v8604_v42 = vadd.f32 %v5897_v3, %v3205_v63  ;;  %v8605_v45 = vadd.f32 %v8526_v15, %v8206_v48  ;;  %v8210_v52 = vpop.f32.mrb[62].mxu1 }
 0x337   :  { %v9600_v21 = vpop.eup %9599  ;;  %v6302_v60 = vadd.f32 1.0, %v9598_v39  ;;  %9617 = vpow2.f32 %v6231_v36  ;;  %v6116_v26 = vsub.f32 0.0, %v11321_v1  ;;  %v6121_v17 = vsub.f32 0.0, %v11324_v37  ;;  %v8529_v50 = vpop.f32.mrb[60].mxu0 }
 0x338   :  { %v9602_v6 = vpop.eup %9601  ;;  %v7368_v16 = vpack.c.bf16 %v6426_v20, %v6425_v54  ;;  %v6300_v11 = vadd.f32 1.0, %v9600_v21  ;;  %9619 = vpow2.f32 %v6237_v4  ;;  %v11330_v2 = vadd.f32 %v11257_v27, %v8604_v42  ;;  %v5913_v46 = vpop.f32.mrb[61].mxu0 }
 0x339   :  { %v9604_v30 = vpop.eup %9603  ;;  %9621 = vrcp.f32 %v6302_v60  ;;  %v6305_v25 = vadd.f32 1.0, %v9602_v6  ;;  %v6233_v12 = vmul.f32 1.442695, %v6116_v26  ;;  %v6243_v53 = vmul.f32 1.442695, %v6121_v17  ;;  %v8530_v35 = vpop.f32.mrb[62].mxu0 }
 0x33a   :  { %v9606_v63 = vpop.eup %9605  ;;  %7440 = vst [vmem:[%s11434_s19 + $0xa8] sm:$0xff] %v7368_v16   ;;  %9623 = vrcp.f32 %v6300_v11  ;;  %v6303_v13 = vadd.f32 1.0, %v9604_v30  ;;  %v6119_v55 = vsub.f32 0.0, %v11330_v2  ;;  %v11337_v3 = vadd.f32 %v11257_v27, %v8605_v45  ;;  %v3224_v48 = vpop.f32.mrb[63].mxu1 }
 0x33b   :  { %v5916_v32 = vpop.f32.mrb[63].mxu0  ;;  %v9608_v41 = vpop.eup %9607  ;;  %9625 = vrcp.f32 %v6305_v25  ;;  %v6306_v34 = vadd.f32 1.0, %v9606_v63  ;;  %v8606_v29 = vadd.f32 %v5900_v56, %v3208_v57  ;;  %v8607_v15 = vadd.f32 %v8529_v50, %v8209_v0 }
 0x33c   :  { %9627 = vrcp.f32 %v6303_v13  ;;  %v6304_v43 = vadd.f32 1.0, %v9608_v41  ;;  %v6239_v9 = vmul.f32 1.442695, %v6119_v55  ;;  %v6122_v40 = vsub.f32 0.0, %v11337_v3 }
 0x33d   :  { %v9610_v7 = vpop.eup %9609  ;;  %9629 = vrcp.f32 %v6306_v34  ;;  %v11341_v28 = vadd.f32 %v11257_v27, %v8606_v29  ;;  %v11344_v47 = vadd.f32 %v11257_v27, %v8607_v15  ;;  %v8608_v33 = vadd.f32 %v5913_v46, %v3221_v23 }
 0x33e   :  { %v9612_v14 = vpop.eup %9611  ;;  %v6424_v49 = vmul.f32 %v9610_v7, %v11229_v31  ;;  %9631 = vrcp.f32 %v6304_v43  ;;  %v6245_v57 = vmul.f32 1.442695, %v6122_v40  ;;  %v8609_v56 = vadd.f32 %v8530_v35, %v8210_v52 }
 0x33f   :  { %v9614_v51 = vpop.eup %9613  ;;  %9633 = vpow2.f32 %v6233_v12  ;;  %v6120_v54 = vsub.f32 0.0, %v11341_v28  ;;  %v6125_v36 = vsub.f32 0.0, %v11344_v47  ;;  %v11351_v39 = vadd.f32 %v11257_v27, %v8608_v33 }
 0x340   :  { %v9616_v4 = vpop.eup %9615  ;;  %v7363_v59 = vpack.c.bf16 %v6424_v49, %v11318_v5  ;;  %9635 = vpow2.f32 %v6243_v53  ;;  %v11358_v21 = vadd.f32 %v11257_v27, %v8609_v56  ;;  %v8610_v17 = vadd.f32 %v5916_v32, %v3224_v48 }
 0x341   :  { %v9618_v20 = vpop.eup %9617  ;;  %v6309_v42 = vadd.f32 1.0, %v9616_v4  ;;  %9637 = vpow2.f32 %v6239_v9  ;;  %v6241_v45 = vmul.f32 1.442695, %v6120_v54  ;;  %v6123_v0 = vsub.f32 0.0, %v11351_v39 }
 0x342   :  { %v9620_v31 = vpop.eup %9619  ;;  %7439 = vst [vmem:[%s11434_s19 + $0xa0] sm:$0xff] %v7363_v59   ;;  %9639 = vpow2.f32 %v6245_v57  ;;  %v6251_v26 = vmul.f32 1.442695, %v6125_v36  ;;  %v6429_v23 = vmul.f32 %v9612_v14, %v11235_v61  ;;  %v6126_v11 = vsub.f32 0.0, %v11358_v21 }
 0x343   :  { %v9622_v5 = vpop.eup %9621  ;;  %9641 = vrcp.f32 %v6309_v42  ;;  %v6310_v60 = vadd.f32 1.0, %v9620_v31  ;;  %v6247_v16 = vmul.f32 1.442695, %v6123_v0  ;;  %v6427_v52 = vmul.f32 %v9614_v51, %v11240_v8 }
 0x344   :  { %v9624_v50 = vpop.eup %9623  ;;  %v6430_v6 = vmul.f32 %v9622_v5, %v11248_v19  ;;  %v11366_v25 = vadd.f32 %v11257_v27, %v8610_v17  ;;  %v6307_v35 = vadd.f32 1.0, %v9618_v20  ;;  %v6253_v63 = vmul.f32 1.442695, %v6126_v11 }
 0x345   :  { %v9626_v46 = vpop.eup %9625  ;;  %v6428_v30 = vmul.f32 %v9624_v50, %v11260_v24  ;;  %9643 = vrcp.f32 %v6310_v60 }
 0x346   :  { %v9628_v12 = vpop.eup %9627  ;;  %v7378_v53 = vpack.c.bf16 %v6430_v6, %v6429_v23  ;;  %9645 = vpow2.f32 %v6241_v45  ;;  %v6124_v19 = vsub.f32 0.0, %v11366_v25  ;;  %v6433_v8 = vmul.f32 %v9626_v46, %v11264_v62 }
 0x347   :  { %v9630_v61 = vpop.eup %9629  ;;  %v7373_v13 = vpack.c.bf16 %v6428_v30, %v6427_v52  ;;  %9647 = vpow2.f32 %v6251_v26  ;;  %v6431_v48 = vmul.f32 %v9628_v12, %v11269_v18 }
 0x348   :  { %v9632_v55 = vpop.eup %9631  ;;  %7442 = vst [vmem:[%s11434_s19 + $0xb8] sm:$0xff] %v7378_v53   ;;  %v6434_v27 = vmul.f32 %v9630_v61, %v11279_v22  ;;  %9649 = vpow2.f32 %v6247_v16  ;;  %v6249_v41 = vmul.f32 1.442695, %v6124_v19 }
 0x349   :  { %v9634_v24 = vpop.eup %9633  ;;  %7441 = vst [vmem:[%s11434_s19 + $0xb0] sm:$0xff] %v7373_v13   ;;  %v6432_v32 = vmul.f32 %v9632_v55, %v11283_v10  ;;  %9651 = vpow2.f32 %v6253_v63 }
 0x34a   :  { %v9636_v34 = vpop.eup %9635  ;;  %v7388_v29 = vpack.c.bf16 %v6434_v27, %v6433_v8  ;;  %9653 = vrcp.f32 %v6307_v35  ;;  %v6308_v15 = vadd.f32 1.0, %v9634_v24 }
 0x34b   :  { %v9638_v43 = vpop.eup %9637  ;;  %v7383_v62 = vpack.c.bf16 %v6432_v32, %v6431_v48  ;;  %v6313_v9 = vadd.f32 1.0, %v9636_v34  ;;  %9655 = vpow2.f32 %v6249_v41 }
 0x34c   :  { %v9640_v22 = vpop.eup %9639  ;;  %7444 = vst [vmem:[%s11434_s19 + $0xc8] sm:$0xff] %v7388_v29   ;;  %9657 = vrcp.f32 %v6308_v15  ;;  %v6311_v18 = vadd.f32 1.0, %v9638_v43 }
 0x34d   :  { %v9642_v40 = vpop.eup %9641  ;;  %7443 = vst [vmem:[%s11434_s19 + $0xc0] sm:$0xff] %v7383_v62   ;;  %9659 = vrcp.f32 %v6313_v9  ;;  %v6314_v10 = vadd.f32 1.0, %v9640_v22 }
 0x34e   :  { %v6437_v14 = vmul.f32 %v9642_v40, %v11288_v44 }
 0x34f   :  { %v9644_v7 = vpop.eup %9643  ;;  %9661 = vrcp.f32 %v6314_v10 }
 0x350   :  { %v9646_v33 = vpop.eup %9645  ;;  %v6438_v49 = vmul.f32 %v9644_v7, %v11306_v58  ;;  %9663 = vrcp.f32 %v6311_v18 }
 0x351   :  { %v9648_v57 = vpop.eup %9647  ;;  %v6312_v56 = vadd.f32 1.0, %v9646_v33 }
 0x352   :  { %v9650_v51 = vpop.eup %9649  ;;  %v7398_v54 = vpack.c.bf16 %v6438_v49, %v6437_v14  ;;  %v6317_v36 = vadd.f32 1.0, %v9648_v57 }
 0x353   :  { %v9652_v4 = vpop.eup %9651  ;;  %9665 = vrcp.f32 %v6312_v56  ;;  %v6315_v59 = vadd.f32 1.0, %v9650_v51 }
 0x354   :  { %v9654_v20 = vpop.eup %9653  ;;  %7446 = vst [vmem:[%s11434_s19 + $0xd8] sm:$0xff] %v7398_v54   ;;  %9667 = vrcp.f32 %v6317_v36  ;;  %v6318_v42 = vadd.f32 1.0, %v9652_v4 }
 0x355   :  { %v9656_v31 = vpop.eup %9655  ;;  %9669 = vrcp.f32 %v6315_v59  ;;  %v6435_v0 = vmul.f32 %v9654_v20, %v11303_v38 }
 0x356   :  { %v9658_v44 = vpop.eup %9657  ;;  %9671 = vrcp.f32 %v6318_v42  ;;  %v6316_v58 = vadd.f32 1.0, %v9656_v31 }
 0x357   :  { %v9660_v45 = vpop.eup %9659  ;;  %v6436_v5 = vmul.f32 %v9658_v44, %v11321_v1 }
 0x358   :  { %9673 = vrcp.f32 %v6316_v58  ;;  %v6441_v17 = vmul.f32 %v9660_v45, %v11324_v37 }
 0x359   :  { %v9662_v60 = vpop.eup %9661  ;;  %v7393_v26 = vpack.c.bf16 %v6436_v5, %v6435_v0 }
 0x35a   :  { %v6442_v50 = vmul.f32 %v9662_v60, %v11337_v3  ;;  %v9664_v23 = vpop.eup %9663 }
 0x35b   :  { %7445 = vst [vmem:[%s11434_s19 + $0xd0] sm:$0xff] %v7393_v26   ;;  %v6439_v46 = vmul.f32 %v9664_v23, %v11330_v2 }
 0x35c   :  { %v7408_v6 = vpack.c.bf16 %v6442_v50, %v6441_v17 }
 0x35d   :  { %v9666_v16 = vpop.eup %9665 }
 0x35e   :  { %v9668_v11 = vpop.eup %9667  ;;  %7448 = vst [vmem:[%s11434_s19 + $0xe8] sm:$0xff] %v7408_v6   ;;  %v6440_v38 = vmul.f32 %v9666_v16, %v11341_v28 }
 0x35f   :  { %v9670_v1 = vpop.eup %9669  ;;  %v6445_v3 = vmul.f32 %v9668_v11, %v11344_v47 }
 0x360   :  { %v9672_v37 = vpop.eup %9671  ;;  %v7403_v52 = vpack.c.bf16 %v6440_v38, %v6439_v46  ;;  %v6443_v2 = vmul.f32 %v9670_v1, %v11351_v39 }
 0x361   :  { %v6446_v30 = vmul.f32 %v9672_v37, %v11358_v21 }
 0x362   :  { %v9674_v12 = vpop.eup %9673  ;;  %7447 = vst [vmem:[%s11434_s19 + $0xe0] sm:$0xff] %v7403_v52  }
 0x363   :  { %v7418_v53 = vpack.c.bf16 %v6446_v30, %v6445_v3  ;;  %v6444_v35 = vmul.f32 %v9674_v12, %v11366_v25 }
 0x365   :  { %7450 = vst [vmem:[%s11434_s19 + $0xf8] sm:$0xff] %v7418_v53   ;;  %v7413_v28 = vpack.c.bf16 %v6444_v35, %v6443_v2 }
 0x367   :  { %7449 = vst [vmem:[%s11434_s19 + $0xf0] sm:$0xff] %v7413_v28  }

// kernel: neck_forward.32
= control target key start
LH: loop header
LB: loop body
LE: loop exit
PB: predicated region body
PF: predicated region fallthrough
CT: control target
= control target key end

     0   :  { %v588_v1 = vmov 0   ;;  %v353_v37 = vlaneseq  ;;  %s762_s3 = inlined_call_operand.vmem [shape: bf16[128,256], index: 3, kind: input, shape index: {}]   ;;  %s763_s2 = inlined_call_operand.vmem [shape: bf16[128,256], index: 2, kind: input, shape index: {}]   ;;  %s764_s1 = inlined_call_operand.vmem [shape: bf16[32,128], index: 1, kind: input, shape index: {}]   ;;  %s765_s0 = inlined_call_operand.vmem [shape: bf16[32,128], index: 0, kind: input, shape index: {}]   ;;  %s766_s4 = inlined_call_operand.vmem [shape: f32[1,256], index: 4, kind: input, shape index: {}]   ;;  %s767_s5 = inlined_call_operand.vmem [shape: bf16[32,256], index: 5, kind: output, shape index: {}]  }
   0x1   :  { %v504_v0 = vld [vmem:[%s762_s3 + $0x4] ss:$8 sps:$4 sm:$0xff]   ;;  %185 = vmatprep.mubr.bf16.mxu1 %v588_v1  ;;  %330 = vmatprep.mubr.bf16.mxu0 %v588_v1  ;;  %v508_v3 = vld [vmem:[%s762_s3] ss:$8 sps:$4 sm:$0xff]   ;;  %v510_v5 = vld [vmem:[%s762_s3 + $0x14] ss:$8 sps:$4 sm:$0xff]  }
   0x2   :  { %v506_v2 = vld [vmem:[%s763_s2 + $0x4] ss:$8 sps:$4 sm:$0xff]   ;;  %153 = vmatprep.subr.bf16.mxu1 %v504_v0  ;;  %v509_v4 = vld [vmem:[%s763_s2] ss:$8 sps:$4 sm:$0xff]   ;;  %v512_v6 = vld [vmem:[%s763_s2 + $0x14] ss:$8 sps:$4 sm:$0xff]  }
   0x3   :  { %298 = vmatprep.subr.bf16.mxu0 %v506_v2  ;;  %154 = vmatpush1.bf16.msra.mxu1 %v508_v3  ;;  %v514_v7 = vld [vmem:[%s762_s3 + $0x10] ss:$8 sps:$4 sm:$0xff]   ;;  %v516_v9 = vld [vmem:[%s762_s3 + $0x24] ss:$8 sps:$4 sm:$0xff]   ;;  %v520_v11 = vld [vmem:[%s762_s3 + $0x20] ss:$8 sps:$4 sm:$0xff]  }
   0x4   :  { %299 = vmatpush1.bf16.msra.mxu0 %v509_v4  ;;  %155 = vmatprep.subr.bf16.mxu1 %v510_v5  ;;  %v515_v8 = vld [vmem:[%s763_s2 + $0x10] ss:$8 sps:$4 sm:$0xff]   ;;  %v518_v10 = vld [vmem:[%s763_s2 + $0x24] ss:$8 sps:$4 sm:$0xff]   ;;  %v521_v12 = vld [vmem:[%s763_s2 + $0x20] ss:$8 sps:$4 sm:$0xff]  }
   0x5   :  { %300 = vmatprep.subr.bf16.mxu0 %v512_v6  ;;  %v522_v13 = vld [vmem:[%s762_s3 + $0x34] ss:$8 sps:$4 sm:$0xff]   ;;  %v526_v15 = vld [vmem:[%s762_s3 + $0x30] ss:$8 sps:$4 sm:$0xff]   ;;  %v528_v17 = vld [vmem:[%s762_s3 + $0x44] ss:$8 sps:$4 sm:$0xff]  }
   0x6   :  { %v524_v14 = vld [vmem:[%s763_s2 + $0x34] ss:$8 sps:$4 sm:$0xff]   ;;  %v527_v16 = vld [vmem:[%s763_s2 + $0x30] ss:$8 sps:$4 sm:$0xff]   ;;  %v530_v18 = vld [vmem:[%s763_s2 + $0x44] ss:$8 sps:$4 sm:$0xff]  }
   0x7   :  { %156 = vmatpush1.bf16.msra.mxu1 %v514_v7  ;;  %v532_v19 = vld [vmem:[%s762_s3 + $0x40] ss:$8 sps:$4 sm:$0xff]   ;;  %v534_v21 = vld [vmem:[%s762_s3 + $0x54] ss:$8 sps:$4 sm:$0xff]   ;;  %v538_v23 = vld [vmem:[%s762_s3 + $0x50] ss:$8 sps:$4 sm:$0xff]  }
   0x8   :  { %301 = vmatpush1.bf16.msra.mxu0 %v515_v8  ;;  %157 = vmatprep.subr.bf16.mxu1 %v516_v9  ;;  %v533_v20 = vld [vmem:[%s763_s2 + $0x40] ss:$8 sps:$4 sm:$0xff]   ;;  %v536_v22 = vld [vmem:[%s763_s2 + $0x54] ss:$8 sps:$4 sm:$0xff]   ;;  %v539_v24 = vld [vmem:[%s763_s2 + $0x50] ss:$8 sps:$4 sm:$0xff]  }
   0x9   :  { %302 = vmatprep.subr.bf16.mxu0 %v518_v10  ;;  %v540_v25 = vld [vmem:[%s762_s3 + $0x64] ss:$8 sps:$4 sm:$0xff]   ;;  %v544_v27 = vld [vmem:[%s762_s3 + $0x60] ss:$8 sps:$4 sm:$0xff]   ;;  %v546_v29 = vld [vmem:[%s762_s3 + $0x74] ss:$8 sps:$4 sm:$0xff]  }
   0xa   :  { %v542_v26 = vld [vmem:[%s763_s2 + $0x64] ss:$8 sps:$4 sm:$0xff]   ;;  %v545_v28 = vld [vmem:[%s763_s2 + $0x60] ss:$8 sps:$4 sm:$0xff]   ;;  %v548_v30 = vld [vmem:[%s763_s2 + $0x74] ss:$8 sps:$4 sm:$0xff]  }
   0xb   :  { %158 = vmatpush1.bf16.msra.mxu1 %v520_v11  ;;  %v550_v31 = vld [vmem:[%s762_s3 + $0x70] ss:$8 sps:$4 sm:$0xff]   ;;  %v552_v33 = vld [vmem:[%s764_s1] sm:$0xff]   ;;  %v554_v35 = vld [vmem:[%s764_s1 + $0x8] sm:$0xff]   ;;  %v354_v38 = vshrl.u32 %v353_v37, 7 }
   0xc   :  { %303 = vmatpush1.bf16.msra.mxu0 %v521_v12  ;;  %159 = vmatprep.subr.bf16.mxu1 %v522_v13  ;;  %v551_v32 = vld [vmem:[%s763_s2 + $0x70] ss:$8 sps:$4 sm:$0xff]   ;;  %v553_v34 = vld [vmem:[%s765_s0] sm:$0xff]   ;;  %v555_v36 = vld [vmem:[%s765_s0 + $0x8] sm:$0xff]  }
   0xd   :  { %304 = vmatprep.subr.bf16.mxu0 %v524_v14  ;;  %v355_v39 = vsub.s32 0, %v354_v38  ;;  %v351_v40 = vld [vmem:[%s766_s4] sm:$0x3]  ;;  %v359_v41 = vsub.s32 1, %v354_v38 }
   0xf   :  { %160 = vmatpush1.bf16.msra.mxu1 %v526_v15  ;;  %v356_v42 = vrot.slane %v351_v40, %v355_v39  ;;  %v360_v45 = vrot.slane %v351_v40, %v359_v41 }
  0x10   :  { %305 = vmatpush1.bf16.msra.mxu0 %v527_v16  ;;  %161 = vmatprep.subr.bf16.mxu1 %v528_v17 }
  0x11   :  { %306 = vmatprep.subr.bf16.mxu0 %v530_v18 }
  0x13   :  { %162 = vmatpush1.bf16.msra.mxu1 %v532_v19 }
  0x14   :  { %307 = vmatpush1.bf16.msra.mxu0 %v533_v20  ;;  %163 = vmatprep.subr.bf16.mxu1 %v534_v21 }
  0x15   :  { %308 = vmatprep.subr.bf16.mxu0 %v536_v22 }
  0x17   :  { %164 = vmatpush1.bf16.msra.mxu1 %v538_v23 }
  0x18   :  { %309 = vmatpush1.bf16.msra.mxu0 %v539_v24  ;;  %165 = vmatprep.subr.bf16.mxu1 %v540_v25 }
  0x19   :  { %310 = vmatprep.subr.bf16.mxu0 %v542_v26 }
  0x1b   :  { %166 = vmatpush1.bf16.msra.mxu1 %v544_v27 }
  0x1c   :  { %311 = vmatpush1.bf16.msra.mxu0 %v545_v28  ;;  %167 = vmatprep.subr.bf16.mxu1 %v546_v29 }
  0x1d   :  { %312 = vmatprep.subr.bf16.mxu0 %v548_v30 }
  0x1f   :  { %168 = vmatpush1.bf16.msra.mxu1 %v550_v31 }
  0x20   :  { %313 = vmatpush1.bf16.msra.mxu0 %v551_v32 }
  0x22   :  { %186 = vmatmul.mubr.bf16.vlgmr.msra.gmra.mrb[0].mxu1 %v552_v33 }
  0x23   :  { %331 = vmatmul.mubr.bf16.vlgmr.msra.gmra.mrb[0].mxu0 %v553_v34  ;;  %195 = vmatprep.mubr.bf16.mxu1 %v588_v1 }
  0x24   :  { %340 = vmatprep.mubr.bf16.mxu0 %v588_v1 }
  0x2a   :  { %196 = vmatmul.mubr.bf16.gmra.mrb[4].mxu1 %v554_v35 }
  0x2b   :  { %341 = vmatmul.mubr.bf16.gmra.mrb[4].mxu0 %v555_v36 }
  0xf5   :  { %v187_v43 = vpop.f32.mrb[0].mxu1 }
  0xf6   :  { %v332_v44 = vpop.f32.mrb[0].mxu0  ;;  %v189_v47 = vpop.f32.mrb[1].mxu1 }
  0xf7   :  { %v333_v46 = vadd.f32 %v332_v44, %v187_v43  ;;  %v334_v48 = vpop.f32.mrb[1].mxu0  ;;  %v191_v50 = vpop.f32.mrb[2].mxu1 }
  0xf8   :  { %v335_v49 = vadd.f32 %v334_v48, %v189_v47  ;;  %v336_v51 = vpop.f32.mrb[2].mxu0  ;;  %v193_v54 = vpop.f32.mrb[3].mxu1 }
  0xf9   :  { %v734_v52 = vadd.f32 %v356_v42, %v333_v46  ;;  %v337_v53 = vadd.f32 %v336_v51, %v191_v50  ;;  %v338_v55 = vpop.f32.mrb[3].mxu0 }
  0xfa   :  { %v736_v56 = vadd.f32 %v360_v45, %v335_v49  ;;  %v339_v57 = vadd.f32 %v338_v55, %v193_v54 }
  0xfb   :  { %v371_v58 = vsub.f32 0.0, %v734_v52  ;;  %v739_v59 = vadd.f32 %v356_v42, %v337_v53 }
  0xfc   :  { %v372_v60 = vsub.f32 0.0, %v736_v56  ;;  %v742_v61 = vadd.f32 %v360_v45, %v339_v57 }
  0xfd   :  { %v379_v62 = vmul.f32 1.442695, %v371_v58  ;;  %v373_v63 = vsub.f32 0.0, %v739_v59  ;;  %v197_v2 = vpop.f32.mrb[4].mxu1 }
  0xfe   :  { %v381_v0 = vmul.f32 1.442695, %v372_v60  ;;  %v374_v1 = vsub.f32 0.0, %v742_v61  ;;  %v342_v3 = vpop.f32.mrb[4].mxu0  ;;  %v199_v6 = vpop.f32.mrb[5].mxu1 }
  0xff   :  { %556 = vpow2.f32 %v379_v62  ;;  %v383_v4 = vmul.f32 1.442695, %v373_v63  ;;  %v343_v5 = vadd.f32 %v342_v3, %v197_v2  ;;  %v344_v7 = vpop.f32.mrb[5].mxu0  ;;  %v201_v10 = vpop.f32.mrb[6].mxu1 }
 0x100   :  { %558 = vpow2.f32 %v381_v0  ;;  %v385_v8 = vmul.f32 1.442695, %v374_v1  ;;  %v345_v9 = vadd.f32 %v344_v7, %v199_v6  ;;  %v346_v11 = vpop.f32.mrb[6].mxu0  ;;  %v203_v14 = vpop.f32.mrb[7].mxu1 }
 0x101   :  { %560 = vpow2.f32 %v383_v4  ;;  %v367_v12 = vadd.f32 %v356_v42, %v343_v5  ;;  %v347_v13 = vadd.f32 %v346_v11, %v201_v10  ;;  %v348_v15 = vpop.f32.mrb[7].mxu0 }
 0x102   :  { %562 = vpow2.f32 %v385_v8  ;;  %v368_v16 = vadd.f32 %v360_v45, %v345_v9  ;;  %v349_v17 = vadd.f32 %v348_v15, %v203_v14 }
 0x103   :  { %v375_v18 = vsub.f32 0.0, %v367_v12  ;;  %v369_v19 = vadd.f32 %v356_v42, %v347_v13 }
 0x104   :  { %v376_v20 = vsub.f32 0.0, %v368_v16  ;;  %v370_v21 = vadd.f32 %v360_v45, %v349_v17 }
 0x105   :  { %v387_v22 = vmul.f32 1.442695, %v375_v18  ;;  %v377_v23 = vsub.f32 0.0, %v369_v19 }
 0x106   :  { %v389_v24 = vmul.f32 1.442695, %v376_v20  ;;  %v378_v25 = vsub.f32 0.0, %v370_v21 }
 0x107   :  { %564 = vpow2.f32 %v387_v22  ;;  %v391_v26 = vmul.f32 1.442695, %v377_v23 }
 0x108   :  { %566 = vpow2.f32 %v389_v24  ;;  %v393_v27 = vmul.f32 1.442695, %v378_v25 }
 0x109   :  { %v557_v28 = vpop.eup %556  ;;  %568 = vpow2.f32 %v391_v26 }
 0x10a   :  { %v559_v29 = vpop.eup %558  ;;  %v395_v30 = vadd.f32 1.0, %v557_v28  ;;  %570 = vpow2.f32 %v393_v27 }
 0x10b   :  { %v561_v31 = vpop.eup %560  ;;  %v396_v32 = vadd.f32 1.0, %v559_v29 }
 0x10c   :  { %v563_v33 = vpop.eup %562  ;;  %572 = vrcp.f32 %v395_v30  ;;  %v397_v34 = vadd.f32 1.0, %v561_v31 }
 0x10d   :  { %574 = vrcp.f32 %v396_v32  ;;  %v398_v35 = vadd.f32 1.0, %v563_v33 }
 0x10e   :  { %576 = vrcp.f32 %v397_v34 }
 0x10f   :  { %578 = vrcp.f32 %v398_v35 }
 0x111   :  { %v565_v36 = vpop.eup %564 }
 0x112   :  { %v567_v37 = vpop.eup %566  ;;  %v399_v38 = vadd.f32 1.0, %v565_v36 }
 0x113   :  { %v569_v39 = vpop.eup %568  ;;  %v400_v40 = vadd.f32 1.0, %v567_v37 }
 0x114   :  { %v571_v41 = vpop.eup %570  ;;  %580 = vrcp.f32 %v399_v38  ;;  %v401_v42 = vadd.f32 1.0, %v569_v39 }
 0x115   :  { %582 = vrcp.f32 %v400_v40  ;;  %v402_v43 = vadd.f32 1.0, %v571_v41 }
 0x116   :  { %v573_v44 = vpop.eup %572  ;;  %584 = vrcp.f32 %v401_v42 }
 0x117   :  { %v575_v45 = vpop.eup %574  ;;  %v411_v46 = vmul.f32 %v573_v44, %v734_v52  ;;  %586 = vrcp.f32 %v402_v43 }
 0x118   :  { %v577_v47 = vpop.eup %576  ;;  %v412_v48 = vmul.f32 %v575_v45, %v736_v56 }
 0x119   :  { %v579_v49 = vpop.eup %578  ;;  %v413_v50 = vmul.f32 %v577_v47, %v739_v59 }
 0x11a   :  { %v491_v51 = vpack.c.bf16 %v412_v48, %v411_v46  ;;  %v414_v53 = vmul.f32 %v579_v49, %v742_v61 }
 0x11c   :  { %443 = vst [vmem:[%s767_s5] sm:$0xff] %v491_v51  ;;  %v492_v54 = vpack.c.bf16 %v414_v53, %v413_v50 }
 0x11e   :  { %v581_v55 = vpop.eup %580  ;;  %444 = vst [vmem:[%s767_s5 + $0x8] sm:$0xff] %v492_v54 }
 0x11f   :  { %v583_v52 = vpop.eup %582  ;;  %v415_v57 = vmul.f32 %v581_v55, %v367_v12 }
 0x120   :  { %v585_v58 = vpop.eup %584  ;;  %v416_v56 = vmul.f32 %v583_v52, %v368_v16 }
 0x121   :  { %v587_v60 = vpop.eup %586  ;;  %v417_v62 = vmul.f32 %v585_v58, %v369_v19 }
 0x122   :  { %v493_v59 = vpack.c.bf16 %v416_v56, %v415_v57  ;;  %v418_v63 = vmul.f32 %v587_v60, %v370_v21 }
 0x124   :  { %445 = vst [vmem:[%s767_s5 + $0x10] sm:$0xff] %v493_v59  ;;  %v494_v61 = vpack.c.bf16 %v418_v63, %v417_v62 }
 0x126   :  { %446 = vst [vmem:[%s767_s5 + $0x18] sm:$0xff] %v494_v61 }

// kernel: neck_forward.35
= control target key start
LH: loop header
LB: loop body
LE: loop exit
PB: predicated region body
PF: predicated region fallthrough
CT: control target
= control target key end

     0   :  { %s810_s3 = inlined_call_operand.vmem [shape: bf16[128,128], index: 3, kind: input, shape index: {}]   ;;  %s811_s4 = inlined_call_operand.vmem [shape: bf16[128,128], index: 4, kind: input, shape index: {}]   ;;  %s812_s0 = inlined_call_operand.vmem [shape: bf16[32,128], index: 0, kind: input, shape index: {}]   ;;  %s813_s5 = inlined_call_operand.vmem [shape: bf16[128,128], index: 5, kind: input, shape index: {}]   ;;  %s814_s1 = inlined_call_operand.vmem [shape: bf16[32,128], index: 1, kind: input, shape index: {}]   ;;  %s815_s2 = inlined_call_operand.vmem [shape: bf16[32,128], index: 2, kind: input, shape index: {}]   ;;  %s816_s6 = inlined_call_operand.vmem [shape: f32[1,128], index: 6, kind: input, shape index: {}]   ;;  %s817_s7 = inlined_call_operand.vmem [shape: bf16[32,128], index: 7, kind: output, shape index: {}]  }
   0x1   :  { %v625_v0 = vld [vmem:[%s810_s3] sm:$0xff]   ;;  %v626_v1 = vld [vmem:[%s810_s3 + $0x8] sm:$0xff]   ;;  %v627_v2 = vld [vmem:[%s810_s3 + $0x10] sm:$0xff]  }
   0x2   :  { %577 = vmatprep.subr.bf16.mxu0 %v625_v0  ;;  %v628_v3 = vld [vmem:[%s810_s3 + $0x18] sm:$0xff]   ;;  %v633_v4 = vld [vmem:[%s811_s4] sm:$0xff]   ;;  %v636_v6 = vld [vmem:[%s811_s4 + $0x8] sm:$0xff]  }
   0x3   :  { %578 = vmatpush3.bf16.msra.mxu0 %v625_v0  ;;  %v634_v5 = vld [vmem:[%s812_s0] sm:$0xff]   ;;  %557 = vmatprep.subr.bf16.mxu1 %v633_v4  ;;  %v639_v8 = vld [vmem:[%s811_s4 + $0x10] sm:$0xff]   ;;  %v630_v9 = vld [vmem:[%s810_s3 + $0x28] sm:$0xff]  }
   0x4   :  { %579 = vmatprep.subr.bf16.mxu0 %v626_v1  ;;  %558 = vmatpush3.bf16.msra.mxu1 %v633_v4  ;;  %v629_v7 = vld [vmem:[%s810_s3 + $0x20] sm:$0xff]   ;;  %v641_v10 = vld [vmem:[%s811_s4 + $0x18] sm:$0xff]   ;;  %v631_v11 = vld [vmem:[%s810_s3 + $0x30] sm:$0xff]  }
   0x5   :  { %593 = vmatprep.mubr.bf16.mxu0 %v634_v5  ;;  %559 = vmatprep.subr.bf16.mxu1 %v636_v6  ;;  %v643_v12 = vld [vmem:[%s811_s4 + $0x20] sm:$0xff]   ;;  %v632_v13 = vld [vmem:[%s810_s3 + $0x38] sm:$0xff]   ;;  %v645_v14 = vld [vmem:[%s811_s4 + $0x28] sm:$0xff]  }
   0x6   :  { %v650_v15 = vld [vmem:[%s814_s1] sm:$0xff]   ;;  %v647_v17 = vld [vmem:[%s811_s4 + $0x30] sm:$0xff]   ;;  %v637_v18 = vld [vmem:[%s812_s0 + $0x8] sm:$0xff]  }
   0x7   :  { %580 = vmatpush3.bf16.msra.mxu0 %v626_v1  ;;  %v635_v16 = vld [vmem:[%s813_s5] sm:$0xff]   ;;  %573 = vmatprep.mubr.bf16.mxu1 %v650_v15  ;;  %v638_v19 = vld [vmem:[%s813_s5 + $0x8] sm:$0xff]   ;;  %v649_v20 = vld [vmem:[%s811_s4 + $0x38] sm:$0xff]  }
   0x8   :  { %581 = vmatprep.subr.bf16.mxu0 %v627_v2  ;;  %560 = vmatpush3.bf16.msra.mxu1 %v636_v6  ;;  %v653_v21 = vld [vmem:[%s815_s2] sm:$0xff]   ;;  %v640_v22 = vld [vmem:[%s813_s5 + $0x10] sm:$0xff]   ;;  %v652_v23 = vld [vmem:[%s814_s1 + $0x8] sm:$0xff]  }
   0x9   :  { %561 = vmatprep.subr.bf16.mxu1 %v639_v8  ;;  %v642_v24 = vld [vmem:[%s813_s5 + $0x18] sm:$0xff]   ;;  %v644_v25 = vld [vmem:[%s813_s5 + $0x20] sm:$0xff]   ;;  %v646_v26 = vld [vmem:[%s813_s5 + $0x28] sm:$0xff]  }
   0xa   :  { %v648_v27 = vld [vmem:[%s813_s5 + $0x30] sm:$0xff]   ;;  %v651_v28 = vld [vmem:[%s813_s5 + $0x38] sm:$0xff]   ;;  %v654_v29 = vld [vmem:[%s815_s2 + $0x8] sm:$0xff]  }
   0xb   :  { %582 = vmatpush3.bf16.msra.mxu0 %v627_v2  ;;  %v507_v35 = vld [vmem:[%s816_s6] ss:$0 sm:$0xff] }
   0xc   :  { %583 = vmatprep.subr.bf16.mxu0 %v628_v3  ;;  %562 = vmatpush3.bf16.msra.mxu1 %v639_v8 }
   0xd   :  { %563 = vmatprep.subr.bf16.mxu1 %v641_v10 }
   0xf   :  { %584 = vmatpush3.bf16.msra.mxu0 %v628_v3 }
  0x10   :  { %585 = vmatprep.subr.bf16.mxu0 %v629_v7  ;;  %564 = vmatpush3.bf16.msra.mxu1 %v641_v10 }
  0x11   :  { %565 = vmatprep.subr.bf16.mxu1 %v643_v12 }
  0x13   :  { %586 = vmatpush3.bf16.msra.mxu0 %v629_v7 }
  0x14   :  { %587 = vmatprep.subr.bf16.mxu0 %v630_v9  ;;  %566 = vmatpush3.bf16.msra.mxu1 %v643_v12 }
  0x15   :  { %567 = vmatprep.subr.bf16.mxu1 %v645_v14 }
  0x17   :  { %588 = vmatpush3.bf16.msra.mxu0 %v630_v9 }
  0x18   :  { %589 = vmatprep.subr.bf16.mxu0 %v631_v11  ;;  %568 = vmatpush3.bf16.msra.mxu1 %v645_v14 }
  0x19   :  { %569 = vmatprep.subr.bf16.mxu1 %v647_v17 }
  0x1b   :  { %590 = vmatpush3.bf16.msra.mxu0 %v631_v11 }
  0x1c   :  { %591 = vmatprep.subr.bf16.mxu0 %v632_v13  ;;  %570 = vmatpush3.bf16.msra.mxu1 %v647_v17 }
  0x1d   :  { %571 = vmatprep.subr.bf16.mxu1 %v649_v20 }
  0x1f   :  { %592 = vmatpush3.bf16.msra.mxu0 %v632_v13 }
  0x20   :  { %597 = vmatprep.subr.bf16.mxu0 %v635_v16  ;;  %572 = vmatpush3.bf16.msra.mxu1 %v649_v20 }
  0x22   :  { %594 = vmatmul.mubr.bf16.vlgmr.msra.gmra.mrb[0].mxu0 %v637_v18 }
  0x23   :  { %598 = vmatpush3.bf16.msra.mxu0 %v635_v16  ;;  %613 = vmatprep.mubr.bf16.mxu0 %v653_v21 }
  0x24   :  { %599 = vmatprep.subr.bf16.mxu0 %v638_v19  ;;  %574 = vmatmul.mubr.bf16.vlgmr.msra.gmra.mrb[0].mxu1 %v652_v23 }
  0x27   :  { %600 = vmatpush3.bf16.msra.mxu0 %v638_v19 }
  0x28   :  { %601 = vmatprep.subr.bf16.mxu0 %v640_v22 }
  0x2b   :  { %602 = vmatpush3.bf16.msra.mxu0 %v640_v22 }
  0x2c   :  { %603 = vmatprep.subr.bf16.mxu0 %v642_v24 }
  0x2f   :  { %604 = vmatpush3.bf16.msra.mxu0 %v642_v24 }
  0x30   :  { %605 = vmatprep.subr.bf16.mxu0 %v644_v25 }
  0x33   :  { %606 = vmatpush3.bf16.msra.mxu0 %v644_v25 }
  0x34   :  { %607 = vmatprep.subr.bf16.mxu0 %v646_v26 }
  0x37   :  { %608 = vmatpush3.bf16.msra.mxu0 %v646_v26 }
  0x38   :  { %609 = vmatprep.subr.bf16.mxu0 %v648_v27 }
  0x3b   :  { %610 = vmatpush3.bf16.msra.mxu0 %v648_v27 }
  0x3c   :  { %611 = vmatprep.subr.bf16.mxu0 %v651_v28 }
  0x3f   :  { %612 = vmatpush3.bf16.msra.mxu0 %v651_v28 }
  0x42   :  { %614 = vmatmul.mubr.bf16.vlgmr.msra.gmra.mrb[0].mxu0 %v654_v29 }
  0xf7   :  { %v575_v30 = vpop.f32.mrb[0].mxu1 }
  0xf8   :  { %v161_v31 = vpop.f32.mrb[1].mxu1 }
  0xf9   :  { %v576_v32 = vpop.f32.mrb[2].mxu1 }
  0xfa   :  { %v164_v33 = vpop.f32.mrb[3].mxu1 }
 0x115   :  { %v615_v34 = vpop.f32.mrb[0].mxu0 }
 0x116   :  { %v617_v36 = vadd.f32 %v615_v34, %v575_v30  ;;  %v399_v37 = vpop.f32.mrb[1].mxu0 }
 0x117   :  { %v618_v38 = vadd.f32 %v399_v37, %v161_v31  ;;  %v616_v39 = vpop.f32.mrb[2].mxu0 }
 0x118   :  { %v427_v40 = vadd.f32 %v617_v36, %v507_v35  ;;  %v619_v41 = vadd.f32 %v616_v39, %v576_v32  ;;  %v402_v42 = vpop.f32.mrb[3].mxu0 }
 0x119   :  { %v425_v43 = vadd.f32 %v618_v38, %v507_v35  ;;  %v620_v44 = vadd.f32 %v402_v42, %v164_v33 }
 0x11a   :  { %v431_v45 = vsub.f32 0.0, %v427_v40  ;;  %v428_v46 = vadd.f32 %v619_v41, %v507_v35 }
 0x11b   :  { %v429_v47 = vsub.f32 0.0, %v425_v43  ;;  %v426_v48 = vadd.f32 %v620_v44, %v507_v35 }
 0x11c   :  { %v437_v49 = vmul.f32 1.442695, %v431_v45  ;;  %v432_v50 = vsub.f32 0.0, %v428_v46 }
 0x11d   :  { %v433_v51 = vmul.f32 1.442695, %v429_v47  ;;  %v430_v52 = vsub.f32 0.0, %v426_v48 }
 0x11e   :  { %655 = vpow2.f32 %v437_v49  ;;  %v439_v53 = vmul.f32 1.442695, %v432_v50 }
 0x11f   :  { %657 = vpow2.f32 %v433_v51  ;;  %v435_v54 = vmul.f32 1.442695, %v430_v52 }
 0x120   :  { %659 = vpow2.f32 %v439_v53 }
 0x121   :  { %661 = vpow2.f32 %v435_v54 }
 0x128   :  { %v656_v55 = vpop.eup %655 }
 0x129   :  { %v658_v56 = vpop.eup %657  ;;  %v443_v57 = vadd.f32 1.0, %v656_v55 }
 0x12a   :  { %v660_v58 = vpop.eup %659  ;;  %v441_v59 = vadd.f32 1.0, %v658_v56 }
 0x12b   :  { %v662_v60 = vpop.eup %661  ;;  %663 = vrcp.f32 %v443_v57  ;;  %v444_v61 = vadd.f32 1.0, %v660_v58 }
 0x12c   :  { %665 = vrcp.f32 %v441_v59  ;;  %v442_v62 = vadd.f32 1.0, %v662_v60 }
 0x12d   :  { %667 = vrcp.f32 %v444_v61 }
 0x12e   :  { %669 = vrcp.f32 %v442_v62 }
 0x135   :  { %v664_v63 = vpop.eup %663 }
 0x136   :  { %v666_v0 = vpop.eup %665  ;;  %v451_v3 = vmul.f32 %v664_v63, %v427_v40 }
 0x137   :  { %v668_v1 = vpop.eup %667  ;;  %v449_v5 = vmul.f32 %v666_v0, %v425_v43 }
 0x138   :  { %v670_v2 = vpop.eup %669  ;;  %v452_v4 = vmul.f32 %v668_v1, %v428_v46 }
 0x139   :  { %v450_v6 = vmul.f32 %v670_v2, %v426_v48 }
 0x13a   :  { %v524_v7 = vpack.c.bf16 %v452_v4, %v451_v3 }
 0x13b   :  { %v519_v8 = vpack.c.bf16 %v450_v6, %v449_v5 }
 0x13c   :  { %526 = vst [vmem:[%s817_s7 + $0x8] sm:$0xff] %v524_v7  }
 0x13d   :  { %520 = vst [vmem:[%s817_s7] sm:$0xff] %v519_v8  }

// kernel: neck_forward.31
= control target key start
LH: loop header
LB: loop body
LE: loop exit
PB: predicated region body
PF: predicated region fallthrough
CT: control target
= control target key end

     0   :  { %s2208_s10 = inlined_call_operand.vmem [shape: bf16[128,128], index: 10, kind: input, shape index: {}]   ;;  %s2209_s13 = inlined_call_operand.vmem [shape: bf16[128,128], index: 13, kind: input, shape index: {}]   ;;  %s2210_s1 = inlined_call_operand.vmem [shape: bf16[32,128], index: 1, kind: input, shape index: {}]   ;;  %s2211_s4 = inlined_call_operand.vmem [shape: bf16[32,128], index: 4, kind: input, shape index: {}]   ;;  %s2212_s9 = inlined_call_operand.vmem [shape: bf16[128,128], index: 9, kind: input, shape index: {}]   ;;  %s2213_s14 = inlined_call_operand.vmem [shape: bf16[128,128], index: 14, kind: input, shape index: {}]   ;;  %s2214_s0 = inlined_call_operand.vmem [shape: bf16[32,128], index: 0, kind: input, shape index: {}]   ;;  %s2215_s5 = inlined_call_operand.vmem [shape: bf16[32,128], index: 5, kind: input, shape index: {}]   ;;  %s2216_s11 = inlined_call_operand.vmem [shape: bf16[128,128], index: 11, kind: input, shape index: {}]   ;;  %s2217_s15 = inlined_call_operand.vmem [shape: bf16[128,128], index: 15, kind: input, shape index: {}]   ;;  %s2218_s2 = inlined_call_operand.vmem [shape: bf16[32,128], index: 2, kind: input, shape index: {}]   ;;  %s2219_s12 = inlined_call_operand.vmem [shape: bf16[128,128], index: 12, kind: input, shape index: {}]   ;;  %s2220_s6 = inlined_call_operand.vmem [shape: bf16[32,128], index: 6, kind: input, shape index: {}]   ;;  %s2221_s16 = inlined_call_operand.vmem [shape: bf16[128,128], index: 16, kind: input, shape index: {}]   ;;  %s2222_s3 = inlined_call_operand.vmem [shape: bf16[32,128], index: 3, kind: input, shape index: {}]   ;;  %s2223_s7 = inlined_call_operand.vmem [shape: bf16[32,128], index: 7, kind: input, shape index: {}]   ;;  %s2224_s17 = inlined_call_operand.vmem [shape: bf16[128,128], index: 17, kind: input, shape index: {}]   ;;  %s2225_s8 = inlined_call_operand.vmem [shape: bf16[32,128], index: 8, kind: input, shape index: {}]   ;;  %s2226_s18 = inlined_call_operand.vmem [shape: f32[1,128], index: 18, kind: input, shape index: {}]   ;;  %s2227_s19 = inlined_call_operand.vmem [shape: bf16[32,128], index: 19, kind: output, shape index: {}]  }
   0x1   :  { %2233 = sst [smem:[#allocation2_spill]] %s2208_s10  ;;  %v1740_v18 = vld [vmem:[%s2212_s9] sm:$0xff]   ;;  %v1745_v22 = vld [vmem:[%s2212_s9 + $0x8] sm:$0xff]   ;;  %v1747_v24 = vld [vmem:[%s2212_s9 + $0x10] sm:$0xff]  }
   0x2   :  { %2234 = sst [smem:[#allocation3_spill]] %s2209_s13  ;;  %s2238_s20 = sld [smem:[#allocation2_spill]]  ;;  %v1742_v19 = vld [vmem:[%s2213_s14] sm:$0xff]   ;;  %v1746_v23 = vld [vmem:[%s2213_s14 + $0x8] sm:$0xff]   ;;  %v1748_v26 = vld [vmem:[%s2213_s14 + $0x10] sm:$0xff]  }
   0x3   :  { %2235 = sst [smem:[#allocation4_spill]] %s2210_s1  ;;  %v1759_v25 = vld [vmem:[%s2214_s0] sm:$0xff]   ;;  %v1749_v28 = vld [vmem:[%s2212_s9 + $0x18] sm:$0xff]   ;;  %v1753_v32 = vld [vmem:[%s2212_s9 + $0x28] sm:$0xff]  }
   0x4   :  { %2236 = sst [smem:[#allocation5_spill]] %s2211_s4  ;;  %s2240_s26 = sld [smem:[#allocation4_spill]]  ;;  %v1761_v27 = vld [vmem:[%s2215_s5] sm:$0xff]   ;;  %v1750_v29 = vld [vmem:[%s2213_s14 + $0x18] sm:$0xff]   ;;  %v1754_v33 = vld [vmem:[%s2213_s14 + $0x28] sm:$0xff]  }
   0x5   :  { %2237 = sst [smem:[#allocation6_spill]] %s2222_s3  ;;  %s2239_s3 = sld [smem:[#allocation3_spill]]  ;;  %v1751_v30 = vld [vmem:[%s2212_s9 + $0x20] sm:$0xff]   ;;  %v1755_v34 = vld [vmem:[%s2212_s9 + $0x30] sm:$0xff]   ;;  %v1757_v36 = vld [vmem:[%s2212_s9 + $0x38] sm:$0xff]  }
   0x6   :  { %s2241_s30 = sld [smem:[#allocation5_spill]]  ;;  %v1752_v31 = vld [vmem:[%s2213_s14 + $0x20] sm:$0xff]   ;;  %v1756_v35 = vld [vmem:[%s2213_s14 + $0x30] sm:$0xff]   ;;  %v1758_v37 = vld [vmem:[%s2213_s14 + $0x38] sm:$0xff]   ;;  %s2242_s29 = sld [smem:[#allocation6_spill]] }
   0x7   :  { %v1760_v38 = vld [vmem:[%s2216_s11] sm:$0xff]   ;;  %v1763_v40 = vld [vmem:[%s2214_s0 + $0x8] sm:$0xff]   ;;  %v1767_v46 = vld [vmem:[%s2216_s11 + $0x10] sm:$0xff]  }
   0x8   :  { %v1723_v0 = vld [vmem:[%s2238_s20] sm:$0xff]   ;;  %v1725_v2 = vld [vmem:[%s2238_s20 + $0x8] sm:$0xff]   ;;  %v1727_v4 = vld [vmem:[%s2238_s20 + $0x10] sm:$0xff]  }
   0x9   :  { %1511 = vmatprep.subr.bf16.mxu1 %v1723_v0  ;;  %v1729_v6 = vld [vmem:[%s2238_s20 + $0x18] sm:$0xff]   ;;  %v1731_v8 = vld [vmem:[%s2238_s20 + $0x20] sm:$0xff]   ;;  %v1733_v10 = vld [vmem:[%s2238_s20 + $0x28] sm:$0xff]  }
   0xa   :  { %1512 = vmatpush3.bf16.msra.mxu1 %v1723_v0  ;;  %v1739_v11 = vld [vmem:[%s2240_s26] sm:$0xff]   ;;  %v1735_v14 = vld [vmem:[%s2238_s20 + $0x30] sm:$0xff]   ;;  %v1737_v16 = vld [vmem:[%s2238_s20 + $0x38] sm:$0xff]  }
   0xb   :  { %v1724_v1 = vld [vmem:[%s2239_s3] sm:$0xff]   ;;  %v1726_v3 = vld [vmem:[%s2239_s3 + $0x8] sm:$0xff]   ;;  %1513 = vmatprep.subr.bf16.mxu1 %v1725_v2  ;;  %v1728_v5 = vld [vmem:[%s2239_s3 + $0x10] sm:$0xff]   ;;  %1527 = vmatprep.mubr.bf16.mxu1 %v1739_v11 }
   0xc   :  { %1591 = vmatprep.subr.bf16.mxu0 %v1724_v1  ;;  %v1730_v7 = vld [vmem:[%s2239_s3 + $0x18] sm:$0xff]   ;;  %v1732_v9 = vld [vmem:[%s2239_s3 + $0x20] sm:$0xff]   ;;  %v1734_v12 = vld [vmem:[%s2239_s3 + $0x28] sm:$0xff]  }
   0xd   :  { %1592 = vmatpush3.bf16.msra.mxu0 %v1724_v1  ;;  %v1741_v13 = vld [vmem:[%s2241_s30] sm:$0xff]   ;;  %v1736_v15 = vld [vmem:[%s2239_s3 + $0x30] sm:$0xff]   ;;  %v1738_v17 = vld [vmem:[%s2239_s3 + $0x38] sm:$0xff]  }
   0xe   :  { %1593 = vmatprep.subr.bf16.mxu0 %v1726_v3  ;;  %1514 = vmatpush3.bf16.msra.mxu1 %v1725_v2  ;;  %v1743_v20 = vld [vmem:[%s2240_s26 + $0x8] sm:$0xff]   ;;  %v1762_v39 = vld [vmem:[%s2217_s15] sm:$0xff]   ;;  %v1768_v47 = vld [vmem:[%s2217_s15 + $0x10] sm:$0xff]  }
   0xf   :  { %1515 = vmatprep.subr.bf16.mxu1 %v1727_v4  ;;  %1607 = vmatprep.mubr.bf16.mxu0 %v1741_v13  ;;  %v1744_v21 = vld [vmem:[%s2241_s30 + $0x8] sm:$0xff]   ;;  %v1779_v44 = vld [vmem:[%s2218_s2] sm:$0xff]   ;;  %v1769_v48 = vld [vmem:[%s2216_s11 + $0x18] sm:$0xff]  }
  0x10   :  { %v1764_v41 = vld [vmem:[%s2215_s5 + $0x8] sm:$0xff]   ;;  %v1781_v45 = vld [vmem:[%s2220_s6] sm:$0xff]   ;;  %v1770_v49 = vld [vmem:[%s2217_s15 + $0x18] sm:$0xff]  }
  0x11   :  { %1594 = vmatpush3.bf16.msra.mxu0 %v1726_v3  ;;  %v1765_v42 = vld [vmem:[%s2216_s11 + $0x8] sm:$0xff]   ;;  %v1771_v50 = vld [vmem:[%s2216_s11 + $0x20] sm:$0xff]   ;;  %v1775_v54 = vld [vmem:[%s2216_s11 + $0x30] sm:$0xff]  }
  0x12   :  { %1595 = vmatprep.subr.bf16.mxu0 %v1728_v5  ;;  %1516 = vmatpush3.bf16.msra.mxu1 %v1727_v4  ;;  %v1766_v43 = vld [vmem:[%s2217_s15 + $0x8] sm:$0xff]   ;;  %v1772_v51 = vld [vmem:[%s2217_s15 + $0x20] sm:$0xff]   ;;  %v1776_v55 = vld [vmem:[%s2217_s15 + $0x30] sm:$0xff]  }
  0x13   :  { %1517 = vmatprep.subr.bf16.mxu1 %v1729_v6  ;;  %v1773_v52 = vld [vmem:[%s2216_s11 + $0x28] sm:$0xff]   ;;  %v1777_v56 = vld [vmem:[%s2216_s11 + $0x38] sm:$0xff]   ;;  %v1780_v58 = vld [vmem:[%s2219_s12] sm:$0xff]  }
  0x14   :  { %v1774_v53 = vld [vmem:[%s2217_s15 + $0x28] sm:$0xff]   ;;  %v1778_v57 = vld [vmem:[%s2217_s15 + $0x38] sm:$0xff]   ;;  %v1782_v59 = vld [vmem:[%s2221_s16] sm:$0xff]  }
  0x15   :  { %1596 = vmatpush3.bf16.msra.mxu0 %v1728_v5  ;;  %v1783_v60 = vld [vmem:[%s2218_s2 + $0x8] sm:$0xff]   ;;  %v1799_v0 = vld [vmem:[%s2242_s29] sm:$0xff]   ;;  %v1787_v2 = vld [vmem:[%s2219_s12 + $0x10] sm:$0xff]  }
  0x16   :  { %1597 = vmatprep.subr.bf16.mxu0 %v1730_v7  ;;  %1518 = vmatpush3.bf16.msra.mxu1 %v1729_v6  ;;  %v1784_v61 = vld [vmem:[%s2220_s6 + $0x8] sm:$0xff]   ;;  %v1801_v1 = vld [vmem:[%s2223_s7] sm:$0xff]   ;;  %v1788_v3 = vld [vmem:[%s2221_s16 + $0x10] sm:$0xff]  }
  0x17   :  { %1519 = vmatprep.subr.bf16.mxu1 %v1731_v8  ;;  %v1785_v62 = vld [vmem:[%s2219_s12 + $0x8] sm:$0xff]   ;;  %v1789_v4 = vld [vmem:[%s2219_s12 + $0x18] sm:$0xff]   ;;  %v1791_v6 = vld [vmem:[%s2219_s12 + $0x20] sm:$0xff]  }
  0x18   :  { %v1786_v63 = vld [vmem:[%s2221_s16 + $0x8] sm:$0xff]   ;;  %v1790_v5 = vld [vmem:[%s2221_s16 + $0x18] sm:$0xff]   ;;  %v1796_v11 = vld [vmem:[%s2221_s16 + $0x30] sm:$0xff]  }
  0x19   :  { %1598 = vmatpush3.bf16.msra.mxu0 %v1730_v7  ;;  %v1792_v7 = vld [vmem:[%s2221_s16 + $0x20] sm:$0xff]   ;;  %v1798_v13 = vld [vmem:[%s2221_s16 + $0x38] sm:$0xff]  }
  0x1a   :  { %1599 = vmatprep.subr.bf16.mxu0 %v1732_v9  ;;  %1520 = vmatpush3.bf16.msra.mxu1 %v1731_v8  ;;  %v1793_v8 = vld [vmem:[%s2219_s12 + $0x28] sm:$0xff]  }
  0x1b   :  { %1521 = vmatprep.subr.bf16.mxu1 %v1733_v10 }
  0x1d   :  { %1600 = vmatpush3.bf16.msra.mxu0 %v1732_v9  ;;  %v1794_v9 = vld [vmem:[%s2221_s16 + $0x28] sm:$0xff]  }
  0x1e   :  { %1601 = vmatprep.subr.bf16.mxu0 %v1734_v12  ;;  %1522 = vmatpush3.bf16.msra.mxu1 %v1733_v10  ;;  %v1795_v10 = vld [vmem:[%s2219_s12 + $0x30] sm:$0xff]  }
  0x1f   :  { %1523 = vmatprep.subr.bf16.mxu1 %v1735_v14 }
  0x21   :  { %1602 = vmatpush3.bf16.msra.mxu0 %v1734_v12  ;;  %v1797_v12 = vld [vmem:[%s2219_s12 + $0x38] sm:$0xff]  }
  0x22   :  { %1603 = vmatprep.subr.bf16.mxu0 %v1736_v15  ;;  %1524 = vmatpush3.bf16.msra.mxu1 %v1735_v14  ;;  %v1802_v14 = vld [vmem:[%s2224_s17] sm:$0xff]  }
  0x23   :  { %1525 = vmatprep.subr.bf16.mxu1 %v1737_v16 }
  0x25   :  { %1604 = vmatpush3.bf16.msra.mxu0 %v1736_v15  ;;  %v1800_v15 = vld [vmem:[%s2242_s29 + $0x8] sm:$0xff]  }
  0x26   :  { %1605 = vmatprep.subr.bf16.mxu0 %v1738_v17  ;;  %1526 = vmatpush3.bf16.msra.mxu1 %v1737_v16  ;;  %v1803_v16 = vld [vmem:[%s2223_s7 + $0x8] sm:$0xff]  }
  0x27   :  { %1531 = vmatprep.subr.bf16.mxu1 %v1740_v18 }
  0x29   :  { %1606 = vmatpush3.bf16.msra.mxu0 %v1738_v17  ;;  %1528 = vmatmul.mubr.bf16.vlgmr.msra.gmra.mrb[0].mxu1 %v1743_v20  ;;  %v1811_v17 = vld [vmem:[%s2225_s8] sm:$0xff]   ;;  %v1806_v20 = vld [vmem:[%s2224_s17 + $0x18] sm:$0xff]  }
  0x2a   :  { %1611 = vmatprep.subr.bf16.mxu0 %v1742_v19  ;;  %1532 = vmatpush3.bf16.msra.mxu1 %v1740_v18  ;;  %v1804_v18 = vld [vmem:[%s2224_s17 + $0x8] sm:$0xff]  }
  0x2b   :  { %1533 = vmatprep.subr.bf16.mxu1 %v1745_v22  ;;  %1547 = vmatprep.mubr.bf16.mxu1 %v1759_v25  ;;  %v1812_v25 = vld [vmem:[%s2225_s8 + $0x8] sm:$0xff]  }
  0x2c   :  { %1608 = vmatmul.mubr.bf16.vlgmr.msra.gmra.mrb[0].mxu0 %v1744_v21  ;;  %v1807_v21 = vld [vmem:[%s2224_s17 + $0x20] sm:$0xff]  }
  0x2d   :  { %1612 = vmatpush3.bf16.msra.mxu0 %v1742_v19  ;;  %1627 = vmatprep.mubr.bf16.mxu0 %v1761_v27  ;;  %v1805_v19 = vld [vmem:[%s2224_s17 + $0x10] sm:$0xff]  }
  0x2e   :  { %1613 = vmatprep.subr.bf16.mxu0 %v1746_v23  ;;  %1534 = vmatpush3.bf16.msra.mxu1 %v1745_v22  ;;  %v1808_v22 = vld [vmem:[%s2224_s17 + $0x28] sm:$0xff]  }
  0x2f   :  { %1535 = vmatprep.subr.bf16.mxu1 %v1747_v24 }
  0x31   :  { %1614 = vmatpush3.bf16.msra.mxu0 %v1746_v23  ;;  %v1809_v23 = vld [vmem:[%s2224_s17 + $0x30] sm:$0xff]  }
  0x32   :  { %1615 = vmatprep.subr.bf16.mxu0 %v1748_v26  ;;  %1536 = vmatpush3.bf16.msra.mxu1 %v1747_v24  ;;  %v1810_v24 = vld [vmem:[%s2224_s17 + $0x38] sm:$0xff]  }
  0x33   :  { %1537 = vmatprep.subr.bf16.mxu1 %v1749_v28 }
  0x35   :  { %1616 = vmatpush3.bf16.msra.mxu0 %v1748_v26 }
  0x36   :  { %1617 = vmatprep.subr.bf16.mxu0 %v1750_v29  ;;  %1538 = vmatpush3.bf16.msra.mxu1 %v1749_v28 }
  0x37   :  { %1539 = vmatprep.subr.bf16.mxu1 %v1751_v30 }
  0x39   :  { %1618 = vmatpush3.bf16.msra.mxu0 %v1750_v29 }
  0x3a   :  { %1619 = vmatprep.subr.bf16.mxu0 %v1752_v31  ;;  %1540 = vmatpush3.bf16.msra.mxu1 %v1751_v30 }
  0x3b   :  { %1541 = vmatprep.subr.bf16.mxu1 %v1753_v32 }
  0x3d   :  { %1620 = vmatpush3.bf16.msra.mxu0 %v1752_v31  ;;  %v1401_v31 = vld [vmem:[%s2226_s18] ss:$0 sm:$0xff] }
  0x3e   :  { %1621 = vmatprep.subr.bf16.mxu0 %v1754_v33  ;;  %1542 = vmatpush3.bf16.msra.mxu1 %v1753_v32 }
  0x3f   :  { %1543 = vmatprep.subr.bf16.mxu1 %v1755_v34 }
  0x41   :  { %1622 = vmatpush3.bf16.msra.mxu0 %v1754_v33 }
  0x42   :  { %1623 = vmatprep.subr.bf16.mxu0 %v1756_v35  ;;  %1544 = vmatpush3.bf16.msra.mxu1 %v1755_v34 }
  0x43   :  { %1545 = vmatprep.subr.bf16.mxu1 %v1757_v36 }
  0x45   :  { %1624 = vmatpush3.bf16.msra.mxu0 %v1756_v35 }
  0x46   :  { %1625 = vmatprep.subr.bf16.mxu0 %v1758_v37  ;;  %1546 = vmatpush3.bf16.msra.mxu1 %v1757_v36 }
  0x47   :  { %1551 = vmatprep.subr.bf16.mxu1 %v1760_v38 }
  0x49   :  { %1626 = vmatpush3.bf16.msra.mxu0 %v1758_v37  ;;  %1548 = vmatmul.mubr.bf16.vlgmr.msra.gmra.mrb[0].mxu1 %v1763_v40 }
  0x4a   :  { %1631 = vmatprep.subr.bf16.mxu0 %v1762_v39  ;;  %1552 = vmatpush3.bf16.msra.mxu1 %v1760_v38 }
  0x4b   :  { %1553 = vmatprep.subr.bf16.mxu1 %v1765_v42  ;;  %1567 = vmatprep.mubr.bf16.mxu1 %v1779_v44 }
  0x4c   :  { %1628 = vmatmul.mubr.bf16.vlgmr.msra.gmra.mrb[0].mxu0 %v1764_v41 }
  0x4d   :  { %1632 = vmatpush3.bf16.msra.mxu0 %v1762_v39  ;;  %1647 = vmatprep.mubr.bf16.mxu0 %v1781_v45 }
  0x4e   :  { %1633 = vmatprep.subr.bf16.mxu0 %v1766_v43  ;;  %1554 = vmatpush3.bf16.msra.mxu1 %v1765_v42 }
  0x4f   :  { %1555 = vmatprep.subr.bf16.mxu1 %v1767_v46 }
  0x51   :  { %1634 = vmatpush3.bf16.msra.mxu0 %v1766_v43 }
  0x52   :  { %1635 = vmatprep.subr.bf16.mxu0 %v1768_v47  ;;  %1556 = vmatpush3.bf16.msra.mxu1 %v1767_v46 }
  0x53   :  { %1557 = vmatprep.subr.bf16.mxu1 %v1769_v48 }
  0x55   :  { %1636 = vmatpush3.bf16.msra.mxu0 %v1768_v47 }
  0x56   :  { %1637 = vmatprep.subr.bf16.mxu0 %v1770_v49  ;;  %1558 = vmatpush3.bf16.msra.mxu1 %v1769_v48 }
  0x57   :  { %1559 = vmatprep.subr.bf16.mxu1 %v1771_v50 }
  0x59   :  { %1638 = vmatpush3.bf16.msra.mxu0 %v1770_v49 }
  0x5a   :  { %1639 = vmatprep.subr.bf16.mxu0 %v1772_v51  ;;  %1560 = vmatpush3.bf16.msra.mxu1 %v1771_v50 }
  0x5b   :  { %1561 = vmatprep.subr.bf16.mxu1 %v1773_v52 }
  0x5d   :  { %1640 = vmatpush3.bf16.msra.mxu0 %v1772_v51 }
  0x5e   :  { %1641 = vmatprep.subr.bf16.mxu0 %v1774_v53  ;;  %1562 = vmatpush3.bf16.msra.mxu1 %v1773_v52 }
  0x5f   :  { %1563 = vmatprep.subr.bf16.mxu1 %v1775_v54 }
  0x61   :  { %1642 = vmatpush3.bf16.msra.mxu0 %v1774_v53 }
  0x62   :  { %1643 = vmatprep.subr.bf16.mxu0 %v1776_v55  ;;  %1564 = vmatpush3.bf16.msra.mxu1 %v1775_v54 }
  0x63   :  { %1565 = vmatprep.subr.bf16.mxu1 %v1777_v56 }
  0x65   :  { %1644 = vmatpush3.bf16.msra.mxu0 %v1776_v55 }
  0x66   :  { %1645 = vmatprep.subr.bf16.mxu0 %v1778_v57  ;;  %1566 = vmatpush3.bf16.msra.mxu1 %v1777_v56 }
  0x67   :  { %1571 = vmatprep.subr.bf16.mxu1 %v1780_v58 }
  0x69   :  { %1646 = vmatpush3.bf16.msra.mxu0 %v1778_v57  ;;  %1568 = vmatmul.mubr.bf16.vlgmr.msra.gmra.mrb[0].mxu1 %v1783_v60 }
  0x6a   :  { %1651 = vmatprep.subr.bf16.mxu0 %v1782_v59  ;;  %1572 = vmatpush3.bf16.msra.mxu1 %v1780_v58 }
  0x6b   :  { %1573 = vmatprep.subr.bf16.mxu1 %v1785_v62  ;;  %1587 = vmatprep.mubr.bf16.mxu1 %v1799_v0 }
  0x6c   :  { %1648 = vmatmul.mubr.bf16.vlgmr.msra.gmra.mrb[0].mxu0 %v1784_v61 }
  0x6d   :  { %1652 = vmatpush3.bf16.msra.mxu0 %v1782_v59  ;;  %1667 = vmatprep.mubr.bf16.mxu0 %v1801_v1 }
  0x6e   :  { %1653 = vmatprep.subr.bf16.mxu0 %v1786_v63  ;;  %1574 = vmatpush3.bf16.msra.mxu1 %v1785_v62 }
  0x6f   :  { %1575 = vmatprep.subr.bf16.mxu1 %v1787_v2 }
  0x71   :  { %1654 = vmatpush3.bf16.msra.mxu0 %v1786_v63 }
  0x72   :  { %1655 = vmatprep.subr.bf16.mxu0 %v1788_v3  ;;  %1576 = vmatpush3.bf16.msra.mxu1 %v1787_v2 }
  0x73   :  { %1577 = vmatprep.subr.bf16.mxu1 %v1789_v4 }
  0x75   :  { %1656 = vmatpush3.bf16.msra.mxu0 %v1788_v3 }
  0x76   :  { %1657 = vmatprep.subr.bf16.mxu0 %v1790_v5  ;;  %1578 = vmatpush3.bf16.msra.mxu1 %v1789_v4 }
  0x77   :  { %1579 = vmatprep.subr.bf16.mxu1 %v1791_v6 }
  0x79   :  { %1658 = vmatpush3.bf16.msra.mxu0 %v1790_v5 }
  0x7a   :  { %1659 = vmatprep.subr.bf16.mxu0 %v1792_v7  ;;  %1580 = vmatpush3.bf16.msra.mxu1 %v1791_v6 }
  0x7b   :  { %1581 = vmatprep.subr.bf16.mxu1 %v1793_v8 }
  0x7d   :  { %1660 = vmatpush3.bf16.msra.mxu0 %v1792_v7 }
  0x7e   :  { %1661 = vmatprep.subr.bf16.mxu0 %v1794_v9  ;;  %1582 = vmatpush3.bf16.msra.mxu1 %v1793_v8 }
  0x7f   :  { %1583 = vmatprep.subr.bf16.mxu1 %v1795_v10 }
  0x81   :  { %1662 = vmatpush3.bf16.msra.mxu0 %v1794_v9 }
  0x82   :  { %1663 = vmatprep.subr.bf16.mxu0 %v1796_v11  ;;  %1584 = vmatpush3.bf16.msra.mxu1 %v1795_v10 }
  0x83   :  { %1585 = vmatprep.subr.bf16.mxu1 %v1797_v12 }
  0x85   :  { %1664 = vmatpush3.bf16.msra.mxu0 %v1796_v11 }
  0x86   :  { %1665 = vmatprep.subr.bf16.mxu0 %v1798_v13  ;;  %1586 = vmatpush3.bf16.msra.mxu1 %v1797_v12 }
  0x89   :  { %1666 = vmatpush3.bf16.msra.mxu0 %v1798_v13  ;;  %1588 = vmatmul.mubr.bf16.vlgmr.msra.gmra.mrb[0].mxu1 %v1800_v15 }
  0x8a   :  { %1671 = vmatprep.subr.bf16.mxu0 %v1802_v14 }
  0x8c   :  { %1668 = vmatmul.mubr.bf16.vlgmr.msra.gmra.mrb[0].mxu0 %v1803_v16 }
  0x8d   :  { %1672 = vmatpush3.bf16.msra.mxu0 %v1802_v14  ;;  %1687 = vmatprep.mubr.bf16.mxu0 %v1811_v17 }
  0x8e   :  { %1673 = vmatprep.subr.bf16.mxu0 %v1804_v18 }
  0x91   :  { %1674 = vmatpush3.bf16.msra.mxu0 %v1804_v18 }
  0x92   :  { %1675 = vmatprep.subr.bf16.mxu0 %v1805_v19 }
  0x95   :  { %1676 = vmatpush3.bf16.msra.mxu0 %v1805_v19 }
  0x96   :  { %1677 = vmatprep.subr.bf16.mxu0 %v1806_v20 }
  0x99   :  { %1678 = vmatpush3.bf16.msra.mxu0 %v1806_v20 }
  0x9a   :  { %1679 = vmatprep.subr.bf16.mxu0 %v1807_v21 }
  0x9d   :  { %1680 = vmatpush3.bf16.msra.mxu0 %v1807_v21 }
  0x9e   :  { %1681 = vmatprep.subr.bf16.mxu0 %v1808_v22 }
  0xa1   :  { %1682 = vmatpush3.bf16.msra.mxu0 %v1808_v22 }
  0xa2   :  { %1683 = vmatprep.subr.bf16.mxu0 %v1809_v23 }
  0xa5   :  { %1684 = vmatpush3.bf16.msra.mxu0 %v1809_v23 }
  0xa6   :  { %1685 = vmatprep.subr.bf16.mxu0 %v1810_v24 }
  0xa9   :  { %1686 = vmatpush3.bf16.msra.mxu0 %v1810_v24 }
  0xac   :  { %1688 = vmatmul.mubr.bf16.vlgmr.msra.gmra.mrb[0].mxu0 %v1812_v25 }
 0x15c   :  { %v1589_v26 = vpop.f32.mrb[0].mxu1 }
 0x15d   :  { %v568_v27 = vpop.f32.mrb[1].mxu1 }
 0x15e   :  { %v1590_v28 = vpop.f32.mrb[2].mxu1 }
 0x15f   :  { %v571_v29 = vpop.f32.mrb[3].mxu1 }
 0x17f   :  { %v1689_v30 = vpop.f32.mrb[0].mxu0 }
 0x180   :  { %v1691_v32 = vadd.f32 %v1689_v30, %v1589_v26  ;;  %v1233_v33 = vpop.f32.mrb[1].mxu0 }
 0x181   :  { %v1692_v34 = vadd.f32 %v1233_v33, %v568_v27  ;;  %v1690_v35 = vpop.f32.mrb[2].mxu0 }
 0x182   :  { %v1261_v36 = vadd.f32 %v1691_v32, %v1401_v31  ;;  %v1693_v37 = vadd.f32 %v1690_v35, %v1590_v28  ;;  %v1236_v38 = vpop.f32.mrb[3].mxu0 }
 0x183   :  { %v1259_v39 = vadd.f32 %v1692_v34, %v1401_v31  ;;  %v1694_v40 = vadd.f32 %v1236_v38, %v571_v29 }
 0x184   :  { %v1265_v41 = vsub.f32 0.0, %v1261_v36  ;;  %v1262_v42 = vadd.f32 %v1693_v37, %v1401_v31 }
 0x185   :  { %v1263_v43 = vsub.f32 0.0, %v1259_v39  ;;  %v1260_v44 = vadd.f32 %v1694_v40, %v1401_v31 }
 0x186   :  { %v1271_v45 = vmul.f32 1.442695, %v1265_v41  ;;  %v1266_v46 = vsub.f32 0.0, %v1262_v42 }
 0x187   :  { %v1267_v47 = vmul.f32 1.442695, %v1263_v43  ;;  %v1264_v48 = vsub.f32 0.0, %v1260_v44 }
 0x188   :  { %1813 = vpow2.f32 %v1271_v45  ;;  %v1273_v49 = vmul.f32 1.442695, %v1266_v46 }
 0x189   :  { %1815 = vpow2.f32 %v1267_v47  ;;  %v1269_v50 = vmul.f32 1.442695, %v1264_v48 }
 0x18a   :  { %1817 = vpow2.f32 %v1273_v49 }
 0x18b   :  { %1819 = vpow2.f32 %v1269_v50 }
 0x192   :  { %v1814_v51 = vpop.eup %1813 }
 0x193   :  { %v1816_v52 = vpop.eup %1815  ;;  %v1277_v53 = vadd.f32 1.0, %v1814_v51 }
 0x194   :  { %v1818_v54 = vpop.eup %1817  ;;  %v1275_v55 = vadd.f32 1.0, %v1816_v52 }
 0x195   :  { %v1820_v56 = vpop.eup %1819  ;;  %1821 = vrcp.f32 %v1277_v53  ;;  %v1278_v57 = vadd.f32 1.0, %v1818_v54 }
 0x196   :  { %1823 = vrcp.f32 %v1275_v55  ;;  %v1276_v58 = vadd.f32 1.0, %v1820_v56 }
 0x197   :  { %1825 = vrcp.f32 %v1278_v57 }
 0x198   :  { %1827 = vrcp.f32 %v1276_v58 }
 0x19f   :  { %v1822_v59 = vpop.eup %1821 }
 0x1a0   :  { %v1824_v60 = vpop.eup %1823  ;;  %v1285_v63 = vmul.f32 %v1822_v59, %v1261_v36 }
 0x1a1   :  { %v1826_v61 = vpop.eup %1825  ;;  %v1283_v1 = vmul.f32 %v1824_v60, %v1259_v39 }
 0x1a2   :  { %v1828_v62 = vpop.eup %1827  ;;  %v1286_v0 = vmul.f32 %v1826_v61, %v1262_v42 }
 0x1a3   :  { %v1284_v2 = vmul.f32 %v1828_v62, %v1260_v44 }
 0x1a4   :  { %v1418_v3 = vpack.c.bf16 %v1286_v0, %v1285_v63 }
 0x1a5   :  { %v1413_v4 = vpack.c.bf16 %v1284_v2, %v1283_v1 }
 0x1a6   :  { %1420 = vst [vmem:[%s2227_s19 + $0x8] sm:$0xff] %v1418_v3  }
 0x1a7   :  { %1414 = vst [vmem:[%s2227_s19] sm:$0xff] %v1413_v4  }

</bundles_post_ra>
